<compile_context>
chip_gen: v6e
topology: v6e:2x2x1
jax: 0.10.0
libtpu: 0.0.40
codegen_flags: <defaults>
</compile_context>

<pallas_src>
import math

import jax
import jax.numpy as jnp
from jax.experimental import pallas as pl
from jax.experimental.pallas import tpu as pltpu

BN_EPS = 1e-5
EXPANSION = 4
# v7x has only 64 MiB of physical VMEM per TensorCore (v5e/v6e: 128 MiB); keep the
# scoped VMEM request well below that so double-buffering always has headroom.
VMEM_BUDGET_BYTES = 48 * 1024 * 1024


def _full_block(shape):
    """BlockSpec mapping the whole array as one resident block (grid=(1,))."""
    nd = len(shape)
    return pl.BlockSpec(shape, lambda i, _nd=nd: (0,) * _nd)


# ------------------------------ fused kernel --------------------------------

def _make_bottleneck_kernel(N, H, W, Cin, P, C3, stride, has_downsample,
                            separate_xs):
    Hout = (H - 1) // stride + 1
    Wout = (W - 1) // stride + 1
    M2 = N * Hout * Wout

    def bn(a, g_ref, b_ref, relu):
        # Training-mode BatchNorm over the N*H*W rows (axis 0), biased variance,
        # one-pass statistics, all in f32.
        mu = jnp.mean(a, axis=0, keepdims=True)
        var = jnp.maximum(jnp.mean(a * a, axis=0, keepdims=True) - mu * mu, 0.0)
        y = (a - mu) * jax.lax.rsqrt(var + BN_EPS) * g_ref[...] + b_ref[...]
        return jnp.maximum(y, 0.0) if relu else y

    def kernel(*refs):
        it = iter(refs)
        x_ref = next(it)                                   # (N*H*W, Cin) f32
        xs_ref = next(it) if separate_xs else None         # (M2, Cin) f32 (stride>1)
        w1_ref, g1_ref, b1_ref = next(it), next(it), next(it)
        w2_ref, g2_ref, b2_ref = next(it), next(it), next(it)
        w3_ref, g3_ref, b3_ref = next(it), next(it), next(it)
        if has_downsample:
            wd_ref, gd_ref, bd_ref = next(it), next(it), next(it)
        o_ref = next(it)                                   # (M2, C3) f32
        pad_ref = next(it)                                 # (N, H+2, W+2, P) f32

        xv = x_ref[...]

        # ---- conv1 (1x1) + bn1 + relu: bf16 MXU matmul, f32 accumulation ----
        a1 = jnp.dot(xv.astype(jnp.bfloat16), w1_ref[...],
                     preferred_element_type=jnp.float32)   # (N*H*W, P)
        a1 = bn(a1, g1_ref, b1_ref, relu=True)

        # ---- conv2 (3x3, stride, pad=1): zero-padded VMEM scratch, 9-tap MXU
        #      accumulation (in-kernel im2col; nothing goes back to HBM) ----
        pad_ref[...] = jnp.zeros(pad_ref.shape, pad_ref.dtype)
        pad_ref[:, 1:H + 1, 1:W + 1, :] = a1.reshape(N, H, W, P)

        acc = None
        for kh in range(3):
            for kw in range(3):
                if stride == 1:
                    tap = pad_ref[:, kh:kh + Hout, kw:kw + Wout, :]
                else:
                    tap = pad_ref[:, pl.ds(kh, Hout, stride),
                                  pl.ds(kw, Wout, stride), :]
                tap2d = tap.reshape(M2, P).astype(jnp.bfloat16)
                d = jnp.dot(tap2d, w2_ref[kh * 3 + kw],
                            preferred_element_type=jnp.float32)
                acc = d if acc is None else acc + d
        a2 = bn(acc, g2_ref, b2_ref, relu=True)            # (M2, P)

        # ---- conv3 (1x1) + bn3 (no relu before the residual add) ----
        a3 = jnp.dot(a2.astype(jnp.bfloat16), w3_ref[...],
                     preferred_element_type=jnp.float32)   # (M2, C3)
        a3 = bn(a3, g3_ref, b3_ref, relu=False)

        # ---- identity / downsample path ----
        if has_downsample:
            xs = xs_ref[...] if separate_xs else xv        # (M2, Cin)
            ident = jnp.dot(xs.astype(jnp.bfloat16), wd_ref[...],
                            preferred_element_type=jnp.float32)
            ident = bn(ident, gd_ref, bd_ref, relu=False)
        else:
            ident = xv                                     # stride==1 and Cin==C3

        o_ref[...] = jnp.maximum(a3 + ident, 0.0)

    return kernel


# ------------------------------ python wrapper -------------------------------

def bottleneck_forward(params, x_nchw):
    """Forward pass of one Bottleneck block; input/output are NCHW like PyTorch."""
    x = jnp.transpose(x_nchw, (0, 2, 3, 1)).astype(jnp.float32)   # NCHW -> NHWC
    N, H, W, Cin = x.shape
    stride = int(params['stride'])
    P = params['conv1_w'].shape[1]
    C3 = params['conv3_w'].shape[1]
    has_downsample = 'ds_w' in params
    separate_xs = has_downsample and stride > 1
    if not has_downsample:
        assert stride == 1 and Cin == C3, "identity path requires matching shapes"
    Hout = (H - 1) // stride + 1
    Wout = (W - 1) // stride + 1
    M1, M2 = N * H * W, N * Hout * Wout

    bf16 = jnp.bfloat16

    def bn_args(g, b, c):
        return [g.reshape(1, c).astype(jnp.float32),
                b.reshape(1, c).astype(jnp.float32)]

    args = [x.reshape(M1, Cin)]
    if separate_xs:  # strided 1x1 downsample reads x at subsampled positions
        args.append(x[:, ::stride, ::stride, :].reshape(M2, Cin))
    args += [params['conv1_w'].astype(bf16)] + bn_args(params['bn1_g'], params['bn1_b'], P)
    args += [params['conv2_w'].astype(bf16)] + bn_args(params['bn2_g'], params['bn2_b'], P)
    args += [params['conv3_w'].astype(bf16)] + bn_args(params['bn3_g'], params['bn3_b'], C3)
    if has_downsample:
        args += [params['ds_w'].astype(bf16)] + bn_args(params['ds_g'], params['ds_b'], C3)

    # VMEM footprint gate: the fully fused block must fit comfortably in VMEM
    # (estimate is lane-padded and includes double buffering + live intermediates).
    in_bytes = sum(a.size * a.dtype.itemsize for a in args)
    out_bytes = M2 * C3 * 4
    scratch_bytes = N * (H + 2) * (W + 2) * max(P, 128) * 4
    interm_bytes = 4 * (M1 * max(P, 128) + 4 * M2 * max(P, 128) + 4 * M2 * C3)
    need = 2 * (in_bytes + out_bytes) + scratch_bytes + interm_bytes
    if need > VMEM_BUDGET_BYTES:
        raise ValueError(
            f"fused Bottleneck needs ~{need} bytes of VMEM "
            f"(budget {VMEM_BUDGET_BYTES}); reduce batch/spatial size.")

    flops = (2 * M1 * Cin * P + 2 * M2 * 9 * P * P + 2 * M2 * P * C3
             + (2 * M2 * Cin * C3 if has_downsample else 0))
    cost = pl.CostEstimate(flops=flops, transcendentals=2 * (P + C3),
                           bytes_accessed=in_bytes + out_bytes)

    kernel = _make_bottleneck_kernel(N, H, W, Cin, P, C3, stride,
                                     has_downsample, separate_xs)
    out2d = pl.pallas_call(
        kernel,
        grid=(1,),
        in_specs=[_full_block(a.shape) for a in args],
        out_specs=_full_block((M2, C3)),
        out_shape=jax.ShapeDtypeStruct((M2, C3), jnp.float32),
        scratch_shapes=[pltpu.VMEM((N, H + 2, W + 2, P), jnp.float32)],
        compiler_params=pltpu.CompilerParams(
            dimension_semantics=("arbitrary",),
            vmem_limit_bytes=VMEM_BUDGET_BYTES,
        ),
        cost_estimate=cost,
    )(*args)

    out = out2d.reshape(N, Hout, Wout, C3)
    return jnp.transpose(out, (0, 3, 1, 2))                # NHWC -> NCHW


# --------------------------- deterministic params ----------------------------

def make_bottleneck_params(key, inplanes, planes, stride=1):
    """PyTorch defaults: Conv2d kaiming-uniform(a=sqrt(5)) == U(+-1/sqrt(fan_in));
    BatchNorm weight=1, bias=0. Conv weights stored in matmul layout:
    (Cin, Cout) for 1x1, (kh*3+kw, Cin, Cout) for the 3x3."""
    C3 = planes * EXPANSION

    def conv_w(k, fan_in, shape):
        bound = 1.0 / math.sqrt(fan_in)
        return jax.random.uniform(k, shape, jnp.float32, -bound, bound)

    k1, k2, k3, k4 = jax.random.split(key, 4)
    p = dict(
        stride=stride,
        conv1_w=conv_w(k1, inplanes, (inplanes, planes)),
        bn1_g=jnp.ones((planes,), jnp.float32),
        bn1_b=jnp.zeros((planes,), jnp.float32),
        conv2_w=conv_w(k2, planes * 9, (9, planes, planes)),
        bn2_g=jnp.ones((planes,), jnp.float32),
        bn2_b=jnp.zeros((planes,), jnp.float32),
        conv3_w=conv_w(k3, planes, (planes, C3)),
        bn3_g=jnp.ones((C3,), jnp.float32),
        bn3_b=jnp.zeros((C3,), jnp.float32),
    )
    if stride != 1 or inplanes != C3:
        # downsample = Conv2d(inplanes, C3, k=1, stride=stride, bias=False) + BN
        p['ds_w'] = conv_w(k4, inplanes, (inplanes, C3))
        p['ds_g'] = jnp.ones((C3,), jnp.float32)
        p['ds_b'] = jnp.zeros((C3,), jnp.float32)
    return p


# ------------------------------ pure-JAX reference ---------------------------

def _reference_bottleneck(params, x_nchw):
    """XLA reference (same bf16 weight rounding the kernel applies)."""
    x = jnp.transpose(x_nchw, (0, 2, 3, 1)).astype(jnp.float32)
    s = int(params['stride'])
    Cin = x.shape[-1]
    P = params['conv1_w'].shape[1]
    C3 = params['conv3_w'].shape[1]
    dn = ('NHWC', 'HWIO', 'NHWC')

    def wq(w):
        return w.astype(jnp.bfloat16).astype(jnp.float32)

    def bn(a, g, b, relu):
        mu = jnp.mean(a, axis=(0, 1, 2), keepdims=True)
        var = jnp.mean((a - mu) ** 2, axis=(0, 1, 2), keepdims=True)
        y = (a - mu) * jax.lax.rsqrt(var + BN_EPS)
        y = y * g.reshape(1, 1, 1, -1) + b.reshape(1, 1, 1, -1)
        return jnp.maximum(y, 0.0) if relu else y

    def conv(a, w_hwio, strides, padding):
        return jax.lax.conv_general_dilated(a, w_hwio, strides, padding,
                                            dimension_numbers=dn)

    a = conv(x, wq(params['conv1_w']).reshape(1, 1, Cin, P), (1, 1), 'VALID')
    a = bn(a, params['bn1_g'], params['bn1_b'], True)
    a = conv(a, wq(params['conv2_w']).reshape(3, 3, P, P), (s, s), ((1, 1), (1, 1)))
    a = bn(a, params['bn2_g'], params['bn2_b'], True)
    a = conv(a, wq(params['conv3_w']).reshape(1, 1, P, C3), (1, 1), 'VALID')
    a = bn(a, params['bn3_g'], params['bn3_b'], False)
    if 'ds_w' in params:
        ident = conv(x, wq(params['ds_w']).reshape(1, 1, Cin, C3), (s, s), 'VALID')
        ident = bn(ident, params['ds_g'], params['ds_b'], False)
    else:
        ident = x
    out = jnp.maximum(a + ident, 0.0)
    return jnp.transpose(out, (0, 3, 1, 2))


# ------------------------------------ main ------------------------------------

if __name__ == "__main__":
    key = jax.random.PRNGKey(0)
    pkey, xkey = jax.random.split(key)

    # Small Bottleneck-shaped config: inplanes=64, planes=32 (-> 128 output
    # channels, lane-dense output), 16x16 spatial, batch 2, stride 1, with a
    # 1x1-conv+BN downsample projection on the identity path (64 != 128).
    N, inplanes, H, W = 2, 64, 16, 16
    planes, stride = 32, 1

    params = make_bottleneck_params(pkey, inplanes, planes, stride)
    x = jax.random.normal(xkey, (N, inplanes, H, W), dtype=jnp.float32)  # NCHW

    out = jax.block_until_ready(bottleneck_forward(params, x))
    assert out.shape == (N, planes * EXPANSION, H // stride, W // stride), out.shape
    assert bool(jnp.all(jnp.isfinite(out)))
    assert bool(jnp.all(out >= 0.0))

    # Correctness vs a pure-JAX reference (bf16 MXU operands account for the
    # small tolerance; structural bugs would show O(1) errors).
    ref = _reference_bottleneck(params, x)
    max_err = float(jnp.max(jnp.abs(out - ref)))
    mean_err = float(jnp.mean(jnp.abs(out - ref)))
    assert max_err < 0.3 and mean_err < 0.05, (max_err, mean_err)

    print("KERNEL_OK")
</pallas_src>

<mosaic_0001>
module attributes {stable_mosaic.version = 11 : i64} {
  func.func @kernel(%arg0: i32, %arg1: memref<512x64xf32, #tpu.memory_space<vmem>>, %arg2: memref<64x32xbf16, #tpu.memory_space<vmem>>, %arg3: memref<1x32xf32, #tpu.memory_space<vmem>>, %arg4: memref<1x32xf32, #tpu.memory_space<vmem>>, %arg5: memref<9x32x32xbf16, #tpu.memory_space<vmem>>, %arg6: memref<1x32xf32, #tpu.memory_space<vmem>>, %arg7: memref<1x32xf32, #tpu.memory_space<vmem>>, %arg8: memref<32x128xbf16, #tpu.memory_space<vmem>>, %arg9: memref<1x128xf32, #tpu.memory_space<vmem>>, %arg10: memref<1x128xf32, #tpu.memory_space<vmem>>, %arg11: memref<64x128xbf16, #tpu.memory_space<vmem>>, %arg12: memref<1x128xf32, #tpu.memory_space<vmem>>, %arg13: memref<1x128xf32, #tpu.memory_space<vmem>>, %arg14: memref<512x128xf32, #tpu.memory_space<vmem>>, %arg15: memref<2x18x18x32xf32, #tpu.memory_space<vmem>>) attributes {dimension_semantics = [#tpu.dimension_semantics<arbitrary>], iteration_bounds = array<i64: 1>, scalar_prefetch = 0 : i64, scratch_operands = 1 : i64, tpu.core_type = #tpu.core_type<tc>, window_params = [{pipeline_mode = #tpu.pipeline_mode<synchronous>, transform_indices = @transform_0, window_bounds = array<i64: 512, 64>}, {pipeline_mode = #tpu.pipeline_mode<synchronous>, transform_indices = @transform_1, window_bounds = array<i64: 64, 32>}, {pipeline_mode = #tpu.pipeline_mode<synchronous>, transform_indices = @transform_2, window_bounds = array<i64: 1, 32>}, {pipeline_mode = #tpu.pipeline_mode<synchronous>, transform_indices = @transform_3, window_bounds = array<i64: 1, 32>}, {pipeline_mode = #tpu.pipeline_mode<synchronous>, transform_indices = @transform_4, window_bounds = array<i64: 9, 32, 32>}, {pipeline_mode = #tpu.pipeline_mode<synchronous>, transform_indices = @transform_5, window_bounds = array<i64: 1, 32>}, {pipeline_mode = #tpu.pipeline_mode<synchronous>, transform_indices = @transform_6, window_bounds = array<i64: 1, 32>}, {pipeline_mode = #tpu.pipeline_mode<synchronous>, transform_indices = @transform_7, window_bounds = array<i64: 32, 128>}, {pipeline_mode = #tpu.pipeline_mode<synchronous>, transform_indices = @transform_8, window_bounds = array<i64: 1, 128>}, {pipeline_mode = #tpu.pipeline_mode<synchronous>, transform_indices = @transform_9, window_bounds = array<i64: 1, 128>}, {pipeline_mode = #tpu.pipeline_mode<synchronous>, transform_indices = @transform_10, window_bounds = array<i64: 64, 128>}, {pipeline_mode = #tpu.pipeline_mode<synchronous>, transform_indices = @transform_11, window_bounds = array<i64: 1, 128>}, {pipeline_mode = #tpu.pipeline_mode<synchronous>, transform_indices = @transform_12, window_bounds = array<i64: 1, 128>}, {pipeline_mode = #tpu.pipeline_mode<synchronous>, transform_indices = @transform_13, window_bounds = array<i64: 512, 128>}]} {
    %c0 = arith.constant 0 : index
    %c0_0 = arith.constant 0 : index
    %0 = vector.load %arg1[%c0, %c0_0] : memref<512x64xf32, #tpu.memory_space<vmem>>, vector<512x64xf32>
    %1 = arith.truncf %0 : vector<512x64xf32> to vector<512x64xbf16>
    %c0_1 = arith.constant 0 : index
    %c0_2 = arith.constant 0 : index
    %2 = vector.load %arg2[%c0_1, %c0_2] : memref<64x32xbf16, #tpu.memory_space<vmem>>, vector<64x32xbf16>
    %cst = arith.constant dense<0.000000e+00> : vector<512x32xf32>
    %3 = tpu.matmul %1, %2, %cst {dimension_numbers = #tpu.dot_dimension_numbers<[1], [0], [0], [1], [0, 0, 1, 1], [], []>} : vector<512x64xbf16>, vector<64x32xbf16>, vector<512x32xf32> -> vector<512x32xf32>
    %cst_3 = arith.constant dense<0.000000e+00> : vector<32xf32>
    %4 = vector.multi_reduction <add>, %3, %cst_3 [0] : vector<512x32xf32> to vector<32xf32>
    %5 = vector.shape_cast %4 : vector<32xf32> to vector<1x32xf32>
    %cst_4 = arith.constant 5.120000e+02 : f32
    %6 = vector.broadcast %cst_4 : f32 to vector<1x32xf32>
    %7 = arith.divf %5, %6 : vector<1x32xf32>
    %8 = arith.mulf %3, %3 : vector<512x32xf32>
    %cst_5 = arith.constant dense<0.000000e+00> : vector<32xf32>
    %9 = vector.multi_reduction <add>, %8, %cst_5 [0] : vector<512x32xf32> to vector<32xf32>
    %10 = vector.shape_cast %9 : vector<32xf32> to vector<1x32xf32>
    %cst_6 = arith.constant 5.120000e+02 : f32
    %11 = vector.broadcast %cst_6 : f32 to vector<1x32xf32>
    %12 = arith.divf %10, %11 : vector<1x32xf32>
    %13 = arith.mulf %7, %7 : vector<1x32xf32>
    %14 = arith.subf %12, %13 : vector<1x32xf32>
    %cst_7 = arith.constant 0.000000e+00 : f32
    %15 = vector.broadcast %cst_7 : f32 to vector<1x32xf32>
    %16 = arith.maximumf %14, %15 : vector<1x32xf32>
    %17 = vector.broadcast %7 : vector<1x32xf32> to vector<512x32xf32>
    %18 = arith.subf %3, %17 : vector<512x32xf32>
    %cst_8 = arith.constant 9.99999974E-6 : f32
    %19 = vector.broadcast %cst_8 : f32 to vector<1x32xf32>
    %20 = arith.addf %16, %19 : vector<1x32xf32>
    %21 = math.rsqrt %20 : vector<1x32xf32>
    %22 = vector.broadcast %21 : vector<1x32xf32> to vector<512x32xf32>
    %23 = arith.mulf %18, %22 : vector<512x32xf32>
    %c0_9 = arith.constant 0 : index
    %c0_10 = arith.constant 0 : index
    %24 = vector.load %arg3[%c0_9, %c0_10] : memref<1x32xf32, #tpu.memory_space<vmem>>, vector<1x32xf32>
    %25 = vector.broadcast %24 : vector<1x32xf32> to vector<512x32xf32>
    %26 = arith.mulf %23, %25 : vector<512x32xf32>
    %c0_11 = arith.constant 0 : index
    %c0_12 = arith.constant 0 : index
    %27 = vector.load %arg4[%c0_11, %c0_12] : memref<1x32xf32, #tpu.memory_space<vmem>>, vector<1x32xf32>
    %28 = vector.broadcast %27 : vector<1x32xf32> to vector<512x32xf32>
    %29 = arith.addf %26, %28 : vector<512x32xf32>
    %cst_13 = arith.constant 0.000000e+00 : f32
    %30 = vector.broadcast %cst_13 : f32 to vector<512x32xf32>
    %31 = arith.maximumf %29, %30 : vector<512x32xf32>
    %cst_14 = arith.constant 0.000000e+00 : f32
    %32 = vector.broadcast %cst_14 : f32 to vector<2x18x18x32xf32>
    %c0_15 = arith.constant 0 : index
    %c0_16 = arith.constant 0 : index
    %c0_17 = arith.constant 0 : index
    %c0_18 = arith.constant 0 : index
    %33 = vector.load %arg15[%c0_15, %c0_16, %c0_17, %c0_18] : memref<2x18x18x32xf32, #tpu.memory_space<vmem>>, vector<2x18x18x32xf32>
    tpu.vector_store %arg15[%c0_15, %c0_16, %c0_17, %c0_18], %32 {strides = array<i32>} : memref<2x18x18x32xf32, #tpu.memory_space<vmem>>, vector<2x18x18x32xf32>,
    %34 = vector.shape_cast %31 : vector<512x32xf32> to vector<2x16x16x32xf32>
    %c0_19 = arith.constant 0 : index
    %c1 = arith.constant 1 : index
    %c1_20 = arith.constant 1 : index
    %c0_21 = arith.constant 0 : index
    %35 = vector.load %arg15[%c0_19, %c1, %c1_20, %c0_21] : memref<2x18x18x32xf32, #tpu.memory_space<vmem>>, vector<2x16x16x32xf32>
    tpu.vector_store %arg15[%c0_19, %c1, %c1_20, %c0_21], %34 {strides = array<i32>} : memref<2x18x18x32xf32, #tpu.memory_space<vmem>>, vector<2x16x16x32xf32>,
    %c0_22 = arith.constant 0 : index
    %c0_23 = arith.constant 0 : index
    %c0_24 = arith.constant 0 : index
    %c0_25 = arith.constant 0 : index
    %36 = vector.load %arg15[%c0_22, %c0_23, %c0_24, %c0_25] : memref<2x18x18x32xf32, #tpu.memory_space<vmem>>, vector<2x16x16x32xf32>
    %37 = vector.shape_cast %36 : vector<2x16x16x32xf32> to vector<512x32xf32>
    %38 = arith.truncf %37 : vector<512x32xf32> to vector<512x32xbf16>
    %c0_26 = arith.constant 0 : index
    %c0_27 = arith.constant 0 : index
    %c0_28 = arith.constant 0 : index
    %39 = vector.load %arg5[%c0_26, %c0_27, %c0_28] : memref<9x32x32xbf16, #tpu.memory_space<vmem>>, vector<1x32x32xbf16>
    %40 = vector.shape_cast %39 : vector<1x32x32xbf16> to vector<32x32xbf16>
    %cst_29 = arith.constant dense<0.000000e+00> : vector<512x32xf32>
    %41 = tpu.matmul %38, %40, %cst_29 {dimension_numbers = #tpu.dot_dimension_numbers<[1], [0], [0], [1], [0, 0, 1, 1], [], []>} : vector<512x32xbf16>, vector<32x32xbf16>, vector<512x32xf32> -> vector<512x32xf32>
    %c0_30 = arith.constant 0 : index
    %c0_31 = arith.constant 0 : index
    %c1_32 = arith.constant 1 : index
    %c0_33 = arith.constant 0 : index
    %42 = vector.load %arg15[%c0_30, %c0_31, %c1_32, %c0_33] : memref<2x18x18x32xf32, #tpu.memory_space<vmem>>, vector<2x16x16x32xf32>
    %43 = vector.shape_cast %42 : vector<2x16x16x32xf32> to vector<512x32xf32>
    %44 = arith.truncf %43 : vector<512x32xf32> to vector<512x32xbf16>
    %c1_34 = arith.constant 1 : index
    %c0_35 = arith.constant 0 : index
    %c0_36 = arith.constant 0 : index
    %45 = vector.load %arg5[%c1_34, %c0_35, %c0_36] : memref<9x32x32xbf16, #tpu.memory_space<vmem>>, vector<1x32x32xbf16>
    %46 = vector.shape_cast %45 : vector<1x32x32xbf16> to vector<32x32xbf16>
    %cst_37 = arith.constant dense<0.000000e+00> : vector<512x32xf32>
    %47 = tpu.matmul %44, %46, %cst_37 {dimension_numbers = #tpu.dot_dimension_numbers<[1], [0], [0], [1], [0, 0, 1, 1], [], []>} : vector<512x32xbf16>, vector<32x32xbf16>, vector<512x32xf32> -> vector<512x32xf32>
    %48 = arith.addf %41, %47 : vector<512x32xf32>
    %c0_38 = arith.constant 0 : index
    %c0_39 = arith.constant 0 : index
    %c2 = arith.constant 2 : index
    %c0_40 = arith.constant 0 : index
    %49 = vector.load %arg15[%c0_38, %c0_39, %c2, %c0_40] : memref<2x18x18x32xf32, #tpu.memory_space<vmem>>, vector<2x16x16x32xf32>
    %50 = vector.shape_cast %49 : vector<2x16x16x32xf32> to vector<512x32xf32>
    %51 = arith.truncf %50 : vector<512x32xf32> to vector<512x32xbf16>
    %c2_41 = arith.constant 2 : index
    %c0_42 = arith.constant 0 : index
    %c0_43 = arith.constant 0 : index
    %52 = vector.load %arg5[%c2_41, %c0_42, %c0_43] : memref<9x32x32xbf16, #tpu.memory_space<vmem>>, vector<1x32x32xbf16>
    %53 = vector.shape_cast %52 : vector<1x32x32xbf16> to vector<32x32xbf16>
    %cst_44 = arith.constant dense<0.000000e+00> : vector<512x32xf32>
    %54 = tpu.matmul %51, %53, %cst_44 {dimension_numbers = #tpu.dot_dimension_numbers<[1], [0], [0], [1], [0, 0, 1, 1], [], []>} : vector<512x32xbf16>, vector<32x32xbf16>, vector<512x32xf32> -> vector<512x32xf32>
    %55 = arith.addf %48, %54 : vector<512x32xf32>
    %c0_45 = arith.constant 0 : index
    %c1_46 = arith.constant 1 : index
    %c0_47 = arith.constant 0 : index
    %c0_48 = arith.constant 0 : index
    %56 = vector.load %arg15[%c0_45, %c1_46, %c0_47, %c0_48] : memref<2x18x18x32xf32, #tpu.memory_space<vmem>>, vector<2x16x16x32xf32>
    %57 = vector.shape_cast %56 : vector<2x16x16x32xf32> to vector<512x32xf32>
    %58 = arith.truncf %57 : vector<512x32xf32> to vector<512x32xbf16>
    %c3 = arith.constant 3 : index
    %c0_49 = arith.constant 0 : index
    %c0_50 = arith.constant 0 : index
    %59 = vector.load %arg5[%c3, %c0_49, %c0_50] : memref<9x32x32xbf16, #tpu.memory_space<vmem>>, vector<1x32x32xbf16>
    %60 = vector.shape_cast %59 : vector<1x32x32xbf16> to vector<32x32xbf16>
    %cst_51 = arith.constant dense<0.000000e+00> : vector<512x32xf32>
    %61 = tpu.matmul %58, %60, %cst_51 {dimension_numbers = #tpu.dot_dimension_numbers<[1], [0], [0], [1], [0, 0, 1, 1], [], []>} : vector<512x32xbf16>, vector<32x32xbf16>, vector<512x32xf32> -> vector<512x32xf32>
    %62 = arith.addf %55, %61 : vector<512x32xf32>
    %c0_52 = arith.constant 0 : index
    %c1_53 = arith.constant 1 : index
    %c1_54 = arith.constant 1 : index
    %c0_55 = arith.constant 0 : index
    %63 = vector.load %arg15[%c0_52, %c1_53, %c1_54, %c0_55] : memref<2x18x18x32xf32, #tpu.memory_space<vmem>>, vector<2x16x16x32xf32>
    %64 = vector.shape_cast %63 : vector<2x16x16x32xf32> to vector<512x32xf32>
    %65 = arith.truncf %64 : vector<512x32xf32> to vector<512x32xbf16>
    %c4 = arith.constant 4 : index
    %c0_56 = arith.constant 0 : index
    %c0_57 = arith.constant 0 : index
    %66 = vector.load %arg5[%c4, %c0_56, %c0_57] : memref<9x32x32xbf16, #tpu.memory_space<vmem>>, vector<1x32x32xbf16>
    %67 = vector.shape_cast %66 : vector<1x32x32xbf16> to vector<32x32xbf16>
    %cst_58 = arith.constant dense<0.000000e+00> : vector<512x32xf32>
    %68 = tpu.matmul %65, %67, %cst_58 {dimension_numbers = #tpu.dot_dimension_numbers<[1], [0], [0], [1], [0, 0, 1, 1], [], []>} : vector<512x32xbf16>, vector<32x32xbf16>, vector<512x32xf32> -> vector<512x32xf32>
    %69 = arith.addf %62, %68 : vector<512x32xf32>
    %c0_59 = arith.constant 0 : index
    %c1_60 = arith.constant 1 : index
    %c2_61 = arith.constant 2 : index
    %c0_62 = arith.constant 0 : index
    %70 = vector.load %arg15[%c0_59, %c1_60, %c2_61, %c0_62] : memref<2x18x18x32xf32, #tpu.memory_space<vmem>>, vector<2x16x16x32xf32>
    %71 = vector.shape_cast %70 : vector<2x16x16x32xf32> to vector<512x32xf32>
    %72 = arith.truncf %71 : vector<512x32xf32> to vector<512x32xbf16>
    %c5 = arith.constant 5 : index
    %c0_63 = arith.constant 0 : index
    %c0_64 = arith.constant 0 : index
    %73 = vector.load %arg5[%c5, %c0_63, %c0_64] : memref<9x32x32xbf16, #tpu.memory_space<vmem>>, vector<1x32x32xbf16>
    %74 = vector.shape_cast %73 : vector<1x32x32xbf16> to vector<32x32xbf16>
    %cst_65 = arith.constant dense<0.000000e+00> : vector<512x32xf32>
    %75 = tpu.matmul %72, %74, %cst_65 {dimension_numbers = #tpu.dot_dimension_numbers<[1], [0], [0], [1], [0, 0, 1, 1], [], []>} : vector<512x32xbf16>, vector<32x32xbf16>, vector<512x32xf32> -> vector<512x32xf32>
    %76 = arith.addf %69, %75 : vector<512x32xf32>
    %c0_66 = arith.constant 0 : index
    %c2_67 = arith.constant 2 : index
    %c0_68 = arith.constant 0 : index
    %c0_69 = arith.constant 0 : index
    %77 = vector.load %arg15[%c0_66, %c2_67, %c0_68, %c0_69] : memref<2x18x18x32xf32, #tpu.memory_space<vmem>>, vector<2x16x16x32xf32>
    %78 = vector.shape_cast %77 : vector<2x16x16x32xf32> to vector<512x32xf32>
    %79 = arith.truncf %78 : vector<512x32xf32> to vector<512x32xbf16>
    %c6 = arith.constant 6 : index
    %c0_70 = arith.constant 0 : index
    %c0_71 = arith.constant 0 : index
    %80 = vector.load %arg5[%c6, %c0_70, %c0_71] : memref<9x32x32xbf16, #tpu.memory_space<vmem>>, vector<1x32x32xbf16>
    %81 = vector.shape_cast %80 : vector<1x32x32xbf16> to vector<32x32xbf16>
    %cst_72 = arith.constant dense<0.000000e+00> : vector<512x32xf32>
    %82 = tpu.matmul %79, %81, %cst_72 {dimension_numbers = #tpu.dot_dimension_numbers<[1], [0], [0], [1], [0, 0, 1, 1], [], []>} : vector<512x32xbf16>, vector<32x32xbf16>, vector<512x32xf32> -> vector<512x32xf32>
    %83 = arith.addf %76, %82 : vector<512x32xf32>
    %c0_73 = arith.constant 0 : index
    %c2_74 = arith.constant 2 : index
    %c1_75 = arith.constant 1 : index
    %c0_76 = arith.constant 0 : index
    %84 = vector.load %arg15[%c0_73, %c2_74, %c1_75, %c0_76] : memref<2x18x18x32xf32, #tpu.memory_space<vmem>>, vector<2x16x16x32xf32>
    %85 = vector.shape_cast %84 : vector<2x16x16x32xf32> to vector<512x32xf32>
    %86 = arith.truncf %85 : vector<512x32xf32> to vector<512x32xbf16>
    %c7 = arith.constant 7 : index
    %c0_77 = arith.constant 0 : index
    %c0_78 = arith.constant 0 : index
    %87 = vector.load %arg5[%c7, %c0_77, %c0_78] : memref<9x32x32xbf16, #tpu.memory_space<vmem>>, vector<1x32x32xbf16>
    %88 = vector.shape_cast %87 : vector<1x32x32xbf16> to vector<32x32xbf16>
    %cst_79 = arith.constant dense<0.000000e+00> : vector<512x32xf32>
    %89 = tpu.matmul %86, %88, %cst_79 {dimension_numbers = #tpu.dot_dimension_numbers<[1], [0], [0], [1], [0, 0, 1, 1], [], []>} : vector<512x32xbf16>, vector<32x32xbf16>, vector<512x32xf32> -> vector<512x32xf32>
    %90 = arith.addf %83, %89 : vector<512x32xf32>
    %c0_80 = arith.constant 0 : index
    %c2_81 = arith.constant 2 : index
    %c2_82 = arith.constant 2 : index
    %c0_83 = arith.constant 0 : index
    %91 = vector.load %arg15[%c0_80, %c2_81, %c2_82, %c0_83] : memref<2x18x18x32xf32, #tpu.memory_space<vmem>>, vector<2x16x16x32xf32>
    %92 = vector.shape_cast %91 : vector<2x16x16x32xf32> to vector<512x32xf32>
    %93 = arith.truncf %92 : vector<512x32xf32> to vector<512x32xbf16>
    %c8 = arith.constant 8 : index
    %c0_84 = arith.constant 0 : index
    %c0_85 = arith.constant 0 : index
    %94 = vector.load %arg5[%c8, %c0_84, %c0_85] : memref<9x32x32xbf16, #tpu.memory_space<vmem>>, vector<1x32x32xbf16>
    %95 = vector.shape_cast %94 : vector<1x32x32xbf16> to vector<32x32xbf16>
    %cst_86 = arith.constant dense<0.000000e+00> : vector<512x32xf32>
    %96 = tpu.matmul %93, %95, %cst_86 {dimension_numbers = #tpu.dot_dimension_numbers<[1], [0], [0], [1], [0, 0, 1, 1], [], []>} : vector<512x32xbf16>, vector<32x32xbf16>, vector<512x32xf32> -> vector<512x32xf32>
    %97 = arith.addf %90, %96 : vector<512x32xf32>
    %cst_87 = arith.constant dense<0.000000e+00> : vector<32xf32>
    %98 = vector.multi_reduction <add>, %97, %cst_87 [0] : vector<512x32xf32> to vector<32xf32>
    %99 = vector.shape_cast %98 : vector<32xf32> to vector<1x32xf32>
    %cst_88 = arith.constant 5.120000e+02 : f32
    %100 = vector.broadcast %cst_88 : f32 to vector<1x32xf32>
    %101 = arith.divf %99, %100 : vector<1x32xf32>
    %102 = arith.mulf %97, %97 : vector<512x32xf32>
    %cst_89 = arith.constant dense<0.000000e+00> : vector<32xf32>
    %103 = vector.multi_reduction <add>, %102, %cst_89 [0] : vector<512x32xf32> to vector<32xf32>
    %104 = vector.shape_cast %103 : vector<32xf32> to vector<1x32xf32>
    %cst_90 = arith.constant 5.120000e+02 : f32
    %105 = vector.broadcast %cst_90 : f32 to vector<1x32xf32>
    %106 = arith.divf %104, %105 : vector<1x32xf32>
    %107 = arith.mulf %101, %101 : vector<1x32xf32>
    %108 = arith.subf %106, %107 : vector<1x32xf32>
    %cst_91 = arith.constant 0.000000e+00 : f32
    %109 = vector.broadcast %cst_91 : f32 to vector<1x32xf32>
    %110 = arith.maximumf %108, %109 : vector<1x32xf32>
    %111 = vector.broadcast %101 : vector<1x32xf32> to vector<512x32xf32>
    %112 = arith.subf %97, %111 : vector<512x32xf32>
    %cst_92 = arith.constant 9.99999974E-6 : f32
    %113 = vector.broadcast %cst_92 : f32 to vector<1x32xf32>
    %114 = arith.addf %110, %113 : vector<1x32xf32>
    %115 = math.rsqrt %114 : vector<1x32xf32>
    %116 = vector.broadcast %115 : vector<1x32xf32> to vector<512x32xf32>
    %117 = arith.mulf %112, %116 : vector<512x32xf32>
    %c0_93 = arith.constant 0 : index
    %c0_94 = arith.constant 0 : index
    %118 = vector.load %arg6[%c0_93, %c0_94] : memref<1x32xf32, #tpu.memory_space<vmem>>, vector<1x32xf32>
    %119 = vector.broadcast %118 : vector<1x32xf32> to vector<512x32xf32>
    %120 = arith.mulf %117, %119 : vector<512x32xf32>
    %c0_95 = arith.constant 0 : index
    %c0_96 = arith.constant 0 : index
    %121 = vector.load %arg7[%c0_95, %c0_96] : memref<1x32xf32, #tpu.memory_space<vmem>>, vector<1x32xf32>
    %122 = vector.broadcast %121 : vector<1x32xf32> to vector<512x32xf32>
    %123 = arith.addf %120, %122 : vector<512x32xf32>
    %cst_97 = arith.constant 0.000000e+00 : f32
    %124 = vector.broadcast %cst_97 : f32 to vector<512x32xf32>
    %125 = arith.maximumf %123, %124 : vector<512x32xf32>
    %126 = arith.truncf %125 : vector<512x32xf32> to vector<512x32xbf16>
    %c0_98 = arith.constant 0 : index
    %c0_99 = arith.constant 0 : index
    %127 = vector.load %arg8[%c0_98, %c0_99] : memref<32x128xbf16, #tpu.memory_space<vmem>>, vector<32x128xbf16>
    %cst_100 = arith.constant dense<0.000000e+00> : vector<512x128xf32>
    %128 = tpu.matmul %126, %127, %cst_100 {dimension_numbers = #tpu.dot_dimension_numbers<[1], [0], [0], [1], [0, 0, 1, 1], [], []>} : vector<512x32xbf16>, vector<32x128xbf16>, vector<512x128xf32> -> vector<512x128xf32>
    %cst_101 = arith.constant dense<0.000000e+00> : vector<128xf32>
    %129 = vector.multi_reduction <add>, %128, %cst_101 [0] : vector<512x128xf32> to vector<128xf32>
    %130 = vector.shape_cast %129 : vector<128xf32> to vector<1x128xf32>
    %cst_102 = arith.constant 5.120000e+02 : f32
    %131 = vector.broadcast %cst_102 : f32 to vector<1x128xf32>
    %132 = arith.divf %130, %131 : vector<1x128xf32>
    %133 = arith.mulf %128, %128 : vector<512x128xf32>
    %cst_103 = arith.constant dense<0.000000e+00> : vector<128xf32>
    %134 = vector.multi_reduction <add>, %133, %cst_103 [0] : vector<512x128xf32> to vector<128xf32>
    %135 = vector.shape_cast %134 : vector<128xf32> to vector<1x128xf32>
    %cst_104 = arith.constant 5.120000e+02 : f32
    %136 = vector.broadcast %cst_104 : f32 to vector<1x128xf32>
    %137 = arith.divf %135, %136 : vector<1x128xf32>
    %138 = arith.mulf %132, %132 : vector<1x128xf32>
    %139 = arith.subf %137, %138 : vector<1x128xf32>
    %cst_105 = arith.constant 0.000000e+00 : f32
    %140 = vector.broadcast %cst_105 : f32 to vector<1x128xf32>
    %141 = arith.maximumf %139, %140 : vector<1x128xf32>
    %142 = vector.broadcast %132 : vector<1x128xf32> to vector<512x128xf32>
    %143 = arith.subf %128, %142 : vector<512x128xf32>
    %cst_106 = arith.constant 9.99999974E-6 : f32
    %144 = vector.broadcast %cst_106 : f32 to vector<1x128xf32>
    %145 = arith.addf %141, %144 : vector<1x128xf32>
    %146 = math.rsqrt %145 : vector<1x128xf32>
    %147 = vector.broadcast %146 : vector<1x128xf32> to vector<512x128xf32>
    %148 = arith.mulf %143, %147 : vector<512x128xf32>
    %c0_107 = arith.constant 0 : index
    %c0_108 = arith.constant 0 : index
    %149 = vector.load %arg9[%c0_107, %c0_108] : memref<1x128xf32, #tpu.memory_space<vmem>>, vector<1x128xf32>
    %150 = vector.broadcast %149 : vector<1x128xf32> to vector<512x128xf32>
    %151 = arith.mulf %148, %150 : vector<512x128xf32>
    %c0_109 = arith.constant 0 : index
    %c0_110 = arith.constant 0 : index
    %152 = vector.load %arg10[%c0_109, %c0_110] : memref<1x128xf32, #tpu.memory_space<vmem>>, vector<1x128xf32>
    %153 = vector.broadcast %152 : vector<1x128xf32> to vector<512x128xf32>
    %154 = arith.addf %151, %153 : vector<512x128xf32>
    %155 = arith.truncf %0 : vector<512x64xf32> to vector<512x64xbf16>
    %c0_111 = arith.constant 0 : index
    %c0_112 = arith.constant 0 : index
    %156 = vector.load %arg11[%c0_111, %c0_112] : memref<64x128xbf16, #tpu.memory_space<vmem>>, vector<64x128xbf16>
    %cst_113 = arith.constant dense<0.000000e+00> : vector<512x128xf32>
    %157 = tpu.matmul %155, %156, %cst_113 {dimension_numbers = #tpu.dot_dimension_numbers<[1], [0], [0], [1], [0, 0, 1, 1], [], []>} : vector<512x64xbf16>, vector<64x128xbf16>, vector<512x128xf32> -> vector<512x128xf32>
    %cst_114 = arith.constant dense<0.000000e+00> : vector<128xf32>
    %158 = vector.multi_reduction <add>, %157, %cst_114 [0] : vector<512x128xf32> to vector<128xf32>
    %159 = vector.shape_cast %158 : vector<128xf32> to vector<1x128xf32>
    %cst_115 = arith.constant 5.120000e+02 : f32
    %160 = vector.broadcast %cst_115 : f32 to vector<1x128xf32>
    %161 = arith.divf %159, %160 : vector<1x128xf32>
    %162 = arith.mulf %157, %157 : vector<512x128xf32>
    %cst_116 = arith.constant dense<0.000000e+00> : vector<128xf32>
    %163 = vector.multi_reduction <add>, %162, %cst_116 [0] : vector<512x128xf32> to vector<128xf32>
    %164 = vector.shape_cast %163 : vector<128xf32> to vector<1x128xf32>
    %cst_117 = arith.constant 5.120000e+02 : f32
    %165 = vector.broadcast %cst_117 : f32 to vector<1x128xf32>
    %166 = arith.divf %164, %165 : vector<1x128xf32>
    %167 = arith.mulf %161, %161 : vector<1x128xf32>
    %168 = arith.subf %166, %167 : vector<1x128xf32>
    %cst_118 = arith.constant 0.000000e+00 : f32
    %169 = vector.broadcast %cst_118 : f32 to vector<1x128xf32>
    %170 = arith.maximumf %168, %169 : vector<1x128xf32>
    %171 = vector.broadcast %161 : vector<1x128xf32> to vector<512x128xf32>
    %172 = arith.subf %157, %171 : vector<512x128xf32>
    %cst_119 = arith.constant 9.99999974E-6 : f32
    %173 = vector.broadcast %cst_119 : f32 to vector<1x128xf32>
    %174 = arith.addf %170, %173 : vector<1x128xf32>
    %175 = math.rsqrt %174 : vector<1x128xf32>
    %176 = vector.broadcast %175 : vector<1x128xf32> to vector<512x128xf32>
    %177 = arith.mulf %172, %176 : vector<512x128xf32>
    %c0_120 = arith.constant 0 : index
    %c0_121 = arith.constant 0 : index
    %178 = vector.load %arg12[%c0_120, %c0_121] : memref<1x128xf32, #tpu.memory_space<vmem>>, vector<1x128xf32>
    %179 = vector.broadcast %178 : vector<1x128xf32> to vector<512x128xf32>
    %180 = arith.mulf %177, %179 : vector<512x128xf32>
    %c0_122 = arith.constant 0 : index
    %c0_123 = arith.constant 0 : index
    %181 = vector.load %arg13[%c0_122, %c0_123] : memref<1x128xf32, #tpu.memory_space<vmem>>, vector<1x128xf32>
    %182 = vector.broadcast %181 : vector<1x128xf32> to vector<512x128xf32>
    %183 = arith.addf %180, %182 : vector<512x128xf32>
    %184 = arith.addf %154, %183 : vector<512x128xf32>
    %cst_124 = arith.constant 0.000000e+00 : f32
    %185 = vector.broadcast %cst_124 : f32 to vector<512x128xf32>
    %186 = arith.maximumf %184, %185 : vector<512x128xf32>
    %c0_125 = arith.constant 0 : index
    %c0_126 = arith.constant 0 : index
    %187 = vector.load %arg14[%c0_125, %c0_126] : memref<512x128xf32, #tpu.memory_space<vmem>>, vector<512x128xf32>
    tpu.vector_store %arg14[%c0_125, %c0_126], %186 {strides = array<i32>} : memref<512x128xf32, #tpu.memory_space<vmem>>, vector<512x128xf32>,
    return
  }
  func.func @transform_0(%arg0: i32) -> (i32, i32) {
    %c0_i32 = arith.constant 0 : i32
    %c0_i32_0 = arith.constant 0 : i32
    %c0_i32_1 = arith.constant 0 : i32
    return %c0_i32, %c0_i32_0 : i32, i32
  }
  func.func @transform_1(%arg0: i32) -> (i32, i32) {
    %c0_i32 = arith.constant 0 : i32
    %c0_i32_0 = arith.constant 0 : i32
    %c0_i32_1 = arith.constant 0 : i32
    return %c0_i32, %c0_i32_0 : i32, i32
  }
  func.func @transform_2(%arg0: i32) -> (i32, i32) {
    %c0_i32 = arith.constant 0 : i32
    %c0_i32_0 = arith.constant 0 : i32
    %c0_i32_1 = arith.constant 0 : i32
    return %c0_i32, %c0_i32_0 : i32, i32
  }
  func.func @transform_3(%arg0: i32) -> (i32, i32) {
    %c0_i32 = arith.constant 0 : i32
    %c0_i32_0 = arith.constant 0 : i32
    %c0_i32_1 = arith.constant 0 : i32
    return %c0_i32, %c0_i32_0 : i32, i32
  }
  func.func @transform_4(%arg0: i32) -> (i32, i32, i32) {
    %c0_i32 = arith.constant 0 : i32
    %c0_i32_0 = arith.constant 0 : i32
    %c0_i32_1 = arith.constant 0 : i32
    %c0_i32_2 = arith.constant 0 : i32
    return %c0_i32, %c0_i32_0, %c0_i32_1 : i32, i32, i32
  }
  func.func @transform_5(%arg0: i32) -> (i32, i32) {
    %c0_i32 = arith.constant 0 : i32
    %c0_i32_0 = arith.constant 0 : i32
    %c0_i32_1 = arith.constant 0 : i32
    return %c0_i32, %c0_i32_0 : i32, i32
  }
  func.func @transform_6(%arg0: i32) -> (i32, i32) {
    %c0_i32 = arith.constant 0 : i32
    %c0_i32_0 = arith.constant 0 : i32
    %c0_i32_1 = arith.constant 0 : i32
    return %c0_i32, %c0_i32_0 : i32, i32
  }
  func.func @transform_7(%arg0: i32) -> (i32, i32) {
    %c0_i32 = arith.constant 0 : i32
    %c0_i32_0 = arith.constant 0 : i32
    %c0_i32_1 = arith.constant 0 : i32
    return %c0_i32, %c0_i32_0 : i32, i32
  }
  func.func @transform_8(%arg0: i32) -> (i32, i32) {
    %c0_i32 = arith.constant 0 : i32
    %c0_i32_0 = arith.constant 0 : i32
    %c0_i32_1 = arith.constant 0 : i32
    return %c0_i32, %c0_i32_0 : i32, i32
  }
  func.func @transform_9(%arg0: i32) -> (i32, i32) {
    %c0_i32 = arith.constant 0 : i32
    %c0_i32_0 = arith.constant 0 : i32
    %c0_i32_1 = arith.constant 0 : i32
    return %c0_i32, %c0_i32_0 : i32, i32
  }
  func.func @transform_10(%arg0: i32) -> (i32, i32) {
    %c0_i32 = arith.constant 0 : i32
    %c0_i32_0 = arith.constant 0 : i32
    %c0_i32_1 = arith.constant 0 : i32
    return %c0_i32, %c0_i32_0 : i32, i32
  }
  func.func @transform_11(%arg0: i32) -> (i32, i32) {
    %c0_i32 = arith.constant 0 : i32
    %c0_i32_0 = arith.constant 0 : i32
    %c0_i32_1 = arith.constant 0 : i32
    return %c0_i32, %c0_i32_0 : i32, i32
  }
  func.func @transform_12(%arg0: i32) -> (i32, i32) {
    %c0_i32 = arith.constant 0 : i32
    %c0_i32_0 = arith.constant 0 : i32
    %c0_i32_1 = arith.constant 0 : i32
    return %c0_i32, %c0_i32_0 : i32, i32
  }
  func.func @transform_13(%arg0: i32) -> (i32, i32) {
    %c0_i32 = arith.constant 0 : i32
    %c0_i32_0 = arith.constant 0 : i32
    %c0_i32_1 = arith.constant 0 : i32
    return %c0_i32, %c0_i32_0 : i32, i32
  }
}

</mosaic_0001>

<bundles_post_ra>
// kernel: tpu_custom_call.1
= control target key start
LH: loop header
LB: loop body
LE: loop exit
PB: predicated region body
PF: predicated region fallthrough
CT: control target
= control target key end

     0   :  { %vm174_vm0 = vcmask 523264   ;;  %s19279_s0 = inlined_call_operand.vmem [shape: f32[512,64], index: 0, kind: input, shape index: {}]   ;;  %s19280_s1 = inlined_call_operand.vmem [shape: bf16[64,32], index: 1, kind: input, shape index: {}]   ;;  %s19281_s2 = inlined_call_operand.vmem [shape: f32[1,32], index: 2, kind: input, shape index: {}]   ;;  %s19282_s3 = inlined_call_operand.vmem [shape: f32[1,32], index: 3, kind: input, shape index: {}]   ;;  %s19283_s4 = inlined_call_operand.vmem [shape: bf16[9,32,32], index: 4, kind: input, shape index: {}]   ;;  %s19284_s5 = inlined_call_operand.vmem [shape: f32[1,32], index: 5, kind: input, shape index: {}]   ;;  %s19285_s6 = inlined_call_operand.vmem [shape: f32[1,32], index: 6, kind: input, shape index: {}]   ;;  %s19286_s7 = inlined_call_operand.vmem [shape: bf16[32,128], index: 7, kind: input, shape index: {}]   ;;  %s19287_s8 = inlined_call_operand.vmem [shape: f32[1,128], index: 8, kind: input, shape index: {}]   ;;  %s19288_s9 = inlined_call_operand.vmem [shape: f32[1,128], index: 9, kind: input, shape index: {}]   ;;  %s19289_s10 = inlined_call_operand.vmem [shape: bf16[64,128], index: 10, kind: input, shape index: {}]   ;;  %s19290_s11 = inlined_call_operand.vmem [shape: f32[1,128], index: 11, kind: input, shape index: {}]   ;;  %s19291_s12 = inlined_call_operand.vmem [shape: f32[1,128], index: 12, kind: input, shape index: {}]   ;;  %s19292_s13 = inlined_call_operand.hbm [shape: f32[512,128], index: 13, kind: output, shape index: {}]  }
   0x1   :  { %v10620_v0 = vld [vmem:[%s19280_s1 + $0x18] sm:$0xff]   ;;  %v10621_v1 = vld [vmem:[%s19280_s1 + $0x10] sm:$0xff]   ;;  %v10622_v2 = vld [vmem:[%s19280_s1 + $0x8] sm:$0xff]  }
   0x2   :  { %9792 = vmatprep.subr.bf16.mxu0 %v10620_v0  ;;  %v46_v3 = vld [vmem:[%s19279_s0] sm:$0xff]  ;;  %v47_v4 = vld [vmem:[%s19279_s0 + $0x8] sm:$0xff]  ;;  %v48_v7 = vld [vmem:[%s19279_s0 + $0x10] sm:$0xff] }
   0x3   :  { %9793 = vmatpush3.bf16.msra.mxu0 %v10620_v0  ;;  %v10767_v5 = vpack.c.bf16 %v47_v4, %v46_v3  ;;  %v10623_v6 = vld [vmem:[%s19280_s1] sm:$0xff]   ;;  %v49_v8 = vld [vmem:[%s19279_s0 + $0x18] sm:$0xff]  ;;  %v51_v10 = vld [vmem:[%s19279_s0 + $0x28] sm:$0xff] }
   0x4   :  { %9794 = vmatprep.subr.bf16.mxu0 %v10621_v1  ;;  %v50_v9 = vld [vmem:[%s19279_s0 + $0x20] sm:$0xff]  ;;  %v10786_v11 = vpack.c.bf16 %v49_v8, %v48_v7  ;;  %v52_v13 = vld [vmem:[%s19279_s0 + $0x30] sm:$0xff]  ;;  %v53_v14 = vld [vmem:[%s19279_s0 + $0x38] sm:$0xff] }
   0x5   :  { %19553 = vst [vmem:[#allocation6_spill] sm:$0xff] %v10767_v5  ;;  %9800 = vmatprep.mubr.msk.bf16.mxu0 %vm174_vm0, %v10767_v5  ;;  %v10788_v12 = vpack.c.bf16 %v51_v10, %v50_v9  ;;  %v54_v15 = vld [vmem:[%s19279_s0 + $0x40] sm:$0xff]  ;;  %v55_v16 = vld [vmem:[%s19279_s0 + $0x48] sm:$0xff]  ;;  %v10806_v17 = vpack.c.bf16 %v53_v14, %v52_v13  ;;  %v56_v19 = vld [vmem:[%s19279_s0 + $0x50] sm:$0xff] }
   0x6   :  { %19554 = vst [vmem:[#allocation7_spill] sm:$0xff] %v10786_v11  ;;  %v10808_v18 = vpack.c.bf16 %v55_v16, %v54_v15  ;;  %v57_v20 = vld [vmem:[%s19279_s0 + $0x58] sm:$0xff]  ;;  %v58_v21 = vld [vmem:[%s19279_s0 + $0x60] sm:$0xff]  ;;  %v59_v22 = vld [vmem:[%s19279_s0 + $0x68] sm:$0xff] }
   0x7   :  { %9795 = vmatpush3.bf16.msra.mxu0 %v10621_v1  ;;  %19555 = vst [vmem:[#allocation8_spill] sm:$0xff] %v10788_v12  ;;  %19556 = vst [vmem:[#allocation9_spill] sm:$0xff] %v10806_v17  ;;  %v10826_v23 = vpack.c.bf16 %v57_v20, %v56_v19  ;;  %v10828_v24 = vpack.c.bf16 %v59_v22, %v58_v21  ;;  %v60_v25 = vld [vmem:[%s19279_s0 + $0x70] sm:$0xff]  ;;  %v61_v26 = vld [vmem:[%s19279_s0 + $0x78] sm:$0xff] }
   0x8   :  { %9796 = vmatprep.subr.bf16.mxu0 %v10622_v2  ;;  %19557 = vst [vmem:[#allocation10_spill] sm:$0xff] %v10808_v18  ;;  %v62_v27 = vld [vmem:[%s19279_s0 + $0x80] sm:$0xff]  ;;  %v63_v28 = vld [vmem:[%s19279_s0 + $0x88] sm:$0xff]  ;;  %v10846_v29 = vpack.c.bf16 %v61_v26, %v60_v25 }
   0x9   :  { %19558 = vst [vmem:[#allocation11_spill] sm:$0xff] %v10826_v23  ;;  %19559 = vst [vmem:[#allocation12_spill] sm:$0xff] %v10828_v24  ;;  %v10848_v30 = vpack.c.bf16 %v63_v28, %v62_v27 }
   0xa   :  { %19560 = vst [vmem:[#allocation13_spill] sm:$0xff] %v10846_v29 }
   0xb   :  { %9797 = vmatpush3.bf16.msra.mxu0 %v10622_v2  ;;  %19561 = vst [vmem:[#allocation14_spill] sm:$0xff] %v10848_v30 }
   0xc   :  { %9798 = vmatprep.subr.bf16.mxu0 %v10623_v6 }
   0xf   :  { %9799 = vmatpush3.bf16.msra.mxu0 %v10623_v6 }
  0x12   :  { %9801 = vmatmul.mubr.msk.bf16.vlgmr.msra.gmra.mxu0 %vm174_vm0, %v10786_v11 }
  0x13   :  { %9804 = vmatprep.mubr.msk.bf16.mxu0 %vm174_vm0, %v10788_v12 }
  0x1a   :  { %9805 = vmatmul.mubr.msk.bf16.gmra.mxu0 %vm174_vm0, %v10806_v17 }
  0x1b   :  { %9808 = vmatprep.mubr.msk.bf16.mxu0 %vm174_vm0, %v10808_v18 }
  0x22   :  { %9809 = vmatmul.mubr.msk.bf16.gmra.mxu0 %vm174_vm0, %v10826_v23 }
  0x23   :  { %9812 = vmatprep.mubr.msk.bf16.mxu0 %vm174_vm0, %v10828_v24 }
  0x24   :  { %18 = vsyncpa [#allocation4], 0  ;;  %v64_v31 = vld [vmem:[%s19279_s0 + $0x90] sm:$0xff]  ;;  %v65_v32 = vld [vmem:[%s19279_s0 + $0x98] sm:$0xff]  ;;  %vm560_vm1 = vcmask 261120   ;;  %v10678_v2 = vmov 0.0  }
  0x25   :  { %v66_v33 = vld [vmem:[%s19279_s0 + $0xa0] sm:$0xff]  ;;  %v67_v34 = vld [vmem:[%s19279_s0 + $0xa8] sm:$0xff]  ;;  %v10866_v35 = vpack.c.bf16 %v65_v32, %v64_v31  ;;  %v68_v37 = vld [vmem:[%s19279_s0 + $0xb0] sm:$0xff]  ;;  %1240 = vst.msk [vmem:[#allocation2 + $0x30] sm:$0xff] %vm560_vm1, %v10678_v2  ;;  %vm1235_vm2 = vcmask 254976  }
  0x26   :  { %v10868_v36 = vpack.c.bf16 %v67_v34, %v66_v33  ;;  %v69_v38 = vld [vmem:[%s19279_s0 + $0xb8] sm:$0xff]  ;;  %v70_v39 = vld [vmem:[%s19279_s0 + $0xc0] sm:$0xff]  ;;  %v71_v40 = vld [vmem:[%s19279_s0 + $0xc8] sm:$0xff]  ;;  %1241 = vst.msk [vmem:[#allocation2 + $0x38] sm:$0xff] %vm560_vm1, %v10678_v2 }
  0x27   :  { %19562 = vst [vmem:[#allocation15_spill] sm:$0xff] %v10866_v35  ;;  %v10886_v41 = vpack.c.bf16 %v69_v38, %v68_v37  ;;  %v10888_v42 = vpack.c.bf16 %v71_v40, %v70_v39  ;;  %v72_v43 = vld [vmem:[%s19279_s0 + $0xd0] sm:$0xff]  ;;  %v73_v44 = vld [vmem:[%s19279_s0 + $0xd8] sm:$0xff]  ;;  %v74_v45 = vld [vmem:[%s19279_s0 + $0xe0] sm:$0xff] }
  0x28   :  { %19563 = vst [vmem:[#allocation16_spill] sm:$0xff] %v10868_v36  ;;  %v75_v46 = vld [vmem:[%s19279_s0 + $0xe8] sm:$0xff]  ;;  %v10906_v47 = vpack.c.bf16 %v73_v44, %v72_v43  ;;  %v76_v49 = vld [vmem:[%s19279_s0 + $0xf0] sm:$0xff]  ;;  %v77_v50 = vld [vmem:[%s19279_s0 + $0xf8] sm:$0xff] }
  0x29   :  { %19564 = vst [vmem:[#allocation17_spill] sm:$0xff] %v10886_v41  ;;  %19565 = vst [vmem:[#allocation18_spill] sm:$0xff] %v10888_v42  ;;  %v10908_v48 = vpack.c.bf16 %v75_v46, %v74_v45  ;;  %v78_v51 = vld [vmem:[%s19279_s0 + $0x100] sm:$0xff]  ;;  %v79_v52 = vld [vmem:[%s19279_s0 + $0x108] sm:$0xff]  ;;  %v10926_v53 = vpack.c.bf16 %v77_v50, %v76_v49 }
  0x2a   :  { %9813 = vmatmul.mubr.msk.bf16.gmra.mxu0 %vm174_vm0, %v10846_v29  ;;  %19566 = vst [vmem:[#allocation19_spill] sm:$0xff] %v10906_v47  ;;  %v10928_v54 = vpack.c.bf16 %v79_v52, %v78_v51  ;;  %v80_v55 = vld [vmem:[%s19279_s0 + $0x110] sm:$0xff]  ;;  %v81_v56 = vld [vmem:[%s19279_s0 + $0x118] sm:$0xff]  ;;  %v82_v57 = vld [vmem:[%s19279_s0 + $0x120] sm:$0xff] }
  0x2b   :  { %9816 = vmatprep.mubr.msk.bf16.mxu0 %vm174_vm0, %v10848_v30  ;;  %19567 = vst [vmem:[#allocation20_spill] sm:$0xff] %v10908_v48  ;;  %19568 = vst [vmem:[#allocation21_spill] sm:$0xff] %v10926_v53  ;;  %v83_v58 = vld [vmem:[%s19279_s0 + $0x128] sm:$0xff]  ;;  %v10946_v59 = vpack.c.bf16 %v81_v56, %v80_v55  ;;  %v84_v61 = vld [vmem:[%s19279_s0 + $0x130] sm:$0xff] }
  0x2c   :  { %19569 = vst [vmem:[#allocation22_spill] sm:$0xff] %v10928_v54  ;;  %v10948_v60 = vpack.c.bf16 %v83_v58, %v82_v57  ;;  %v85_v62 = vld [vmem:[%s19279_s0 + $0x138] sm:$0xff]  ;;  %v10963_v63 = vld [vmem:[%s19279_s0 + $0x140] sm:$0xff]  ;;  %v10968_v0 = vld [vmem:[%s19279_s0 + $0x148] sm:$0xff] }
  0x2d   :  { %19570 = vst [vmem:[#allocation23_spill] sm:$0xff] %v10946_v59  ;;  %v10970_v1 = vpack.c.bf16 %v85_v62, %v84_v61  ;;  %1233 = vst.msk [vmem:[#allocation2] sm:$0xff] %vm560_vm1, %v10678_v2  ;;  %v11118_v3 = vpack.c.bf16 %v10968_v0, %v10963_v63  ;;  %v88_v4 = vld [vmem:[%s19279_s0 + $0x150] sm:$0xff]  ;;  %v89_v6 = vld [vmem:[%s19279_s0 + $0x158] sm:$0xff] }
  0x2e   :  { %19571 = vst [vmem:[#allocation24_spill] sm:$0xff] %v10948_v60  ;;  %1234 = vst.msk [vmem:[#allocation2 + $0x8] sm:$0xff] %vm560_vm1, %v10678_v2  ;;  %v90_v7 = vld [vmem:[%s19279_s0 + $0x160] sm:$0xff]  ;;  %v91_v8 = vld [vmem:[%s19279_s0 + $0x168] sm:$0xff]  ;;  %v11208_v9 = vpack.c.bf16 %v89_v6, %v88_v4 }
  0x2f   :  { %19572 = vst [vmem:[#allocation25_spill] sm:$0xff] %v10970_v1  ;;  %1237 = vst.msk [vmem:[#allocation2 + $0x18] sm:$0xff] %vm560_vm1, %v10678_v2  ;;  %v11210_v10 = vpack.c.bf16 %v91_v8, %v90_v7  ;;  %v92_v13 = vld [vmem:[%s19279_s0 + $0x170] sm:$0xff]  ;;  %v93_v14 = vld [vmem:[%s19279_s0 + $0x178] sm:$0xff] }
  0x30   :  { %1238 = vst.msk [vmem:[#allocation2 + $0x20] sm:$0xff] %vm560_vm1, %v10678_v2  ;;  %1243 = vst.msk [vmem:[#allocation2 + $0x48] sm:$0xff] %vm560_vm1, %v10678_v2  ;;  %v94_v15 = vld [vmem:[%s19279_s0 + $0x180] sm:$0xff]  ;;  %v95_v16 = vld [vmem:[%s19279_s0 + $0x188] sm:$0xff]  ;;  %v11228_v19 = vpack.c.bf16 %v93_v14, %v92_v13 }
  0x31   :  { %1244 = vst.msk [vmem:[#allocation2 + $0x50] sm:$0xff] %vm560_vm1, %v10678_v2  ;;  %1246 = vst.msk [vmem:[#allocation2 + $0x60] sm:$0xff] %vm560_vm1, %v10678_v2  ;;  %v11230_v20 = vpack.c.bf16 %v95_v16, %v94_v15  ;;  %v96_v21 = vld [vmem:[%s19279_s0 + $0x190] sm:$0xff]  ;;  %v97_v22 = vld [vmem:[%s19279_s0 + $0x198] sm:$0xff] }
  0x32   :  { %9817 = vmatmul.mubr.msk.bf16.gmra.mxu0 %vm174_vm0, %v10866_v35  ;;  %1247 = vst.msk [vmem:[#allocation2 + $0x68] sm:$0xff] %vm560_vm1, %v10678_v2  ;;  %1249 = vst.msk [vmem:[#allocation2 + $0x78] sm:$0xff] %vm560_vm1, %v10678_v2  ;;  %v98_v25 = vld [vmem:[%s19279_s0 + $0x1a0] sm:$0xff]  ;;  %v99_v26 = vld [vmem:[%s19279_s0 + $0x1a8] sm:$0xff]  ;;  %v11248_v27 = vpack.c.bf16 %v97_v22, %v96_v21 }
  0x33   :  { %9820 = vmatprep.mubr.msk.bf16.mxu0 %vm174_vm0, %v10868_v36  ;;  %1250 = vst.msk [vmem:[#allocation2 + $0x80] sm:$0xff] %vm560_vm1, %v10678_v2  ;;  %1252 = vst.msk [vmem:[#allocation2 + $0x90] sm:$0xff] %vm560_vm1, %v10678_v2  ;;  %v11250_v28 = vpack.c.bf16 %v99_v26, %v98_v25  ;;  %v100_v31 = vld [vmem:[%s19279_s0 + $0x1b0] sm:$0xff]  ;;  %v101_v32 = vld [vmem:[%s19279_s0 + $0x1b8] sm:$0xff] }
  0x34   :  { %1253 = vst.msk [vmem:[#allocation2 + $0x98] sm:$0xff] %vm560_vm1, %v10678_v2  ;;  %1255 = vst.msk [vmem:[#allocation2 + $0xa8] sm:$0xff] %vm560_vm1, %v10678_v2  ;;  %v102_v33 = vld [vmem:[%s19279_s0 + $0x1c0] sm:$0xff]  ;;  %v103_v34 = vld [vmem:[%s19279_s0 + $0x1c8] sm:$0xff]  ;;  %v11268_v37 = vpack.c.bf16 %v101_v32, %v100_v31 }
  0x35   :  { %1256 = vst.msk [vmem:[#allocation2 + $0xb0] sm:$0xff] %vm560_vm1, %v10678_v2  ;;  %1258 = vst.msk [vmem:[#allocation2 + $0xc0] sm:$0xff] %vm560_vm1, %v10678_v2  ;;  %v11270_v38 = vpack.c.bf16 %v103_v34, %v102_v33  ;;  %v104_v39 = vld [vmem:[%s19279_s0 + $0x1d0] sm:$0xff]  ;;  %v105_v40 = vld [vmem:[%s19279_s0 + $0x1d8] sm:$0xff] }
  0x36   :  { %1259 = vst.msk [vmem:[#allocation2 + $0xc8] sm:$0xff] %vm560_vm1, %v10678_v2  ;;  %1261 = vst.msk [vmem:[#allocation2 + $0xd8] sm:$0xff] %vm560_vm1, %v10678_v2  ;;  %v106_v43 = vld [vmem:[%s19279_s0 + $0x1e0] sm:$0xff]  ;;  %v107_v44 = vld [vmem:[%s19279_s0 + $0x1e8] sm:$0xff]  ;;  %v11288_v45 = vpack.c.bf16 %v105_v40, %v104_v39 }
  0x37   :  { %1262 = vst.msk [vmem:[#allocation2 + $0xe0] sm:$0xff] %vm560_vm1, %v10678_v2  ;;  %1264 = vst.msk [vmem:[#allocation2 + $0xf0] sm:$0xff] %vm560_vm1, %v10678_v2  ;;  %v11290_v46 = vpack.c.bf16 %v107_v44, %v106_v43  ;;  %v108_v49 = vld [vmem:[%s19279_s0 + $0x1f0] sm:$0xff]  ;;  %v109_v50 = vld [vmem:[%s19279_s0 + $0x1f8] sm:$0xff] }
  0x38   :  { %1265 = vst.msk [vmem:[#allocation2 + $0xf8] sm:$0xff] %vm560_vm1, %v10678_v2  ;;  %1267 = vst.msk [vmem:[#allocation2 + $0x108] sm:$0xff] %vm560_vm1, %v10678_v2  ;;  %v11302_v51 = vpack.c.bf16 %v109_v50, %v108_v49 }
  0x39   :  { %1268 = vst.msk [vmem:[#allocation2 + $0x110] sm:$0xff] %vm560_vm1, %v10678_v2  ;;  %1270 = vst.msk [vmem:[#allocation2 + $0x120] sm:$0xff] %vm560_vm1, %v10678_v2 }
  0x3a   :  { %9821 = vmatmul.mubr.msk.bf16.gmra.mxu0 %vm174_vm0, %v10886_v41  ;;  %1271 = vst.msk [vmem:[#allocation2 + $0x128] sm:$0xff] %vm560_vm1, %v10678_v2  ;;  %1273 = vst.msk [vmem:[#allocation2 + $0x138] sm:$0xff] %vm560_vm1, %v10678_v2 }
  0x3b   :  { %9824 = vmatprep.mubr.msk.bf16.mxu0 %vm174_vm0, %v10888_v42  ;;  %1274 = vst.msk [vmem:[#allocation2 + $0x140] sm:$0xff] %vm560_vm1, %v10678_v2  ;;  %1276 = vst.msk [vmem:[#allocation2 + $0x150] sm:$0xff] %vm560_vm1, %v10678_v2 }
  0x3c   :  { %1277 = vst.msk [vmem:[#allocation2 + $0x158] sm:$0xff] %vm560_vm1, %v10678_v2  ;;  %1279 = vst.msk [vmem:[#allocation2 + $0x168] sm:$0xff] %vm560_vm1, %v10678_v2 }
  0x3d   :  { %1280 = vst.msk [vmem:[#allocation2 + $0x170] sm:$0xff] %vm560_vm1, %v10678_v2  ;;  %1282 = vst.msk [vmem:[#allocation2 + $0x180] sm:$0xff] %vm560_vm1, %v10678_v2 }
  0x3e   :  { %1283 = vst.msk [vmem:[#allocation2 + $0x188] sm:$0xff] %vm560_vm1, %v10678_v2  ;;  %1285 = vst.msk [vmem:[#allocation2 + $0x198] sm:$0xff] %vm560_vm1, %v10678_v2 }
  0x3f   :  { %1286 = vst.msk [vmem:[#allocation2 + $0x1a0] sm:$0xff] %vm560_vm1, %v10678_v2  ;;  %1288 = vst.msk [vmem:[#allocation2 + $0x1b0] sm:$0xff] %vm560_vm1, %v10678_v2 }
  0x40   :  { %1289 = vst.msk [vmem:[#allocation2 + $0x1b8] sm:$0xff] %vm560_vm1, %v10678_v2  ;;  %1291 = vst.msk [vmem:[#allocation2 + $0x1c8] sm:$0xff] %vm560_vm1, %v10678_v2 }
  0x41   :  { %1292 = vst.msk [vmem:[#allocation2 + $0x1d0] sm:$0xff] %vm560_vm1, %v10678_v2  ;;  %1294 = vst.msk [vmem:[#allocation2 + $0x1e0] sm:$0xff] %vm560_vm1, %v10678_v2 }
  0x42   :  { %9825 = vmatmul.mubr.msk.bf16.gmra.mxu0 %vm174_vm0, %v10906_v47  ;;  %1295 = vst.msk [vmem:[#allocation2 + $0x1e8] sm:$0xff] %vm560_vm1, %v10678_v2  ;;  %1297 = vst.msk [vmem:[#allocation2 + $0x1f8] sm:$0xff] %vm560_vm1, %v10678_v2 }
  0x43   :  { %9828 = vmatprep.mubr.msk.bf16.mxu0 %vm174_vm0, %v10908_v48  ;;  %1298 = vst.msk [vmem:[#allocation2 + $0x200] sm:$0xff] %vm560_vm1, %v10678_v2  ;;  %1300 = vst.msk [vmem:[#allocation2 + $0x210] sm:$0xff] %vm560_vm1, %v10678_v2 }
  0x44   :  { %1301 = vst.msk [vmem:[#allocation2 + $0x218] sm:$0xff] %vm560_vm1, %v10678_v2  ;;  %1303 = vst.msk [vmem:[#allocation2 + $0x228] sm:$0xff] %vm560_vm1, %v10678_v2 }
  0x45   :  { %1304 = vst.msk [vmem:[#allocation2 + $0x230] sm:$0xff] %vm560_vm1, %v10678_v2  ;;  %1306 = vst.msk [vmem:[#allocation2 + $0x240] sm:$0xff] %vm560_vm1, %v10678_v2 }
  0x46   :  { %1307 = vst.msk [vmem:[#allocation2 + $0x248] sm:$0xff] %vm560_vm1, %v10678_v2  ;;  %1309 = vst.msk [vmem:[#allocation2 + $0x258] sm:$0xff] %vm560_vm1, %v10678_v2 }
  0x47   :  { %1310 = vst.msk [vmem:[#allocation2 + $0x260] sm:$0xff] %vm560_vm1, %v10678_v2  ;;  %1312 = vst.msk [vmem:[#allocation2 + $0x270] sm:$0xff] %vm560_vm1, %v10678_v2 }
  0x48   :  { %1313 = vst.msk [vmem:[#allocation2 + $0x278] sm:$0xff] %vm560_vm1, %v10678_v2  ;;  %1315 = vst.msk [vmem:[#allocation2 + $0x288] sm:$0xff] %vm560_vm1, %v10678_v2 }
  0x49   :  { %1316 = vst.msk [vmem:[#allocation2 + $0x290] sm:$0xff] %vm560_vm1, %v10678_v2  ;;  %1318 = vst.msk [vmem:[#allocation2 + $0x2a0] sm:$0xff] %vm560_vm1, %v10678_v2 }
  0x4a   :  { %9829 = vmatmul.mubr.msk.bf16.gmra.mxu0 %vm174_vm0, %v10926_v53  ;;  %1319 = vst.msk [vmem:[#allocation2 + $0x2a8] sm:$0xff] %vm560_vm1, %v10678_v2  ;;  %1321 = vst.msk [vmem:[#allocation2 + $0x2b8] sm:$0xff] %vm560_vm1, %v10678_v2 }
  0x4b   :  { %9832 = vmatprep.mubr.msk.bf16.mxu0 %vm174_vm0, %v10928_v54  ;;  %1322 = vst.msk [vmem:[#allocation2 + $0x2c0] sm:$0xff] %vm560_vm1, %v10678_v2  ;;  %1324 = vst.msk [vmem:[#allocation2 + $0x2d0] sm:$0xff] %vm560_vm1, %v10678_v2 }
  0x4c   :  { %1325 = vst.msk [vmem:[#allocation2 + $0x2d8] sm:$0xff] %vm560_vm1, %v10678_v2  ;;  %1327 = vst.msk [vmem:[#allocation2 + $0x2e8] sm:$0xff] %vm560_vm1, %v10678_v2 }
  0x4d   :  { %1328 = vst.msk [vmem:[#allocation2 + $0x2f0] sm:$0xff] %vm560_vm1, %v10678_v2  ;;  %1330 = vst.msk [vmem:[#allocation2 + $0x300] sm:$0xff] %vm560_vm1, %v10678_v2 }
  0x4e   :  { %1331 = vst.msk [vmem:[#allocation2 + $0x308] sm:$0xff] %vm560_vm1, %v10678_v2  ;;  %1333 = vst.msk [vmem:[#allocation2 + $0x318] sm:$0xff] %vm560_vm1, %v10678_v2 }
  0x4f   :  { %1334 = vst.msk [vmem:[#allocation2 + $0x320] sm:$0xff] %vm560_vm1, %v10678_v2  ;;  %1336 = vst.msk [vmem:[#allocation2 + $0x330] sm:$0xff] %vm560_vm1, %v10678_v2 }
  0x50   :  { %1337 = vst.msk [vmem:[#allocation2 + $0x338] sm:$0xff] %vm560_vm1, %v10678_v2  ;;  %1339 = vst.msk [vmem:[#allocation2 + $0x348] sm:$0xff] %vm560_vm1, %v10678_v2 }
  0x51   :  { %1340 = vst.msk [vmem:[#allocation2 + $0x350] sm:$0xff] %vm560_vm1, %v10678_v2  ;;  %19573 = vst [vmem:[#allocation26_spill] sm:$0xff] %v11118_v3 }
  0x52   :  { %9833 = vmatmul.mubr.msk.bf16.gmra.mxu0 %vm174_vm0, %v10946_v59  ;;  %1242 = vst.msk [vmem:[#allocation2 + $0x40] sm:$0x3] %vm1235_vm2, %v10678_v2  ;;  %1236 = vst.msk [vmem:[#allocation2 + $0x10] sm:$0x3] %vm1235_vm2, %v10678_v2 }
  0x53   :  { %9836 = vmatprep.mubr.msk.bf16.mxu0 %vm174_vm0, %v10948_v60  ;;  %1239 = vst.msk [vmem:[#allocation2 + $0x28] sm:$0x3] %vm1235_vm2, %v10678_v2  ;;  %1245 = vst.msk [vmem:[#allocation2 + $0x58] sm:$0x3] %vm1235_vm2, %v10678_v2 }
  0x54   :  { %1248 = vst.msk [vmem:[#allocation2 + $0x70] sm:$0x3] %vm1235_vm2, %v10678_v2  ;;  %1251 = vst.msk [vmem:[#allocation2 + $0x88] sm:$0x3] %vm1235_vm2, %v10678_v2 }
  0x55   :  { %1254 = vst.msk [vmem:[#allocation2 + $0xa0] sm:$0x3] %vm1235_vm2, %v10678_v2  ;;  %1257 = vst.msk [vmem:[#allocation2 + $0xb8] sm:$0x3] %vm1235_vm2, %v10678_v2 }
  0x56   :  { %1260 = vst.msk [vmem:[#allocation2 + $0xd0] sm:$0x3] %vm1235_vm2, %v10678_v2  ;;  %1263 = vst.msk [vmem:[#allocation2 + $0xe8] sm:$0x3] %vm1235_vm2, %v10678_v2 }
  0x57   :  { %1266 = vst.msk [vmem:[#allocation2 + $0x100] sm:$0x3] %vm1235_vm2, %v10678_v2  ;;  %1269 = vst.msk [vmem:[#allocation2 + $0x118] sm:$0x3] %vm1235_vm2, %v10678_v2 }
  0x58   :  { %1272 = vst.msk [vmem:[#allocation2 + $0x130] sm:$0x3] %vm1235_vm2, %v10678_v2  ;;  %1275 = vst.msk [vmem:[#allocation2 + $0x148] sm:$0x3] %vm1235_vm2, %v10678_v2 }
  0x59   :  { %1278 = vst.msk [vmem:[#allocation2 + $0x160] sm:$0x3] %vm1235_vm2, %v10678_v2  ;;  %1281 = vst.msk [vmem:[#allocation2 + $0x178] sm:$0x3] %vm1235_vm2, %v10678_v2 }
  0x5a   :  { %9837 = vmatmul.mubr.msk.bf16.gmra.mxu0 %vm174_vm0, %v10970_v1  ;;  %1284 = vst.msk [vmem:[#allocation2 + $0x190] sm:$0x3] %vm1235_vm2, %v10678_v2  ;;  %1287 = vst.msk [vmem:[#allocation2 + $0x1a8] sm:$0x3] %vm1235_vm2, %v10678_v2 }
  0x5b   :  { %1290 = vst.msk [vmem:[#allocation2 + $0x1c0] sm:$0x3] %vm1235_vm2, %v10678_v2  ;;  %1293 = vst.msk [vmem:[#allocation2 + $0x1d8] sm:$0x3] %vm1235_vm2, %v10678_v2  ;;  %9840 = vmatprep.mubr.msk.bf16.mxu0 %vm174_vm0, %v11118_v3 }
  0x5c   :  { %1296 = vst.msk [vmem:[#allocation2 + $0x1f0] sm:$0x3] %vm1235_vm2, %v10678_v2  ;;  %1299 = vst.msk [vmem:[#allocation2 + $0x208] sm:$0x3] %vm1235_vm2, %v10678_v2 }
  0x5d   :  { %1302 = vst.msk [vmem:[#allocation2 + $0x220] sm:$0x3] %vm1235_vm2, %v10678_v2  ;;  %1305 = vst.msk [vmem:[#allocation2 + $0x238] sm:$0x3] %vm1235_vm2, %v10678_v2 }
  0x5e   :  { %1308 = vst.msk [vmem:[#allocation2 + $0x250] sm:$0x3] %vm1235_vm2, %v10678_v2  ;;  %1311 = vst.msk [vmem:[#allocation2 + $0x268] sm:$0x3] %vm1235_vm2, %v10678_v2 }
  0x5f   :  { %1314 = vst.msk [vmem:[#allocation2 + $0x280] sm:$0x3] %vm1235_vm2, %v10678_v2  ;;  %1317 = vst.msk [vmem:[#allocation2 + $0x298] sm:$0x3] %vm1235_vm2, %v10678_v2 }
  0x60   :  { %1320 = vst.msk [vmem:[#allocation2 + $0x2b0] sm:$0x3] %vm1235_vm2, %v10678_v2  ;;  %1323 = vst.msk [vmem:[#allocation2 + $0x2c8] sm:$0x3] %vm1235_vm2, %v10678_v2 }
  0x61   :  { %1326 = vst.msk [vmem:[#allocation2 + $0x2e0] sm:$0x3] %vm1235_vm2, %v10678_v2  ;;  %1329 = vst.msk [vmem:[#allocation2 + $0x2f8] sm:$0x3] %vm1235_vm2, %v10678_v2 }
  0x62   :  { %1332 = vst.msk [vmem:[#allocation2 + $0x310] sm:$0x3] %vm1235_vm2, %v10678_v2  ;;  %1335 = vst.msk [vmem:[#allocation2 + $0x328] sm:$0x3] %vm1235_vm2, %v10678_v2  ;;  %9841 = vmatmul.mubr.msk.bf16.gmra.mxu0 %vm174_vm0, %v11208_v9 }
  0x63   :  { %1338 = vst.msk [vmem:[#allocation2 + $0x340] sm:$0x3] %vm1235_vm2, %v10678_v2  ;;  %1341 = vst.msk [vmem:[#allocation2 + $0x358] sm:$0x3] %vm1235_vm2, %v10678_v2  ;;  %9844 = vmatprep.mubr.msk.bf16.mxu0 %vm174_vm0, %v11210_v10 }
  0x64   :  { %19574 = vst [vmem:[#allocation27_spill] sm:$0xff] %v11208_v9  ;;  %19575 = vst [vmem:[#allocation28_spill] sm:$0xff] %v11210_v10 }
  0x65   :  { %19576 = vst [vmem:[#allocation29_spill] sm:$0xff] %v11228_v19  ;;  %19577 = vst [vmem:[#allocation30_spill] sm:$0xff] %v11230_v20 }
  0x66   :  { %19578 = vst [vmem:[#allocation31_spill] sm:$0xff] %v11248_v27  ;;  %19579 = vst [vmem:[#allocation32_spill] sm:$0xff] %v11250_v28 }
  0x67   :  { %19580 = vst [vmem:[#allocation33_spill] sm:$0xff] %v11268_v37  ;;  %19581 = vst [vmem:[#allocation34_spill] sm:$0xff] %v11270_v38 }
  0x68   :  { %19582 = vst [vmem:[#allocation35_spill] sm:$0xff] %v11288_v45  ;;  %19583 = vst [vmem:[#allocation36_spill] sm:$0xff] %v11290_v46 }
  0x69   :  { %19584 = vst [vmem:[#allocation37_spill] sm:$0xff] %v11302_v51 }
  0x6a   :  { %9845 = vmatmul.mubr.msk.bf16.gmra.mxu0 %vm174_vm0, %v11228_v19 }
  0x6b   :  { %9848 = vmatprep.mubr.msk.bf16.mxu0 %vm174_vm0, %v11230_v20 }
  0x72   :  { %9849 = vmatmul.mubr.msk.bf16.gmra.mxu0 %vm174_vm0, %v11248_v27 }
  0x73   :  { %9852 = vmatprep.mubr.msk.bf16.mxu0 %vm174_vm0, %v11250_v28 }
  0x7a   :  { %9853 = vmatmul.mubr.msk.bf16.gmra.mxu0 %vm174_vm0, %v11268_v37 }
  0x7b   :  { %9856 = vmatprep.mubr.msk.bf16.mxu0 %vm174_vm0, %v11270_v38 }
  0x82   :  { %9857 = vmatmul.mubr.msk.bf16.gmra.mxu0 %vm174_vm0, %v11288_v45 }
  0x83   :  { %9860 = vmatprep.mubr.msk.bf16.mxu0 %vm174_vm0, %v11290_v46 }
  0x8a   :  { %9861 = vmatmul.mubr.msk.bf16.gmra.mxu0 %vm174_vm0, %v11302_v51 }
  0xd2   :  { %v11306_v52 = vpop.f32.mrf.mxu0 }
  0xd3   :  { %v698_v61 = vmul.f32 %v11306_v52, %v11306_v52  ;;  %v564_v6 = vsel %vm560_vm1, %v11306_v52, 0.0 }
  0xd4   :  { %v11308_v55 = vpop.f32.mrf.mxu0 }
  0xd5   :  { %v696_v57 = vmul.f32 %v11308_v55, %v11308_v55  ;;  %v561_v62 = vsel %vm560_vm1, %v11308_v55, 0.0  ;;  %v763_v21 = vsel %vm560_vm1, %v698_v61, 0.0 }
  0xd6   :  { %v11310_v56 = vpop.f32.mrf.mxu0 }
  0xd7   :  { %v760_v7 = vsel %vm560_vm1, %v696_v57, 0.0  ;;  %v699_v8 = vmul.f32 %v11310_v56, %v11310_v56  ;;  %v566_v22 = vsel %vm560_vm1, %v11310_v56, 0.0 }
  0xd8   :  { %v11314_v58 = vpop.f32.mrf.mxu0 }
  0xd9   :  { %v562_v63 = vsel %vm560_vm1, %v11314_v58, 0.0  ;;  %v697_v0 = vmul.f32 %v11314_v58, %v11314_v58  ;;  %v765_v33 = vsel %vm560_vm1, %v699_v8, 0.0 }
  0xda   :  { %v563_v2 = vadd.f32 %v562_v63, %v561_v62  ;;  %v11324_v4 = vpop.f32.mrf.mxu0 }
  0xdb   :  { %v761_v13 = vsel %vm560_vm1, %v697_v0, 0.0  ;;  %v702_v44 = vmul.f32 %v11324_v4, %v11324_v4  ;;  %v572_v0 = vsel %vm560_vm1, %v11324_v4, 0.0 }
  0xdc   :  { %v762_v14 = vadd.f32 %v761_v13, %v760_v7  ;;  %v11332_v15 = vpop.f32.mrf.mxu0  ;;  %v565_v16 = vadd.f32 %v564_v6, %v563_v2 }
  0xdd   :  { %v700_v25 = vmul.f32 %v11332_v15, %v11332_v15  ;;  %v568_v34 = vsel %vm560_vm1, %v11332_v15, 0.0 }
  0xde   :  { %v567_v26 = vadd.f32 %v566_v22, %v565_v16  ;;  %v764_v31 = vadd.f32 %v763_v21, %v762_v14  ;;  %v11339_v32 = vpop.f32.mrf.mxu0  ;;  %v771_v14 = vsel %vm560_vm1, %v702_v44, 0.0 }
  0xdf   :  { %v767_v49 = vsel %vm560_vm1, %v700_v25, 0.0  ;;  %v703_v2 = vmul.f32 %v11339_v32, %v11339_v32  ;;  %v574_v16 = vsel %vm560_vm1, %v11339_v32, 0.0 }
  0xe0   :  { %v569_v39 = vadd.f32 %v568_v34, %v567_v26  ;;  %v766_v40 = vadd.f32 %v765_v33, %v764_v31  ;;  %v11344_v43 = vpop.f32.mrf.mxu0 }
  0xe1   :  { %v570_v50 = vsel %vm560_vm1, %v11344_v43, 0.0  ;;  %v701_v57 = vmul.f32 %v11344_v43, %v11344_v43  ;;  %v773_v31 = vsel %vm560_vm1, %v703_v2, 0.0 }
  0xe2   :  { %v768_v61 = vadd.f32 %v767_v49, %v766_v40  ;;  %v571_v62 = vadd.f32 %v570_v50, %v569_v39  ;;  %v11353_v63 = vpop.f32.mrf.mxu0 }
  0xe3   :  { %v769_v6 = vsel %vm560_vm1, %v701_v57, 0.0  ;;  %v706_v44 = vmul.f32 %v11353_v63, %v11353_v63  ;;  %v580_v2 = vsel %vm560_vm1, %v11353_v63, 0.0 }
  0xe4   :  { %v770_v7 = vadd.f32 %v769_v6, %v768_v61  ;;  %v11360_v8 = vpop.f32.mrf.mxu0  ;;  %v573_v13 = vadd.f32 %v572_v0, %v571_v62 }
  0xe5   :  { %v704_v21 = vmul.f32 %v11360_v8, %v11360_v8  ;;  %v576_v33 = vsel %vm560_vm1, %v11360_v8, 0.0 }
  0xe6   :  { %v575_v22 = vadd.f32 %v574_v16, %v573_v13  ;;  %v772_v25 = vadd.f32 %v771_v14, %v770_v7  ;;  %v11367_v26 = vpop.f32.mrf.mxu0 }
  0xe7   :  { %v775_v49 = vsel %vm560_vm1, %v704_v21, 0.0  ;;  %v707_v6 = vmul.f32 %v11367_v26, %v11367_v26  ;;  %v779_v21 = vsel %vm560_vm1, %v706_v44, 0.0 }
  0xe8   :  { %v577_v34 = vadd.f32 %v576_v33, %v575_v22  ;;  %v774_v39 = vadd.f32 %v773_v31, %v772_v25  ;;  %v11372_v40 = vpop.f32.mrf.mxu0  ;;  %v582_v22 = vsel %vm560_vm1, %v11367_v26, 0.0 }
  0xe9   :  { %v578_v50 = vsel %vm560_vm1, %v11372_v40, 0.0  ;;  %v705_v57 = vmul.f32 %v11372_v40, %v11372_v40 }
  0xea   :  { %v776_v61 = vadd.f32 %v775_v49, %v774_v39  ;;  %v579_v62 = vadd.f32 %v578_v50, %v577_v34  ;;  %v11381_v0 = vpop.f32.mrf.mxu0  ;;  %v781_v39 = vsel %vm560_vm1, %v707_v6, 0.0 }
  0xeb   :  { %v777_v7 = vsel %vm560_vm1, %v705_v57, 0.0  ;;  %v710_v44 = vmul.f32 %v11381_v0, %v11381_v0 }
  0xec   :  { %v778_v13 = vadd.f32 %v777_v7, %v776_v61  ;;  %v11388_v14 = vpop.f32.mrf.mxu0  ;;  %v581_v16 = vadd.f32 %v580_v2, %v579_v62 }
  0xed   :  { %v708_v25 = vmul.f32 %v11388_v14, %v11388_v14  ;;  %v584_v49 = vsel %vm560_vm1, %v11388_v14, 0.0 }
  0xee   :  { %v583_v31 = vadd.f32 %v582_v22, %v581_v16  ;;  %v780_v33 = vadd.f32 %v779_v21, %v778_v13  ;;  %v11395_v34 = vpop.f32.mrf.mxu0  ;;  %v588_v21 = vsel %vm560_vm1, %v11381_v0, 0.0 }
  0xef   :  { %v783_v62 = vsel %vm560_vm1, %v708_v25, 0.0  ;;  %v711_v22 = vmul.f32 %v11395_v34, %v11395_v34 }
  0xf0   :  { %v585_v50 = vadd.f32 %v584_v49, %v583_v31  ;;  %v782_v57 = vadd.f32 %v781_v39, %v780_v33  ;;  %v11400_v61 = vpop.f32.mrf.mxu0  ;;  %v787_v49 = vsel %vm560_vm1, %v710_v44, 0.0 }
  0xf1   :  { %v586_v2 = vsel %vm560_vm1, %v11400_v61, 0.0  ;;  %v709_v7 = vmul.f32 %v11400_v61, %v11400_v61  ;;  %v789_v46 = vsel %vm560_vm1, %v711_v22, 0.0 }
  0xf2   :  { %v784_v13 = vadd.f32 %v783_v62, %v782_v57  ;;  %v587_v6 = vadd.f32 %v586_v2, %v585_v50  ;;  %v11409_v16 = vpop.f32.mrf.mxu0  ;;  %v590_v57 = vsel %vm560_vm1, %v11395_v34, 0.0 }
  0xf3   :  { %v785_v31 = vsel %vm560_vm1, %v709_v7, 0.0  ;;  %v714_v44 = vmul.f32 %v11409_v16, %v11409_v16 }
  0xf4   :  { %v786_v33 = vadd.f32 %v785_v31, %v784_v13  ;;  %v11416_v25 = vpop.f32.mrf.mxu0  ;;  %v589_v39 = vadd.f32 %v588_v21, %v587_v6 }
  0xf5   :  { %v712_v50 = vmul.f32 %v11416_v25, %v11416_v25  ;;  %v592_v7 = vsel %vm560_vm1, %v11416_v25, 0.0  ;;  %v795_v38 = vsel %vm560_vm1, %v714_v44, 0.0 }
  0xf6   :  { %v591_v62 = vadd.f32 %v590_v57, %v589_v39  ;;  %v788_v2 = vadd.f32 %v787_v49, %v786_v33  ;;  %v11423_v51 = vpop.f32.mrf.mxu0 }
  0xf7   :  { %v791_v21 = vsel %vm560_vm1, %v712_v50, 0.0 }
  0xf8   :  { %v593_v13 = vadd.f32 %v592_v7, %v591_v62  ;;  %v790_v31 = vadd.f32 %v789_v46, %v788_v2  ;;  %v11428_v6 = vpop.f32.mrf.mxu0  ;;  %v596_v46 = vsel %vm560_vm1, %v11409_v16, 0.0  ;;  %v715_v62 = vmul.f32 %v11423_v51, %v11423_v51 }
  0xf9   :  { %v594_v39 = vsel %vm560_vm1, %v11428_v6, 0.0  ;;  %v713_v33 = vmul.f32 %v11428_v6, %v11428_v6 }
  0xfa   :  { %v792_v49 = vadd.f32 %v791_v21, %v790_v31  ;;  %v595_v22 = vadd.f32 %v594_v39, %v593_v13  ;;  %v11437_v57 = vpop.f32.mrf.mxu0  ;;  %v598_v31 = vsel %vm560_vm1, %v11423_v51, 0.0  ;;  %v797_v28 = vsel %vm560_vm1, %v715_v62, 0.0 }
  0xfb   :  { %v793_v2 = vsel %vm560_vm1, %v713_v33, 0.0  ;;  %v718_v44 = vmul.f32 %v11437_v57, %v11437_v57 }
  0xfc   :  { %v794_v7 = vadd.f32 %v793_v2, %v792_v49  ;;  %v11444_v50 = vpop.f32.mrf.mxu0  ;;  %v597_v45 = vadd.f32 %v596_v46, %v595_v22 }
  0xfd   :  { %v716_v13 = vmul.f32 %v11444_v50, %v11444_v50  ;;  %v600_v33 = vsel %vm560_vm1, %v11444_v50, 0.0  ;;  %v803_v20 = vsel %vm560_vm1, %v718_v44, 0.0 }
  0xfe   :  { %v599_v21 = vadd.f32 %v598_v31, %v597_v45  ;;  %v796_v39 = vadd.f32 %v795_v38, %v794_v7  ;;  %v11451_v37 = vpop.f32.mrf.mxu0 }
  0xff   :  { %v799_v46 = vsel %vm560_vm1, %v716_v13, 0.0 }
 0x100   :  { %v601_v49 = vadd.f32 %v600_v33, %v599_v21  ;;  %v798_v2 = vadd.f32 %v797_v28, %v796_v39  ;;  %v11456_v22 = vpop.f32.mrf.mxu0  ;;  %v604_v28 = vsel %vm560_vm1, %v11437_v57, 0.0  ;;  %v719_v21 = vmul.f32 %v11451_v37, %v11451_v37 }
 0x101   :  { %v602_v45 = vsel %vm560_vm1, %v11456_v22, 0.0  ;;  %v717_v38 = vmul.f32 %v11456_v22, %v11456_v22 }
 0x102   :  { %v800_v7 = vadd.f32 %v799_v46, %v798_v2  ;;  %v603_v62 = vadd.f32 %v602_v45, %v601_v49  ;;  %v11465_v31 = vpop.f32.mrf.mxu0  ;;  %v606_v2 = vsel %vm560_vm1, %v11451_v37, 0.0  ;;  %v805_v10 = vsel %vm560_vm1, %v719_v21, 0.0 }
 0x103   :  { %v801_v39 = vsel %vm560_vm1, %v717_v38, 0.0  ;;  %v722_v44 = vmul.f32 %v11465_v31, %v11465_v31 }
 0x104   :  { %v802_v33 = vadd.f32 %v801_v39, %v800_v7  ;;  %v11472_v13 = vpop.f32.mrf.mxu0  ;;  %v605_v27 = vadd.f32 %v604_v28, %v603_v62 }
 0x105   :  { %v720_v49 = vmul.f32 %v11472_v13, %v11472_v13  ;;  %v608_v38 = vsel %vm560_vm1, %v11472_v13, 0.0  ;;  %v811_v3 = vsel %vm560_vm1, %v722_v44, 0.0 }
 0x106   :  { %v607_v46 = vadd.f32 %v606_v2, %v605_v27  ;;  %v804_v45 = vadd.f32 %v803_v20, %v802_v33  ;;  %v11479_v19 = vpop.f32.mrf.mxu0 }
 0x107   :  { %v807_v28 = vsel %vm560_vm1, %v720_v49, 0.0 }
 0x108   :  { %v609_v7 = vadd.f32 %v608_v38, %v607_v46  ;;  %v806_v39 = vadd.f32 %v805_v10, %v804_v45  ;;  %v11484_v62 = vpop.f32.mrf.mxu0  ;;  %v612_v10 = vsel %vm560_vm1, %v11465_v31, 0.0  ;;  %v723_v46 = vmul.f32 %v11479_v19, %v11479_v19 }
 0x109   :  { %v610_v27 = vsel %vm560_vm1, %v11484_v62, 0.0  ;;  %v721_v20 = vmul.f32 %v11484_v62, %v11484_v62 }
 0x10a   :  { %v808_v33 = vadd.f32 %v807_v28, %v806_v39  ;;  %v611_v21 = vadd.f32 %v610_v27, %v609_v7  ;;  %v11493_v2 = vpop.f32.mrf.mxu0  ;;  %v614_v39 = vsel %vm560_vm1, %v11479_v19, 0.0  ;;  %v813_v60 = vsel %vm560_vm1, %v723_v46, 0.0 }
 0x10b   :  { %v809_v45 = vsel %vm560_vm1, %v721_v20, 0.0  ;;  %v726_v44 = vmul.f32 %v11493_v2, %v11493_v2 }
 0x10c   :  { %v810_v38 = vadd.f32 %v809_v45, %v808_v33  ;;  %v11500_v49 = vpop.f32.mrf.mxu0  ;;  %v613_v9 = vadd.f32 %v612_v10, %v611_v21 }
 0x10d   :  { %v724_v7 = vmul.f32 %v11500_v49, %v11500_v49  ;;  %v616_v20 = vsel %vm560_vm1, %v11500_v49, 0.0  ;;  %v819_v54 = vsel %vm560_vm1, %v726_v44, 0.0 }
 0x10e   :  { %v615_v28 = vadd.f32 %v614_v39, %v613_v9  ;;  %v812_v27 = vadd.f32 %v811_v3, %v810_v38  ;;  %v11507_v1 = vpop.f32.mrf.mxu0 }
 0x10f   :  { %v815_v10 = vsel %vm560_vm1, %v724_v7, 0.0 }
 0x110   :  { %v617_v33 = vadd.f32 %v616_v20, %v615_v28  ;;  %v814_v45 = vadd.f32 %v813_v60, %v812_v27  ;;  %v11512_v21 = vpop.f32.mrf.mxu0  ;;  %v620_v60 = vsel %vm560_vm1, %v11493_v2, 0.0  ;;  %v727_v28 = vmul.f32 %v11507_v1, %v11507_v1 }
 0x111   :  { %v618_v9 = vsel %vm560_vm1, %v11512_v21, 0.0  ;;  %v725_v3 = vmul.f32 %v11512_v21, %v11512_v21 }
 0x112   :  { %v816_v38 = vadd.f32 %v815_v10, %v814_v45  ;;  %v619_v46 = vadd.f32 %v618_v9, %v617_v33  ;;  %v11521_v39 = vpop.f32.mrf.mxu0  ;;  %v622_v45 = vsel %vm560_vm1, %v11507_v1, 0.0  ;;  %v821_v48 = vsel %vm560_vm1, %v727_v28, 0.0 }
 0x113   :  { %19585 = vst [vmem:[#allocation38_spill] sm:$0xff] %v11521_v39  ;;  %v817_v27 = vsel %vm560_vm1, %v725_v3, 0.0  ;;  %v730_v44 = vmul.f32 %v11521_v39, %v11521_v39 }
 0x114   :  { %v818_v20 = vadd.f32 %v817_v27, %v816_v38  ;;  %v11528_v7 = vpop.f32.mrf.mxu0  ;;  %v621_v59 = vadd.f32 %v620_v60, %v619_v46 }
 0x115   :  { %v728_v33 = vmul.f32 %v11528_v7, %v11528_v7  ;;  %v624_v3 = vsel %vm560_vm1, %v11528_v7, 0.0  ;;  %v827_v42 = vsel %vm560_vm1, %v730_v44, 0.0 }
 0x116   :  { %v623_v10 = vadd.f32 %v622_v45, %v621_v59  ;;  %v820_v9 = vadd.f32 %v819_v54, %v818_v20  ;;  %v11535_v53 = vpop.f32.mrf.mxu0 }
 0x117   :  { %19586 = vst [vmem:[#allocation39_spill] sm:$0xff] %v11535_v53  ;;  %v823_v60 = vsel %vm560_vm1, %v728_v33, 0.0 }
 0x118   :  { %v625_v38 = vadd.f32 %v624_v3, %v623_v10  ;;  %v822_v27 = vadd.f32 %v821_v48, %v820_v9  ;;  %v11540_v46 = vpop.f32.mrf.mxu0  ;;  %v628_v48 = vsel %vm560_vm1, %v11521_v39, 0.0  ;;  %v731_v10 = vmul.f32 %v11535_v53, %v11535_v53 }
 0x119   :  { %v626_v59 = vsel %vm560_vm1, %v11540_v46, 0.0  ;;  %v729_v54 = vmul.f32 %v11540_v46, %v11540_v46 }
 0x11a   :  { %v824_v20 = vadd.f32 %v823_v60, %v822_v27  ;;  %v627_v28 = vadd.f32 %v626_v59, %v625_v38  ;;  %v11549_v45 = vpop.f32.mrf.mxu0  ;;  %v630_v27 = vsel %vm560_vm1, %v11535_v53, 0.0  ;;  %v829_v36 = vsel %vm560_vm1, %v731_v10, 0.0 }
 0x11b   :  { %19587 = vst [vmem:[#allocation40_spill] sm:$0xff] %v11549_v45  ;;  %v825_v9 = vsel %vm560_vm1, %v729_v54, 0.0  ;;  %v734_v44 = vmul.f32 %v11549_v45, %v11549_v45 }
 0x11c   :  { %v826_v3 = vadd.f32 %v825_v9, %v824_v20  ;;  %v11556_v33 = vpop.f32.mrf.mxu0  ;;  %v629_v47 = vadd.f32 %v628_v48, %v627_v28 }
 0x11d   :  { %19588 = vst [vmem:[#allocation41_spill] sm:$0xff] %v11556_v33  ;;  %v732_v38 = vmul.f32 %v11556_v33, %v11556_v33  ;;  %v632_v54 = vsel %vm560_vm1, %v11556_v33, 0.0  ;;  %v835_v30 = vsel %vm560_vm1, %v734_v44, 0.0 }
 0x11e   :  { %v631_v60 = vadd.f32 %v630_v27, %v629_v47  ;;  %v828_v59 = vadd.f32 %v827_v42, %v826_v3  ;;  %v11563_v41 = vpop.f32.mrf.mxu0 }
 0x11f   :  { %19589 = vst [vmem:[#allocation42_spill] sm:$0xff] %v11563_v41  ;;  %v831_v48 = vsel %vm560_vm1, %v732_v38, 0.0 }
 0x120   :  { %v633_v20 = vadd.f32 %v632_v54, %v631_v60  ;;  %v830_v9 = vadd.f32 %v829_v36, %v828_v59  ;;  %v11568_v28 = vpop.f32.mrf.mxu0  ;;  %v636_v36 = vsel %vm560_vm1, %v11549_v45, 0.0  ;;  %v735_v60 = vmul.f32 %v11563_v41, %v11563_v41 }
 0x121   :  { %19590 = vst [vmem:[#allocation43_spill] sm:$0xff] %v11568_v28  ;;  %v634_v47 = vsel %vm560_vm1, %v11568_v28, 0.0  ;;  %v733_v42 = vmul.f32 %v11568_v28, %v11568_v28 }
 0x122   :  { %v832_v3 = vadd.f32 %v831_v48, %v830_v9  ;;  %v635_v10 = vadd.f32 %v634_v47, %v633_v20  ;;  %v11577_v27 = vpop.f32.mrf.mxu0  ;;  %v638_v9 = vsel %vm560_vm1, %v11563_v41, 0.0  ;;  %v837_v24 = vsel %vm560_vm1, %v735_v60, 0.0 }
 0x123   :  { %19591 = vst [vmem:[#allocation44_spill] sm:$0xff] %v11577_v27  ;;  %v833_v59 = vsel %vm560_vm1, %v733_v42, 0.0  ;;  %v738_v44 = vmul.f32 %v11577_v27, %v11577_v27 }
 0x124   :  { %v834_v54 = vadd.f32 %v833_v59, %v832_v3  ;;  %v11584_v38 = vpop.f32.mrf.mxu0  ;;  %v637_v35 = vadd.f32 %v636_v36, %v635_v10 }
 0x125   :  { %19592 = vst [vmem:[#allocation45_spill] sm:$0xff] %v11584_v38  ;;  %v736_v20 = vmul.f32 %v11584_v38, %v11584_v38  ;;  %v640_v42 = vsel %vm560_vm1, %v11584_v38, 0.0  ;;  %v843_v18 = vsel %vm560_vm1, %v738_v44, 0.0  ;;  %v2403_v38 = vld [vmem:[#allocation2 + $0xa] sm:$0xff] }
 0x126   :  { %v639_v48 = vadd.f32 %v638_v9, %v637_v35  ;;  %v836_v47 = vadd.f32 %v835_v30, %v834_v54  ;;  %v11591_v29 = vpop.f32.mrf.mxu0 }
 0x127   :  { %19593 = vst [vmem:[#allocation46_spill] sm:$0xff] %v11591_v29  ;;  %v839_v36 = vsel %vm560_vm1, %v736_v20, 0.0 }
 0x128   :  { %v641_v3 = vadd.f32 %v640_v42, %v639_v48  ;;  %v838_v59 = vadd.f32 %v837_v24, %v836_v47  ;;  %v11596_v10 = vpop.f32.mrf.mxu0  ;;  %v644_v24 = vsel %vm560_vm1, %v11577_v27, 0.0  ;;  %v739_v48 = vmul.f32 %v11591_v29, %v11591_v29 }
 0x129   :  { %19594 = vst [vmem:[#allocation47_spill] sm:$0xff] %v11596_v10  ;;  %v642_v35 = vsel %vm560_vm1, %v11596_v10, 0.0  ;;  %v737_v30 = vmul.f32 %v11596_v10, %v11596_v10  ;;  %v2402_v10 = vld [vmem:[#allocation2 + $0x2] sm:$0xff] }
 0x12a   :  { %v840_v54 = vadd.f32 %v839_v36, %v838_v59  ;;  %v643_v60 = vadd.f32 %v642_v35, %v641_v3  ;;  %v11605_v9 = vpop.f32.mrf.mxu0  ;;  %v646_v59 = vsel %vm560_vm1, %v11591_v29, 0.0  ;;  %v845_v12 = vsel %vm560_vm1, %v739_v48, 0.0 }
 0x12b   :  { %19595 = vst [vmem:[#allocation48_spill] sm:$0xff] %v11605_v9  ;;  %v841_v47 = vsel %vm560_vm1, %v737_v30, 0.0  ;;  %v742_v44 = vmul.f32 %v11605_v9, %v11605_v9 }
 0x12c   :  { %v842_v42 = vadd.f32 %v841_v47, %v840_v54  ;;  %v11612_v20 = vpop.f32.mrf.mxu0  ;;  %v645_v23 = vadd.f32 %v644_v24, %v643_v60 }
 0x12d   :  { %19596 = vst [vmem:[#allocation49_spill] sm:$0xff] %v11612_v20  ;;  %v740_v3 = vmul.f32 %v11612_v20, %v11612_v20  ;;  %v648_v30 = vsel %vm560_vm1, %v11612_v20, 0.0  ;;  %v851_v5 = vsel %vm560_vm1, %v742_v44, 0.0 }
 0x12e   :  { %v647_v36 = vadd.f32 %v646_v59, %v645_v23  ;;  %v844_v35 = vadd.f32 %v843_v18, %v842_v42  ;;  %v11619_v17 = vpop.f32.mrf.mxu0 }
 0x12f   :  { %19597 = vst [vmem:[#allocation50_spill] sm:$0xff] %v11619_v17  ;;  %v847_v24 = vsel %vm560_vm1, %v740_v3, 0.0 }
 0x130   :  { %v649_v54 = vadd.f32 %v648_v30, %v647_v36  ;;  %v846_v47 = vadd.f32 %v845_v12, %v844_v35  ;;  %v11624_v60 = vpop.f32.mrf.mxu0  ;;  %v652_v12 = vsel %vm560_vm1, %v11605_v9, 0.0  ;;  %v743_v36 = vmul.f32 %v11619_v17, %v11619_v17 }
 0x131   :  { %19598 = vst [vmem:[#allocation51_spill] sm:$0xff] %v11624_v60  ;;  %v650_v23 = vsel %vm560_vm1, %v11624_v60, 0.0  ;;  %v741_v18 = vmul.f32 %v11624_v60, %v11624_v60 }
 0x132   :  { %v848_v42 = vadd.f32 %v847_v24, %v846_v47  ;;  %v651_v48 = vadd.f32 %v650_v23, %v649_v54  ;;  %v11633_v59 = vpop.f32.mrf.mxu0  ;;  %v654_v47 = vsel %vm560_vm1, %v11619_v17, 0.0  ;;  %v853_v60 = vsel %vm560_vm1, %v743_v36, 0.0 }
 0x133   :  { %19599 = vst [vmem:[#allocation52_spill] sm:$0xff] %v11633_v59  ;;  %v849_v35 = vsel %vm560_vm1, %v741_v18, 0.0  ;;  %v746_v44 = vmul.f32 %v11633_v59, %v11633_v59 }
 0x134   :  { %v850_v30 = vadd.f32 %v849_v35, %v848_v42  ;;  %v11640_v3 = vpop.f32.mrf.mxu0  ;;  %v653_v11 = vadd.f32 %v652_v12, %v651_v48 }
 0x135   :  { %19600 = vst [vmem:[#allocation53_spill] sm:$0xff] %v11640_v3  ;;  %v744_v54 = vmul.f32 %v11640_v3, %v11640_v3  ;;  %v656_v18 = vsel %vm560_vm1, %v11640_v3, 0.0  ;;  %v859_v20 = vsel %vm560_vm1, %v746_v44, 0.0 }
 0x136   :  { %v655_v24 = vadd.f32 %v654_v47, %v653_v11  ;;  %v852_v23 = vadd.f32 %v851_v5, %v850_v30  ;;  %v11647_v9 = vpop.f32.mrf.mxu0 }
 0x137   :  { %19601 = vst [vmem:[#allocation54_spill] sm:$0xff] %v11647_v9  ;;  %v855_v12 = vsel %vm560_vm1, %v744_v54, 0.0 }
 0x138   :  { %v657_v42 = vadd.f32 %v656_v18, %v655_v24  ;;  %v854_v35 = vadd.f32 %v853_v60, %v852_v23  ;;  %v11652_v48 = vpop.f32.mrf.mxu0  ;;  %v660_v60 = vsel %vm560_vm1, %v11633_v59, 0.0  ;;  %v747_v24 = vmul.f32 %v11647_v9, %v11647_v9  ;;  %v1508_v59 = vld [vmem:[#allocation2 + $0x9] sm:$0xff] }
 0x139   :  { %19602 = vst [vmem:[#allocation55_spill] sm:$0xff] %v11652_v48  ;;  %v658_v11 = vsel %vm560_vm1, %v11652_v48, 0.0  ;;  %v745_v5 = vmul.f32 %v11652_v48, %v11652_v48 }
 0x13a   :  { %v856_v30 = vadd.f32 %v855_v12, %v854_v35  ;;  %v659_v36 = vadd.f32 %v658_v11, %v657_v42  ;;  %v11661_v47 = vpop.f32.mrf.mxu0  ;;  %v662_v35 = vsel %vm560_vm1, %v11647_v9, 0.0  ;;  %v10624_v12 = vld [vmem:[%s19283_s4 + $0x18] sm:$0xff]   ;;  %v10625_v11 = vld [vmem:[%s19283_s4 + $0x28] sm:$0xff]   ;;  %v861_v48 = vsel %vm560_vm1, %v747_v24, 0.0 }
 0x13b   :  { %19603 = vst [vmem:[#allocation56_spill] sm:$0xff] %v11661_v47  ;;  %v857_v23 = vsel %vm560_vm1, %v745_v5, 0.0  ;;  %v10626_v5 = vld [vmem:[%s19283_s4 + $0x10] sm:$0xff]   ;;  %9864 = vmatprep.subr.bf16.mxu1 %v10624_v12  ;;  %10000 = vmatprep.subr.bf16.mxu0 %v10625_v11  ;;  %v750_v41 = vmul.f32 %v11661_v47, %v11661_v47 }
 0x13c   :  { %v858_v18 = vadd.f32 %v857_v23, %v856_v30  ;;  %v11668_v54 = vpop.f32.mrf.mxu0  ;;  %v661_v17 = vadd.f32 %v660_v60, %v659_v36  ;;  %v10627_v60 = vld [vmem:[%s19283_s4 + $0x20] sm:$0xff]   ;;  %9865 = vmatpush3.bf16.msra.mxu1 %v10624_v12  ;;  %10001 = vmatpush3.bf16.msra.mxu0 %v10625_v11 }
 0x13d   :  { %19604 = vst [vmem:[#allocation57_spill] sm:$0xff] %v11668_v54  ;;  %v748_v42 = vmul.f32 %v11668_v54, %v11668_v54  ;;  %v1507_v23 = vld [vmem:[#allocation2 + $0x1] sm:$0xff]  ;;  %v664_v29 = vsel %vm560_vm1, %v11668_v54, 0.0  ;;  %9866 = vmatprep.subr.bf16.mxu1 %v10626_v5  ;;  %10002 = vmatprep.subr.bf16.mxu0 %v10627_v60 }
 0x13e   :  { %v663_v30 = vadd.f32 %v662_v35, %v661_v17  ;;  %v860_v44 = vadd.f32 %v859_v20, %v858_v18  ;;  %v11684_v36 = vpop.f32.mrf.mxu0  ;;  %v1571_v27 = vpack.c.bf16 %v1508_v59, %v1507_v23  ;;  %v2466_v35 = vpack.c.bf16 %v2403_v38, %v2402_v10 }
 0x13f   :  { %19605 = vst [vmem:[#allocation58_spill] sm:$0xff] %v11684_v36  ;;  %v863_v24 = vsel %vm560_vm1, %v748_v42, 0.0  ;;  %v668_v42 = vsel %vm560_vm1, %v11661_v47, 0.0  ;;  %v751_v12 = vmul.f32 %v11684_v36, %v11684_v36 }
 0x140   :  { %v665_v17 = vadd.f32 %v664_v29, %v663_v30  ;;  %v862_v20 = vadd.f32 %v861_v48, %v860_v44  ;;  %v11692_v18 = vpop.f32.mrf.mxu0  ;;  %v11704_v29 = vld [vmem:[%s19283_s4 + $0x8] sm:$0xff]   ;;  %9868 = vmatprep.mubr.msk.bf16.mxu1 %vm560_vm1, %v1571_v27  ;;  %10004 = vmatprep.mubr.msk.bf16.mxu0 %vm560_vm1, %v2466_v35  ;;  %v670_v27 = vsel %vm560_vm1, %v11684_v36, 0.0 }
 0x141   :  { %19606 = vst [vmem:[#allocation59_spill] sm:$0xff] %v11692_v18  ;;  %v666_v45 = vsel %vm560_vm1, %v11692_v18, 0.0  ;;  %v749_v59 = vmul.f32 %v11692_v18, %v11692_v18  ;;  %19607 = vst [vmem:[#allocation60_spill] sm:$0xff] %v11704_v29  ;;  %9867 = vmatpush3.bf16.msra.mxu1 %v10626_v5  ;;  %10003 = vmatpush3.bf16.msra.mxu0 %v10627_v60 }
 0x142   :  { %v864_v48 = vadd.f32 %v863_v24, %v862_v20  ;;  %v667_v38 = vadd.f32 %v666_v45, %v665_v17  ;;  %v11706_v10 = vpop.f32.mrf.mxu0  ;;  %v867_v45 = vsel %vm560_vm1, %v750_v41, 0.0  ;;  %9932 = vmatprep.subr.bf16.mxu1 %v11704_v29 }
 0x143   :  { %19608 = vst [vmem:[#allocation61_spill] sm:$0xff] %v11706_v10  ;;  %v865_v11 = vsel %vm560_vm1, %v749_v59, 0.0  ;;  %v869_v59 = vsel %vm560_vm1, %v751_v12, 0.0 }
 0x144   :  { %v866_v30 = vadd.f32 %v865_v11, %v864_v48  ;;  %v11715_v44 = vpop.f32.mrf.mxu0  ;;  %v669_v23 = vadd.f32 %v668_v42, %v667_v38  ;;  %v754_v38 = vmul.f32 %v11706_v10, %v11706_v10 }
 0x145   :  { %19609 = vst [vmem:[#allocation62_spill] sm:$0xff] %v11715_v44  ;;  %v752_v17 = vmul.f32 %v11715_v44, %v11715_v44  ;;  %v672_v5 = vsel %vm560_vm1, %v11715_v44, 0.0 }
 0x146   :  { %v671_v20 = vadd.f32 %v670_v27, %v669_v23  ;;  %v868_v35 = vadd.f32 %v867_v45, %v866_v30  ;;  %v11723_v24 = vpop.f32.mrf.mxu0  ;;  %v676_v27 = vsel %vm560_vm1, %v11706_v10, 0.0  ;;  %v875_v29 = vsel %vm560_vm1, %v754_v38, 0.0 }
 0x147   :  { %19610 = vst [vmem:[#allocation63_spill] sm:$0xff] %v11723_v24  ;;  %v871_v42 = vsel %vm560_vm1, %v752_v17, 0.0 }
 0x148   :  { %v673_v60 = vadd.f32 %v672_v5, %v671_v20  ;;  %v870_v48 = vadd.f32 %v869_v59, %v868_v35  ;;  %v11728_v41 = vpop.f32.mrf.mxu0  ;;  %v755_v20 = vmul.f32 %v11723_v24, %v11723_v24 }
 0x149   :  { %19611 = vst [vmem:[#allocation64_spill] sm:$0xff] %v11728_v41  ;;  %v674_v11 = vsel %vm560_vm1, %v11728_v41, 0.0  ;;  %v753_v30 = vmul.f32 %v11728_v41, %v11728_v41 }
 0x14a   :  { %v872_v23 = vadd.f32 %v871_v42, %v870_v48  ;;  %v675_v12 = vadd.f32 %v674_v11, %v673_v60  ;;  %v11737_v45 = vpop.f32.mrf.mxu0  ;;  %v678_v48 = vsel %vm560_vm1, %v11723_v24, 0.0  ;;  %v877_v18 = vsel %vm560_vm1, %v755_v20, 0.0 }
 0x14b   :  { %19612 = vst [vmem:[#allocation65_spill] sm:$0xff] %v11737_v45  ;;  %v873_v35 = vsel %vm560_vm1, %v753_v30, 0.0  ;;  %v758_v38 = vmul.f32 %v11737_v45, %v11737_v45 }
 0x14c   :  { %v874_v59 = vadd.f32 %v873_v35, %v872_v23  ;;  %v11744_v17 = vpop.f32.mrf.mxu0  ;;  %v677_v5 = vadd.f32 %v676_v27, %v675_v12 }
 0x14d   :  { %19613 = vst [vmem:[#allocation66_spill] sm:$0xff] %v11744_v17  ;;  %v756_v60 = vmul.f32 %v11744_v17, %v11744_v17  ;;  %v680_v30 = vsel %vm560_vm1, %v11744_v17, 0.0 }
 0x14e   :  { %v679_v42 = vadd.f32 %v678_v48, %v677_v5  ;;  %v876_v11 = vadd.f32 %v875_v29, %v874_v59  ;;  %v11751_v41 = vpop.f32.mrf.mxu0  ;;  %v684_v48 = vsel %vm560_vm1, %v11737_v45, 0.0 }
 0x14f   :  { %19614 = vst [vmem:[#allocation67_spill] sm:$0xff] %v11751_v41  ;;  %v879_v27 = vsel %vm560_vm1, %v756_v60, 0.0  ;;  %v883_v60 = vsel %vm560_vm1, %v758_v38, 0.0  ;;  %v686_v28 = vsel %vm560_vm1, %v11751_v41, 0.0 }
 0x150   :  { %v681_v23 = vadd.f32 %v680_v30, %v679_v42  ;;  %v878_v35 = vadd.f32 %v877_v18, %v876_v11  ;;  %v11756_v12 = vpop.f32.mrf.mxu0  ;;  %v759_v18 = vmul.f32 %v11751_v41, %v11751_v41 }
 0x151   :  { %v682_v5 = vsel %vm560_vm1, %v11756_v12, 0.0  ;;  %v757_v29 = vmul.f32 %v11756_v12, %v11756_v12 }
 0x152   :  { %v880_v59 = vadd.f32 %v879_v27, %v878_v35  ;;  %v683_v20 = vadd.f32 %v682_v5, %v681_v23  ;;  %v885_v35 = vsel %vm560_vm1, %v759_v18, 0.0 }
 0x153   :  { %v881_v42 = vsel %vm560_vm1, %v757_v29, 0.0 }
 0x154   :  { %v685_v11 = vadd.f32 %v684_v48, %v683_v20  ;;  %v882_v30 = vadd.f32 %v881_v42, %v880_v59 }
 0x156   :  { %v687_v33 = vadd.f32 %v686_v28, %v685_v11  ;;  %v884_v53 = vadd.f32 %v883_v60, %v882_v30  ;;  %v19628_v60 = vld [vmem:[#allocation44_spill] sm:$0xff] }
 0x158   :  { %v688_v23 = vrot.slane %v687_v33, 4  ;;  %v886_v27 = vadd.f32 %v885_v35, %v884_v53  ;;  %v19627_v35 = vld [vmem:[#allocation47_spill] sm:$0xff] }
 0x15a   :  { %v689_v5 = vadd.f32 %v688_v23, %v687_v33  ;;  %v887_v45 = vrot.slane %v886_v27, 4 }
 0x15c   :  { %v690_v39 = vrot.slane %v689_v5, 2  ;;  %v888_v17 = vadd.f32 %v887_v45, %v886_v27 }
 0x15e   :  { %v691_v24 = vadd.f32 %v690_v39, %v689_v5  ;;  %v889_v10 = vrot.slane %v888_v17, 2  ;;  %v19624_v5 = vld [vmem:[#allocation40_spill] sm:$0xff] }
 0x160   :  { %v692_v29 = vrot.slane %v691_v24, 1  ;;  %v890_v20 = vadd.f32 %v889_v10, %v888_v17 }
 0x162   :  { %v693_v59 = vadd.f32 %v692_v29, %v691_v24  ;;  %v891_v48 = vrot.slane %v890_v20, 1  ;;  %v19623_v29 = vld [vmem:[#allocation43_spill] sm:$0xff] }
 0x164   :  { %v11774_v38 = vmul.f32 0.001953125, %v693_v59  ;;  %v892_v42 = vadd.f32 %v891_v48, %v890_v20  ;;  %v19618_v48 = vld [vmem:[#allocation38_spill] sm:$0xff]  ;;  %v19622_v20 = vld [vmem:[#allocation41_spill] sm:$0xff] }
 0x166   :  { %v893_v41 = vmul.f32 0.001953125, %v892_v42  ;;  %v894_v28 = vmul.f32 %v11774_v38, %v11774_v38  ;;  %v931_v27 = vsub.f32 %v19618_v48, %v11774_v38  ;;  %v19619_v42 = vld [vmem:[#allocation39_spill] sm:$0xff]  ;;  %v933_v30 = vsub.f32 %v19622_v20, %v11774_v38  ;;  %v19625_v48 = vld [vmem:[#allocation42_spill] sm:$0xff] }
 0x167   :  { %v932_v23 = vsub.f32 %v19619_v42, %v11774_v38  ;;  %v934_v17 = vsub.f32 %v19623_v29, %v11774_v38  ;;  %v936_v45 = vsub.f32 %v19625_v48, %v11774_v38  ;;  %v19626_v42 = vld [vmem:[#allocation45_spill] sm:$0xff]  ;;  %v938_v10 = vsub.f32 %v19627_v35, %v11774_v38  ;;  %v19629_v20 = vld [vmem:[#allocation46_spill] sm:$0xff]  ;;  %v19632_v48 = vld [vmem:[#allocation48_spill] sm:$0xff] }
 0x168   :  { %v895_v18 = vsub.f32 %v893_v41, %v894_v28  ;;  %v935_v41 = vsub.f32 %v19624_v5, %v11774_v38  ;;  %v937_v24 = vsub.f32 %v19626_v42, %v11774_v38  ;;  %v939_v39 = vsub.f32 %v19628_v60, %v11774_v38  ;;  %v19630_v29 = vld [vmem:[#allocation49_spill] sm:$0xff]  ;;  %v19631_v5 = vld [vmem:[#allocation51_spill] sm:$0xff]  ;;  %v19633_v42 = vld [vmem:[#allocation50_spill] sm:$0xff] }
 0x169   :  { %v940_v53 = vsub.f32 %v19629_v20, %v11774_v38  ;;  %v942_v28 = vsub.f32 %v19631_v5, %v11774_v38  ;;  %v943_v59 = vsub.f32 %v19632_v48, %v11774_v38  ;;  %v11903_v60 = vld [vmem:[%s19281_s2] ss:$0 sm:$0xff]  ;;  %v19634_v35 = vld [vmem:[#allocation55_spill] sm:$0xff]  ;;  %v19637_v48 = vld [vmem:[#allocation64_spill] sm:$0xff]  ;;  %v19639_v9 = vsub.f32 %v11308_v55, %v11774_v38 }
 0x16a   :  { %v896_v11 = vmax.f32 %v895_v18, 0.0  ;;  %v941_v18 = vsub.f32 %v19630_v29, %v11774_v38  ;;  %v946_v20 = vsub.f32 %v19634_v35, %v11774_v38  ;;  %v19635_v29 = vld [vmem:[#allocation52_spill] sm:$0xff]  ;;  %v19636_v5 = vld [vmem:[#allocation59_spill] sm:$0xff]  ;;  %v19640_v35 = vsub.f32 %v11314_v58, %v11774_v38 }
 0x16b   :  { %v947_v44 = vsub.f32 %v19635_v29, %v11774_v38  ;;  %v950_v36 = vsub.f32 %v19636_v5, %v11774_v38  ;;  %v19641_v5 = vsub.f32 %v11306_v52, %v11774_v38  ;;  %v19643_v55 = vsub.f32 %v11310_v56, %v11774_v38 }
 0x16c   :  { %v961_v33 = vadd.f32 1e-05, %v896_v11  ;;  %v19644_v58 = vsub.f32 %v11332_v15, %v11774_v38  ;;  %v19645_v52 = vsub.f32 %v11344_v43, %v11774_v38  ;;  %v19647_v15 = vsub.f32 %v11339_v32, %v11774_v38 }
 0x16d   :  { %v19648_v43 = vsub.f32 %v11360_v8, %v11774_v38 }
 0x16e   :  { %10648 = vrsqrt.f32 %v961_v33  ;;  %v944_v33 = vsub.f32 %v19633_v42, %v11774_v38  ;;  %v19638_v42 = vsub.f32 %v11756_v12, %v11774_v38  ;;  %v11938_v12 = vld [vmem:[%s19282_s3] ss:$0 sm:$0xff] }
 0x16f   :  { %19642 = vst [vmem:[#allocation38_spill] sm:$0xff] %v11938_v12 }
 0x17b   :  { %v11898_v11 = vpop.eup %10648 }
 0x17c   :  { %v1024_v54 = vmul.f32 %v11898_v11, %v19638_v42  ;;  %v11921_v3 = vmul.f32 %v11898_v11, %v19639_v9  ;;  %v11927_v29 = vmul.f32 %v11898_v11, %v19640_v35  ;;  %v11933_v47 = vmul.f32 %v11898_v11, %v19641_v5 }
 0x17d   :  { %v11944_v9 = vmul.f32 %v11898_v11, %v19643_v55  ;;  %v11950_v42 = vmul.f32 %v11898_v11, %v19644_v58  ;;  %v11956_v35 = vmul.f32 %v11898_v11, %v19645_v52  ;;  %v19646_v5 = vsub.f32 %v11324_v4, %v11774_v38 }
 0x17e   :  { %v1095_v55 = vmul.f32 %v11903_v60, %v1024_v54  ;;  %v11969_v58 = vmul.f32 %v11898_v11, %v19647_v15  ;;  %v11975_v52 = vmul.f32 %v11898_v11, %v19648_v43  ;;  %v19649_v4 = vsub.f32 %v11372_v40, %v11774_v38 }
 0x17f   :  { %v11962_v56 = vmul.f32 %v11898_v11, %v19646_v5  ;;  %v19650_v54 = vsub.f32 %v11353_v63, %v11774_v38  ;;  %v19651_v15 = vsub.f32 %v11367_v26, %v11774_v38  ;;  %v19652_v43 = vsub.f32 %v11388_v14, %v11774_v38 }
 0x180   :  { %v11981_v5 = vmul.f32 %v11898_v11, %v19649_v4  ;;  %v19653_v4 = vsub.f32 %v11400_v61, %v11774_v38  ;;  %v19654_v26 = vsub.f32 %v11381_v0, %v11774_v38  ;;  %v19655_v14 = vsub.f32 %v11395_v34, %v11774_v38 }
 0x181   :  { %v11987_v32 = vmul.f32 %v11898_v11, %v19650_v54  ;;  %v11993_v8 = vmul.f32 %v11898_v11, %v19651_v15  ;;  %v11999_v40 = vmul.f32 %v11898_v11, %v19652_v43  ;;  %v1166_v54 = vadd.f32 %v11938_v12, %v1095_v55 }
 0x182   :  { %v12005_v63 = vmul.f32 %v11898_v11, %v19653_v4  ;;  %v12012_v15 = vmul.f32 %v11898_v11, %v19654_v26  ;;  %v12018_v43 = vmul.f32 %v11898_v11, %v19655_v14  ;;  %v19656_v61 = vsub.f32 %v11416_v25, %v11774_v38 }
 0x183   :  { %v19657_v55 = vsub.f32 %v11428_v6, %v11774_v38  ;;  %v19658_v26 = vsub.f32 %v11409_v16, %v11774_v38  ;;  %v19659_v14 = vsub.f32 %v11423_v51, %v11774_v38  ;;  %v19661_v12 = vsub.f32 %v11456_v22, %v11774_v38 }
 0x184   :  { %v12024_v4 = vmul.f32 %v11898_v11, %v19656_v61  ;;  %v19660_v61 = vsub.f32 %v11444_v50, %v11774_v38 }
 0x185   :  { %v12030_v0 = vmul.f32 %v11898_v11, %v19657_v55  ;;  %v12036_v34 = vmul.f32 %v11898_v11, %v19658_v26  ;;  %v12042_v25 = vmul.f32 %v11898_v11, %v19659_v14  ;;  %v1230_v55 = vmax.f32 %v1166_v54, 0.0 }
 0x186   :  { %v12048_v6 = vmul.f32 %v11898_v11, %v19660_v61  ;;  %v12054_v16 = vmul.f32 %v11898_v11, %v19661_v12  ;;  %v19662_v26 = vsub.f32 %v11437_v57, %v11774_v38  ;;  %v19663_v14 = vsub.f32 %v11451_v37, %v11774_v38 }
 0x187   :  { %v19664_v54 = vsub.f32 %v11472_v13, %v11774_v38  ;;  %v19665_v12 = vsub.f32 %v11484_v62, %v11774_v38  ;;  %v19666_v61 = vsub.f32 %v11465_v31, %v11774_v38  ;;  %1404 = vst.msk [vmem:[#allocation2 + $0x321] sm:$0xff] %vm560_vm1, %v1230_v55  ;;  %v19668_v62 = vsub.f32 %v11500_v49, %v11774_v38 }
 0x188   :  { %v12060_v51 = vmul.f32 %v11898_v11, %v19662_v26  ;;  %v12066_v50 = vmul.f32 %v11898_v11, %v19663_v14  ;;  %v19667_v26 = vsub.f32 %v11479_v19, %v11774_v38  ;;  %v19669_v31 = vsub.f32 %v11512_v21, %v11774_v38 }
 0x189   :  { %v12072_v22 = vmul.f32 %v11898_v11, %v19664_v54  ;;  %v12078_v57 = vmul.f32 %v11898_v11, %v19665_v12  ;;  %v12084_v37 = vmul.f32 %v11898_v11, %v19666_v61  ;;  %v12097_v14 = vmul.f32 %v11898_v11, %v19668_v62 }
 0x18a   :  { %v12090_v13 = vmul.f32 %v11898_v11, %v19667_v26  ;;  %v12103_v54 = vmul.f32 %v11898_v11, %v19669_v31  ;;  %v19670_v19 = vsub.f32 %v11493_v2, %v11774_v38  ;;  %v19671_v55 = vsub.f32 %v11507_v1, %v11774_v38 }
 0x18b   :  { %v19672_v61 = vsub.f32 %v11528_v7, %v11774_v38  ;;  %v19673_v26 = vsub.f32 %v11540_v46, %v11774_v38  ;;  %v12130_v62 = vmul.f32 %v11898_v11, %v931_v27  ;;  %v12133_v1 = vmul.f32 %v11898_v11, %v932_v23 }
 0x18c   :  { %v12109_v12 = vmul.f32 %v11898_v11, %v19670_v19  ;;  %v12115_v49 = vmul.f32 %v11898_v11, %v19671_v55  ;;  %v12136_v31 = vmul.f32 %v11898_v11, %v933_v30  ;;  %v12139_v7 = vmul.f32 %v11898_v11, %v934_v17 }
 0x18d   :  { %v12121_v21 = vmul.f32 %v11898_v11, %v19672_v61  ;;  %v12127_v2 = vmul.f32 %v11898_v11, %v19673_v26  ;;  %v12142_v19 = vmul.f32 %v11898_v11, %v935_v41  ;;  %v12145_v46 = vmul.f32 %v11898_v11, %v936_v45 }
 0x18e   :  { %v12148_v55 = vmul.f32 %v11898_v11, %v937_v24  ;;  %v12151_v27 = vmul.f32 %v11898_v11, %v938_v10  ;;  %v12154_v23 = vmul.f32 %v11898_v11, %v939_v39  ;;  %v12157_v30 = vmul.f32 %v11898_v11, %v940_v53  ;;  %v19675_v10 = vld [vmem:[#allocation53_spill] sm:$0xff] }
 0x18f   :  { %v12160_v17 = vmul.f32 %v11898_v11, %v941_v18  ;;  %v12163_v41 = vmul.f32 %v11898_v11, %v942_v28  ;;  %v12166_v45 = vmul.f32 %v11898_v11, %v943_v59  ;;  %v12169_v24 = vmul.f32 %v11898_v11, %v944_v33  ;;  %v19679_v28 = vld [vmem:[#allocation54_spill] sm:$0xff]  ;;  %v19682_v33 = vld [vmem:[#allocation57_spill] sm:$0xff] }
 0x190   :  { %v19676_v61 = vsub.f32 %v19675_v10, %v11774_v38  ;;  %v12178_v53 = vmul.f32 %v11898_v11, %v946_v20  ;;  %v12181_v18 = vmul.f32 %v11898_v11, %v947_v44  ;;  %v19680_v26 = vsub.f32 %v19679_v28, %v11774_v38  ;;  %v19684_v20 = vld [vmem:[#allocation56_spill] sm:$0xff] }
 0x191   :  { %19674 = vst [vmem:[#allocation39_spill] sm:$0xff] %v12169_v24  ;;  %v19683_v24 = vsub.f32 %v19682_v33, %v11774_v38 }
 0x192   :  { %v12175_v39 = vmul.f32 %v11898_v11, %v19676_v61  ;;  %19677 = vst [vmem:[#allocation41_spill] sm:$0xff] %v12178_v53  ;;  %19678 = vst [vmem:[#allocation43_spill] sm:$0xff] %v12181_v18  ;;  %v12187_v59 = vmul.f32 %v11898_v11, %v19680_v26  ;;  %v12196_v61 = vmul.f32 %v11898_v11, %v950_v36  ;;  %v19687_v18 = vld [vmem:[#allocation58_spill] sm:$0xff] }
 0x193   :  { %v12193_v10 = vmul.f32 %v11898_v11, %v19683_v24  ;;  %v19685_v53 = vsub.f32 %v19684_v20, %v11774_v38  ;;  %v19688_v28 = vsub.f32 %v19687_v18, %v11774_v38  ;;  %v19693_v36 = vsub.f32 %v19637_v48, %v11774_v38 }
 0x194   :  { %19681 = vst [vmem:[#allocation40_spill] sm:$0xff] %v12187_v59  ;;  %v19690_v59 = vld [vmem:[#allocation62_spill] sm:$0xff] }
 0x195   :  { %v12202_v44 = vmul.f32 %v11898_v11, %v19685_v53  ;;  %v12208_v26 = vmul.f32 %v11898_v11, %v19688_v28  ;;  %v19691_v33 = vsub.f32 %v19690_v59, %v11774_v38  ;;  %v12220_v20 = vmul.f32 %v11898_v11, %v19693_v36  ;;  %v19695_v53 = vld [vmem:[#allocation61_spill] sm:$0xff]  ;;  %v19698_v28 = vld [vmem:[#allocation63_spill] sm:$0xff] }
 0x196   :  { %v19702_v36 = vld [vmem:[#allocation65_spill] sm:$0xff] }
 0x197   :  { %19686 = vst [vmem:[#allocation42_spill] sm:$0xff] %v12202_v44  ;;  %19689 = vst [vmem:[#allocation45_spill] sm:$0xff] %v12208_v26  ;;  %v12214_v24 = vmul.f32 %v11898_v11, %v19691_v33  ;;  %v19696_v44 = vsub.f32 %v19695_v53, %v11774_v38  ;;  %v19699_v26 = vsub.f32 %v19698_v28, %v11774_v38  ;;  %v19700_v33 = vld [vmem:[#allocation66_spill] sm:$0xff] }
 0x198   :  { %19694 = vst [vmem:[#allocation44_spill] sm:$0xff] %v12220_v20  ;;  %v19703_v20 = vsub.f32 %v19702_v36, %v11774_v38 }
 0x199   :  { %19692 = vst [vmem:[#allocation47_spill] sm:$0xff] %v12214_v24  ;;  %v12226_v18 = vmul.f32 %v11898_v11, %v19696_v44  ;;  %v12232_v59 = vmul.f32 %v11898_v11, %v19699_v26  ;;  %v19701_v24 = vsub.f32 %v19700_v33, %v11774_v38  ;;  %v19704_v44 = vld [vmem:[#allocation67_spill] sm:$0xff]  ;;  %v12254_v26 = vmul.f32 %v11903_v60, %v11921_v3 }
 0x19a   :  { %v12244_v53 = vmul.f32 %v11898_v11, %v19703_v20  ;;  %v12262_v33 = vmul.f32 %v11903_v60, %v11933_v47  ;;  %v12266_v20 = vmul.f32 %v11903_v60, %v11944_v9  ;;  %v12274_v3 = vmul.f32 %v11903_v60, %v11956_v35  ;;  %v19710_v36 = vld [vmem:[#allocation43_spill] sm:$0xff] }
 0x19b   :  { %19697 = vst [vmem:[#allocation46_spill] sm:$0xff] %v12226_v18  ;;  %v12238_v48 = vmul.f32 %v11898_v11, %v19701_v24  ;;  %v19705_v18 = vsub.f32 %v19704_v44, %v11774_v38  ;;  %v12258_v24 = vmul.f32 %v11903_v60, %v11927_v29  ;;  %v12270_v38 = vmul.f32 %v11903_v60, %v11950_v42  ;;  %v19712_v44 = vld [vmem:[#allocation40_spill] sm:$0xff] }
 0x19c   :  { %v12282_v47 = vmul.f32 %v11903_v60, %v11969_v58  ;;  %v12286_v29 = vmul.f32 %v11903_v60, %v11975_v52  ;;  %v12290_v9 = vmul.f32 %v11903_v60, %v11981_v5  ;;  %v12294_v42 = vmul.f32 %v11903_v60, %v11987_v32 }
 0x19d   :  { %v12250_v28 = vmul.f32 %v11898_v11, %v19705_v18  ;;  %v12278_v11 = vmul.f32 %v11903_v60, %v11962_v56  ;;  %v12298_v35 = vmul.f32 %v11903_v60, %v11993_v8  ;;  %v12302_v56 = vmul.f32 %v11903_v60, %v11999_v40  ;;  %v19708_v18 = vld [vmem:[#allocation41_spill] sm:$0xff] }
 0x19e   :  { %v12306_v58 = vmul.f32 %v11903_v60, %v12005_v63  ;;  %v12310_v52 = vmul.f32 %v11903_v60, %v12012_v15  ;;  %v12314_v5 = vmul.f32 %v11903_v60, %v12018_v43  ;;  %v12318_v32 = vmul.f32 %v11903_v60, %v12024_v4 }
 0x19f   :  { %v12322_v8 = vmul.f32 %v11903_v60, %v12030_v0  ;;  %v12326_v40 = vmul.f32 %v11903_v60, %v12036_v34  ;;  %v12330_v63 = vmul.f32 %v11903_v60, %v12042_v25  ;;  %v12334_v15 = vmul.f32 %v11903_v60, %v12048_v6 }
 0x1a0   :  { %v12338_v43 = vmul.f32 %v11903_v60, %v12054_v16  ;;  %v12342_v4 = vmul.f32 %v11903_v60, %v12060_v51  ;;  %v12346_v0 = vmul.f32 %v11903_v60, %v12066_v50  ;;  %v12350_v34 = vmul.f32 %v11903_v60, %v12072_v22 }
 0x1a1   :  { %v12354_v25 = vmul.f32 %v11903_v60, %v12078_v57  ;;  %v12358_v6 = vmul.f32 %v11903_v60, %v12084_v37  ;;  %v12362_v16 = vmul.f32 %v11903_v60, %v12090_v13  ;;  %v12366_v51 = vmul.f32 %v11903_v60, %v12097_v14 }
 0x1a2   :  { %v12370_v50 = vmul.f32 %v11903_v60, %v12103_v54  ;;  %v12374_v22 = vmul.f32 %v11903_v60, %v12109_v12  ;;  %v12378_v57 = vmul.f32 %v11903_v60, %v12115_v49  ;;  %v12382_v37 = vmul.f32 %v11903_v60, %v12121_v21 }
 0x1a3   :  { %v12386_v13 = vmul.f32 %v11903_v60, %v12127_v2  ;;  %v12390_v14 = vmul.f32 %v11903_v60, %v12130_v62  ;;  %v12394_v54 = vmul.f32 %v11903_v60, %v12133_v1  ;;  %v12398_v12 = vmul.f32 %v11903_v60, %v12136_v31 }
 0x1a4   :  { %v12402_v49 = vmul.f32 %v11903_v60, %v12139_v7  ;;  %v12406_v21 = vmul.f32 %v11903_v60, %v12142_v19  ;;  %v12410_v2 = vmul.f32 %v11903_v60, %v12145_v46  ;;  %v12414_v62 = vmul.f32 %v11903_v60, %v12148_v55 }
 0x1a5   :  { %v12418_v1 = vmul.f32 %v11903_v60, %v12151_v27  ;;  %v12422_v31 = vmul.f32 %v11903_v60, %v12154_v23  ;;  %v12426_v7 = vmul.f32 %v11903_v60, %v12157_v30  ;;  %v12430_v19 = vmul.f32 %v11903_v60, %v12160_v17  ;;  %v19706_v27 = vld [vmem:[#allocation39_spill] sm:$0xff] }
 0x1a6   :  { %v12434_v46 = vmul.f32 %v11903_v60, %v12163_v41  ;;  %v12438_v55 = vmul.f32 %v11903_v60, %v12166_v45  ;;  %v12442_v23 = vmul.f32 %v11903_v60, %v19706_v27  ;;  %v12446_v30 = vmul.f32 %v11903_v60, %v12175_v39 }
 0x1a7   :  { %v12450_v17 = vmul.f32 %v11903_v60, %v19708_v18  ;;  %v12454_v41 = vmul.f32 %v11903_v60, %v19710_v36  ;;  %v12458_v45 = vmul.f32 %v11903_v60, %v19712_v44  ;;  %v12462_v27 = vmul.f32 %v11903_v60, %v12193_v10 }
 0x1a8   :  { %19707 = vst [vmem:[#allocation49_spill] sm:$0xff] %v12446_v30  ;;  %v12466_v39 = vmul.f32 %v11903_v60, %v12196_v61  ;;  %v19715_v30 = vld [vmem:[#allocation42_spill] sm:$0xff] }
 0x1a9   :  { %19709 = vst [vmem:[#allocation51_spill] sm:$0xff] %v12450_v17  ;;  %19711 = vst [vmem:[#allocation48_spill] sm:$0xff] %v12454_v41  ;;  %v12470_v18 = vmul.f32 %v11903_v60, %v19715_v30  ;;  %v19716_v17 = vld [vmem:[#allocation45_spill] sm:$0xff]  ;;  %v19717_v41 = vld [vmem:[#allocation47_spill] sm:$0xff]  ;;  %v12490_v30 = vmul.f32 %v11903_v60, %v12232_v59 }
 0x1aa   :  { %19713 = vst [vmem:[#allocation50_spill] sm:$0xff] %v12458_v45  ;;  %19714 = vst [vmem:[#allocation55_spill] sm:$0xff] %v12462_v27  ;;  %v12474_v36 = vmul.f32 %v11903_v60, %v19716_v17  ;;  %v12478_v44 = vmul.f32 %v11903_v60, %v19717_v41  ;;  %v19718_v45 = vld [vmem:[#allocation44_spill] sm:$0xff]  ;;  %v19720_v27 = vld [vmem:[#allocation46_spill] sm:$0xff]  ;;  %v12494_v17 = vmul.f32 %v11903_v60, %v12238_v48 }
 0x1ab   :  { %v12482_v10 = vmul.f32 %v11903_v60, %v19718_v45  ;;  %v12486_v61 = vmul.f32 %v11903_v60, %v19720_v27  ;;  %v12498_v41 = vmul.f32 %v11903_v60, %v12244_v53  ;;  %v12502_v45 = vmul.f32 %v11903_v60, %v12250_v28 }
 0x1ad   :  { %19719 = vst [vmem:[#allocation52_spill] sm:$0xff] %v12482_v10  ;;  %v19721_v10 = vld [vmem:[#allocation38_spill] sm:$0xff] }
 0x1ae   :  { %v12506_v27 = vadd.f32 %v19721_v10, %v12254_v26  ;;  %v12510_v59 = vadd.f32 %v19721_v10, %v12258_v24  ;;  %v12514_v48 = vadd.f32 %v19721_v10, %v12262_v33  ;;  %v12518_v53 = vadd.f32 %v19721_v10, %v12266_v20 }
 0x1af   :  { %v12522_v60 = vadd.f32 %v19721_v10, %v12270_v38  ;;  %v12526_v28 = vadd.f32 %v19721_v10, %v12274_v3  ;;  %v12530_v26 = vadd.f32 %v19721_v10, %v12278_v11  ;;  %v12534_v24 = vadd.f32 %v19721_v10, %v12282_v47 }
 0x1b0   :  { %v12538_v33 = vadd.f32 %v19721_v10, %v12286_v29  ;;  %v12542_v20 = vadd.f32 %v19721_v10, %v12290_v9  ;;  %v12546_v38 = vadd.f32 %v19721_v10, %v12294_v42  ;;  %v12550_v3 = vadd.f32 %v19721_v10, %v12298_v35 }
 0x1b1   :  { %v12554_v11 = vadd.f32 %v19721_v10, %v12302_v56  ;;  %v12558_v47 = vadd.f32 %v19721_v10, %v12306_v58  ;;  %v12562_v29 = vadd.f32 %v19721_v10, %v12310_v52  ;;  %v12566_v9 = vadd.f32 %v19721_v10, %v12314_v5 }
 0x1b2   :  { %v12570_v42 = vadd.f32 %v19721_v10, %v12318_v32  ;;  %v12574_v35 = vadd.f32 %v19721_v10, %v12322_v8  ;;  %v12578_v56 = vadd.f32 %v19721_v10, %v12326_v40  ;;  %v12582_v58 = vadd.f32 %v19721_v10, %v12330_v63 }
 0x1b3   :  { %v12586_v52 = vadd.f32 %v19721_v10, %v12334_v15  ;;  %v12590_v5 = vadd.f32 %v19721_v10, %v12338_v43  ;;  %v12594_v32 = vadd.f32 %v19721_v10, %v12342_v4  ;;  %v12598_v8 = vadd.f32 %v19721_v10, %v12346_v0 }
 0x1b4   :  { %v12602_v40 = vadd.f32 %v19721_v10, %v12350_v34  ;;  %v12606_v63 = vadd.f32 %v19721_v10, %v12354_v25  ;;  %v12610_v15 = vadd.f32 %v19721_v10, %v12358_v6  ;;  %v12614_v43 = vadd.f32 %v19721_v10, %v12362_v16 }
 0x1b5   :  { %v12618_v4 = vadd.f32 %v19721_v10, %v12366_v51  ;;  %v12622_v0 = vadd.f32 %v19721_v10, %v12370_v50  ;;  %v12626_v34 = vadd.f32 %v19721_v10, %v12374_v22  ;;  %v12630_v25 = vadd.f32 %v19721_v10, %v12378_v57 }
 0x1b6   :  { %v12634_v6 = vadd.f32 %v19721_v10, %v12382_v37  ;;  %v12638_v16 = vadd.f32 %v19721_v10, %v12386_v13  ;;  %v12642_v51 = vadd.f32 %v19721_v10, %v12390_v14  ;;  %v12646_v50 = vadd.f32 %v19721_v10, %v12394_v54 }
 0x1b7   :  { %v12650_v22 = vadd.f32 %v19721_v10, %v12398_v12  ;;  %v12654_v57 = vadd.f32 %v19721_v10, %v12402_v49  ;;  %v12658_v37 = vadd.f32 %v19721_v10, %v12406_v21  ;;  %v12662_v13 = vadd.f32 %v19721_v10, %v12410_v2 }
 0x1b8   :  { %v12666_v14 = vadd.f32 %v19721_v10, %v12414_v62  ;;  %v12670_v54 = vadd.f32 %v19721_v10, %v12418_v1  ;;  %v12674_v12 = vadd.f32 %v19721_v10, %v12422_v31  ;;  %v12678_v49 = vadd.f32 %v19721_v10, %v12426_v7  ;;  %v19726_v31 = vld [vmem:[#allocation49_spill] sm:$0xff] }
 0x1b9   :  { %v12682_v21 = vadd.f32 %v19721_v10, %v12430_v19  ;;  %v12686_v2 = vadd.f32 %v19721_v10, %v12434_v46  ;;  %v12690_v62 = vadd.f32 %v19721_v10, %v12438_v55  ;;  %v12694_v1 = vadd.f32 %v19721_v10, %v12442_v23 }
 0x1ba   :  { %19722 = vst [vmem:[#allocation59_spill] sm:$0xff] %v12678_v49  ;;  %v12698_v7 = vadd.f32 %v19721_v10, %v19726_v31  ;;  %v19727_v49 = vld [vmem:[#allocation51_spill] sm:$0xff]  ;;  %v12718_v31 = vadd.f32 %v19721_v10, %v12466_v39  ;;  %v12738_v39 = vadd.f32 %v19721_v10, %v12486_v61  ;;  %v1170_v61 = vmax.f32 %v12510_v59, 0.0 }
 0x1bb   :  { %19723 = vst [vmem:[#allocation64_spill] sm:$0xff] %v12682_v21  ;;  %19724 = vst [vmem:[#allocation53_spill] sm:$0xff] %v12686_v2  ;;  %v12702_v19 = vadd.f32 %v19721_v10, %v19727_v49  ;;  %v19728_v21 = vld [vmem:[#allocation48_spill] sm:$0xff]  ;;  %v19729_v2 = vld [vmem:[#allocation50_spill] sm:$0xff]  ;;  %v12722_v49 = vadd.f32 %v19721_v10, %v12470_v18  ;;  %v12742_v18 = vadd.f32 %v19721_v10, %v12490_v30  ;;  %v1172_v30 = vmax.f32 %v12518_v53, 0.0 }
 0x1bc   :  { %19725 = vst [vmem:[#allocation54_spill] sm:$0xff] %v12690_v62  ;;  %v12706_v46 = vadd.f32 %v19721_v10, %v19728_v21  ;;  %v12710_v55 = vadd.f32 %v19721_v10, %v19729_v2  ;;  %v19731_v62 = vld [vmem:[#allocation55_spill] sm:$0xff]  ;;  %v12726_v21 = vadd.f32 %v19721_v10, %v12474_v36  ;;  %v12730_v2 = vadd.f32 %v19721_v10, %v12478_v44 }
 0x1bd   :  { %v12714_v23 = vadd.f32 %v19721_v10, %v19731_v62  ;;  %19734 = vst [vmem:[#allocation58_spill] sm:$0xff] %v12738_v39  ;;  %19735 = vst [vmem:[#allocation62_spill] sm:$0xff] %v12742_v18  ;;  %v12746_v36 = vadd.f32 %v19721_v10, %v12494_v17  ;;  %v12750_v44 = vadd.f32 %v19721_v10, %v12498_v41  ;;  %v1171_v39 = vmax.f32 %v12514_v48, 0.0 }
 0x1be   :  { %19730 = vst [vmem:[#allocation57_spill] sm:$0xff] %v12710_v55  ;;  %v19732_v55 = vld [vmem:[#allocation52_spill] sm:$0xff]  ;;  %v1173_v18 = vmax.f32 %v12522_v60, 0.0  ;;  %v1174_v17 = vmax.f32 %v12526_v28, 0.0  ;;  %v1176_v41 = vmax.f32 %v12534_v24, 0.0  ;;  %1344 = vst.msk [vmem:[#allocation2 + $0x21] sm:$0xff] %vm560_vm1, %v1170_v61 }
 0x1bf   :  { %v12734_v62 = vadd.f32 %v19721_v10, %v19732_v55  ;;  %19736 = vst [vmem:[#allocation61_spill] sm:$0xff] %v12746_v36  ;;  %19737 = vst [vmem:[#allocation63_spill] sm:$0xff] %v12750_v44  ;;  %v12754_v55 = vadd.f32 %v19721_v10, %v12502_v45  ;;  %v1175_v36 = vmax.f32 %v12530_v26, 0.0  ;;  %v1177_v44 = vmax.f32 %v12538_v33, 0.0 }
 0x1c0   :  { %v1178_v10 = vmax.f32 %v12542_v20, 0.0  ;;  %v1179_v45 = vmax.f32 %v12546_v38, 0.0  ;;  %1345 = vst.msk [vmem:[#allocation2 + $0x31] sm:$0xff] %vm560_vm1, %v1171_v39  ;;  %v1181_v59 = vmax.f32 %v12554_v11, 0.0  ;;  %v1182_v48 = vmax.f32 %v12558_v47, 0.0  ;;  %1346 = vst.msk [vmem:[#allocation2 + $0x39] sm:$0xff] %vm560_vm1, %v1172_v30 }
 0x1c1   :  { %19733 = vst [vmem:[#allocation56_spill] sm:$0xff] %v12734_v62  ;;  %v1169_v62 = vmax.f32 %v12506_v27, 0.0  ;;  %v1180_v27 = vmax.f32 %v12550_v3, 0.0  ;;  %v1183_v53 = vmax.f32 %v12562_v29, 0.0  ;;  %1347 = vst.msk [vmem:[#allocation2 + $0x49] sm:$0xff] %vm560_vm1, %v1173_v18  ;;  %v1184_v60 = vmax.f32 %v12566_v9, 0.0 }
 0x1c2   :  { %1348 = vst.msk [vmem:[#allocation2 + $0x51] sm:$0xff] %vm560_vm1, %v1174_v17  ;;  %1349 = vst.msk [vmem:[#allocation2 + $0x61] sm:$0xff] %vm560_vm1, %v1175_v36  ;;  %v1185_v28 = vmax.f32 %v12570_v42, 0.0  ;;  %v1186_v26 = vmax.f32 %v12574_v35, 0.0  ;;  %v1187_v24 = vmax.f32 %v12578_v56, 0.0  ;;  %v1188_v33 = vmax.f32 %v12582_v58, 0.0 }
 0x1c3   :  { %1343 = vst.msk [vmem:[#allocation2 + $0x19] sm:$0xff] %vm560_vm1, %v1169_v62  ;;  %1350 = vst.msk [vmem:[#allocation2 + $0x69] sm:$0xff] %vm560_vm1, %v1176_v41  ;;  %v1189_v20 = vmax.f32 %v12586_v52, 0.0  ;;  %v1190_v38 = vmax.f32 %v12590_v5, 0.0  ;;  %v1191_v3 = vmax.f32 %v12594_v32, 0.0  ;;  %v1192_v11 = vmax.f32 %v12598_v8, 0.0 }
 0x1c4   :  { %1351 = vst.msk [vmem:[#allocation2 + $0x79] sm:$0xff] %vm560_vm1, %v1177_v44  ;;  %1352 = vst.msk [vmem:[#allocation2 + $0x81] sm:$0xff] %vm560_vm1, %v1178_v10  ;;  %v1193_v47 = vmax.f32 %v12602_v40, 0.0  ;;  %v1194_v29 = vmax.f32 %v12606_v63, 0.0  ;;  %v1195_v9 = vmax.f32 %v12610_v15, 0.0  ;;  %v1196_v42 = vmax.f32 %v12614_v43, 0.0 }
 0x1c5   :  { %1353 = vst.msk [vmem:[#allocation2 + $0x91] sm:$0xff] %vm560_vm1, %v1179_v45  ;;  %1354 = vst.msk [vmem:[#allocation2 + $0x99] sm:$0xff] %vm560_vm1, %v1180_v27  ;;  %v1197_v35 = vmax.f32 %v12618_v4, 0.0  ;;  %v1198_v56 = vmax.f32 %v12622_v0, 0.0  ;;  %v1199_v58 = vmax.f32 %v12626_v34, 0.0  ;;  %v1200_v52 = vmax.f32 %v12630_v25, 0.0 }
 0x1c6   :  { %1355 = vst.msk [vmem:[#allocation2 + $0xa9] sm:$0xff] %vm560_vm1, %v1181_v59  ;;  %1356 = vst.msk [vmem:[#allocation2 + $0xb1] sm:$0xff] %vm560_vm1, %v1182_v48  ;;  %v1201_v5 = vmax.f32 %v12634_v6, 0.0  ;;  %v1202_v32 = vmax.f32 %v12638_v16, 0.0  ;;  %v1203_v8 = vmax.f32 %v12642_v51, 0.0  ;;  %v1204_v40 = vmax.f32 %v12646_v50, 0.0 }
 0x1c7   :  { %1357 = vst.msk [vmem:[#allocation2 + $0xc1] sm:$0xff] %vm560_vm1, %v1183_v53  ;;  %1358 = vst.msk [vmem:[#allocation2 + $0xc9] sm:$0xff] %vm560_vm1, %v1184_v60  ;;  %v1205_v63 = vmax.f32 %v12650_v22, 0.0  ;;  %v1206_v15 = vmax.f32 %v12654_v57, 0.0  ;;  %v1207_v43 = vmax.f32 %v12658_v37, 0.0  ;;  %v1208_v4 = vmax.f32 %v12662_v13, 0.0 }
 0x1c8   :  { %1359 = vst.msk [vmem:[#allocation2 + $0xd9] sm:$0xff] %vm560_vm1, %v1185_v28  ;;  %1360 = vst.msk [vmem:[#allocation2 + $0xe1] sm:$0xff] %vm560_vm1, %v1186_v26  ;;  %v1209_v0 = vmax.f32 %v12666_v14, 0.0  ;;  %v1210_v34 = vmax.f32 %v12670_v54, 0.0  ;;  %v1211_v25 = vmax.f32 %v12674_v12, 0.0  ;;  %v19738_v6 = vld [vmem:[#allocation59_spill] sm:$0xff] }
 0x1c9   :  { %1361 = vst.msk [vmem:[#allocation2 + $0xf1] sm:$0xff] %vm560_vm1, %v1187_v24  ;;  %1362 = vst.msk [vmem:[#allocation2 + $0xf9] sm:$0xff] %vm560_vm1, %v1188_v33  ;;  %v1212_v16 = vmax.f32 %v19738_v6, 0.0  ;;  %v19739_v51 = vld [vmem:[#allocation64_spill] sm:$0xff]  ;;  %v19740_v22 = vld [vmem:[#allocation53_spill] sm:$0xff]  ;;  %v1216_v39 = vmax.f32 %v12694_v1, 0.0 }
 0x1ca   :  { %1363 = vst.msk [vmem:[#allocation2 + $0x109] sm:$0xff] %vm560_vm1, %v1189_v20  ;;  %1364 = vst.msk [vmem:[#allocation2 + $0x111] sm:$0xff] %vm560_vm1, %v1190_v38  ;;  %v1213_v50 = vmax.f32 %v19739_v51, 0.0  ;;  %v1214_v57 = vmax.f32 %v19740_v22, 0.0  ;;  %v19741_v37 = vld [vmem:[#allocation54_spill] sm:$0xff]  ;;  %v1217_v18 = vmax.f32 %v12698_v7, 0.0 }
 0x1cb   :  { %1365 = vst.msk [vmem:[#allocation2 + $0x121] sm:$0xff] %vm560_vm1, %v1191_v3  ;;  %1366 = vst.msk [vmem:[#allocation2 + $0x129] sm:$0xff] %vm560_vm1, %v1192_v11  ;;  %v1215_v13 = vmax.f32 %v19741_v37, 0.0  ;;  %v1509_v14 = vld [vmem:[#allocation2 + $0x19] sm:$0xff]  ;;  %v1510_v54 = vld [vmem:[#allocation2 + $0x21] sm:$0xff]  ;;  %v1218_v36 = vmax.f32 %v12702_v19, 0.0 }
 0x1cc   :  { %1367 = vst.msk [vmem:[#allocation2 + $0x139] sm:$0xff] %vm560_vm1, %v1193_v47  ;;  %1368 = vst.msk [vmem:[#allocation2 + $0x141] sm:$0xff] %vm560_vm1, %v1194_v29  ;;  %v2404_v12 = vld [vmem:[#allocation2 + $0x1a] sm:$0xff]  ;;  %v2405_v62 = vld [vmem:[#allocation2 + $0x22] sm:$0xff]  ;;  %v1219_v44 = vmax.f32 %v12706_v46, 0.0  ;;  %v1221_v1 = vmax.f32 %v12714_v23, 0.0  ;;  %v12878_v24 = vpack.c.bf16 %v1510_v54, %v1509_v14 }
 0x1cd   :  { %1369 = vst.msk [vmem:[#allocation2 + $0x151] sm:$0xff] %vm560_vm1, %v1195_v9  ;;  %1370 = vst.msk [vmem:[#allocation2 + $0x159] sm:$0xff] %vm560_vm1, %v1196_v42  ;;  %v1511_v61 = vld [vmem:[#allocation2 + $0x31] sm:$0xff]  ;;  %v1512_v30 = vld [vmem:[#allocation2 + $0x39] sm:$0xff]  ;;  %v1222_v7 = vmax.f32 %v12718_v31, 0.0  ;;  %v1223_v19 = vmax.f32 %v12722_v49, 0.0  ;;  %v2467_v33 = vpack.c.bf16 %v2405_v62, %v2404_v12 }
 0x1ce   :  { %1371 = vst.msk [vmem:[#allocation2 + $0x169] sm:$0xff] %vm560_vm1, %v1197_v35  ;;  %1372 = vst.msk [vmem:[#allocation2 + $0x171] sm:$0xff] %vm560_vm1, %v1198_v56  ;;  %v19742_v17 = vld [vmem:[#allocation57_spill] sm:$0xff]  ;;  %v1224_v45 = vmax.f32 %v12726_v21, 0.0  ;;  %v1225_v27 = vmax.f32 %v12730_v2, 0.0  ;;  %v19743_v59 = vld [vmem:[#allocation56_spill] sm:$0xff]  ;;  %9869 = vmatmul.mubr.msk.bf16.vlgmr.msra.gmra.mxu1 %vm560_vm1, %v12878_v24 }
 0x1cf   :  { %1373 = vst.msk [vmem:[#allocation2 + $0x181] sm:$0xff] %vm560_vm1, %v1199_v58  ;;  %1374 = vst.msk [vmem:[#allocation2 + $0x189] sm:$0xff] %vm560_vm1, %v1200_v52  ;;  %v1220_v41 = vmax.f32 %v19742_v17, 0.0  ;;  %v2406_v46 = vld [vmem:[#allocation2 + $0x32] sm:$0xff]  ;;  %v2407_v10 = vld [vmem:[#allocation2 + $0x3a] sm:$0xff]  ;;  %v1226_v23 = vmax.f32 %v19743_v59, 0.0  ;;  %10005 = vmatmul.mubr.msk.bf16.vlgmr.msra.gmra.mxu0 %vm560_vm1, %v2467_v33 }
 0x1d0   :  { %1375 = vst.msk [vmem:[#allocation2 + $0x1c9] sm:$0xff] %vm560_vm1, %v1201_v5  ;;  %1376 = vst.msk [vmem:[#allocation2 + $0x1d1] sm:$0xff] %vm560_vm1, %v1202_v32  ;;  %v19744_v48 = vld [vmem:[#allocation58_spill] sm:$0xff]  ;;  %v19746_v60 = vld [vmem:[#allocation61_spill] sm:$0xff]  ;;  %v1232_v2 = vmax.f32 %v12754_v55, 0.0  ;;  %v12880_v55 = vpack.c.bf16 %v1512_v30, %v1511_v61  ;;  %v2468_v20 = vpack.c.bf16 %v2407_v10, %v2406_v46 }
 0x1d1   :  { %1377 = vst.msk [vmem:[#allocation2 + $0x1e1] sm:$0xff] %vm560_vm1, %v1203_v8  ;;  %1378 = vst.msk [vmem:[#allocation2 + $0x1e9] sm:$0xff] %vm560_vm1, %v1204_v40  ;;  %v1227_v31 = vmax.f32 %v19744_v48, 0.0  ;;  %v19745_v49 = vld [vmem:[#allocation62_spill] sm:$0xff]  ;;  %v1229_v28 = vmax.f32 %v19746_v60, 0.0  ;;  %v19747_v26 = vld [vmem:[#allocation63_spill] sm:$0xff] }
 0x1d2   :  { %1379 = vst.msk [vmem:[#allocation2 + $0x1f9] sm:$0xff] %vm560_vm1, %v1205_v63  ;;  %1380 = vst.msk [vmem:[#allocation2 + $0x201] sm:$0xff] %vm560_vm1, %v1206_v15  ;;  %v1228_v53 = vmax.f32 %v19745_v49, 0.0  ;;  %v1231_v21 = vmax.f32 %v19747_v26, 0.0  ;;  %v10629_v38 = vld [vmem:[%s19283_s4] sm:$0xff]   ;;  %v19748_v3 = vld [vmem:[#allocation60_spill] sm:$0xff]  ;;  %9872 = vmatprep.mubr.msk.bf16.mxu1 %vm560_vm1, %v12880_v55  ;;  %10008 = vmatprep.mubr.msk.bf16.mxu0 %vm560_vm1, %v2468_v20 }
 0x1d3   :  { %1381 = vst.msk [vmem:[#allocation2 + $0x211] sm:$0xff] %vm560_vm1, %v1207_v43  ;;  %1382 = vst.msk [vmem:[#allocation2 + $0x219] sm:$0xff] %vm560_vm1, %v1208_v4  ;;  %9933 = vmatpush3.bf16.msra.mxu1 %v19748_v3  ;;  %v1513_v11 = vld [vmem:[#allocation2 + $0x49] sm:$0xff]  ;;  %v1514_v47 = vld [vmem:[#allocation2 + $0x51] sm:$0xff] }
 0x1d4   :  { %1383 = vst.msk [vmem:[#allocation2 + $0x229] sm:$0xff] %vm560_vm1, %v1209_v0  ;;  %1384 = vst.msk [vmem:[#allocation2 + $0x231] sm:$0xff] %vm560_vm1, %v1210_v34  ;;  %9934 = vmatprep.subr.bf16.mxu1 %v10629_v38  ;;  %v2408_v29 = vld [vmem:[#allocation2 + $0x4a] sm:$0xff]  ;;  %v2409_v9 = vld [vmem:[#allocation2 + $0x52] sm:$0xff]  ;;  %v12896_v52 = vpack.c.bf16 %v1514_v47, %v1513_v11 }
 0x1d5   :  { %1385 = vst.msk [vmem:[#allocation2 + $0x241] sm:$0xff] %vm560_vm1, %v1211_v25  ;;  %1386 = vst.msk [vmem:[#allocation2 + $0x249] sm:$0xff] %vm560_vm1, %v1212_v16  ;;  %v1515_v42 = vld [vmem:[#allocation2 + $0x61] sm:$0xff]  ;;  %v1516_v35 = vld [vmem:[#allocation2 + $0x69] sm:$0xff]  ;;  %v2469_v5 = vpack.c.bf16 %v2409_v9, %v2408_v29 }
 0x1d6   :  { %1387 = vst.msk [vmem:[#allocation2 + $0x259] sm:$0xff] %vm560_vm1, %v1213_v50  ;;  %1388 = vst.msk [vmem:[#allocation2 + $0x261] sm:$0xff] %vm560_vm1, %v1214_v57  ;;  %v2410_v56 = vld [vmem:[#allocation2 + $0x62] sm:$0xff]  ;;  %v2411_v58 = vld [vmem:[#allocation2 + $0x6a] sm:$0xff]  ;;  %v12898_v32 = vpack.c.bf16 %v1516_v35, %v1515_v42  ;;  %9873 = vmatmul.mubr.msk.bf16.gmra.mxu1 %vm560_vm1, %v12896_v52 }
 0x1d7   :  { %1389 = vst.msk [vmem:[#allocation2 + $0x271] sm:$0xff] %vm560_vm1, %v1215_v13  ;;  %1390 = vst.msk [vmem:[#allocation2 + $0x279] sm:$0xff] %vm560_vm1, %v1216_v39  ;;  %9935 = vmatpush3.bf16.msra.mxu1 %v10629_v38  ;;  %v2470_v8 = vpack.c.bf16 %v2411_v58, %v2410_v56  ;;  %10009 = vmatmul.mubr.msk.bf16.gmra.mxu0 %vm560_vm1, %v2469_v5  ;;  %v1517_v40 = vld [vmem:[#allocation2 + $0x79] sm:$0xff]  ;;  %v1518_v63 = vld [vmem:[#allocation2 + $0x81] sm:$0xff] }
 0x1d8   :  { %1391 = vst.msk [vmem:[#allocation2 + $0x289] sm:$0xff] %vm560_vm1, %v1217_v18  ;;  %1392 = vst.msk [vmem:[#allocation2 + $0x291] sm:$0xff] %vm560_vm1, %v1218_v36  ;;  %9876 = vmatprep.mubr.msk.bf16.mxu1 %vm560_vm1, %v12898_v32  ;;  %v2412_v15 = vld [vmem:[#allocation2 + $0x7a] sm:$0xff]  ;;  %v2413_v43 = vld [vmem:[#allocation2 + $0x82] sm:$0xff]  ;;  %v12906_v6 = vpack.c.bf16 %v1518_v63, %v1517_v40 }
 0x1d9   :  { %1393 = vst.msk [vmem:[#allocation2 + $0x2a1] sm:$0xff] %vm560_vm1, %v1219_v44  ;;  %1394 = vst.msk [vmem:[#allocation2 + $0x2a9] sm:$0xff] %vm560_vm1, %v1220_v41  ;;  %10012 = vmatprep.mubr.msk.bf16.mxu0 %vm560_vm1, %v2470_v8  ;;  %v1519_v4 = vld [vmem:[#allocation2 + $0x91] sm:$0xff]  ;;  %v1520_v0 = vld [vmem:[#allocation2 + $0x99] sm:$0xff]  ;;  %v2471_v16 = vpack.c.bf16 %v2413_v43, %v2412_v15 }
 0x1da   :  { %1395 = vst.msk [vmem:[#allocation2 + $0x2b9] sm:$0xff] %vm560_vm1, %v1221_v1  ;;  %1396 = vst.msk [vmem:[#allocation2 + $0x2c1] sm:$0xff] %vm560_vm1, %v1222_v7  ;;  %v2414_v34 = vld [vmem:[#allocation2 + $0x92] sm:$0xff]  ;;  %v2415_v25 = vld [vmem:[#allocation2 + $0x9a] sm:$0xff]  ;;  %v12908_v51 = vpack.c.bf16 %v1520_v0, %v1519_v4 }
 0x1db   :  { %1397 = vst.msk [vmem:[#allocation2 + $0x2d1] sm:$0xff] %vm560_vm1, %v1223_v19  ;;  %1398 = vst.msk [vmem:[#allocation2 + $0x2d9] sm:$0xff] %vm560_vm1, %v1224_v45  ;;  %v2472_v50 = vpack.c.bf16 %v2415_v25, %v2414_v34  ;;  %v1521_v22 = vld [vmem:[#allocation2 + $0xa9] sm:$0xff]  ;;  %v1522_v57 = vld [vmem:[#allocation2 + $0xb1] sm:$0xff] }
 0x1dc   :  { %1399 = vst.msk [vmem:[#allocation2 + $0x2e9] sm:$0xff] %vm560_vm1, %v1225_v27  ;;  %1400 = vst.msk [vmem:[#allocation2 + $0x2f1] sm:$0xff] %vm560_vm1, %v1226_v23  ;;  %v2416_v37 = vld [vmem:[#allocation2 + $0xaa] sm:$0xff]  ;;  %v2417_v13 = vld [vmem:[#allocation2 + $0xb2] sm:$0xff]  ;;  %v12916_v39 = vpack.c.bf16 %v1522_v57, %v1521_v22 }
 0x1dd   :  { %1401 = vst.msk [vmem:[#allocation2 + $0x301] sm:$0xff] %vm560_vm1, %v1227_v31  ;;  %1402 = vst.msk [vmem:[#allocation2 + $0x309] sm:$0xff] %vm560_vm1, %v1228_v53  ;;  %v1523_v14 = vld [vmem:[#allocation2 + $0xc1] sm:$0xff]  ;;  %v1524_v54 = vld [vmem:[#allocation2 + $0xc9] sm:$0xff]  ;;  %v2473_v18 = vpack.c.bf16 %v2417_v13, %v2416_v37 }
 0x1de   :  { %1403 = vst.msk [vmem:[#allocation2 + $0x319] sm:$0xff] %vm560_vm1, %v1229_v28  ;;  %1405 = vst.msk [vmem:[#allocation2 + $0x331] sm:$0xff] %vm560_vm1, %v1231_v21  ;;  %9877 = vmatmul.mubr.msk.bf16.gmra.mxu1 %vm560_vm1, %v12906_v6  ;;  %v2418_v12 = vld [vmem:[#allocation2 + $0xc2] sm:$0xff]  ;;  %v2419_v62 = vld [vmem:[#allocation2 + $0xca] sm:$0xff]  ;;  %v12918_v36 = vpack.c.bf16 %v1524_v54, %v1523_v14 }
 0x1df   :  { %1406 = vst.msk [vmem:[#allocation2 + $0x339] sm:$0xff] %vm560_vm1, %v1232_v2  ;;  %10013 = vmatmul.mubr.msk.bf16.gmra.mxu0 %vm560_vm1, %v2471_v16  ;;  %9880 = vmatprep.mubr.msk.bf16.mxu1 %vm560_vm1, %v12908_v51  ;;  %v2474_v44 = vpack.c.bf16 %v2419_v62, %v2418_v12  ;;  %v1525_v61 = vld [vmem:[#allocation2 + $0xd9] sm:$0xff]  ;;  %v1526_v30 = vld [vmem:[#allocation2 + $0xe1] sm:$0xff]  ;;  %v1527_v1 = vld [vmem:[#allocation2 + $0xf1] sm:$0xff] }
 0x1e0   :  { %10016 = vmatprep.mubr.msk.bf16.mxu0 %vm560_vm1, %v2472_v50  ;;  %v2420_v17 = vld [vmem:[#allocation2 + $0xda] sm:$0xff]  ;;  %v2421_v41 = vld [vmem:[#allocation2 + $0xe2] sm:$0xff]  ;;  %v2422_v19 = vld [vmem:[#allocation2 + $0xf2] sm:$0xff]  ;;  %v12926_v10 = vpack.c.bf16 %v1526_v30, %v1525_v61 }
 0x1e1   :  { %v1528_v7 = vld [vmem:[#allocation2 + $0xf9] sm:$0xff]  ;;  %v2475_v45 = vpack.c.bf16 %v2421_v41, %v2420_v17  ;;  %v10630_v23 = vld [vmem:[%s19283_s4 + $0x48] sm:$0xff]   ;;  %v1530_v49 = vld [vmem:[#allocation2 + $0x111] sm:$0xff] }
 0x1e2   :  { %v2423_v46 = vld [vmem:[#allocation2 + $0xfa] sm:$0xff]  ;;  %v12928_v27 = vpack.c.bf16 %v1528_v7, %v1527_v1  ;;  %v1529_v31 = vld [vmem:[#allocation2 + $0x109] sm:$0xff]  ;;  %10136 = vmatprep.subr.bf16.mxu0 %v10630_v23  ;;  %v2425_v28 = vld [vmem:[#allocation2 + $0x112] sm:$0xff] }
 0x1e3   :  { %v2476_v59 = vpack.c.bf16 %v2423_v46, %v2422_v19  ;;  %v10631_v48 = vld [vmem:[%s19283_s4 + $0x40] sm:$0xff]   ;;  %v12945_v53 = vld [vmem:[%s19283_s4 + $0x38] sm:$0xff]   ;;  %v2424_v60 = vld [vmem:[#allocation2 + $0x10a] sm:$0xff]  ;;  %10137 = vmatpush3.bf16.msra.mxu0 %v10630_v23  ;;  %v12948_v20 = vpack.c.bf16 %v1530_v49, %v1529_v31 }
 0x1e4   :  { %v1531_v26 = vld [vmem:[#allocation2 + $0x121] sm:$0xff]  ;;  %v1532_v21 = vld [vmem:[#allocation2 + $0x129] sm:$0xff]  ;;  %10138 = vmatprep.subr.bf16.mxu0 %v10631_v48  ;;  %10068 = vmatprep.subr.bf16.mxu1 %v12945_v53  ;;  %v2477_v38 = vpack.c.bf16 %v2425_v28, %v2424_v60  ;;  %v1533_v47 = vld [vmem:[#allocation2 + $0x139] sm:$0xff] }
 0x1e5   :  { %v2426_v2 = vld [vmem:[#allocation2 + $0x122] sm:$0xff]  ;;  %v2427_v33 = vld [vmem:[#allocation2 + $0x12a] sm:$0xff]  ;;  %v12950_v3 = vpack.c.bf16 %v1532_v21, %v1531_v26  ;;  %v2428_v9 = vld [vmem:[#allocation2 + $0x13a] sm:$0xff] }
 0x1e6   :  { %9881 = vmatmul.mubr.msk.bf16.gmra.mxu1 %vm560_vm1, %v12916_v39  ;;  %v2478_v11 = vpack.c.bf16 %v2427_v33, %v2426_v2  ;;  %v1534_v29 = vld [vmem:[#allocation2 + $0x141] sm:$0xff]  ;;  %v1535_v35 = vld [vmem:[#allocation2 + $0x151] sm:$0xff]  ;;  %v1536_v56 = vld [vmem:[#allocation2 + $0x159] sm:$0xff] }
 0x1e7   :  { %10017 = vmatmul.mubr.msk.bf16.gmra.mxu0 %vm560_vm1, %v2473_v18  ;;  %9884 = vmatprep.mubr.msk.bf16.mxu1 %vm560_vm1, %v12918_v36  ;;  %v2429_v42 = vld [vmem:[#allocation2 + $0x142] sm:$0xff]  ;;  %v2430_v58 = vld [vmem:[#allocation2 + $0x152] sm:$0xff]  ;;  %v2431_v5 = vld [vmem:[#allocation2 + $0x15a] sm:$0xff]  ;;  %v12958_v8 = vpack.c.bf16 %v1534_v29, %v1533_v47  ;;  %v12960_v63 = vpack.c.bf16 %v1536_v56, %v1535_v35 }
 0x1e8   :  { %10020 = vmatprep.mubr.msk.bf16.mxu0 %vm560_vm1, %v2474_v44  ;;  %10139 = vmatpush3.bf16.msra.mxu0 %v10631_v48  ;;  %v2479_v40 = vpack.c.bf16 %v2429_v42, %v2428_v9  ;;  %v2480_v15 = vpack.c.bf16 %v2431_v5, %v2430_v58  ;;  %v1539_v43 = vld [vmem:[#allocation2 + $0x1b1] sm:$0xff]  ;;  %v1540_v4 = vld [vmem:[#allocation2 + $0x1b9] sm:$0xff]  ;;  %v1537_v0 = vld [vmem:[#allocation2 + $0x169] sm:$0xff] }
 0x1e9   :  { %v2434_v34 = vld [vmem:[#allocation2 + $0x1b2] sm:$0xff]  ;;  %v2435_v25 = vld [vmem:[#allocation2 + $0x1ba] sm:$0xff]  ;;  %v2432_v50 = vld [vmem:[#allocation2 + $0x16a] sm:$0xff]  ;;  %v1587_v57 = vpack.c.bf16 %v1540_v4, %v1539_v43 }
 0x1ea   :  { %v1538_v16 = vld [vmem:[#allocation2 + $0x171] sm:$0xff]  ;;  %v2482_v37 = vpack.c.bf16 %v2435_v25, %v2434_v34  ;;  %v1541_v54 = vld [vmem:[#allocation2 + $0x1c9] sm:$0xff]  ;;  %v1543_v44 = vld [vmem:[#allocation2 + $0x1e1] sm:$0xff] }
 0x1eb   :  { %v2433_v22 = vld [vmem:[#allocation2 + $0x172] sm:$0xff]  ;;  %v12968_v13 = vpack.c.bf16 %v1538_v16, %v1537_v0  ;;  %v2436_v62 = vld [vmem:[#allocation2 + $0x1ca] sm:$0xff]  ;;  %v2438_v30 = vld [vmem:[#allocation2 + $0x1e2] sm:$0xff] }
 0x1ec   :  { %v2481_v14 = vpack.c.bf16 %v2433_v22, %v2432_v50  ;;  %v1542_v12 = vld [vmem:[#allocation2 + $0x1d1] sm:$0xff]  ;;  %v1544_v61 = vld [vmem:[#allocation2 + $0x1e9] sm:$0xff]  ;;  %v1545_v46 = vld [vmem:[#allocation2 + $0x1f9] sm:$0xff] }
 0x1ed   :  { %v2437_v18 = vld [vmem:[#allocation2 + $0x1d2] sm:$0xff]  ;;  %v2439_v17 = vld [vmem:[#allocation2 + $0x1ea] sm:$0xff]  ;;  %v12975_v41 = vpack.c.bf16 %v1542_v12, %v1541_v54  ;;  %v12977_v7 = vpack.c.bf16 %v1544_v61, %v1543_v44  ;;  %v2441_v23 = vld [vmem:[#allocation2 + $0x202] sm:$0xff] }
 0x1ee   :  { %9885 = vmatmul.mubr.msk.bf16.gmra.mxu1 %vm560_vm1, %v12926_v10  ;;  %v2483_v1 = vpack.c.bf16 %v2437_v18, %v2436_v62  ;;  %v2484_v19 = vpack.c.bf16 %v2439_v17, %v2438_v30  ;;  %v1547_v48 = vld [vmem:[#allocation2 + $0x211] sm:$0xff]  ;;  %v1548_v31 = vld [vmem:[#allocation2 + $0x219] sm:$0xff]  ;;  %v1549_v33 = vld [vmem:[#allocation2 + $0x229] sm:$0xff] }
 0x1ef   :  { %10021 = vmatmul.mubr.msk.bf16.gmra.mxu0 %vm560_vm1, %v2475_v45  ;;  %9888 = vmatprep.mubr.msk.bf16.mxu1 %vm560_vm1, %v12928_v27  ;;  %v1546_v45 = vld [vmem:[#allocation2 + $0x201] sm:$0xff]  ;;  %v2442_v49 = vld [vmem:[#allocation2 + $0x212] sm:$0xff]  ;;  %v12987_v21 = vpack.c.bf16 %v1548_v31, %v1547_v48  ;;  %v1552_v9 = vld [vmem:[#allocation2 + $0x249] sm:$0xff] }
 0x1f0   :  { %10024 = vmatprep.mubr.msk.bf16.mxu0 %vm560_vm1, %v2476_v59  ;;  %v2440_v59 = vld [vmem:[#allocation2 + $0x1fa] sm:$0xff]  ;;  %v12985_v28 = vpack.c.bf16 %v1546_v45, %v1545_v46  ;;  %v2445_v47 = vld [vmem:[#allocation2 + $0x232] sm:$0xff]  ;;  %v2446_v42 = vld [vmem:[#allocation2 + $0x242] sm:$0xff] }
 0x1f1   :  { %v2443_v60 = vld [vmem:[#allocation2 + $0x21a] sm:$0xff]  ;;  %v2485_v26 = vpack.c.bf16 %v2441_v23, %v2440_v59  ;;  %v2447_v35 = vld [vmem:[#allocation2 + $0x24a] sm:$0xff]  ;;  %v2449_v0 = vld [vmem:[#allocation2 + $0x262] sm:$0xff] }
 0x1f2   :  { %v2486_v2 = vpack.c.bf16 %v2443_v60, %v2442_v49  ;;  %v1551_v29 = vld [vmem:[#allocation2 + $0x241] sm:$0xff]  ;;  %v1555_v34 = vld [vmem:[#allocation2 + $0x271] sm:$0xff]  ;;  %v1556_v25 = vld [vmem:[#allocation2 + $0x279] sm:$0xff] }
 0x1f3   :  { %v12997_v5 = vpack.c.bf16 %v1552_v9, %v1551_v29  ;;  %v1554_v43 = vld [vmem:[#allocation2 + $0x261] sm:$0xff]  ;;  %v2450_v16 = vld [vmem:[#allocation2 + $0x272] sm:$0xff]  ;;  %v1557_v54 = vld [vmem:[#allocation2 + $0x289] sm:$0xff] }
 0x1f4   :  { %v2448_v4 = vld [vmem:[#allocation2 + $0x25a] sm:$0xff]  ;;  %v1558_v12 = vld [vmem:[#allocation2 + $0x291] sm:$0xff]  ;;  %v1560_v61 = vld [vmem:[#allocation2 + $0x2a9] sm:$0xff] }
 0x1f5   :  { %v2451_v50 = vld [vmem:[#allocation2 + $0x27a] sm:$0xff]  ;;  %v2452_v62 = vld [vmem:[#allocation2 + $0x28a] sm:$0xff]  ;;  %v2453_v18 = vld [vmem:[#allocation2 + $0x292] sm:$0xff] }
 0x1f6   :  { %9889 = vmatmul.mubr.msk.bf16.gmra.mxu1 %vm560_vm1, %v12948_v20  ;;  %v1559_v44 = vld [vmem:[#allocation2 + $0x2a1] sm:$0xff]  ;;  %v2455_v17 = vld [vmem:[#allocation2 + $0x2aa] sm:$0xff]  ;;  %v1561_v59 = vld [vmem:[#allocation2 + $0x2b9] sm:$0xff] }
 0x1f7   :  { %10025 = vmatmul.mubr.msk.bf16.gmra.mxu0 %vm560_vm1, %v2477_v38  ;;  %9892 = vmatprep.mubr.msk.bf16.mxu1 %vm560_vm1, %v12950_v3  ;;  %v1550_v38 = vld [vmem:[#allocation2 + $0x231] sm:$0xff]  ;;  %v2454_v30 = vld [vmem:[#allocation2 + $0x2a2] sm:$0xff]  ;;  %v13017_v46 = vpack.c.bf16 %v1560_v61, %v1559_v44  ;;  %v2456_v48 = vld [vmem:[#allocation2 + $0x2ba] sm:$0xff] }
 0x1f8   :  { %10028 = vmatprep.mubr.msk.bf16.mxu0 %vm560_vm1, %v2478_v11  ;;  %v2444_v11 = vld [vmem:[#allocation2 + $0x22a] sm:$0xff]  ;;  %v12995_v56 = vpack.c.bf16 %v1550_v38, %v1549_v33  ;;  %v2492_v45 = vpack.c.bf16 %v2455_v17, %v2454_v30  ;;  %v1562_v23 = vld [vmem:[#allocation2 + $0x2c1] sm:$0xff]  ;;  %v1564_v60 = vld [vmem:[#allocation2 + $0x2d9] sm:$0xff] }
 0x1f9   :  { %v2487_v58 = vpack.c.bf16 %v2445_v47, %v2444_v11  ;;  %v2457_v31 = vld [vmem:[#allocation2 + $0x2c2] sm:$0xff]  ;;  %v1563_v49 = vld [vmem:[#allocation2 + $0x2d1] sm:$0xff]  ;;  %v13025_v33 = vpack.c.bf16 %v1562_v23, %v1561_v59 }
 0x1fa   :  { %v2493_v38 = vpack.c.bf16 %v2457_v31, %v2456_v48  ;;  %v13027_v11 = vpack.c.bf16 %v1564_v60, %v1563_v49  ;;  %v1565_v29 = vld [vmem:[#allocation2 + $0x2e9] sm:$0xff]  ;;  %v1566_v9 = vld [vmem:[#allocation2 + $0x2f1] sm:$0xff]  ;;  %v1410_v17 = vld [vmem:[#allocation2 + $0x20] sm:$0xff] }
 0x1fb   :  { %v10634_v61 = vld [vmem:[%s19283_s4 + $0x68] sm:$0xff]   ;;  %v1409_v30 = vld [vmem:[#allocation2 + $0x18] sm:$0xff]  ;;  %v10633_v23 = vld [vmem:[%s19283_s4 + $0x30] sm:$0xff]  }
 0x1fc   :  { %10272 = vmatprep.subr.bf16.mxu0 %v10634_v61  ;;  %v13056_v59 = vpack.c.bf16 %v1410_v17, %v1409_v30  ;;  %v13078_v31 = vld [vmem:[%s19283_s4 + $0x58] sm:$0xff]   ;;  %v1413_v49 = vld [vmem:[#allocation2 + $0x48] sm:$0xff]  ;;  %v1415_v60 = vld [vmem:[#allocation2 + $0x60] sm:$0xff] }
 0x1fd   :  { %v1440_v30 = vld [vmem:[#allocation2 + $0x1b8] sm:$0xff]  ;;  %v1438_v17 = vld [vmem:[#allocation2 + $0x170] sm:$0xff] }
 0x1fe   :  { %9893 = vmatmul.mubr.msk.bf16.gmra.mxu1 %vm560_vm1, %v12958_v8 }
 0x1ff   :  { %10029 = vmatmul.mubr.msk.bf16.gmra.mxu0 %vm560_vm1, %v2479_v40  ;;  %9896 = vmatprep.mubr.msk.bf16.mxu1 %vm560_vm1, %v12960_v63  ;;  %v2488_v40 = vpack.c.bf16 %v2447_v35, %v2446_v42  ;;  %v2460_v42 = vld [vmem:[#allocation2 + $0x2ea] sm:$0xff]  ;;  %v2461_v35 = vld [vmem:[#allocation2 + $0x2f2] sm:$0xff] }
 0x200   :  { %10032 = vmatprep.mubr.msk.bf16.mxu0 %vm560_vm1, %v2480_v15  ;;  %v1553_v15 = vld [vmem:[#allocation2 + $0x259] sm:$0xff] }
 0x201   :  { %v13005_v22 = vpack.c.bf16 %v1554_v43, %v1553_v15  ;;  %v2462_v15 = vld [vmem:[#allocation2 + $0x302] sm:$0xff]  ;;  %v2463_v43 = vld [vmem:[#allocation2 + $0x30a] sm:$0xff] }
 0x206   :  { %9897 = vmatmul.mubr.msk.bf16.gmra.mxu1 %vm560_vm1, %v12968_v13 }
 0x207   :  { %10033 = vmatmul.mubr.msk.bf16.gmra.mxu0 %vm560_vm1, %v2481_v14  ;;  %9900 = vmatprep.mubr.msk.bf16.mxu1 %vm560_vm1, %v1587_v57  ;;  %v2489_v57 = vpack.c.bf16 %v2449_v0, %v2448_v4  ;;  %v2490_v14 = vpack.c.bf16 %v2451_v50, %v2450_v16  ;;  %v13035_v4 = vpack.c.bf16 %v1566_v9, %v1565_v29  ;;  %v1570_v16 = vld [vmem:[#allocation2 + $0x321] sm:$0xff]  ;;  %v1420_v29 = vld [vmem:[#allocation2 + $0x98] sm:$0xff] }
 0x208   :  { %10036 = vmatprep.mubr.msk.bf16.mxu0 %vm560_vm1, %v2482_v37  ;;  %v13007_v37 = vpack.c.bf16 %v1556_v25, %v1555_v34  ;;  %v2495_v0 = vpack.c.bf16 %v2461_v35, %v2460_v42  ;;  %v2496_v25 = vpack.c.bf16 %v2463_v43, %v2462_v15  ;;  %v1407_v50 = vld [vmem:[#allocation2] sm:$0xff]  ;;  %v1427_v43 = vld [vmem:[#allocation2 + $0xf0] sm:$0xff] }
 0x209   :  { %v1423_v35 = vld [vmem:[#allocation2 + $0xc0] sm:$0xff] }
 0x20e   :  { %9901 = vmatmul.mubr.msk.bf16.gmra.mxu1 %vm560_vm1, %v12975_v41 }
 0x20f   :  { %10037 = vmatmul.mubr.msk.bf16.gmra.mxu0 %vm560_vm1, %v2483_v1  ;;  %9904 = vmatprep.mubr.msk.bf16.mxu1 %vm560_vm1, %v12977_v7  ;;  %v13015_v1 = vpack.c.bf16 %v1558_v12, %v1557_v54  ;;  %v2464_v54 = vld [vmem:[#allocation2 + $0x31a] sm:$0xff]  ;;  %v2465_v12 = vld [vmem:[#allocation2 + $0x322] sm:$0xff] }
 0x210   :  { %10040 = vmatprep.mubr.msk.bf16.mxu0 %vm560_vm1, %v2484_v19  ;;  %v2491_v19 = vpack.c.bf16 %v2453_v18, %v2452_v62  ;;  %v2497_v44 = vpack.c.bf16 %v2465_v12, %v2464_v54  ;;  %v1435_v12 = vld [vmem:[#allocation2 + $0x150] sm:$0xff] }
 0x216   :  { %9905 = vmatmul.mubr.msk.bf16.gmra.mxu1 %vm560_vm1, %v12985_v28 }
 0x217   :  { %10041 = vmatmul.mubr.msk.bf16.gmra.mxu0 %vm560_vm1, %v2485_v26  ;;  %9908 = vmatprep.mubr.msk.bf16.mxu1 %vm560_vm1, %v12987_v21  ;;  %v2458_v26 = vld [vmem:[#allocation2 + $0x2d2] sm:$0xff] }
 0x218   :  { %10044 = vmatprep.mubr.msk.bf16.mxu0 %vm560_vm1, %v2486_v2  ;;  %v2459_v2 = vld [vmem:[#allocation2 + $0x2da] sm:$0xff] }
 0x219   :  { %v2494_v47 = vpack.c.bf16 %v2459_v2, %v2458_v26  ;;  %v1416_v26 = vld [vmem:[#allocation2 + $0x68] sm:$0xff] }
 0x21a   :  { %v13083_v2 = vpack.c.bf16 %v1416_v26, %v1415_v60  ;;  %v1444_v60 = vld [vmem:[#allocation2 + $0x1e8] sm:$0xff] }
 0x21e   :  { %9909 = vmatmul.mubr.msk.bf16.gmra.mxu1 %vm560_vm1, %v12995_v56 }
 0x21f   :  { %10045 = vmatmul.mubr.msk.bf16.gmra.mxu0 %vm560_vm1, %v2487_v58  ;;  %9912 = vmatprep.mubr.msk.bf16.mxu1 %vm560_vm1, %v12997_v5  ;;  %v1567_v58 = vld [vmem:[#allocation2 + $0x301] sm:$0xff] }
 0x220   :  { %10048 = vmatprep.mubr.msk.bf16.mxu0 %vm560_vm1, %v2488_v40  ;;  %v1568_v40 = vld [vmem:[#allocation2 + $0x309] sm:$0xff] }
 0x221   :  { %v13037_v34 = vpack.c.bf16 %v1568_v40, %v1567_v58  ;;  %v1424_v58 = vld [vmem:[#allocation2 + $0xc8] sm:$0xff] }
 0x222   :  { %v13107_v15 = vpack.c.bf16 %v1424_v58, %v1423_v35 }
 0x226   :  { %9913 = vmatmul.mubr.msk.bf16.gmra.mxu1 %vm560_vm1, %v13005_v22 }
 0x227   :  { %10049 = vmatmul.mubr.msk.bf16.gmra.mxu0 %vm560_vm1, %v2489_v57  ;;  %9916 = vmatprep.mubr.msk.bf16.mxu1 %vm560_vm1, %v13007_v37  ;;  %v1408_v57 = vld [vmem:[#allocation2 + $0x8] sm:$0xff] }
 0x228   :  { %10052 = vmatprep.mubr.msk.bf16.mxu0 %vm560_vm1, %v2490_v14  ;;  %v1569_v14 = vld [vmem:[#allocation2 + $0x319] sm:$0xff]  ;;  %v1471_v62 = vpack.c.bf16 %v1408_v57, %v1407_v50  ;;  %v1432_v57 = vld [vmem:[#allocation2 + $0x128] sm:$0xff] }
 0x229   :  { %v13045_v18 = vpack.c.bf16 %v1570_v16, %v1569_v14  ;;  %v1431_v50 = vld [vmem:[#allocation2 + $0x120] sm:$0xff] }
 0x22a   :  { %v13131_v54 = vpack.c.bf16 %v1432_v57, %v1431_v50 }
 0x22e   :  { %9917 = vmatmul.mubr.msk.bf16.gmra.mxu1 %vm560_vm1, %v13015_v1 }
 0x22f   :  { %10053 = vmatmul.mubr.msk.bf16.gmra.mxu0 %vm560_vm1, %v2491_v19  ;;  %9920 = vmatprep.mubr.msk.bf16.mxu1 %vm560_vm1, %v13017_v46  ;;  %v1411_v19 = vld [vmem:[#allocation2 + $0x30] sm:$0xff] }
 0x230   :  { %10056 = vmatprep.mubr.msk.bf16.mxu0 %vm560_vm1, %v2492_v45  ;;  %v1412_v45 = vld [vmem:[#allocation2 + $0x38] sm:$0xff] }
 0x231   :  { %v13061_v48 = vpack.c.bf16 %v1412_v45, %v1411_v19  ;;  %v3556_v19 = vld [vmem:[#allocation2 + $0x181] sm:$0xff]  ;;  %v3557_v45 = vld [vmem:[#allocation2 + $0x189] sm:$0xff] }
 0x236   :  { %9921 = vmatmul.mubr.msk.bf16.gmra.mxu1 %vm560_vm1, %v13025_v33 }
 0x237   :  { %10057 = vmatmul.mubr.msk.bf16.gmra.mxu0 %vm560_vm1, %v2493_v38  ;;  %9924 = vmatprep.mubr.msk.bf16.mxu1 %vm560_vm1, %v13027_v11  ;;  %v1418_v38 = vld [vmem:[#allocation2 + $0x80] sm:$0xff] }
 0x238   :  { %10060 = vmatprep.mubr.msk.bf16.mxu0 %vm560_vm1, %v2494_v47  ;;  %v1419_v47 = vld [vmem:[#allocation2 + $0x90] sm:$0xff] }
 0x239   :  { %v13095_v42 = vpack.c.bf16 %v1420_v29, %v1419_v47 }
 0x23e   :  { %9925 = vmatmul.mubr.msk.bf16.gmra.mxu1 %vm560_vm1, %v13035_v4 }
 0x23f   :  { %10061 = vmatmul.mubr.msk.bf16.gmra.mxu0 %vm560_vm1, %v2495_v0  ;;  %9928 = vmatprep.mubr.msk.bf16.mxu1 %vm560_vm1, %v13037_v34  ;;  %v1428_v0 = vld [vmem:[#allocation2 + $0xf8] sm:$0xff] }
 0x240   :  { %10064 = vmatprep.mubr.msk.bf16.mxu0 %vm560_vm1, %v2496_v25  ;;  %v13119_v16 = vpack.c.bf16 %v1428_v0, %v1427_v43 }
 0x246   :  { %9929 = vmatmul.mubr.msk.bf16.gmra.mxu1 %vm560_vm1, %v13045_v18 }
 0x247   :  { %10065 = vmatmul.mubr.msk.bf16.gmra.mxu0 %vm560_vm1, %v2497_v44  ;;  %9936 = vmatprep.mubr.msk.bf16.mxu1 %vm560_vm1, %v1471_v62  ;;  %v1436_v62 = vld [vmem:[#allocation2 + $0x158] sm:$0xff] }
 0x248   :  { %10140 = vmatprep.mubr.msk.bf16.mxu0 %vm560_vm1, %v12878_v24  ;;  %v10635_v24 = vld [vmem:[%s19283_s4 + $0x60] sm:$0xff]  }
 0x24e   :  { %9937 = vmatmul.mubr.msk.bf16.vlgmr.msra.gmra.mxu1 %vm560_vm1, %v13056_v59 }
 0x24f   :  { %10141 = vmatmul.mubr.msk.bf16.vlgmr.msra.gmra.mxu0 %vm560_vm1, %v12880_v55  ;;  %10069 = vmatpush3.bf16.msra.mxu1 %v12945_v53  ;;  %v1414_v55 = vld [vmem:[#allocation2 + $0x50] sm:$0xff] }
 0x250   :  { %9940 = vmatprep.mubr.msk.bf16.mxu1 %vm560_vm1, %v13061_v48  ;;  %10144 = vmatprep.mubr.msk.bf16.mxu0 %vm560_vm1, %v12896_v52  ;;  %v13080_v53 = vpack.c.bf16 %v1414_v55, %v1413_v49  ;;  %v1417_v52 = vld [vmem:[#allocation2 + $0x78] sm:$0xff]  ;;  %v3605_v49 = vpack.c.bf16 %v3557_v45, %v3556_v19  ;;  %v1443_v55 = vld [vmem:[#allocation2 + $0x1e0] sm:$0xff] }
 0x251   :  { %10070 = vmatprep.subr.bf16.mxu1 %v10633_v23  ;;  %10273 = vmatpush3.bf16.msra.mxu0 %v10634_v61  ;;  %v13093_v9 = vpack.c.bf16 %v1418_v38, %v1417_v52  ;;  %v13143_v61 = vpack.c.bf16 %v1436_v62, %v1435_v12  ;;  %v13163_v52 = vpack.c.bf16 %v1444_v60, %v1443_v55 }
 0x252   :  { %10274 = vmatprep.subr.bf16.mxu0 %v10635_v24 }
 0x253   :  { %10071 = vmatpush3.bf16.msra.mxu1 %v10633_v23 }
 0x254   :  { %10204 = vmatprep.subr.bf16.mxu1 %v13078_v31 }
 0x255   :  { %10275 = vmatpush3.bf16.msra.mxu0 %v10635_v24 }
 0x256   :  { %9941 = vmatmul.mubr.msk.bf16.gmra.mxu1 %vm560_vm1, %v13080_v53 }
 0x257   :  { %10145 = vmatmul.mubr.msk.bf16.gmra.mxu0 %vm560_vm1, %v12898_v32  ;;  %9944 = vmatprep.mubr.msk.bf16.mxu1 %vm560_vm1, %v13083_v2  ;;  %v1421_v32 = vld [vmem:[#allocation2 + $0xa8] sm:$0xff] }
 0x258   :  { %10148 = vmatprep.mubr.msk.bf16.mxu0 %vm560_vm1, %v12906_v6  ;;  %v1422_v6 = vld [vmem:[#allocation2 + $0xb0] sm:$0xff] }
 0x259   :  { %v13105_v40 = vpack.c.bf16 %v1422_v6, %v1421_v32  ;;  %v1445_v32 = vld [vmem:[#allocation2 + $0x1f8] sm:$0xff]  ;;  %v1446_v6 = vld [vmem:[#allocation2 + $0x200] sm:$0xff] }
 0x25a   :  { %v13189_v0 = vpack.c.bf16 %v1446_v6, %v1445_v32  ;;  %v1455_v32 = vld [vmem:[#allocation2 + $0x270] sm:$0xff]  ;;  %v1456_v6 = vld [vmem:[#allocation2 + $0x278] sm:$0xff] }
 0x25e   :  { %9945 = vmatmul.mubr.msk.bf16.gmra.mxu1 %vm560_vm1, %v13093_v9 }
 0x25f   :  { %10149 = vmatmul.mubr.msk.bf16.gmra.mxu0 %vm560_vm1, %v12908_v51  ;;  %9948 = vmatprep.mubr.msk.bf16.mxu1 %vm560_vm1, %v13095_v42  ;;  %v1425_v51 = vld [vmem:[#allocation2 + $0xd8] sm:$0xff] }
 0x260   :  { %10152 = vmatprep.mubr.msk.bf16.mxu0 %vm560_vm1, %v12916_v39  ;;  %v1426_v39 = vld [vmem:[#allocation2 + $0xe0] sm:$0xff] }
 0x261   :  { %v13117_v25 = vpack.c.bf16 %v1426_v39, %v1425_v51  ;;  %v1447_v51 = vld [vmem:[#allocation2 + $0x210] sm:$0xff]  ;;  %v1448_v39 = vld [vmem:[#allocation2 + $0x218] sm:$0xff] }
 0x266   :  { %9949 = vmatmul.mubr.msk.bf16.gmra.mxu1 %vm560_vm1, %v13105_v40 }
 0x267   :  { %10153 = vmatmul.mubr.msk.bf16.gmra.mxu0 %vm560_vm1, %v12918_v36  ;;  %9952 = vmatprep.mubr.msk.bf16.mxu1 %vm560_vm1, %v13107_v15  ;;  %v1429_v36 = vld [vmem:[#allocation2 + $0x108] sm:$0xff] }
 0x268   :  { %10156 = vmatprep.mubr.msk.bf16.mxu0 %vm560_vm1, %v12926_v10  ;;  %v1430_v10 = vld [vmem:[#allocation2 + $0x110] sm:$0xff] }
 0x269   :  { %v13129_v14 = vpack.c.bf16 %v1430_v10, %v1429_v36  ;;  %v13191_v36 = vpack.c.bf16 %v1448_v39, %v1447_v51 }
 0x26e   :  { %9953 = vmatmul.mubr.msk.bf16.gmra.mxu1 %vm560_vm1, %v13117_v25 }
 0x26f   :  { %10157 = vmatmul.mubr.msk.bf16.gmra.mxu0 %vm560_vm1, %v12928_v27  ;;  %9956 = vmatprep.mubr.msk.bf16.mxu1 %vm560_vm1, %v13119_v16  ;;  %v1433_v27 = vld [vmem:[#allocation2 + $0x138] sm:$0xff] }
 0x270   :  { %10160 = vmatprep.mubr.msk.bf16.mxu0 %vm560_vm1, %v12948_v20  ;;  %v1434_v20 = vld [vmem:[#allocation2 + $0x140] sm:$0xff] }
 0x271   :  { %v13141_v44 = vpack.c.bf16 %v1434_v20, %v1433_v27  ;;  %v1449_v27 = vld [vmem:[#allocation2 + $0x228] sm:$0xff]  ;;  %v1450_v20 = vld [vmem:[#allocation2 + $0x230] sm:$0xff] }
 0x276   :  { %9957 = vmatmul.mubr.msk.bf16.gmra.mxu1 %vm560_vm1, %v13129_v14 }
 0x277   :  { %10161 = vmatmul.mubr.msk.bf16.gmra.mxu0 %vm560_vm1, %v12950_v3  ;;  %9960 = vmatprep.mubr.msk.bf16.mxu1 %vm560_vm1, %v13131_v54  ;;  %v1437_v3 = vld [vmem:[#allocation2 + $0x168] sm:$0xff] }
 0x278   :  { %10164 = vmatprep.mubr.msk.bf16.mxu0 %vm560_vm1, %v12958_v8  ;;  %v1439_v8 = vld [vmem:[#allocation2 + $0x1b0] sm:$0xff]  ;;  %v13153_v24 = vpack.c.bf16 %v1438_v17, %v1437_v3  ;;  %v1451_v3 = vld [vmem:[#allocation2 + $0x240] sm:$0xff]  ;;  %v13217_v17 = vpack.c.bf16 %v1450_v20, %v1449_v27  ;;  %v13247_v27 = vpack.c.bf16 %v1456_v6, %v1455_v32 }
 0x279   :  { %v1487_v23 = vpack.c.bf16 %v1440_v30, %v1439_v8  ;;  %v1452_v8 = vld [vmem:[#allocation2 + $0x248] sm:$0xff] }
 0x27a   :  { %v13219_v19 = vpack.c.bf16 %v1452_v8, %v1451_v3 }
 0x27e   :  { %9961 = vmatmul.mubr.msk.bf16.gmra.mxu1 %vm560_vm1, %v13141_v44 }
 0x27f   :  { %10165 = vmatmul.mubr.msk.bf16.gmra.mxu0 %vm560_vm1, %v12960_v63  ;;  %9964 = vmatprep.mubr.msk.bf16.mxu1 %vm560_vm1, %v13143_v61  ;;  %v1441_v63 = vld [vmem:[#allocation2 + $0x1c8] sm:$0xff] }
 0x280   :  { %10168 = vmatprep.mubr.msk.bf16.mxu0 %vm560_vm1, %v12968_v13  ;;  %v1442_v13 = vld [vmem:[#allocation2 + $0x1d0] sm:$0xff] }
 0x281   :  { %v13161_v26 = vpack.c.bf16 %v1442_v13, %v1441_v63  ;;  %v1453_v63 = vld [vmem:[#allocation2 + $0x258] sm:$0xff]  ;;  %v1454_v13 = vld [vmem:[#allocation2 + $0x260] sm:$0xff] }
 0x282   :  { %v13245_v39 = vpack.c.bf16 %v1454_v13, %v1453_v63  ;;  %v1457_v63 = vld [vmem:[#allocation2 + $0x288] sm:$0xff]  ;;  %v1458_v13 = vld [vmem:[#allocation2 + $0x290] sm:$0xff] }
 0x286   :  { %9965 = vmatmul.mubr.msk.bf16.gmra.mxu1 %vm560_vm1, %v13153_v24 }
 0x287   :  { %10169 = vmatmul.mubr.msk.bf16.gmra.mxu0 %vm560_vm1, %v3605_v49  ;;  %9968 = vmatprep.mubr.msk.bf16.mxu1 %vm560_vm1, %v1487_v23 }
 0x288   :  { %10172 = vmatprep.mubr.msk.bf16.mxu0 %vm560_vm1, %v12975_v41 }
 0x28e   :  { %v13165_v38 = vpop.f32.mrf.mxu1  ;;  %9969 = vmatmul.mubr.msk.bf16.gmra.mxu1 %vm560_vm1, %v13161_v26 }
 0x28f   :  { %v13169_v47 = vpop.f32.mrf.mxu0  ;;  %10173 = vmatmul.mubr.msk.bf16.gmra.mxu0 %vm560_vm1, %v12977_v7  ;;  %9972 = vmatprep.mubr.msk.bf16.mxu1 %vm560_vm1, %v13163_v52 }
 0x290   :  { %10176 = vmatprep.mubr.msk.bf16.mxu0 %vm560_vm1, %v12985_v28  ;;  %v13177_v41 = vpop.f32.mrf.mxu1 }
 0x291   :  { %v13179_v29 = vpop.f32.mrf.mxu0 }
 0x292   :  { %v13181_v35 = vpop.f32.mrf.mxu1 }
 0x293   :  { %v13183_v58 = vpop.f32.mrf.mxu0 }
 0x294   :  { %v13185_v43 = vpop.f32.mrf.mxu1 }
 0x295   :  { %v13187_v7 = vpop.f32.mrf.mxu0 }
 0x296   :  { %v13193_v28 = vpop.f32.mrf.mxu1  ;;  %9973 = vmatmul.mubr.msk.bf16.gmra.mxu1 %vm560_vm1, %v13189_v0 }
 0x297   :  { %v13197_v10 = vpop.f32.mrf.mxu0  ;;  %10177 = vmatmul.mubr.msk.bf16.gmra.mxu0 %vm560_vm1, %v12987_v21  ;;  %9976 = vmatprep.mubr.msk.bf16.mxu1 %vm560_vm1, %v13191_v36 }
 0x298   :  { %10180 = vmatprep.mubr.msk.bf16.mxu0 %vm560_vm1, %v12995_v56  ;;  %v13205_v50 = vpop.f32.mrf.mxu1 }
 0x299   :  { %v13207_v57 = vpop.f32.mrf.mxu0 }
 0x29a   :  { %v13209_v12 = vpop.f32.mrf.mxu1 }
 0x29b   :  { %v13211_v62 = vpop.f32.mrf.mxu0 }
 0x29c   :  { %v13213_v30 = vpop.f32.mrf.mxu1 }
 0x29d   :  { %v13215_v21 = vpop.f32.mrf.mxu0 }
 0x29e   :  { %v13221_v56 = vpop.f32.mrf.mxu1  ;;  %9977 = vmatmul.mubr.msk.bf16.gmra.mxu1 %vm560_vm1, %v13217_v17 }
 0x29f   :  { %v13225_v45 = vpop.f32.mrf.mxu0  ;;  %10181 = vmatmul.mubr.msk.bf16.gmra.mxu0 %vm560_vm1, %v12997_v5  ;;  %9980 = vmatprep.mubr.msk.bf16.mxu1 %vm560_vm1, %v13219_v19 }
 0x2a0   :  { %10184 = vmatprep.mubr.msk.bf16.mxu0 %vm560_vm1, %v13005_v22  ;;  %v13233_v23 = vpop.f32.mrf.mxu1 }
 0x2a1   :  { %v13235_v49 = vpop.f32.mrf.mxu0 }
 0x2a2   :  { %19749 = vst [vmem:[#allocation66_spill] sm:$0xff] %v13235_v49  ;;  %v13237_v55 = vpop.f32.mrf.mxu1 }
 0x2a3   :  { %v13239_v60 = vpop.f32.mrf.mxu0 }
 0x2a4   :  { %19750 = vst [vmem:[#allocation65_spill] sm:$0xff] %v13239_v60  ;;  %v13241_v51 = vpop.f32.mrf.mxu1 }
 0x2a5   :  { %v13243_v5 = vpop.f32.mrf.mxu0 }
 0x2a6   :  { %19751 = vst [vmem:[#allocation67_spill] sm:$0xff] %v13243_v5  ;;  %v13249_v22 = vpop.f32.mrf.mxu1  ;;  %9981 = vmatmul.mubr.msk.bf16.gmra.mxu1 %vm560_vm1, %v13245_v39  ;;  %v1460_v5 = vld [vmem:[#allocation2 + $0x2a8] sm:$0xff] }
 0x2a7   :  { %19752 = vst [vmem:[#allocation39_spill] sm:$0xff] %v13249_v22  ;;  %v13253_v20 = vpop.f32.mrf.mxu0  ;;  %10185 = vmatmul.mubr.msk.bf16.gmra.mxu0 %vm560_vm1, %v13007_v37  ;;  %9984 = vmatprep.mubr.msk.bf16.mxu1 %vm560_vm1, %v13247_v27  ;;  %v13273_v22 = vpack.c.bf16 %v1458_v13, %v1457_v63  ;;  %v1462_v13 = vld [vmem:[#allocation2 + $0x2c0] sm:$0xff] }
 0x2a8   :  { %19753 = vst [vmem:[#allocation41_spill] sm:$0xff] %v13253_v20  ;;  %10188 = vmatprep.mubr.msk.bf16.mxu0 %vm560_vm1, %v13015_v1  ;;  %v13261_v3 = vpop.f32.mrf.mxu1  ;;  %v1459_v20 = vld [vmem:[#allocation2 + $0x2a0] sm:$0xff] }
 0x2a9   :  { %19754 = vst [vmem:[#allocation43_spill] sm:$0xff] %v13261_v3  ;;  %v13263_v8 = vpop.f32.mrf.mxu0  ;;  %v13275_v49 = vpack.c.bf16 %v1460_v5, %v1459_v20  ;;  %v1461_v20 = vld [vmem:[#allocation2 + $0x2b8] sm:$0xff] }
 0x2aa   :  { %19755 = vst [vmem:[#allocation40_spill] sm:$0xff] %v13263_v8  ;;  %v13265_v32 = vpop.f32.mrf.mxu1 }
 0x2ab   :  { %19756 = vst [vmem:[#allocation42_spill] sm:$0xff] %v13265_v32  ;;  %v13267_v6 = vpop.f32.mrf.mxu0  ;;  %v13301_v32 = vpack.c.bf16 %v1462_v13, %v1461_v20  ;;  %v1466_v13 = vld [vmem:[#allocation2 + $0x2f0] sm:$0xff] }
 0x2ac   :  { %19757 = vst [vmem:[#allocation45_spill] sm:$0xff] %v13267_v6  ;;  %v13269_v60 = vpop.f32.mrf.mxu1 }
 0x2ad   :  { %19758 = vst [vmem:[#allocation47_spill] sm:$0xff] %v13269_v60  ;;  %v13271_v37 = vpop.f32.mrf.mxu0 }
 0x2ae   :  { %19759 = vst [vmem:[#allocation44_spill] sm:$0xff] %v13271_v37  ;;  %v13277_v1 = vpop.f32.mrf.mxu1  ;;  %9985 = vmatmul.mubr.msk.bf16.gmra.mxu1 %vm560_vm1, %v13273_v22 }
 0x2af   :  { %19760 = vst [vmem:[#allocation46_spill] sm:$0xff] %v13277_v1  ;;  %v13281_v8 = vpop.f32.mrf.mxu0  ;;  %10189 = vmatmul.mubr.msk.bf16.gmra.mxu0 %vm560_vm1, %v13017_v46  ;;  %9988 = vmatprep.mubr.msk.bf16.mxu1 %vm560_vm1, %v13275_v49  ;;  %v1464_v1 = vld [vmem:[#allocation2 + $0x2d8] sm:$0xff] }
 0x2b0   :  { %19761 = vst [vmem:[#allocation38_spill] sm:$0xff] %v13281_v8  ;;  %10192 = vmatprep.mubr.msk.bf16.mxu0 %vm560_vm1, %v13025_v33  ;;  %v13289_v63 = vpop.f32.mrf.mxu1  ;;  %v1463_v8 = vld [vmem:[#allocation2 + $0x2d0] sm:$0xff] }
 0x2b1   :  { %19762 = vst [vmem:[#allocation49_spill] sm:$0xff] %v13289_v63  ;;  %v13291_v5 = vpop.f32.mrf.mxu0  ;;  %v13303_v3 = vpack.c.bf16 %v1464_v1, %v1463_v8  ;;  %v1465_v1 = vld [vmem:[#allocation2 + $0x2e8] sm:$0xff] }
 0x2b2   :  { %19763 = vst [vmem:[#allocation51_spill] sm:$0xff] %v13291_v5  ;;  %v13293_v37 = vpop.f32.mrf.mxu1 }
 0x2b3   :  { %19764 = vst [vmem:[#allocation48_spill] sm:$0xff] %v13293_v37  ;;  %v13295_v6 = vpop.f32.mrf.mxu0  ;;  %v13329_v37 = vpack.c.bf16 %v1466_v13, %v1465_v1  ;;  %v1470_v13 = vld [vmem:[#allocation2 + $0x320] sm:$0xff] }
 0x2b4   :  { %19765 = vst [vmem:[#allocation50_spill] sm:$0xff] %v13295_v6  ;;  %v13297_v60 = vpop.f32.mrf.mxu1 }
 0x2b5   :  { %19766 = vst [vmem:[#allocation55_spill] sm:$0xff] %v13297_v60  ;;  %v13299_v46 = vpop.f32.mrf.mxu0 }
 0x2b6   :  { %19767 = vst [vmem:[#allocation52_spill] sm:$0xff] %v13299_v46  ;;  %v13305_v33 = vpop.f32.mrf.mxu1  ;;  %9989 = vmatmul.mubr.msk.bf16.gmra.mxu1 %vm560_vm1, %v13301_v32 }
 0x2b7   :  { %19768 = vst [vmem:[#allocation59_spill] sm:$0xff] %v13305_v33  ;;  %v13309_v5 = vpop.f32.mrf.mxu0  ;;  %10193 = vmatmul.mubr.msk.bf16.gmra.mxu0 %vm560_vm1, %v13027_v11  ;;  %9992 = vmatprep.mubr.msk.bf16.mxu1 %vm560_vm1, %v13303_v3  ;;  %v1468_v33 = vld [vmem:[#allocation2 + $0x308] sm:$0xff] }
 0x2b8   :  { %19769 = vst [vmem:[#allocation64_spill] sm:$0xff] %v13309_v5  ;;  %10196 = vmatprep.mubr.msk.bf16.mxu0 %vm560_vm1, %v13035_v4  ;;  %v13317_v20 = vpop.f32.mrf.mxu1  ;;  %v1467_v5 = vld [vmem:[#allocation2 + $0x300] sm:$0xff] }
 0x2b9   :  { %19770 = vst [vmem:[#allocation53_spill] sm:$0xff] %v13317_v20  ;;  %v13319_v8 = vpop.f32.mrf.mxu0  ;;  %v13331_v63 = vpack.c.bf16 %v1468_v33, %v1467_v5  ;;  %v1469_v33 = vld [vmem:[#allocation2 + $0x318] sm:$0xff] }
 0x2ba   :  { %19771 = vst [vmem:[#allocation54_spill] sm:$0xff] %v13319_v8  ;;  %v13321_v46 = vpop.f32.mrf.mxu1 }
 0x2bb   :  { %19772 = vst [vmem:[#allocation57_spill] sm:$0xff] %v13321_v46  ;;  %v13323_v6 = vpop.f32.mrf.mxu0  ;;  %v13357_v46 = vpack.c.bf16 %v1470_v13, %v1469_v33  ;;  %v10638_v33 = vld [vmem:[%s19283_s4 + $0x88] sm:$0xff]  }
 0x2bc   :  { %19773 = vst [vmem:[#allocation56_spill] sm:$0xff] %v13323_v6  ;;  %v13325_v60 = vpop.f32.mrf.mxu1  ;;  %v3589_v6 = vld [vmem:[#allocation2 + $0x339] sm:$0xff]  ;;  %10408 = vmatprep.subr.bf16.mxu0 %v10638_v33 }
 0x2bd   :  { %19774 = vst [vmem:[#allocation58_spill] sm:$0xff] %v13325_v60  ;;  %v13327_v11 = vpop.f32.mrf.mxu0 }
 0x2be   :  { %19775 = vst [vmem:[#allocation62_spill] sm:$0xff] %v13327_v11  ;;  %v13333_v4 = vpop.f32.mrf.mxu1  ;;  %9993 = vmatmul.mubr.msk.bf16.gmra.mxu1 %vm560_vm1, %v13329_v37  ;;  %v3588_v11 = vld [vmem:[#allocation2 + $0x331] sm:$0xff] }
 0x2bf   :  { %19776 = vst [vmem:[#allocation61_spill] sm:$0xff] %v13333_v4  ;;  %v13337_v8 = vpop.f32.mrf.mxu0  ;;  %10197 = vmatmul.mubr.msk.bf16.gmra.mxu0 %vm560_vm1, %v13037_v34  ;;  %9996 = vmatprep.mubr.msk.bf16.mxu1 %vm560_vm1, %v13331_v63  ;;  %v3621_v20 = vpack.c.bf16 %v3589_v6, %v3588_v11 }
 0x2c0   :  { %19777 = vst [vmem:[#allocation63_spill] sm:$0xff] %v13337_v8  ;;  %10200 = vmatprep.mubr.msk.bf16.mxu0 %vm560_vm1, %v13045_v18  ;;  %v13345_v1 = vpop.f32.mrf.mxu1 }
 0x2c1   :  { %19778 = vst [vmem:[#allocation60_spill] sm:$0xff] %v13345_v1  ;;  %v13347_v5 = vpop.f32.mrf.mxu0 }
 0x2c2   :  { %19779 = vst [vmem:[#allocation68_spill] sm:$0xff] %v13347_v5  ;;  %v13349_v4 = vpop.f32.mrf.mxu1 }
 0x2c3   :  { %19780 = vst [vmem:[#allocation69_spill] sm:$0xff] %v13349_v4  ;;  %v13351_v8 = vpop.f32.mrf.mxu0 }
 0x2c4   :  { %19781 = vst [vmem:[#allocation70_spill] sm:$0xff] %v13351_v8  ;;  %v13353_v60 = vpop.f32.mrf.mxu1 }
 0x2c5   :  { %19782 = vst [vmem:[#allocation71_spill] sm:$0xff] %v13353_v60  ;;  %v13355_v34 = vpop.f32.mrf.mxu0 }
 0x2c6   :  { %19783 = vst [vmem:[#allocation72_spill] sm:$0xff] %v13355_v34  ;;  %v13359_v18 = vpop.f32.mrf.mxu1  ;;  %9997 = vmatmul.mubr.msk.bf16.gmra.mxu1 %vm560_vm1, %v13357_v46 }
 0x2c7   :  { %19784 = vst [vmem:[#allocation73_spill] sm:$0xff] %v13359_v18  ;;  %v13363_v5 = vpop.f32.mrf.mxu0  ;;  %10201 = vmatmul.mubr.msk.bf16.gmra.mxu0 %vm560_vm1, %v3621_v20  ;;  %10072 = vmatprep.mubr.msk.bf16.mxu1 %vm560_vm1, %v13056_v59  ;;  %v10637_v59 = vld [vmem:[%s19283_s4 + $0x50] sm:$0xff]  }
 0x2c8   :  { %19785 = vst [vmem:[#allocation74_spill] sm:$0xff] %v13363_v5  ;;  %10276 = vmatprep.mubr.msk.bf16.mxu0 %vm560_vm1, %v13061_v48  ;;  %v13373_v6 = vpop.f32.mrf.mxu1 }
 0x2c9   :  { %19786 = vst [vmem:[#allocation75_spill] sm:$0xff] %v13373_v6  ;;  %v13375_v11 = vpop.f32.mrf.mxu0 }
 0x2ca   :  { %19787 = vst [vmem:[#allocation76_spill] sm:$0xff] %v13375_v11  ;;  %v13377_v13 = vpop.f32.mrf.mxu1 }
 0x2cb   :  { %19788 = vst [vmem:[#allocation77_spill] sm:$0xff] %v13377_v13  ;;  %v13379_v5 = vpop.f32.mrf.mxu0  ;;  %v5776_v13 = vld [vmem:[#allocation2 + $0x3a] sm:$0xff] }
 0x2cc   :  { %19789 = vst [vmem:[#allocation78_spill] sm:$0xff] %v13379_v5  ;;  %v13381_v20 = vpop.f32.mrf.mxu1  ;;  %v10639_v5 = vld [vmem:[%s19283_s4 + $0x80] sm:$0xff]  }
 0x2cd   :  { %19790 = vst [vmem:[#allocation79_spill] sm:$0xff] %v13381_v20  ;;  %v13383_v34 = vpop.f32.mrf.mxu0  ;;  %v5775_v20 = vld [vmem:[#allocation2 + $0x32] sm:$0xff] }
 0x2ce   :  { %19791 = vst [vmem:[#allocation80_spill] sm:$0xff] %v13383_v34  ;;  %v13388_v8 = vpop.f32.mrf.mxu1  ;;  %10073 = vmatmul.mubr.msk.bf16.vlgmr.msra.gmra.mxu1 %vm560_vm1, %v13061_v48  ;;  %v13411_v48 = vld [vmem:[%s19283_s4 + $0x78] sm:$0xff]   ;;  %v5839_v4 = vpack.c.bf16 %v5776_v13, %v5775_v20  ;;  %v5779_v20 = vld [vmem:[#allocation2 + $0x62] sm:$0xff] }
 0x2cf   :  { %19792 = vst [vmem:[#allocation81_spill] sm:$0xff] %v13388_v8  ;;  %v13390_v18 = vpop.f32.mrf.mxu0  ;;  %10277 = vmatmul.mubr.msk.bf16.vlgmr.msra.gmra.mxu0 %vm560_vm1, %v13080_v53  ;;  %10205 = vmatpush3.bf16.msra.mxu1 %v13078_v31 }
 0x2d0   :  { %19793 = vst [vmem:[#allocation82_spill] sm:$0xff] %v13390_v18  ;;  %10076 = vmatprep.mubr.msk.bf16.mxu1 %vm560_vm1, %v13080_v53  ;;  %10280 = vmatprep.mubr.msk.bf16.mxu0 %vm560_vm1, %v13083_v2  ;;  %v13404_v34 = vpop.f32.mrf.mxu1 }
 0x2d1   :  { %19794 = vst [vmem:[#allocation83_spill] sm:$0xff] %v13404_v34  ;;  %v13406_v18 = vpop.f32.mrf.mxu0  ;;  %10206 = vmatprep.subr.bf16.mxu1 %v10637_v59  ;;  %10409 = vmatpush3.bf16.msra.mxu0 %v10638_v33 }
 0x2d2   :  { %19795 = vst [vmem:[#allocation84_spill] sm:$0xff] %v13406_v18  ;;  %v13413_v8 = vpop.f32.mrf.mxu1  ;;  %10410 = vmatprep.subr.bf16.mxu0 %v10639_v5 }
 0x2d3   :  { %19796 = vst [vmem:[#allocation85_spill] sm:$0xff] %v13413_v8  ;;  %v13415_v31 = vpop.f32.mrf.mxu0  ;;  %10207 = vmatpush3.bf16.msra.mxu1 %v10637_v59  ;;  %v4089_v8 = vld [vmem:[#allocation2 + $0x22] sm:$0xff] }
 0x2d4   :  { %19797 = vst [vmem:[#allocation86_spill] sm:$0xff] %v13415_v31  ;;  %v13417_v53 = vpop.f32.mrf.mxu1  ;;  %10340 = vmatprep.subr.bf16.mxu1 %v13411_v48 }
 0x2d5   :  { %19798 = vst [vmem:[#allocation87_spill] sm:$0xff] %v13417_v53  ;;  %v13419_v11 = vpop.f32.mrf.mxu0  ;;  %10411 = vmatpush3.bf16.msra.mxu0 %v10639_v5 }
 0x2d6   :  { %19799 = vst [vmem:[#allocation88_spill] sm:$0xff] %v13419_v11  ;;  %v13422_v18 = vpop.f32.mrf.mxu1  ;;  %10077 = vmatmul.mubr.msk.bf16.gmra.mxu1 %vm560_vm1, %v13083_v2 }
 0x2d7   :  { %19800 = vst [vmem:[#allocation89_spill] sm:$0xff] %v13422_v18  ;;  %v13424_v34 = vpop.f32.mrf.mxu0  ;;  %10281 = vmatmul.mubr.msk.bf16.gmra.mxu0 %vm560_vm1, %v13093_v9  ;;  %10080 = vmatprep.mubr.msk.bf16.mxu1 %vm560_vm1, %v13093_v9 }
 0x2d8   :  { %19801 = vst [vmem:[#allocation90_spill] sm:$0xff] %v13424_v34  ;;  %10284 = vmatprep.mubr.msk.bf16.mxu0 %vm560_vm1, %v13095_v42  ;;  %v13434_v33 = vpop.f32.mrf.mxu1 }
 0x2d9   :  { %19802 = vst [vmem:[#allocation91_spill] sm:$0xff] %v13434_v33  ;;  %v13436_v59 = vpop.f32.mrf.mxu0 }
 0x2da   :  { %19803 = vst [vmem:[#allocation92_spill] sm:$0xff] %v13436_v59  ;;  %v13438_v5 = vpop.f32.mrf.mxu1 }
 0x2db   :  { %19804 = vst [vmem:[#allocation93_spill] sm:$0xff] %v13438_v5  ;;  %v13440_v11 = vpop.f32.mrf.mxu0 }
 0x2dc   :  { %19805 = vst [vmem:[#allocation94_spill] sm:$0xff] %v13440_v11  ;;  %v13442_v34 = vpop.f32.mrf.mxu1 }
 0x2dd   :  { %19806 = vst [vmem:[#allocation95_spill] sm:$0xff] %v13442_v34  ;;  %v13444_v2 = vpop.f32.mrf.mxu0 }
 0x2de   :  { %19807 = vst [vmem:[#allocation96_spill] sm:$0xff] %v13444_v2  ;;  %v13446_v31 = vpop.f32.mrf.mxu1  ;;  %10081 = vmatmul.mubr.msk.bf16.gmra.mxu1 %vm560_vm1, %v13095_v42 }
 0x2df   :  { %19808 = vst [vmem:[#allocation97_spill] sm:$0xff] %v13446_v31  ;;  %v13448_v18 = vpop.f32.mrf.mxu0  ;;  %10285 = vmatmul.mubr.msk.bf16.gmra.mxu0 %vm560_vm1, %v13105_v40  ;;  %10084 = vmatprep.mubr.msk.bf16.mxu1 %vm560_vm1, %v13105_v40 }
 0x2e0   :  { %19809 = vst [vmem:[#allocation98_spill] sm:$0xff] %v13448_v18  ;;  %10288 = vmatprep.mubr.msk.bf16.mxu0 %vm560_vm1, %v13107_v15  ;;  %v13458_v9 = vpop.f32.mrf.mxu1 }
 0x2e1   :  { %19810 = vst [vmem:[#allocation99_spill] sm:$0xff] %v13458_v9  ;;  %v13460_v11 = vpop.f32.mrf.mxu0 }
 0x2e2   :  { %19811 = vst [vmem:[#allocation100_spill] sm:$0xff] %v13460_v11  ;;  %v13462_v2 = vpop.f32.mrf.mxu1 }
 0x2e3   :  { %19812 = vst [vmem:[#allocation101_spill] sm:$0xff] %v13462_v2  ;;  %v13464_v31 = vpop.f32.mrf.mxu0  ;;  %v4712_v2 = vld [vmem:[#allocation2 + $0x338] sm:$0xff] }
 0x2e4   :  { %19813 = vst [vmem:[#allocation102_spill] sm:$0xff] %v13464_v31  ;;  %v13466_v18 = vpop.f32.mrf.mxu1 }
 0x2e5   :  { %19814 = vst [vmem:[#allocation103_spill] sm:$0xff] %v13466_v18  ;;  %v13468_v42 = vpop.f32.mrf.mxu0 }
 0x2e6   :  { %19815 = vst [vmem:[#allocation104_spill] sm:$0xff] %v13468_v42  ;;  %v13470_v59 = vpop.f32.mrf.mxu1  ;;  %10085 = vmatmul.mubr.msk.bf16.gmra.mxu1 %vm560_vm1, %v13107_v15 }
 0x2e7   :  { %19816 = vst [vmem:[#allocation105_spill] sm:$0xff] %v13470_v59  ;;  %v13472_v34 = vpop.f32.mrf.mxu0  ;;  %10289 = vmatmul.mubr.msk.bf16.gmra.mxu0 %vm560_vm1, %v13117_v25  ;;  %10088 = vmatprep.mubr.msk.bf16.mxu1 %vm560_vm1, %v13117_v25 }
 0x2e8   :  { %19817 = vst [vmem:[#allocation106_spill] sm:$0xff] %v13472_v34  ;;  %10292 = vmatprep.mubr.msk.bf16.mxu0 %vm560_vm1, %v13119_v16  ;;  %v13482_v40 = vpop.f32.mrf.mxu1 }
 0x2e9   :  { %19818 = vst [vmem:[#allocation107_spill] sm:$0xff] %v13482_v40  ;;  %v13484_v31 = vpop.f32.mrf.mxu0 }
 0x2ea   :  { %19819 = vst [vmem:[#allocation108_spill] sm:$0xff] %v13484_v31  ;;  %v13486_v42 = vpop.f32.mrf.mxu1 }
 0x2eb   :  { %19820 = vst [vmem:[#allocation109_spill] sm:$0xff] %v13486_v42  ;;  %v13488_v59 = vpop.f32.mrf.mxu0 }
 0x2ec   :  { %19821 = vst [vmem:[#allocation110_spill] sm:$0xff] %v13488_v59  ;;  %v13490_v34 = vpop.f32.mrf.mxu1 }
 0x2ed   :  { %19822 = vst [vmem:[#allocation111_spill] sm:$0xff] %v13490_v34  ;;  %v13492_v15 = vpop.f32.mrf.mxu0 }
 0x2ee   :  { %19823 = vst [vmem:[#allocation112_spill] sm:$0xff] %v13492_v15  ;;  %v13494_v11 = vpop.f32.mrf.mxu1  ;;  %10089 = vmatmul.mubr.msk.bf16.gmra.mxu1 %vm560_vm1, %v13119_v16 }
 0x2ef   :  { %19824 = vst [vmem:[#allocation113_spill] sm:$0xff] %v13494_v11  ;;  %v13496_v18 = vpop.f32.mrf.mxu0  ;;  %10293 = vmatmul.mubr.msk.bf16.gmra.mxu0 %vm560_vm1, %v13129_v14  ;;  %10092 = vmatprep.mubr.msk.bf16.mxu1 %vm560_vm1, %v13129_v14 }
 0x2f0   :  { %19825 = vst [vmem:[#allocation114_spill] sm:$0xff] %v13496_v18  ;;  %10296 = vmatprep.mubr.msk.bf16.mxu0 %vm560_vm1, %v13131_v54  ;;  %v13506_v25 = vpop.f32.mrf.mxu1 }
 0x2f1   :  { %19826 = vst [vmem:[#allocation115_spill] sm:$0xff] %v13506_v25  ;;  %v13508_v59 = vpop.f32.mrf.mxu0 }
 0x2f2   :  { %19827 = vst [vmem:[#allocation116_spill] sm:$0xff] %v13508_v59  ;;  %v13510_v15 = vpop.f32.mrf.mxu1  ;;  %v4680_v59 = vld [vmem:[#allocation2 + $0x188] sm:$0xff] }
 0x2f3   :  { %19828 = vst [vmem:[#allocation117_spill] sm:$0xff] %v13510_v15  ;;  %v13512_v11 = vpop.f32.mrf.mxu0 }
 0x2f4   :  { %19829 = vst [vmem:[#allocation118_spill] sm:$0xff] %v13512_v11  ;;  %v13514_v18 = vpop.f32.mrf.mxu1 }
 0x2f5   :  { %19830 = vst [vmem:[#allocation119_spill] sm:$0xff] %v13514_v18  ;;  %v13516_v16 = vpop.f32.mrf.mxu0 }
 0x2f6   :  { %19831 = vst [vmem:[#allocation120_spill] sm:$0xff] %v13516_v16  ;;  %v13518_v31 = vpop.f32.mrf.mxu1  ;;  %10093 = vmatmul.mubr.msk.bf16.gmra.mxu1 %vm560_vm1, %v13131_v54 }
 0x2f7   :  { %19832 = vst [vmem:[#allocation121_spill] sm:$0xff] %v13518_v31  ;;  %v13520_v34 = vpop.f32.mrf.mxu0  ;;  %10297 = vmatmul.mubr.msk.bf16.gmra.mxu0 %vm560_vm1, %v13141_v44  ;;  %10096 = vmatprep.mubr.msk.bf16.mxu1 %vm560_vm1, %v13141_v44 }
 0x2f8   :  { %19833 = vst [vmem:[#allocation122_spill] sm:$0xff] %v13520_v34  ;;  %10300 = vmatprep.mubr.msk.bf16.mxu0 %vm560_vm1, %v13143_v61  ;;  %v13530_v14 = vpop.f32.mrf.mxu1  ;;  %v4679_v34 = vld [vmem:[#allocation2 + $0x180] sm:$0xff] }
 0x2f9   :  { %19834 = vst [vmem:[#allocation123_spill] sm:$0xff] %v13530_v14  ;;  %v13532_v11 = vpop.f32.mrf.mxu0  ;;  %v4729_v15 = vpack.c.bf16 %v4680_v59, %v4679_v34 }
 0x2fa   :  { %19835 = vst [vmem:[#allocation124_spill] sm:$0xff] %v13532_v11  ;;  %v13534_v16 = vpop.f32.mrf.mxu1  ;;  %v4682_v11 = vld [vmem:[#allocation2 + $0x1a0] sm:$0xff] }
 0x2fb   :  { %19836 = vst [vmem:[#allocation125_spill] sm:$0xff] %v13534_v16  ;;  %v13536_v31 = vpop.f32.mrf.mxu0 }
 0x2fc   :  { %19837 = vst [vmem:[#allocation126_spill] sm:$0xff] %v13536_v31  ;;  %v13538_v54 = vpop.f32.mrf.mxu1  ;;  %v4681_v31 = vld [vmem:[#allocation2 + $0x198] sm:$0xff] }
 0x2fd   :  { %19838 = vst [vmem:[#allocation127_spill] sm:$0xff] %v13538_v54  ;;  %v13540_v18 = vpop.f32.mrf.mxu0 }
 0x2fe   :  { %19839 = vst [vmem:[#allocation128_spill] sm:$0xff] %v13540_v18  ;;  %v13542_v25 = vpop.f32.mrf.mxu1  ;;  %10097 = vmatmul.mubr.msk.bf16.gmra.mxu1 %vm560_vm1, %v13143_v61  ;;  %v4730_v18 = vpack.c.bf16 %v4682_v11, %v4681_v31 }
 0x2ff   :  { %19840 = vst [vmem:[#allocation129_spill] sm:$0xff] %v13542_v25  ;;  %v13544_v44 = vpop.f32.mrf.mxu0  ;;  %10301 = vmatmul.mubr.msk.bf16.gmra.mxu0 %vm560_vm1, %v13153_v24  ;;  %10100 = vmatprep.mubr.msk.bf16.mxu1 %vm560_vm1, %v13153_v24 }
 0x300   :  { %19841 = vst [vmem:[#allocation130_spill] sm:$0xff] %v13544_v44  ;;  %10304 = vmatprep.mubr.msk.bf16.mxu0 %vm560_vm1, %v4729_v15  ;;  %v13553_v54 = vpop.f32.mrf.mxu1 }
 0x301   :  { %19842 = vst [vmem:[#allocation131_spill] sm:$0xff] %v13553_v54  ;;  %v13555_v34 = vpop.f32.mrf.mxu0 }
 0x302   :  { %19843 = vst [vmem:[#allocation132_spill] sm:$0xff] %v13555_v34  ;;  %v13557_v59 = vpop.f32.mrf.mxu1 }
 0x303   :  { %19844 = vst [vmem:[#allocation133_spill] sm:$0xff] %v13557_v59  ;;  %v13559_v44 = vpop.f32.mrf.mxu0 }
 0x304   :  { %19845 = vst [vmem:[#allocation134_spill] sm:$0xff] %v13559_v44  ;;  %v13561_v61 = vpop.f32.mrf.mxu1 }
 0x305   :  { %19846 = vst [vmem:[#allocation135_spill] sm:$0xff] %v13561_v61  ;;  %v13563_v25 = vpop.f32.mrf.mxu0 }
 0x306   :  { %19847 = vst [vmem:[#allocation136_spill] sm:$0xff] %v13563_v25  ;;  %v13565_v16 = vpop.f32.mrf.mxu1  ;;  %10101 = vmatmul.mubr.msk.bf16.gmra.mxu1 %vm560_vm1, %v4729_v15 }
 0x307   :  { %19848 = vst [vmem:[#allocation137_spill] sm:$0xff] %v13565_v16  ;;  %v13567_v24 = vpop.f32.mrf.mxu0  ;;  %10305 = vmatmul.mubr.msk.bf16.gmra.mxu0 %vm560_vm1, %v4730_v18  ;;  %10104 = vmatprep.mubr.msk.bf16.mxu1 %vm560_vm1, %v13161_v26 }
 0x308   :  { %19849 = vst [vmem:[#allocation138_spill] sm:$0xff] %v13567_v24  ;;  %10308 = vmatprep.mubr.msk.bf16.mxu0 %vm560_vm1, %v13163_v52  ;;  %v13575_v44 = vpop.f32.mrf.mxu1 }
 0x309   :  { %19850 = vst [vmem:[#allocation139_spill] sm:$0xff] %v13575_v44  ;;  %v13577_v11 = vpop.f32.mrf.mxu0 }
 0x30a   :  { %19851 = vst [vmem:[#allocation140_spill] sm:$0xff] %v13577_v11  ;;  %v13579_v31 = vpop.f32.mrf.mxu1 }
 0x30b   :  { %19852 = vst [vmem:[#allocation141_spill] sm:$0xff] %v13579_v31  ;;  %v13581_v25 = vpop.f32.mrf.mxu0 }
 0x30c   :  { %19853 = vst [vmem:[#allocation142_spill] sm:$0xff] %v13581_v25  ;;  %v13583_v16 = vpop.f32.mrf.mxu1 }
 0x30d   :  { %19854 = vst [vmem:[#allocation143_spill] sm:$0xff] %v13583_v16  ;;  %v13585_v24 = vpop.f32.mrf.mxu0 }
 0x30e   :  { %19855 = vst [vmem:[#allocation144_spill] sm:$0xff] %v13585_v24  ;;  %v13587_v15 = vpop.f32.mrf.mxu1  ;;  %10105 = vmatmul.mubr.msk.bf16.gmra.mxu1 %vm560_vm1, %v13163_v52 }
 0x30f   :  { %v13591_v26 = vpop.f32.mrf.mxu0  ;;  %10309 = vmatmul.mubr.msk.bf16.gmra.mxu0 %vm560_vm1, %v13189_v0  ;;  %10108 = vmatprep.mubr.msk.bf16.mxu1 %vm560_vm1, %v13189_v0 }
 0x310   :  { %19856 = vst [vmem:[#allocation145_spill] sm:$0xff] %v13591_v26  ;;  %10312 = vmatprep.mubr.msk.bf16.mxu0 %vm560_vm1, %v13191_v36  ;;  %v13599_v18 = vpop.f32.mrf.mxu1 }
 0x311   :  { %v13601_v25 = vpop.f32.mrf.mxu0 }
 0x312   :  { %19857 = vst [vmem:[#allocation146_spill] sm:$0xff] %v13601_v25  ;;  %v13603_v24 = vpop.f32.mrf.mxu1 }
 0x313   :  { %v13605_v11 = vpop.f32.mrf.mxu0 }
 0x314   :  { %19858 = vst [vmem:[#allocation147_spill] sm:$0xff] %v13605_v11  ;;  %v13607_v52 = vpop.f32.mrf.mxu1 }
 0x315   :  { %v13609_v26 = vpop.f32.mrf.mxu0 }
 0x316   :  { %19859 = vst [vmem:[#allocation148_spill] sm:$0xff] %v13609_v26  ;;  %v13611_v16 = vpop.f32.mrf.mxu1  ;;  %10109 = vmatmul.mubr.msk.bf16.gmra.mxu1 %vm560_vm1, %v13191_v36 }
 0x317   :  { %v13615_v0 = vpop.f32.mrf.mxu0  ;;  %10313 = vmatmul.mubr.msk.bf16.gmra.mxu0 %vm560_vm1, %v13217_v17  ;;  %10112 = vmatprep.mubr.msk.bf16.mxu1 %vm560_vm1, %v13217_v17 }
 0x318   :  { %19860 = vst [vmem:[#allocation149_spill] sm:$0xff] %v13615_v0  ;;  %10316 = vmatprep.mubr.msk.bf16.mxu0 %vm560_vm1, %v13219_v19  ;;  %v13623_v11 = vpop.f32.mrf.mxu1 }
 0x319   :  { %v13625_v25 = vpop.f32.mrf.mxu0 }
 0x31a   :  { %19861 = vst [vmem:[#allocation150_spill] sm:$0xff] %v13625_v25  ;;  %v13627_v26 = vpop.f32.mrf.mxu1 }
 0x31b   :  { %v13629_v31 = vpop.f32.mrf.mxu0 }
 0x31c   :  { %19862 = vst [vmem:[#allocation151_spill] sm:$0xff] %v13629_v31  ;;  %v13631_v36 = vpop.f32.mrf.mxu1 }
 0x31d   :  { %v13633_v0 = vpop.f32.mrf.mxu0 }
 0x31e   :  { %19863 = vst [vmem:[#allocation152_spill] sm:$0xff] %v13633_v0  ;;  %v13635_v44 = vpop.f32.mrf.mxu1  ;;  %10113 = vmatmul.mubr.msk.bf16.gmra.mxu1 %vm560_vm1, %v13219_v19 }
 0x31f   :  { %v13639_v17 = vpop.f32.mrf.mxu0  ;;  %10317 = vmatmul.mubr.msk.bf16.gmra.mxu0 %vm560_vm1, %v13245_v39  ;;  %10116 = vmatprep.mubr.msk.bf16.mxu1 %vm560_vm1, %v13245_v39 }
 0x320   :  { %19864 = vst [vmem:[#allocation153_spill] sm:$0xff] %v13639_v17  ;;  %10320 = vmatprep.mubr.msk.bf16.mxu0 %vm560_vm1, %v13247_v27  ;;  %v13647_v31 = vpop.f32.mrf.mxu1 }
 0x321   :  { %v13649_v25 = vpop.f32.mrf.mxu0 }
 0x322   :  { %19865 = vst [vmem:[#allocation154_spill] sm:$0xff] %v13649_v25  ;;  %v13651_v0 = vpop.f32.mrf.mxu1 }
 0x323   :  { %v13653_v34 = vpop.f32.mrf.mxu0 }
 0x324   :  { %19866 = vst [vmem:[#allocation155_spill] sm:$0xff] %v13653_v34  ;;  %v13655_v19 = vpop.f32.mrf.mxu1 }
 0x325   :  { %v13657_v17 = vpop.f32.mrf.mxu0 }
 0x326   :  { %19867 = vst [vmem:[#allocation156_spill] sm:$0xff] %v13657_v17  ;;  %v13659_v61 = vpop.f32.mrf.mxu1  ;;  %10117 = vmatmul.mubr.msk.bf16.gmra.mxu1 %vm560_vm1, %v13247_v27 }
 0x327   :  { %v13663_v39 = vpop.f32.mrf.mxu0  ;;  %10321 = vmatmul.mubr.msk.bf16.gmra.mxu0 %vm560_vm1, %v13273_v22  ;;  %10120 = vmatprep.mubr.msk.bf16.mxu1 %vm560_vm1, %v13273_v22 }
 0x328   :  { %19868 = vst [vmem:[#allocation157_spill] sm:$0xff] %v13663_v39  ;;  %10324 = vmatprep.mubr.msk.bf16.mxu0 %vm560_vm1, %v13275_v49  ;;  %v13671_v34 = vpop.f32.mrf.mxu1 }
 0x329   :  { %v13673_v25 = vpop.f32.mrf.mxu0 }
 0x32a   :  { %19869 = vst [vmem:[#allocation158_spill] sm:$0xff] %v13673_v25  ;;  %v13675_v17 = vpop.f32.mrf.mxu1 }
 0x32b   :  { %v13677_v59 = vpop.f32.mrf.mxu0 }
 0x32c   :  { %19870 = vst [vmem:[#allocation159_spill] sm:$0xff] %v13677_v59  ;;  %v13679_v27 = vpop.f32.mrf.mxu1 }
 0x32d   :  { %v13681_v39 = vpop.f32.mrf.mxu0 }
 0x32e   :  { %19871 = vst [vmem:[#allocation160_spill] sm:$0xff] %v13681_v39  ;;  %v13683_v54 = vpop.f32.mrf.mxu1  ;;  %10121 = vmatmul.mubr.msk.bf16.gmra.mxu1 %vm560_vm1, %v13275_v49 }
 0x32f   :  { %v13687_v22 = vpop.f32.mrf.mxu0  ;;  %10325 = vmatmul.mubr.msk.bf16.gmra.mxu0 %vm560_vm1, %v13301_v32  ;;  %10124 = vmatprep.mubr.msk.bf16.mxu1 %vm560_vm1, %v13301_v32 }
 0x330   :  { %19872 = vst [vmem:[#allocation161_spill] sm:$0xff] %v13687_v22  ;;  %10328 = vmatprep.mubr.msk.bf16.mxu0 %vm560_vm1, %v13303_v3  ;;  %v13695_v59 = vpop.f32.mrf.mxu1 }
 0x331   :  { %v13697_v25 = vpop.f32.mrf.mxu0 }
 0x332   :  { %19873 = vst [vmem:[#allocation162_spill] sm:$0xff] %v13697_v25  ;;  %v13699_v39 = vpop.f32.mrf.mxu1 }
 0x333   :  { %v13701_v14 = vpop.f32.mrf.mxu0 }
 0x334   :  { %19874 = vst [vmem:[#allocation163_spill] sm:$0xff] %v13701_v14  ;;  %v13703_v49 = vpop.f32.mrf.mxu1 }
 0x335   :  { %v13705_v22 = vpop.f32.mrf.mxu0 }
 0x336   :  { %19875 = vst [vmem:[#allocation164_spill] sm:$0xff] %v13705_v22  ;;  %v13707_v42 = vpop.f32.mrf.mxu1  ;;  %10125 = vmatmul.mubr.msk.bf16.gmra.mxu1 %vm560_vm1, %v13303_v3  ;;  %v4711_v3 = vld [vmem:[#allocation2 + $0x330] sm:$0xff] }
 0x337   :  { %v13711_v32 = vpop.f32.mrf.mxu0  ;;  %10329 = vmatmul.mubr.msk.bf16.gmra.mxu0 %vm560_vm1, %v13329_v37  ;;  %10128 = vmatprep.mubr.msk.bf16.mxu1 %vm560_vm1, %v13329_v37  ;;  %v4745_v5 = vpack.c.bf16 %v4712_v2, %v4711_v3  ;;  %v4088_v3 = vld [vmem:[#allocation2 + $0x1a] sm:$0xff] }
 0x338   :  { %19876 = vst [vmem:[#allocation165_spill] sm:$0xff] %v13711_v32  ;;  %10332 = vmatprep.mubr.msk.bf16.mxu0 %vm560_vm1, %v13331_v63  ;;  %v13719_v14 = vpop.f32.mrf.mxu1  ;;  %v4152_v60 = vpack.c.bf16 %v4089_v8, %v4088_v3 }
 0x339   :  { %v13721_v25 = vpop.f32.mrf.mxu0 }
 0x33a   :  { %19877 = vst [vmem:[#allocation166_spill] sm:$0xff] %v13721_v25  ;;  %v13723_v22 = vpop.f32.mrf.mxu1  ;;  %v4714_v25 = vld [vmem:[#allocation2 + $0x350] sm:$0xff] }
 0x33b   :  { %v13725_v40 = vpop.f32.mrf.mxu0 }
 0x33c   :  { %19878 = vst [vmem:[#allocation167_spill] sm:$0xff] %v13725_v40  ;;  %v13727_v32 = vpop.f32.mrf.mxu1  ;;  %v4713_v40 = vld [vmem:[#allocation2 + $0x348] sm:$0xff] }
 0x33d   :  { %v13729_v9 = vpop.f32.mrf.mxu0 }
 0x33e   :  { %19879 = vst [vmem:[#allocation168_spill] sm:$0xff] %v13729_v9  ;;  %v13731_v33 = vpop.f32.mrf.mxu1  ;;  %10129 = vmatmul.mubr.msk.bf16.gmra.mxu1 %vm560_vm1, %v13331_v63 }
 0x33f   :  { %v13735_v37 = vpop.f32.mrf.mxu0  ;;  %10333 = vmatmul.mubr.msk.bf16.gmra.mxu0 %vm560_vm1, %v13357_v46  ;;  %10132 = vmatprep.mubr.msk.bf16.mxu1 %vm560_vm1, %v13357_v46 }
 0x340   :  { %19880 = vst [vmem:[#allocation169_spill] sm:$0xff] %v13735_v37  ;;  %10336 = vmatprep.mubr.msk.bf16.mxu0 %vm560_vm1, %v4745_v5  ;;  %v13742_v53 = vpop.f32.mrf.mxu1  ;;  %v4746_v37 = vpack.c.bf16 %v4714_v25, %v4713_v40 }
 0x341   :  { %v13744_v2 = vpop.f32.mrf.mxu0 }
 0x342   :  { %19881 = vst [vmem:[#allocation170_spill] sm:$0xff] %v13744_v2  ;;  %v13746_v9 = vpop.f32.mrf.mxu1 }
 0x343   :  { %19882 = vst [vmem:[#allocation171_spill] sm:$0xff] %v13746_v9  ;;  %v13748_v63 = vpop.f32.mrf.mxu0 }
 0x344   :  { %19883 = vst [vmem:[#allocation172_spill] sm:$0xff] %v13748_v63  ;;  %v13750_v6 = vpop.f32.mrf.mxu1  ;;  %v5777_v63 = vld [vmem:[#allocation2 + $0x4a] sm:$0xff] }
 0x345   :  { %19884 = vst [vmem:[#allocation173_spill] sm:$0xff] %v13750_v6  ;;  %v13752_v46 = vpop.f32.mrf.mxu0 }
 0x346   :  { %19885 = vst [vmem:[#allocation174_spill] sm:$0xff] %v13752_v46  ;;  %v13754_v1 = vpop.f32.mrf.mxu1  ;;  %10133 = vmatmul.mubr.msk.bf16.gmra.mxu1 %vm560_vm1, %v4745_v5  ;;  %v5778_v46 = vld [vmem:[#allocation2 + $0x52] sm:$0xff]  ;;  %v5780_v5 = vld [vmem:[#allocation2 + $0x6a] sm:$0xff] }
 0x347   :  { %19886 = vst [vmem:[#allocation175_spill] sm:$0xff] %v13754_v1  ;;  %v13757_v2 = vpop.f32.mrf.mxu0  ;;  %10337 = vmatmul.mubr.msk.bf16.gmra.mxu0 %vm560_vm1, %v4746_v37  ;;  %10208 = vmatprep.mubr.msk.bf16.mxu1 %vm560_vm1, %v4152_v60  ;;  %v5840_v37 = vpack.c.bf16 %v5778_v46, %v5777_v63  ;;  %v10641_v60 = vld [vmem:[%s19283_s4 + $0x70] sm:$0xff]  }
 0x348   :  { %19887 = vst [vmem:[#allocation176_spill] sm:$0xff] %v13757_v2  ;;  %10412 = vmatprep.mubr.msk.bf16.mxu0 %vm560_vm1, %v5839_v4  ;;  %v13762_v40 = vpop.f32.mrf.mxu1 }
 0x349   :  { %19888 = vst [vmem:[#allocation177_spill] sm:$0xff] %v13762_v40  ;;  %v13764_v25 = vpop.f32.mrf.mxu0 }
 0x34a   :  { %19889 = vst [vmem:[#allocation178_spill] sm:$0xff] %v13764_v25  ;;  %v13766_v8 = vpop.f32.mrf.mxu1 }
 0x34b   :  { %19890 = vst [vmem:[#allocation179_spill] sm:$0xff] %v13766_v8  ;;  %v13768_v13 = vpop.f32.mrf.mxu0  ;;  %v5784_v8 = vld [vmem:[#allocation2 + $0x9a] sm:$0xff] }
 0x34c   :  { %19891 = vst [vmem:[#allocation180_spill] sm:$0xff] %v13768_v13  ;;  %v13770_v3 = vpop.f32.mrf.mxu1  ;;  %v5841_v13 = vpack.c.bf16 %v5780_v5, %v5779_v20 }
 0x34d   :  { %19892 = vst [vmem:[#allocation181_spill] sm:$0xff] %v13770_v3  ;;  %v13772_v2 = vpop.f32.mrf.mxu0 }
 0x34e   :  { %19893 = vst [vmem:[#allocation182_spill] sm:$0xff] %v13772_v2  ;;  %v13777_v40 = vpop.f32.mrf.mxu1  ;;  %10209 = vmatmul.mubr.msk.bf16.vlgmr.msra.gmra.mxu1 %vm560_vm1, %v5839_v4  ;;  %v5781_v2 = vld [vmem:[#allocation2 + $0x7a] sm:$0xff]  ;;  %v5783_v4 = vld [vmem:[#allocation2 + $0x92] sm:$0xff] }
 0x34f   :  { %19894 = vst [vmem:[#allocation183_spill] sm:$0xff] %v13777_v40  ;;  %v13779_v25 = vpop.f32.mrf.mxu0  ;;  %10413 = vmatmul.mubr.msk.bf16.vlgmr.msra.gmra.mxu0 %vm560_vm1, %v5840_v37  ;;  %10341 = vmatpush3.bf16.msra.mxu1 %v13411_v48  ;;  %v5782_v40 = vld [vmem:[#allocation2 + $0x82] sm:$0xff] }
 0x350   :  { %19895 = vst [vmem:[#allocation184_spill] sm:$0xff] %v13779_v25  ;;  %10212 = vmatprep.mubr.msk.bf16.mxu1 %vm560_vm1, %v5840_v37  ;;  %10416 = vmatprep.mubr.msk.bf16.mxu0 %vm560_vm1, %v5841_v13  ;;  %v13786_v63 = vpop.f32.mrf.mxu1  ;;  %v5842_v5 = vpack.c.bf16 %v5782_v40, %v5781_v2  ;;  %v5843_v37 = vpack.c.bf16 %v5784_v8, %v5783_v4  ;;  %v5787_v8 = vld [vmem:[#allocation2 + $0xc2] sm:$0xff]  ;;  %v5788_v4 = vld [vmem:[#allocation2 + $0xca] sm:$0xff] }
 0x351   :  { %19896 = vst [vmem:[#allocation185_spill] sm:$0xff] %v13786_v63  ;;  %v13788_v46 = vpop.f32.mrf.mxu0  ;;  %10342 = vmatprep.subr.bf16.mxu1 %v10641_v60 }
 0x352   :  { %19897 = vst [vmem:[#allocation186_spill] sm:$0xff] %v13788_v46  ;;  %v13790_v3 = vpop.f32.mrf.mxu1  ;;  %v5785_v46 = vld [vmem:[#allocation2 + $0xaa] sm:$0xff] }
 0x353   :  { %19898 = vst [vmem:[#allocation187_spill] sm:$0xff] %v13790_v3  ;;  %v13792_v25 = vpop.f32.mrf.mxu0  ;;  %10343 = vmatpush3.bf16.msra.mxu1 %v10641_v60 }
 0x354   :  { %19899 = vst [vmem:[#allocation188_spill] sm:$0xff] %v13792_v25  ;;  %v13794_v20 = vpop.f32.mrf.mxu1 }
 0x355   :  { %19900 = vst [vmem:[#allocation189_spill] sm:$0xff] %v13794_v20  ;;  %v13796_v48 = vpop.f32.mrf.mxu0 }
 0x356   :  { %19901 = vst [vmem:[#allocation190_spill] sm:$0xff] %v13796_v48  ;;  %v13798_v1 = vpop.f32.mrf.mxu1  ;;  %10213 = vmatmul.mubr.msk.bf16.gmra.mxu1 %vm560_vm1, %v5841_v13  ;;  %v5786_v48 = vld [vmem:[#allocation2 + $0xb2] sm:$0xff] }
 0x357   :  { %19902 = vst [vmem:[#allocation191_spill] sm:$0xff] %v13798_v1  ;;  %v13800_v63 = vpop.f32.mrf.mxu0  ;;  %10417 = vmatmul.mubr.msk.bf16.gmra.mxu0 %vm560_vm1, %v5842_v5  ;;  %10216 = vmatprep.mubr.msk.bf16.mxu1 %vm560_vm1, %v5842_v5  ;;  %v5844_v1 = vpack.c.bf16 %v5786_v48, %v5785_v46  ;;  %v5845_v5 = vpack.c.bf16 %v5788_v4, %v5787_v8  ;;  %v5791_v8 = vld [vmem:[#allocation2 + $0xf2] sm:$0xff]  ;;  %v5792_v4 = vld [vmem:[#allocation2 + $0xfa] sm:$0xff] }
 0x358   :  { %19903 = vst [vmem:[#allocation192_spill] sm:$0xff] %v13800_v63  ;;  %10420 = vmatprep.mubr.msk.bf16.mxu0 %vm560_vm1, %v5843_v37  ;;  %v13806_v25 = vpop.f32.mrf.mxu1 }
 0x359   :  { %19904 = vst [vmem:[#allocation193_spill] sm:$0xff] %v13806_v25  ;;  %v13808_v60 = vpop.f32.mrf.mxu0 }
 0x35a   :  { %19905 = vst [vmem:[#allocation194_spill] sm:$0xff] %v13808_v60  ;;  %v13810_v2 = vpop.f32.mrf.mxu1 }
 0x35b   :  { %19906 = vst [vmem:[#allocation195_spill] sm:$0xff] %v13810_v2  ;;  %v13812_v40 = vpop.f32.mrf.mxu0 }
 0x35c   :  { %19907 = vst [vmem:[#allocation196_spill] sm:$0xff] %v13812_v40  ;;  %v13814_v63 = vpop.f32.mrf.mxu1 }
 0x35d   :  { %19908 = vst [vmem:[#allocation197_spill] sm:$0xff] %v13814_v63  ;;  %v13816_v13 = vpop.f32.mrf.mxu0  ;;  %v5789_v63 = vld [vmem:[#allocation2 + $0xda] sm:$0xff] }
 0x35e   :  { %19909 = vst [vmem:[#allocation198_spill] sm:$0xff] %v13816_v13  ;;  %v13818_v20 = vpop.f32.mrf.mxu1  ;;  %10217 = vmatmul.mubr.msk.bf16.gmra.mxu1 %vm560_vm1, %v5843_v37  ;;  %v5790_v13 = vld [vmem:[#allocation2 + $0xe2] sm:$0xff] }
 0x35f   :  { %19910 = vst [vmem:[#allocation199_spill] sm:$0xff] %v13818_v20  ;;  %v13820_v3 = vpop.f32.mrf.mxu0  ;;  %10421 = vmatmul.mubr.msk.bf16.gmra.mxu0 %vm560_vm1, %v5844_v1  ;;  %10220 = vmatprep.mubr.msk.bf16.mxu1 %vm560_vm1, %v5844_v1  ;;  %v5846_v20 = vpack.c.bf16 %v5790_v13, %v5789_v63  ;;  %v5847_v1 = vpack.c.bf16 %v5792_v4, %v5791_v8  ;;  %v5795_v8 = vld [vmem:[#allocation2 + $0x122] sm:$0xff]  ;;  %v5796_v4 = vld [vmem:[#allocation2 + $0x12a] sm:$0xff] }
 0x360   :  { %19911 = vst [vmem:[#allocation200_spill] sm:$0xff] %v13820_v3  ;;  %10424 = vmatprep.mubr.msk.bf16.mxu0 %vm560_vm1, %v5845_v5  ;;  %v13826_v40 = vpop.f32.mrf.mxu1 }
 0x361   :  { %19912 = vst [vmem:[#allocation201_spill] sm:$0xff] %v13826_v40  ;;  %v13828_v60 = vpop.f32.mrf.mxu0 }
 0x362   :  { %19913 = vst [vmem:[#allocation202_spill] sm:$0xff] %v13828_v60  ;;  %v13830_v46 = vpop.f32.mrf.mxu1 }
 0x363   :  { %19914 = vst [vmem:[#allocation203_spill] sm:$0xff] %v13830_v46  ;;  %v13832_v48 = vpop.f32.mrf.mxu0 }
 0x364   :  { %19915 = vst [vmem:[#allocation204_spill] sm:$0xff] %v13832_v48  ;;  %v13834_v3 = vpop.f32.mrf.mxu1 }
 0x365   :  { %19916 = vst [vmem:[#allocation205_spill] sm:$0xff] %v13834_v3  ;;  %v13836_v37 = vpop.f32.mrf.mxu0  ;;  %v5793_v3 = vld [vmem:[#allocation2 + $0x10a] sm:$0xff] }
 0x366   :  { %19917 = vst [vmem:[#allocation206_spill] sm:$0xff] %v13836_v37  ;;  %v13838_v2 = vpop.f32.mrf.mxu1  ;;  %10221 = vmatmul.mubr.msk.bf16.gmra.mxu1 %vm560_vm1, %v5845_v5  ;;  %v5794_v37 = vld [vmem:[#allocation2 + $0x112] sm:$0xff] }
 0x367   :  { %19918 = vst [vmem:[#allocation207_spill] sm:$0xff] %v13838_v2  ;;  %v13840_v25 = vpop.f32.mrf.mxu0  ;;  %10425 = vmatmul.mubr.msk.bf16.gmra.mxu0 %vm560_vm1, %v5846_v20  ;;  %10224 = vmatprep.mubr.msk.bf16.mxu1 %vm560_vm1, %v5846_v20  ;;  %v5848_v2 = vpack.c.bf16 %v5794_v37, %v5793_v3  ;;  %v5849_v20 = vpack.c.bf16 %v5796_v4, %v5795_v8  ;;  %v5799_v8 = vld [vmem:[#allocation2 + $0x152] sm:$0xff]  ;;  %v5800_v4 = vld [vmem:[#allocation2 + $0x15a] sm:$0xff] }
 0x368   :  { %19919 = vst [vmem:[#allocation208_spill] sm:$0xff] %v13840_v25  ;;  %10428 = vmatprep.mubr.msk.bf16.mxu0 %vm560_vm1, %v5847_v1  ;;  %v13846_v48 = vpop.f32.mrf.mxu1 }
 0x369   :  { %19920 = vst [vmem:[#allocation209_spill] sm:$0xff] %v13846_v48  ;;  %v13848_v60 = vpop.f32.mrf.mxu0 }
 0x36a   :  { %19921 = vst [vmem:[#allocation210_spill] sm:$0xff] %v13848_v60  ;;  %v13850_v63 = vpop.f32.mrf.mxu1 }
 0x36b   :  { %19922 = vst [vmem:[#allocation211_spill] sm:$0xff] %v13850_v63  ;;  %v13852_v13 = vpop.f32.mrf.mxu0 }
 0x36c   :  { %19923 = vst [vmem:[#allocation212_spill] sm:$0xff] %v13852_v13  ;;  %v13854_v25 = vpop.f32.mrf.mxu1 }
 0x36d   :  { %19924 = vst [vmem:[#allocation213_spill] sm:$0xff] %v13854_v25  ;;  %v13856_v5 = vpop.f32.mrf.mxu0  ;;  %v5797_v25 = vld [vmem:[#allocation2 + $0x13a] sm:$0xff] }
 0x36e   :  { %19925 = vst [vmem:[#allocation214_spill] sm:$0xff] %v13856_v5  ;;  %v13858_v46 = vpop.f32.mrf.mxu1  ;;  %10225 = vmatmul.mubr.msk.bf16.gmra.mxu1 %vm560_vm1, %v5847_v1  ;;  %v5798_v5 = vld [vmem:[#allocation2 + $0x142] sm:$0xff] }
 0x36f   :  { %19926 = vst [vmem:[#allocation215_spill] sm:$0xff] %v13858_v46  ;;  %v13860_v40 = vpop.f32.mrf.mxu0  ;;  %10429 = vmatmul.mubr.msk.bf16.gmra.mxu0 %vm560_vm1, %v5848_v2  ;;  %10228 = vmatprep.mubr.msk.bf16.mxu1 %vm560_vm1, %v5848_v2  ;;  %v5850_v46 = vpack.c.bf16 %v5798_v5, %v5797_v25  ;;  %v5851_v2 = vpack.c.bf16 %v5800_v4, %v5799_v8  ;;  %v5803_v8 = vld [vmem:[#allocation2 + $0x182] sm:$0xff]  ;;  %v5804_v4 = vld [vmem:[#allocation2 + $0x18a] sm:$0xff] }
 0x370   :  { %19927 = vst [vmem:[#allocation216_spill] sm:$0xff] %v13860_v40  ;;  %10432 = vmatprep.mubr.msk.bf16.mxu0 %vm560_vm1, %v5849_v20  ;;  %v13866_v13 = vpop.f32.mrf.mxu1 }
 0x371   :  { %19928 = vst [vmem:[#allocation217_spill] sm:$0xff] %v13866_v13  ;;  %v13868_v60 = vpop.f32.mrf.mxu0 }
 0x372   :  { %19929 = vst [vmem:[#allocation218_spill] sm:$0xff] %v13868_v60  ;;  %v13870_v3 = vpop.f32.mrf.mxu1 }
 0x373   :  { %19930 = vst [vmem:[#allocation219_spill] sm:$0xff] %v13870_v3  ;;  %v13872_v37 = vpop.f32.mrf.mxu0 }
 0x374   :  { %19931 = vst [vmem:[#allocation220_spill] sm:$0xff] %v13872_v37  ;;  %v13874_v40 = vpop.f32.mrf.mxu1 }
 0x375   :  { %19932 = vst [vmem:[#allocation221_spill] sm:$0xff] %v13874_v40  ;;  %v13876_v1 = vpop.f32.mrf.mxu0  ;;  %v5801_v40 = vld [vmem:[#allocation2 + $0x16a] sm:$0xff] }
 0x376   :  { %19933 = vst [vmem:[#allocation222_spill] sm:$0xff] %v13876_v1  ;;  %v13878_v63 = vpop.f32.mrf.mxu1  ;;  %10229 = vmatmul.mubr.msk.bf16.gmra.mxu1 %vm560_vm1, %v5849_v20  ;;  %v5802_v1 = vld [vmem:[#allocation2 + $0x172] sm:$0xff] }
 0x377   :  { %19934 = vst [vmem:[#allocation223_spill] sm:$0xff] %v13878_v63  ;;  %v13880_v48 = vpop.f32.mrf.mxu0  ;;  %10433 = vmatmul.mubr.msk.bf16.gmra.mxu0 %vm560_vm1, %v5850_v46  ;;  %10232 = vmatprep.mubr.msk.bf16.mxu1 %vm560_vm1, %v5850_v46  ;;  %v5852_v63 = vpack.c.bf16 %v5802_v1, %v5801_v40  ;;  %v5853_v46 = vpack.c.bf16 %v5804_v4, %v5803_v8  ;;  %v4120_v40 = vld [vmem:[#allocation2 + $0x1ca] sm:$0xff] }
 0x378   :  { %19935 = vst [vmem:[#allocation224_spill] sm:$0xff] %v13880_v48  ;;  %10436 = vmatprep.mubr.msk.bf16.mxu0 %vm560_vm1, %v5851_v2  ;;  %v13886_v37 = vpop.f32.mrf.mxu1 }
 0x379   :  { %19936 = vst [vmem:[#allocation225_spill] sm:$0xff] %v13886_v37  ;;  %v13888_v60 = vpop.f32.mrf.mxu0 }
 0x37a   :  { %19937 = vst [vmem:[#allocation226_spill] sm:$0xff] %v13888_v60  ;;  %v13890_v25 = vpop.f32.mrf.mxu1  ;;  %v5806_v60 = vld [vmem:[#allocation2 + $0x1a2] sm:$0xff] }
 0x37b   :  { %19938 = vst [vmem:[#allocation227_spill] sm:$0xff] %v13890_v25  ;;  %v13892_v5 = vpop.f32.mrf.mxu0 }
 0x37c   :  { %19939 = vst [vmem:[#allocation228_spill] sm:$0xff] %v13892_v5  ;;  %v13894_v48 = vpop.f32.mrf.mxu1  ;;  %v5805_v5 = vld [vmem:[#allocation2 + $0x19a] sm:$0xff] }
 0x37d   :  { %19940 = vst [vmem:[#allocation229_spill] sm:$0xff] %v13894_v48  ;;  %v13896_v20 = vpop.f32.mrf.mxu0  ;;  %v5854_v4 = vpack.c.bf16 %v5806_v60, %v5805_v5 }
 0x37e   :  { %19941 = vst [vmem:[#allocation230_spill] sm:$0xff] %v13896_v20  ;;  %v13898_v3 = vpop.f32.mrf.mxu1  ;;  %10233 = vmatmul.mubr.msk.bf16.gmra.mxu1 %vm560_vm1, %v5851_v2  ;;  %v4121_v20 = vld [vmem:[#allocation2 + $0x1d2] sm:$0xff]  ;;  %v5807_v2 = vld [vmem:[#allocation2 + $0x1e2] sm:$0xff] }
 0x37f   :  { %19942 = vst [vmem:[#allocation231_spill] sm:$0xff] %v13898_v3  ;;  %v13900_v13 = vpop.f32.mrf.mxu0  ;;  %10437 = vmatmul.mubr.msk.bf16.gmra.mxu0 %vm560_vm1, %v5852_v63  ;;  %10236 = vmatprep.mubr.msk.bf16.mxu1 %vm560_vm1, %v5852_v63  ;;  %v4168_v37 = vpack.c.bf16 %v4121_v20, %v4120_v40  ;;  %v2156_v20 = vadd.f32 %v13587_v15, %v13165_v38  ;;  %v5810_v40 = vld [vmem:[#allocation2 + $0x202] sm:$0xff] }
 0x380   :  { %19943 = vst [vmem:[#allocation232_spill] sm:$0xff] %v13900_v13  ;;  %10440 = vmatprep.mubr.msk.bf16.mxu0 %vm560_vm1, %v5853_v46  ;;  %v13906_v25 = vpop.f32.mrf.mxu1  ;;  %v5808_v13 = vld [vmem:[#allocation2 + $0x1ea] sm:$0xff] }
 0x381   :  { %19944 = vst [vmem:[#allocation233_spill] sm:$0xff] %v13906_v25  ;;  %v13908_v48 = vpop.f32.mrf.mxu0  ;;  %v5855_v6 = vpack.c.bf16 %v5808_v13, %v5807_v2  ;;  %v5809_v13 = vld [vmem:[#allocation2 + $0x1fa] sm:$0xff]  ;;  %v2902_v38 = vadd.f32 %v13169_v47, %v2156_v20 }
 0x382   :  { %19945 = vst [vmem:[#allocation234_spill] sm:$0xff] %v13908_v48  ;;  %v13910_v1 = vpop.f32.mrf.mxu1  ;;  %v5856_v48 = vpack.c.bf16 %v5810_v40, %v5809_v13  ;;  %v5813_v13 = vld [vmem:[#allocation2 + $0x22a] sm:$0xff] }
 0x383   :  { %v13912_v8 = vpop.f32.mrf.mxu0  ;;  %v5816_v40 = vld [vmem:[#allocation2 + $0x24a] sm:$0xff] }
 0x384   :  { %19946 = vst [vmem:[#allocation235_spill] sm:$0xff] %v13912_v8  ;;  %v13914_v3 = vpop.f32.mrf.mxu1 }
 0x385   :  { %v13916_v63 = vpop.f32.mrf.mxu0 }
 0x386   :  { %19947 = vst [vmem:[#allocation236_spill] sm:$0xff] %v13916_v63  ;;  %v13918_v9 = vpop.f32.mrf.mxu1  ;;  %10237 = vmatmul.mubr.msk.bf16.gmra.mxu1 %vm560_vm1, %v5853_v46  ;;  %v5811_v46 = vld [vmem:[#allocation2 + $0x212] sm:$0xff] }
 0x387   :  { %v13920_v25 = vpop.f32.mrf.mxu0  ;;  %10441 = vmatmul.mubr.msk.bf16.gmra.mxu0 %vm560_vm1, %v5854_v4  ;;  %10240 = vmatprep.mubr.msk.bf16.mxu1 %vm560_vm1, %v4168_v37  ;;  %v2148_v37 = vadd.f32 %v13599_v18, %v13177_v41  ;;  %v2151_v41 = vadd.f32 %v13607_v52, %v13185_v43  ;;  %v5814_v43 = vld [vmem:[#allocation2 + $0x232] sm:$0xff] }
 0x388   :  { %19948 = vst [vmem:[#allocation237_spill] sm:$0xff] %v13920_v25  ;;  %10444 = vmatprep.mubr.msk.bf16.mxu0 %vm560_vm1, %v5855_v6  ;;  %v13926_v60 = vpop.f32.mrf.mxu1  ;;  %v5812_v25 = vld [vmem:[#allocation2 + $0x21a] sm:$0xff] }
 0x389   :  { %19949 = vst [vmem:[#allocation238_spill] sm:$0xff] %v13926_v60  ;;  %v13928_v5 = vpop.f32.mrf.mxu0  ;;  %v5857_v15 = vpack.c.bf16 %v5812_v25, %v5811_v46 }
 0x38a   :  { %19950 = vst [vmem:[#allocation239_spill] sm:$0xff] %v13928_v5  ;;  %v13932_v2 = vpop.f32.mrf.mxu1  ;;  %v2159_v5 = vadd.f32 %v13603_v24, %v13181_v35  ;;  %v2900_v35 = vadd.f32 %v13179_v29, %v2148_v37  ;;  %v2164_v29 = vadd.f32 %v13623_v11, %v13205_v50  ;;  %v2901_v37 = vadd.f32 %v13187_v7, %v2151_v41 }
 0x38b   :  { %v13934_v63 = vpop.f32.mrf.mxu0  ;;  %v2167_v7 = vadd.f32 %v13631_v36, %v13213_v30  ;;  %v5818_v30 = vld [vmem:[#allocation2 + $0x262] sm:$0xff] }
 0x38c   :  { %19951 = vst [vmem:[#allocation240_spill] sm:$0xff] %v13934_v63  ;;  %v13938_v4 = vpop.f32.mrf.mxu1  ;;  %v2903_v20 = vadd.f32 %v13183_v58, %v2159_v5  ;;  %v2175_v58 = vadd.f32 %v13627_v26, %v13209_v12  ;;  %v2904_v12 = vadd.f32 %v13207_v57, %v2164_v29  ;;  %v2180_v57 = vadd.f32 %v13647_v31, %v13233_v23 }
 0x38d   :  { %v13940_v8 = vpop.f32.mrf.mxu0 }
 0x38e   :  { %19952 = vst [vmem:[#allocation241_spill] sm:$0xff] %v13940_v8  ;;  %v10074_v60 = vpop.f32.mrf.mxu1  ;;  %10241 = vmatmul.mubr.msk.bf16.gmra.mxu1 %vm560_vm1, %v5855_v6  ;;  %v2172_v6 = vadd.f32 %v13611_v16, %v13193_v28  ;;  %v5858_v16 = vpack.c.bf16 %v5814_v43, %v5813_v13  ;;  %v5819_v13 = vld [vmem:[#allocation2 + $0x272] sm:$0xff]  ;;  %v5820_v43 = vld [vmem:[#allocation2 + $0x27a] sm:$0xff] }
 0x38f   :  { %v13946_v63 = vpop.f32.mrf.mxu0  ;;  %10445 = vmatmul.mubr.msk.bf16.gmra.mxu0 %vm560_vm1, %v5856_v48  ;;  %v13951_v18 = vadd.f32 %v10074_v60, %v2902_v38  ;;  %10244 = vmatprep.mubr.msk.bf16.mxu1 %vm560_vm1, %v5856_v48  ;;  %v5815_v48 = vld [vmem:[#allocation2 + $0x242] sm:$0xff] }
 0x390   :  { %19953 = vst [vmem:[#allocation242_spill] sm:$0xff] %v13946_v63  ;;  %10448 = vmatprep.mubr.msk.bf16.mxu0 %vm560_vm1, %v5857_v15  ;;  %v3207_v47 = vpop.f32.mrf.mxu1 }
 0x391   :  { %v13956_v24 = vpop.f32.mrf.mxu0  ;;  %v13960_v25 = vadd.f32 %v3207_v47, %v2900_v35  ;;  %v2906_v35 = vadd.f32 %v13197_v10, %v2172_v6  ;;  %v5859_v47 = vpack.c.bf16 %v5816_v40, %v5815_v48  ;;  %v2907_v6 = vadd.f32 %v13211_v62, %v2175_v58 }
 0x392   :  { %19954 = vst [vmem:[#allocation243_spill] sm:$0xff] %v13956_v24  ;;  %v10075_v52 = vpop.f32.mrf.mxu1  ;;  %v2905_v48 = vadd.f32 %v13215_v21, %v2167_v7  ;;  %v2191_v62 = vadd.f32 %v13651_v0, %v13237_v55  ;;  %v2183_v21 = vadd.f32 %v13655_v19, %v13241_v51  ;;  %v19962_v55 = vld [vmem:[#allocation66_spill] sm:$0xff]  ;;  %v5822_v51 = vld [vmem:[#allocation2 + $0x292] sm:$0xff] }
 0x393   :  { %v13963_v60 = vpop.f32.mrf.mxu0  ;;  %v13967_v46 = vadd.f32 %v10075_v52, %v2903_v20  ;;  %v5817_v20 = vld [vmem:[#allocation2 + $0x25a] sm:$0xff]  ;;  %v2908_v0 = vadd.f32 %v19962_v55, %v2180_v57  ;;  %v19968_v57 = vld [vmem:[#allocation67_spill] sm:$0xff] }
 0x394   :  { %19955 = vst [vmem:[#allocation244_spill] sm:$0xff] %v13963_v60  ;;  %v3210_v38 = vpop.f32.mrf.mxu1  ;;  %v19971_v55 = vld [vmem:[#allocation41_spill] sm:$0xff]  ;;  %v20062_v60 = vld [vmem:[#allocation90_spill] sm:$0xff] }
 0x395   :  { %v13970_v28 = vpop.f32.mrf.mxu0  ;;  %v13974_v5 = vadd.f32 %v3210_v38, %v2901_v37  ;;  %v5861_v38 = vpack.c.bf16 %v5820_v43, %v5819_v13 }
 0x396   :  { %19956 = vst [vmem:[#allocation245_spill] sm:$0xff] %v13970_v28  ;;  %v10078_v8 = vpop.f32.mrf.mxu1  ;;  %10245 = vmatmul.mubr.msk.bf16.gmra.mxu1 %vm560_vm1, %v5857_v15  ;;  %v2188_v15 = vadd.f32 %v13635_v44, %v13221_v56  ;;  %v5860_v44 = vpack.c.bf16 %v5818_v30, %v5817_v20  ;;  %v5823_v20 = vld [vmem:[#allocation2 + $0x2a2] sm:$0xff]  ;;  %v5824_v30 = vld [vmem:[#allocation2 + $0x2aa] sm:$0xff] }
 0x397   :  { %v13978_v50 = vpop.f32.mrf.mxu0  ;;  %10449 = vmatmul.mubr.msk.bf16.gmra.mxu0 %vm560_vm1, %v5858_v16  ;;  %v13983_v11 = vadd.f32 %v10078_v8, %v2906_v35  ;;  %10248 = vmatprep.mubr.msk.bf16.mxu1 %vm560_vm1, %v5858_v16  ;;  %v19964_v35 = vld [vmem:[#allocation39_spill] sm:$0xff] }
 0x398   :  { %19957 = vst [vmem:[#allocation246_spill] sm:$0xff] %v13978_v50  ;;  %10452 = vmatprep.mubr.msk.bf16.mxu0 %vm560_vm1, %v5859_v47  ;;  %v3223_v10 = vpop.f32.mrf.mxu1  ;;  %v2910_v37 = vadd.f32 %v13225_v45, %v2188_v15  ;;  %v5821_v15 = vld [vmem:[#allocation2 + $0x28a] sm:$0xff] }
 0x399   :  { %v13988_v26 = vpop.f32.mrf.mxu0  ;;  %v13992_v41 = vadd.f32 %v3223_v10, %v2904_v12  ;;  %v19965_v12 = vld [vmem:[#allocation65_spill] sm:$0xff] }
 0x39a   :  { %19958 = vst [vmem:[#allocation247_spill] sm:$0xff] %v13988_v26  ;;  %v10079_v36 = vpop.f32.mrf.mxu1  ;;  %v2911_v10 = vadd.f32 %v19965_v12, %v2191_v62 }
 0x39b   :  { %v13995_v8 = vpop.f32.mrf.mxu0  ;;  %v13999_v52 = vadd.f32 %v10079_v36, %v2907_v6  ;;  %v19967_v36 = vld [vmem:[#allocation43_spill] sm:$0xff] }
 0x39c   :  { %19959 = vst [vmem:[#allocation248_spill] sm:$0xff] %v13995_v8  ;;  %v3226_v40 = vpop.f32.mrf.mxu1  ;;  %v2196_v13 = vadd.f32 %v13671_v34, %v19967_v36  ;;  %v20045_v8 = vld [vmem:[#allocation82_spill] sm:$0xff] }
 0x39d   :  { %v14002_v56 = vpop.f32.mrf.mxu0  ;;  %v14006_v29 = vadd.f32 %v3226_v40, %v2905_v48  ;;  %v2909_v48 = vadd.f32 %v19968_v57, %v2183_v21  ;;  %v19973_v21 = vld [vmem:[#allocation47_spill] sm:$0xff]  ;;  %v5825_v57 = vld [vmem:[#allocation2 + $0x2ba] sm:$0xff] }
 0x39e   :  { %19960 = vst [vmem:[#allocation249_spill] sm:$0xff] %v14002_v56  ;;  %v10082_v16 = vpop.f32.mrf.mxu1  ;;  %10249 = vmatmul.mubr.msk.bf16.gmra.mxu1 %vm560_vm1, %v5859_v47  ;;  %v2204_v47 = vadd.f32 %v13659_v61, %v19964_v35  ;;  %v2199_v12 = vadd.f32 %v13679_v27, %v19973_v21  ;;  %v5826_v27 = vld [vmem:[#allocation2 + $0x2c2] sm:$0xff] }
 0x39f   :  { %v14010_v23 = vpop.f32.mrf.mxu0  ;;  %10453 = vmatmul.mubr.msk.bf16.gmra.mxu0 %vm560_vm1, %v5860_v44  ;;  %v14015_v31 = vadd.f32 %v10082_v16, %v2910_v37  ;;  %10252 = vmatprep.mubr.msk.bf16.mxu1 %vm560_vm1, %v5860_v44  ;;  %v5862_v44 = vpack.c.bf16 %v5822_v51, %v5821_v15  ;;  %v19970_v37 = vld [vmem:[#allocation42_spill] sm:$0xff] }
 0x3a0   :  { %19961 = vst [vmem:[#allocation250_spill] sm:$0xff] %v14010_v23  ;;  %10456 = vmatprep.mubr.msk.bf16.mxu0 %vm560_vm1, %v5861_v38  ;;  %v3239_v45 = vpop.f32.mrf.mxu1  ;;  %v2207_v62 = vadd.f32 %v13675_v17, %v19970_v37  ;;  %v19974_v17 = vld [vmem:[#allocation40_spill] sm:$0xff]  ;;  %v5828_v37 = vld [vmem:[#allocation2 + $0x2da] sm:$0xff] }
 0x3a1   :  { %v14020_v58 = vpop.f32.mrf.mxu0  ;;  %v14024_v7 = vadd.f32 %v3239_v45, %v2908_v0  ;;  %v2914_v0 = vadd.f32 %v19971_v55, %v2204_v47  ;;  %v5863_v45 = vpack.c.bf16 %v5824_v30, %v5823_v20  ;;  %v2912_v15 = vadd.f32 %v19974_v17, %v2196_v13  ;;  %v19977_v30 = vld [vmem:[#allocation45_spill] sm:$0xff] }
 0x3a2   :  { %19963 = vst [vmem:[#allocation66_spill] sm:$0xff] %v14020_v58  ;;  %v10083_v19 = vpop.f32.mrf.mxu1  ;;  %v2915_v36 = vadd.f32 %v19977_v30, %v2207_v62  ;;  %v19979_v55 = vld [vmem:[#allocation49_spill] sm:$0xff]  ;;  %v19983_v30 = vld [vmem:[#allocation38_spill] sm:$0xff] }
 0x3a3   :  { %v14027_v6 = vpop.f32.mrf.mxu0  ;;  %v14031_v43 = vadd.f32 %v10083_v19, %v2911_v10  ;;  %v19976_v19 = vld [vmem:[#allocation46_spill] sm:$0xff]  ;;  %v2212_v13 = vadd.f32 %v13695_v59, %v19979_v55 }
 0x3a4   :  { %19966 = vst [vmem:[#allocation39_spill] sm:$0xff] %v14027_v6  ;;  %v3242_v40 = vpop.f32.mrf.mxu1  ;;  %v19989_v55 = vld [vmem:[#allocation50_spill] sm:$0xff] }
 0x3a5   :  { %v14034_v61 = vpop.f32.mrf.mxu0  ;;  %v14038_v16 = vadd.f32 %v3242_v40, %v2909_v48 }
 0x3a6   :  { %19969 = vst [vmem:[#allocation65_spill] sm:$0xff] %v14034_v61  ;;  %v10086_v35 = vpop.f32.mrf.mxu1  ;;  %10253 = vmatmul.mubr.msk.bf16.gmra.mxu1 %vm560_vm1, %v5861_v38  ;;  %v2220_v38 = vadd.f32 %v13683_v54, %v19976_v19 }
 0x3a7   :  { %v14042_v34 = vpop.f32.mrf.mxu0  ;;  %10457 = vmatmul.mubr.msk.bf16.gmra.mxu0 %vm560_vm1, %v5862_v44  ;;  %v14047_v10 = vadd.f32 %v10086_v35, %v2914_v0  ;;  %10256 = vmatprep.mubr.msk.bf16.mxu1 %vm560_vm1, %v5862_v44  ;;  %v5827_v44 = vld [vmem:[#allocation2 + $0x2d2] sm:$0xff] }
 0x3a8   :  { %19972 = vst [vmem:[#allocation43_spill] sm:$0xff] %v14042_v34  ;;  %10460 = vmatprep.mubr.msk.bf16.mxu0 %vm560_vm1, %v5863_v45  ;;  %v3255_v47 = vpop.f32.mrf.mxu1  ;;  %v19980_v35 = vld [vmem:[#allocation44_spill] sm:$0xff] }
 0x3a9   :  { %v14052_v51 = vpop.f32.mrf.mxu0  ;;  %v14056_v20 = vadd.f32 %v3255_v47, %v2912_v15  ;;  %v2913_v21 = vadd.f32 %v19980_v35, %v2199_v12  ;;  %v5864_v15 = vpack.c.bf16 %v5826_v27, %v5825_v57  ;;  %v19982_v47 = vld [vmem:[#allocation48_spill] sm:$0xff]  ;;  %v19985_v12 = vld [vmem:[#allocation55_spill] sm:$0xff] }
 0x3aa   :  { %19975 = vst [vmem:[#allocation67_spill] sm:$0xff] %v14052_v51  ;;  %v10087_v48 = vpop.f32.mrf.mxu1  ;;  %v2223_v62 = vadd.f32 %v13699_v39, %v19982_v47  ;;  %v5865_v51 = vpack.c.bf16 %v5828_v37, %v5827_v44  ;;  %v19986_v39 = vld [vmem:[#allocation51_spill] sm:$0xff]  ;;  %v19991_v47 = vld [vmem:[#allocation53_spill] sm:$0xff] }
 0x3ab   :  { %v14059_v40 = vpop.f32.mrf.mxu0  ;;  %v14063_v0 = vadd.f32 %v10087_v48, %v2915_v36  ;;  %v2215_v36 = vadd.f32 %v13703_v49, %v19985_v12  ;;  %v2916_v57 = vadd.f32 %v19986_v39, %v2212_v13  ;;  %v19988_v44 = vld [vmem:[#allocation59_spill] sm:$0xff]  ;;  %v5830_v49 = vld [vmem:[#allocation2 + $0x2f2] sm:$0xff]  ;;  %v2228_v13 = vadd.f32 %v13719_v14, %v19991_v47 }
 0x3ac   :  { %19978 = vst [vmem:[#allocation42_spill] sm:$0xff] %v14059_v40  ;;  %v3258_v17 = vpop.f32.mrf.mxu1  ;;  %v2918_v40 = vadd.f32 %v19983_v30, %v2220_v38  ;;  %v2919_v35 = vadd.f32 %v19989_v55, %v2223_v62  ;;  %v19992_v12 = vld [vmem:[#allocation52_spill] sm:$0xff] }
 0x3ad   :  { %v14066_v54 = vpop.f32.mrf.mxu0  ;;  %v14070_v19 = vadd.f32 %v3258_v17, %v2913_v21  ;;  %v5829_v21 = vld [vmem:[#allocation2 + $0x2ea] sm:$0xff]  ;;  %v5831_v17 = vld [vmem:[#allocation2 + $0x302] sm:$0xff]  ;;  %v2917_v39 = vadd.f32 %v19992_v12, %v2215_v36  ;;  %v5833_v12 = vld [vmem:[#allocation2 + $0x31a] sm:$0xff] }
 0x3ae   :  { %19981 = vst [vmem:[#allocation41_spill] sm:$0xff] %v14066_v54  ;;  %v10090_v34 = vpop.f32.mrf.mxu1  ;;  %10257 = vmatmul.mubr.msk.bf16.gmra.mxu1 %vm560_vm1, %v5863_v45  ;;  %v2236_v45 = vadd.f32 %v13707_v42, %v19988_v44  ;;  %v19996_v55 = vld [vmem:[#allocation64_spill] sm:$0xff]  ;;  %v19998_v36 = vld [vmem:[#allocation58_spill] sm:$0xff] }
 0x3af   :  { %v14074_v59 = vpop.f32.mrf.mxu0  ;;  %10461 = vmatmul.mubr.msk.bf16.gmra.mxu0 %vm560_vm1, %v5864_v15  ;;  %v14079_v48 = vadd.f32 %v10090_v34, %v2918_v40  ;;  %10260 = vmatprep.mubr.msk.bf16.mxu1 %vm560_vm1, %v5864_v15  ;;  %v5832_v15 = vld [vmem:[#allocation2 + $0x30a] sm:$0xff] }
 0x3b0   :  { %19984 = vst [vmem:[#allocation47_spill] sm:$0xff] %v14074_v59  ;;  %10464 = vmatprep.mubr.msk.bf16.mxu0 %vm560_vm1, %v5865_v51  ;;  %v3271_v38 = vpop.f32.mrf.mxu1  ;;  %v5867_v59 = vpack.c.bf16 %v5832_v15, %v5831_v17  ;;  %v20002_v15 = vld [vmem:[#allocation56_spill] sm:$0xff] }
 0x3b1   :  { %v14084_v27 = vpop.f32.mrf.mxu0  ;;  %v14088_v37 = vadd.f32 %v3271_v38, %v2916_v57  ;;  %v5866_v57 = vpack.c.bf16 %v5830_v49, %v5829_v21  ;;  %v19994_v38 = vld [vmem:[#allocation57_spill] sm:$0xff] }
 0x3b2   :  { %19987 = vst [vmem:[#allocation40_spill] sm:$0xff] %v14084_v27  ;;  %v10091_v34 = vpop.f32.mrf.mxu1  ;;  %v2239_v62 = vadd.f32 %v13723_v22, %v19994_v38  ;;  %v19999_v22 = vld [vmem:[#allocation54_spill] sm:$0xff]  ;;  %v20001_v49 = vld [vmem:[#allocation61_spill] sm:$0xff]  ;;  %v20004_v38 = vld [vmem:[#allocation60_spill] sm:$0xff] }
 0x3b3   :  { %v14091_v40 = vpop.f32.mrf.mxu0  ;;  %v14095_v30 = vadd.f32 %v10091_v34, %v2919_v35  ;;  %v2231_v35 = vadd.f32 %v13727_v32, %v19998_v36  ;;  %v5834_v32 = vld [vmem:[#allocation2 + $0x322] sm:$0xff] }
 0x3b4   :  { %19990 = vst [vmem:[#allocation46_spill] sm:$0xff] %v14091_v40  ;;  %v3274_v27 = vpop.f32.mrf.mxu1  ;;  %v2922_v40 = vadd.f32 %v19996_v55, %v2236_v45  ;;  %v2923_v47 = vadd.f32 %v20002_v15, %v2239_v62  ;;  %v20005_v36 = vld [vmem:[#allocation62_spill] sm:$0xff]  ;;  %v20008_v62 = vld [vmem:[#allocation171_spill] sm:$0xff] }
 0x3b5   :  { %v14098_v42 = vpop.f32.mrf.mxu0  ;;  %v14102_v44 = vadd.f32 %v3274_v27, %v2917_v39  ;;  %v2920_v27 = vadd.f32 %v19999_v22, %v2228_v13  ;;  %v5835_v39 = vld [vmem:[#allocation2 + $0x332] sm:$0xff]  ;;  %v2244_v13 = vadd.f32 %v13742_v53, %v20004_v38  ;;  %v2921_v22 = vadd.f32 %v20005_v36, %v2231_v35  ;;  %v20012_v35 = vld [vmem:[#allocation71_spill] sm:$0xff]  ;;  %v20018_v36 = vld [vmem:[#allocation70_spill] sm:$0xff] }
 0x3b6   :  { %19993 = vst [vmem:[#allocation45_spill] sm:$0xff] %v14098_v42  ;;  %v10094_v54 = vpop.f32.mrf.mxu1  ;;  %10261 = vmatmul.mubr.msk.bf16.gmra.mxu1 %vm560_vm1, %v5865_v51  ;;  %v2252_v51 = vadd.f32 %v13731_v33, %v20001_v49 }
 0x3b7   :  { %19995 = vst [vmem:[#allocation49_spill] sm:$0xff] %v14102_v44  ;;  %v14106_v14 = vpop.f32.mrf.mxu0  ;;  %10465 = vmatmul.mubr.msk.bf16.gmra.mxu0 %vm560_vm1, %v5866_v57  ;;  %v14111_v34 = vadd.f32 %v10094_v54, %v2922_v40  ;;  %10264 = vmatprep.mubr.msk.bf16.mxu1 %vm560_vm1, %v5866_v57  ;;  %v5836_v57 = vld [vmem:[#allocation2 + $0x33a] sm:$0xff] }
 0x3b8   :  { %19997 = vst [vmem:[#allocation44_spill] sm:$0xff] %v14106_v14  ;;  %10468 = vmatprep.mubr.msk.bf16.mxu0 %vm560_vm1, %v5867_v59  ;;  %v3287_v45 = vpop.f32.mrf.mxu1  ;;  %v20010_v14 = vld [vmem:[#allocation63_spill] sm:$0xff]  ;;  %v5869_v42 = vpack.c.bf16 %v5836_v57, %v5835_v39 }
 0x3b9   :  { %v14116_v21 = vpop.f32.mrf.mxu0  ;;  %v14120_v17 = vadd.f32 %v3287_v45, %v2920_v27  ;;  %v5868_v27 = vpack.c.bf16 %v5834_v32, %v5833_v12  ;;  %v20007_v45 = vld [vmem:[#allocation69_spill] sm:$0xff] }
 0x3ba   :  { %20000 = vst [vmem:[#allocation48_spill] sm:$0xff] %v14116_v21  ;;  %v10095_v54 = vpop.f32.mrf.mxu1  ;;  %v2255_v49 = vadd.f32 %v20008_v62, %v20007_v45  ;;  %v20016_v32 = vld [vmem:[#allocation73_spill] sm:$0xff] }
 0x3bb   :  { %v14123_v40 = vpop.f32.mrf.mxu0  ;;  %v14127_v55 = vadd.f32 %v10095_v54, %v2923_v47  ;;  %v20013_v47 = vld [vmem:[#allocation173_spill] sm:$0xff] }
 0x3bc   :  { %20003 = vst [vmem:[#allocation38_spill] sm:$0xff] %v14123_v40  ;;  %v3290_v21 = vpop.f32.mrf.mxu1  ;;  %v2926_v40 = vadd.f32 %v20010_v14, %v2252_v51  ;;  %v2247_v54 = vadd.f32 %v20013_v47, %v20012_v35  ;;  %v20021_v35 = vld [vmem:[#allocation177_spill] sm:$0xff] }
 0x3bd   :  { %v14130_v33 = vpop.f32.mrf.mxu0  ;;  %v14134_v15 = vadd.f32 %v3290_v21, %v2921_v22  ;;  %v20014_v21 = vld [vmem:[#allocation68_spill] sm:$0xff]  ;;  %v2927_v22 = vadd.f32 %v20018_v36, %v2255_v49  ;;  %v20025_v49 = vld [vmem:[#allocation179_spill] sm:$0xff] }
 0x3be   :  { %20006 = vst [vmem:[#allocation55_spill] sm:$0xff] %v14130_v33  ;;  %v10098_v61 = vpop.f32.mrf.mxu1  ;;  %10265 = vmatmul.mubr.msk.bf16.gmra.mxu1 %vm560_vm1, %v5867_v59  ;;  %v2924_v12 = vadd.f32 %v20014_v21, %v2244_v13  ;;  %v20017_v59 = vld [vmem:[#allocation175_spill] sm:$0xff]  ;;  %v20022_v13 = vld [vmem:[#allocation72_spill] sm:$0xff] }
 0x3bf   :  { %20009 = vst [vmem:[#allocation51_spill] sm:$0xff] %v14134_v15  ;;  %v14138_v53 = vpop.f32.mrf.mxu0  ;;  %10469 = vmatmul.mubr.msk.bf16.gmra.mxu0 %vm560_vm1, %v5868_v27  ;;  %v14143_v38 = vadd.f32 %v10098_v61, %v2926_v40  ;;  %10268 = vmatprep.mubr.msk.bf16.mxu1 %vm560_vm1, %v5868_v27  ;;  %v2268_v39 = vadd.f32 %v20017_v59, %v20016_v32  ;;  %v5213_v61 = vld [vmem:[#allocation2 + $0x31] sm:$0xff]  ;;  %v5214_v40 = vld [vmem:[#allocation2 + $0x39] sm:$0xff]  ;;  %v20020_v27 = vld [vmem:[#allocation75_spill] sm:$0xff] }
 0x3c0   :  { %20011 = vst [vmem:[#allocation59_spill] sm:$0xff] %v14138_v53  ;;  %10472 = vmatprep.mubr.msk.bf16.mxu0 %vm560_vm1, %v5869_v42  ;;  %v3303_v14 = vpop.f32.mrf.mxu1  ;;  %v2260_v47 = vadd.f32 %v20021_v35, %v20020_v27  ;;  %v2925_v21 = vadd.f32 %v20022_v13, %v2247_v54  ;;  %v5838_v33 = vld [vmem:[#allocation2 + $0x352] sm:$0xff]  ;;  %v5277_v23 = vpack.c.bf16 %v5214_v40, %v5213_v61  ;;  %v20029_v54 = vld [vmem:[#allocation79_spill] sm:$0xff] }
 0x3c1   :  { %v14148_v51 = vpop.f32.mrf.mxu0  ;;  %v14152_v57 = vadd.f32 %v3303_v14, %v2924_v12  ;;  %v20024_v14 = vld [vmem:[#allocation77_spill] sm:$0xff]  ;;  %v20035_v61 = vld [vmem:[#allocation183_spill] sm:$0xff] }
 0x3c2   :  { %20015 = vst [vmem:[#allocation50_spill] sm:$0xff] %v14148_v51  ;;  %v10099_v45 = vpop.f32.mrf.mxu1  ;;  %v5837_v51 = vld [vmem:[#allocation2 + $0x34a] sm:$0xff]  ;;  %v2271_v59 = vadd.f32 %v20025_v49, %v20024_v14 }
 0x3c3   :  { %v14155_v62 = vpop.f32.mrf.mxu0  ;;  %v14159_v53 = vadd.f32 %v10099_v45, %v2927_v22  ;;  %v5870_v12 = vpack.c.bf16 %v5838_v33, %v5837_v51  ;;  %v20030_v45 = vld [vmem:[#allocation181_spill] sm:$0xff]  ;;  %v20031_v33 = vld [vmem:[#allocation76_spill] sm:$0xff]  ;;  %v20032_v51 = vld [vmem:[#allocation6_spill] sm:$0xff] }
 0x3c4   :  { %20019 = vst [vmem:[#allocation53_spill] sm:$0xff] %v14155_v62  ;;  %v3306_v6 = vpop.f32.mrf.mxu1  ;;  %v20027_v62 = vld [vmem:[#allocation74_spill] sm:$0xff]  ;;  %v2263_v27 = vadd.f32 %v20030_v45, %v20029_v54  ;;  %v5215_v14 = vld [vmem:[#allocation2 + $0x49] sm:$0xff]  ;;  %v20039_v45 = vld [vmem:[#allocation185_spill] sm:$0xff] }
 0x3c5   :  { %v14162_v32 = vpop.f32.mrf.mxu0  ;;  %v14166_v36 = vadd.f32 %v3306_v6, %v2925_v21  ;;  %v2930_v58 = vadd.f32 %v20027_v62, %v2268_v39  ;;  %v2928_v6 = vadd.f32 %v20031_v33, %v2260_v47  ;;  %v20036_v21 = vld [vmem:[#allocation78_spill] sm:$0xff]  ;;  %v5218_v47 = vld [vmem:[#allocation2 + $0x69] sm:$0xff] }
 0x3c6   :  { %20023 = vst [vmem:[#allocation52_spill] sm:$0xff] %v14162_v32  ;;  %v10102_v56 = vpop.f32.mrf.mxu1  ;;  %10269 = vmatmul.mubr.msk.bf16.gmra.mxu1 %vm560_vm1, %v5869_v42  ;;  %v20034_v42 = vld [vmem:[#allocation81_spill] sm:$0xff]  ;;  %v20038_v54 = vld [vmem:[#allocation83_spill] sm:$0xff] }
 0x3c7   :  { %20026 = vst [vmem:[#allocation57_spill] sm:$0xff] %v14166_v36  ;;  %v14170_v22 = vpop.f32.mrf.mxu0  ;;  %10473 = vmatmul.mubr.msk.bf16.gmra.mxu0 %vm560_vm1, %v5870_v12  ;;  %v14175_v35 = vadd.f32 %v10102_v56, %v2930_v58  ;;  %10344 = vmatprep.mubr.msk.bf16.mxu1 %vm560_vm1, %v5277_v23  ;;  %v2284_v40 = vadd.f32 %v20035_v61, %v20034_v42  ;;  %v5216_v56 = vld [vmem:[#allocation2 + $0x51] sm:$0xff]  ;;  %v5217_v23 = vld [vmem:[#allocation2 + $0x61] sm:$0xff] }
 0x3c8   :  { %20028 = vst [vmem:[#allocation64_spill] sm:$0xff] %v14170_v22  ;;  %10552 = vmatprep.mubr.msk.bf16.mxu0 %vm174_vm0, %v20032_v51  ;;  %v3319_v39 = vpop.f32.mrf.mxu1  ;;  %v2931_v12 = vadd.f32 %v20036_v21, %v2271_v59  ;;  %v2276_v33 = vadd.f32 %v20039_v45, %v20038_v54  ;;  %v20043_v59 = vld [vmem:[#allocation187_spill] sm:$0xff]  ;;  %v5279_v26 = vpack.c.bf16 %v5218_v47, %v5217_v23  ;;  %v20053_v47 = vld [vmem:[#allocation86_spill] sm:$0xff] }
 0x3c9   :  { %v14181_v62 = vpop.f32.mrf.mxu0  ;;  %v14185_v13 = vadd.f32 %v3319_v39, %v2928_v6  ;;  %v5278_v6 = vpack.c.bf16 %v5216_v56, %v5215_v14  ;;  %v20042_v39 = vld [vmem:[#allocation85_spill] sm:$0xff]  ;;  %v20049_v14 = vld [vmem:[#allocation84_spill] sm:$0xff] }
 0x3ca   :  { %20033 = vst [vmem:[#allocation58_spill] sm:$0xff] %v14181_v62  ;;  %v10103_v58 = vpop.f32.mrf.mxu1  ;;  %v20040_v62 = vld [vmem:[#allocation80_spill] sm:$0xff]  ;;  %v2287_v61 = vadd.f32 %v20043_v59, %v20042_v39  ;;  %v2932_v56 = vadd.f32 %v20049_v14, %v2276_v33  ;;  %v5220_v39 = vld [vmem:[#allocation2 + $0x81] sm:$0xff] }
 0x3cb   :  { %v14188_v49 = vpop.f32.mrf.mxu0  ;;  %v14192_v51 = vadd.f32 %v10103_v58, %v2931_v12  ;;  %v2929_v22 = vadd.f32 %v20040_v62, %v2263_v27  ;;  %v20047_v12 = vld [vmem:[#allocation87_spill] sm:$0xff]  ;;  %v20048_v58 = vld [vmem:[#allocation189_spill] sm:$0xff] }
 0x3cc   :  { %20037 = vst [vmem:[#allocation54_spill] sm:$0xff] %v14188_v49  ;;  %v3322_v32 = vpop.f32.mrf.mxu1  ;;  %v2934_v49 = vadd.f32 %v20045_v8, %v2284_v40  ;;  %v2279_v27 = vadd.f32 %v20048_v58, %v20047_v12  ;;  %v20052_v8 = vld [vmem:[#allocation191_spill] sm:$0xff]  ;;  %v2935_v45 = vadd.f32 %v20053_v47, %v2287_v61  ;;  %v20056_v58 = vld [vmem:[#allocation193_spill] sm:$0xff] }
 0x3cd   :  { %v14195_v42 = vpop.f32.mrf.mxu0  ;;  %v14199_v21 = vadd.f32 %v3322_v32, %v2929_v22  ;;  %v20051_v22 = vld [vmem:[#allocation89_spill] sm:$0xff]  ;;  %v20060_v61 = vld [vmem:[#allocation195_spill] sm:$0xff] }
 0x3ce   :  { %20041 = vst [vmem:[#allocation61_spill] sm:$0xff] %v14195_v42  ;;  %v10106_v50 = vpop.f32.mrf.mxu1  ;;  %10345 = vmatmul.mubr.msk.bf16.vlgmr.msra.gmra.mxu1 %vm560_vm1, %v5278_v6  ;;  %v2300_v40 = vadd.f32 %v20052_v8, %v20051_v22  ;;  %v5219_v6 = vld [vmem:[#allocation2 + $0x79] sm:$0xff] }
 0x3cf   :  { %20044 = vst [vmem:[#allocation56_spill] sm:$0xff] %v14199_v21  ;;  %v14202_v28 = vpop.f32.mrf.mxu0  ;;  %v14207_v62 = vadd.f32 %v10106_v50, %v2934_v49  ;;  %10348 = vmatprep.mubr.msk.bf16.mxu1 %vm560_vm1, %v5279_v26  ;;  %v5221_v50 = vld [vmem:[#allocation2 + $0x91] sm:$0xff]  ;;  %v5222_v49 = vld [vmem:[#allocation2 + $0x99] sm:$0xff]  ;;  %v20055_v26 = vld [vmem:[#allocation91_spill] sm:$0xff] }
 0x3d0   :  { %20046 = vst [vmem:[#allocation60_spill] sm:$0xff] %v14202_v28  ;;  %v3335_v54 = vpop.f32.mrf.mxu1  ;;  %v2292_v33 = vadd.f32 %v20056_v58, %v20055_v26  ;;  %v5281_v63 = vpack.c.bf16 %v5222_v49, %v5221_v50  ;;  %v20070_v49 = vld [vmem:[#allocation94_spill] sm:$0xff] }
 0x3d1   :  { %v14211_v32 = vpop.f32.mrf.mxu0  ;;  %v14215_v23 = vadd.f32 %v3335_v54, %v2932_v56  ;;  %v5280_v56 = vpack.c.bf16 %v5220_v39, %v5219_v6  ;;  %v20059_v54 = vld [vmem:[#allocation93_spill] sm:$0xff]  ;;  %v20066_v6 = vld [vmem:[#allocation92_spill] sm:$0xff] }
 0x3d2   :  { %20050 = vst [vmem:[#allocation62_spill] sm:$0xff] %v14211_v32  ;;  %v10107_v59 = vpop.f32.mrf.mxu1  ;;  %v20057_v32 = vld [vmem:[#allocation88_spill] sm:$0xff]  ;;  %v2303_v8 = vadd.f32 %v20060_v61, %v20059_v54  ;;  %v2936_v39 = vadd.f32 %v20066_v6, %v2292_v33 }
 0x3d3   :  { %v14218_v12 = vpop.f32.mrf.mxu0  ;;  %v14222_v14 = vadd.f32 %v10107_v59, %v2935_v45  ;;  %v2933_v28 = vadd.f32 %v20057_v32, %v2279_v27  ;;  %v20064_v45 = vld [vmem:[#allocation95_spill] sm:$0xff]  ;;  %v20065_v59 = vld [vmem:[#allocation197_spill] sm:$0xff] }
 0x3d4   :  { %20054 = vst [vmem:[#allocation69_spill] sm:$0xff] %v14218_v12  ;;  %v3338_v42 = vpop.f32.mrf.mxu1  ;;  %v2938_v12 = vadd.f32 %v20062_v60, %v2300_v40  ;;  %v2295_v27 = vadd.f32 %v20065_v59, %v20064_v45  ;;  %v20069_v60 = vld [vmem:[#allocation199_spill] sm:$0xff]  ;;  %v2939_v58 = vadd.f32 %v20070_v49, %v2303_v8  ;;  %v5224_v54 = vld [vmem:[#allocation2 + $0xb1] sm:$0xff] }
 0x3d5   :  { %v14225_v22 = vpop.f32.mrf.mxu0  ;;  %v14229_v47 = vadd.f32 %v3338_v42, %v2933_v28  ;;  %v20068_v42 = vld [vmem:[#allocation97_spill] sm:$0xff]  ;;  %v20078_v8 = vld [vmem:[#allocation203_spill] sm:$0xff] }
 0x3d6   :  { %20058 = vst [vmem:[#allocation171_spill] sm:$0xff] %v14225_v22  ;;  %v10110_v21 = vpop.f32.mrf.mxu1  ;;  %10349 = vmatmul.mubr.msk.bf16.gmra.mxu1 %vm560_vm1, %v5280_v56  ;;  %v2316_v40 = vadd.f32 %v20069_v60, %v20068_v42  ;;  %v5223_v56 = vld [vmem:[#allocation2 + $0xa9] sm:$0xff]  ;;  %v20073_v59 = vld [vmem:[#allocation201_spill] sm:$0xff] }
 0x3d7   :  { %20061 = vst [vmem:[#allocation63_spill] sm:$0xff] %v14229_v47  ;;  %v14232_v36 = vpop.f32.mrf.mxu0  ;;  %v14237_v32 = vadd.f32 %v10110_v21, %v2938_v12  ;;  %10352 = vmatprep.mubr.msk.bf16.mxu1 %vm560_vm1, %v5281_v63  ;;  %v5225_v21 = vld [vmem:[#allocation2 + $0xc1] sm:$0xff]  ;;  %v5226_v12 = vld [vmem:[#allocation2 + $0xc9] sm:$0xff] }
 0x3d8   :  { %20063 = vst [vmem:[#allocation71_spill] sm:$0xff] %v14232_v36  ;;  %v3351_v26 = vpop.f32.mrf.mxu1  ;;  %v20072_v63 = vld [vmem:[#allocation99_spill] sm:$0xff]  ;;  %v20080_v47 = vld [vmem:[#allocation98_spill] sm:$0xff]  ;;  %v5283_v15 = vpack.c.bf16 %v5226_v12, %v5225_v21 }
 0x3d9   :  { %v14241_v28 = vpop.f32.mrf.mxu0  ;;  %v14245_v50 = vadd.f32 %v3351_v26, %v2936_v39  ;;  %v2308_v33 = vadd.f32 %v20073_v59, %v20072_v63  ;;  %v5282_v39 = vpack.c.bf16 %v5224_v54, %v5223_v56  ;;  %v20077_v26 = vld [vmem:[#allocation101_spill] sm:$0xff]  ;;  %v20085_v56 = vld [vmem:[#allocation100_spill] sm:$0xff]  ;;  %v20090_v12 = vld [vmem:[#allocation102_spill] sm:$0xff] }
 0x3da   :  { %20067 = vst [vmem:[#allocation173_spill] sm:$0xff] %v14241_v28  ;;  %v10111_v61 = vpop.f32.mrf.mxu1  ;;  %v20075_v28 = vld [vmem:[#allocation96_spill] sm:$0xff]  ;;  %v2319_v60 = vadd.f32 %v20078_v8, %v20077_v26  ;;  %v5228_v26 = vld [vmem:[#allocation2 + $0xe1] sm:$0xff] }
 0x3db   :  { %v14248_v45 = vpop.f32.mrf.mxu0  ;;  %v14252_v6 = vadd.f32 %v10111_v61, %v2939_v58  ;;  %v2937_v36 = vadd.f32 %v20075_v28, %v2295_v27  ;;  %v20082_v58 = vld [vmem:[#allocation103_spill] sm:$0xff]  ;;  %v20083_v61 = vld [vmem:[#allocation205_spill] sm:$0xff]  ;;  %v2940_v54 = vadd.f32 %v20085_v56, %v2308_v33 }
 0x3dc   :  { %20071 = vst [vmem:[#allocation68_spill] sm:$0xff] %v14248_v45  ;;  %v3354_v22 = vpop.f32.mrf.mxu1  ;;  %v2942_v45 = vadd.f32 %v20080_v47, %v2316_v40  ;;  %v2311_v27 = vadd.f32 %v20083_v61, %v20082_v58  ;;  %v20088_v47 = vld [vmem:[#allocation207_spill] sm:$0xff]  ;;  %v2943_v59 = vadd.f32 %v20090_v12, %v2319_v60  ;;  %v20093_v61 = vld [vmem:[#allocation209_spill] sm:$0xff] }
 0x3dd   :  { %20074 = vst [vmem:[#allocation73_spill] sm:$0xff] %v14252_v6  ;;  %v14255_v42 = vpop.f32.mrf.mxu0  ;;  %v14259_v49 = vadd.f32 %v3354_v22, %v2937_v36  ;;  %v20087_v22 = vld [vmem:[#allocation105_spill] sm:$0xff]  ;;  %v20098_v60 = vld [vmem:[#allocation211_spill] sm:$0xff] }
 0x3de   :  { %20076 = vst [vmem:[#allocation175_spill] sm:$0xff] %v14255_v42  ;;  %v10114_v24 = vpop.f32.mrf.mxu1  ;;  %10353 = vmatmul.mubr.msk.bf16.gmra.mxu1 %vm560_vm1, %v5282_v39  ;;  %v2332_v40 = vadd.f32 %v20088_v47, %v20087_v22  ;;  %v5227_v39 = vld [vmem:[#allocation2 + $0xd9] sm:$0xff] }
 0x3df   :  { %20079 = vst [vmem:[#allocation70_spill] sm:$0xff] %v14259_v49  ;;  %v14262_v44 = vpop.f32.mrf.mxu0  ;;  %v14267_v28 = vadd.f32 %v10114_v24, %v2942_v45  ;;  %10356 = vmatprep.mubr.msk.bf16.mxu1 %vm560_vm1, %v5283_v15  ;;  %v5229_v24 = vld [vmem:[#allocation2 + $0xf1] sm:$0xff]  ;;  %v5230_v45 = vld [vmem:[#allocation2 + $0xf9] sm:$0xff]  ;;  %v20092_v15 = vld [vmem:[#allocation107_spill] sm:$0xff] }
 0x3e0   :  { %20081 = vst [vmem:[#allocation75_spill] sm:$0xff] %v14262_v44  ;;  %v3367_v63 = vpop.f32.mrf.mxu1  ;;  %v2324_v33 = vadd.f32 %v20093_v61, %v20092_v15  ;;  %v20100_v49 = vld [vmem:[#allocation106_spill] sm:$0xff] }
 0x3e1   :  { %20084 = vst [vmem:[#allocation177_spill] sm:$0xff] %v14267_v28  ;;  %v14271_v36 = vpop.f32.mrf.mxu0  ;;  %v14275_v21 = vadd.f32 %v3367_v63, %v2940_v54  ;;  %v5284_v54 = vpack.c.bf16 %v5228_v26, %v5227_v39  ;;  %v20097_v63 = vld [vmem:[#allocation109_spill] sm:$0xff]  ;;  %v20105_v39 = vld [vmem:[#allocation108_spill] sm:$0xff] }
 0x3e2   :  { %20086 = vst [vmem:[#allocation72_spill] sm:$0xff] %v14271_v36  ;;  %v10115_v8 = vpop.f32.mrf.mxu1  ;;  %v20095_v36 = vld [vmem:[#allocation104_spill] sm:$0xff]  ;;  %v2335_v47 = vadd.f32 %v20098_v60, %v20097_v63  ;;  %v2944_v26 = vadd.f32 %v20105_v39, %v2324_v33 }
 0x3e3   :  { %20089 = vst [vmem:[#allocation77_spill] sm:$0xff] %v14275_v21  ;;  %v14278_v58 = vpop.f32.mrf.mxu0  ;;  %v14282_v56 = vadd.f32 %v10115_v8, %v2943_v59  ;;  %v2941_v44 = vadd.f32 %v20095_v36, %v2311_v27  ;;  %v5285_v21 = vpack.c.bf16 %v5230_v45, %v5229_v24  ;;  %v20102_v59 = vld [vmem:[#allocation111_spill] sm:$0xff]  ;;  %v20103_v8 = vld [vmem:[#allocation213_spill] sm:$0xff]  ;;  %v20110_v45 = vld [vmem:[#allocation110_spill] sm:$0xff] }
 0x3e4   :  { %20091 = vst [vmem:[#allocation179_spill] sm:$0xff] %v14278_v58  ;;  %v3370_v42 = vpop.f32.mrf.mxu1  ;;  %v2946_v58 = vadd.f32 %v20100_v49, %v2332_v40  ;;  %v2327_v27 = vadd.f32 %v20103_v8, %v20102_v59  ;;  %v20108_v49 = vld [vmem:[#allocation215_spill] sm:$0xff]  ;;  %v2947_v61 = vadd.f32 %v20110_v45, %v2335_v47  ;;  %v5232_v63 = vld [vmem:[#allocation2 + $0x111] sm:$0xff] }
 0x3e5   :  { %20094 = vst [vmem:[#allocation74_spill] sm:$0xff] %v14282_v56  ;;  %v14285_v22 = vpop.f32.mrf.mxu0  ;;  %v14289_v12 = vadd.f32 %v3370_v42, %v2941_v44  ;;  %v20107_v42 = vld [vmem:[#allocation113_spill] sm:$0xff]  ;;  %v20118_v47 = vld [vmem:[#allocation219_spill] sm:$0xff] }
 0x3e6   :  { %20096 = vst [vmem:[#allocation79_spill] sm:$0xff] %v14285_v22  ;;  %v10118_v28 = vpop.f32.mrf.mxu1  ;;  %10357 = vmatmul.mubr.msk.bf16.gmra.mxu1 %vm560_vm1, %v5284_v54  ;;  %v2348_v40 = vadd.f32 %v20108_v49, %v20107_v42  ;;  %v5231_v54 = vld [vmem:[#allocation2 + $0x109] sm:$0xff]  ;;  %v20113_v8 = vld [vmem:[#allocation217_spill] sm:$0xff] }
 0x3e7   :  { %20099 = vst [vmem:[#allocation181_spill] sm:$0xff] %v14289_v12  ;;  %v14292_v6 = vpop.f32.mrf.mxu0  ;;  %v14297_v36 = vadd.f32 %v10118_v28, %v2946_v58  ;;  %10360 = vmatprep.mubr.msk.bf16.mxu1 %vm560_vm1, %v5285_v21  ;;  %v5233_v28 = vld [vmem:[#allocation2 + $0x121] sm:$0xff]  ;;  %v5234_v58 = vld [vmem:[#allocation2 + $0x129] sm:$0xff] }
 0x3e8   :  { %20101 = vst [vmem:[#allocation76_spill] sm:$0xff] %v14292_v6  ;;  %v3383_v15 = vpop.f32.mrf.mxu1  ;;  %v20112_v21 = vld [vmem:[#allocation115_spill] sm:$0xff]  ;;  %v20120_v12 = vld [vmem:[#allocation114_spill] sm:$0xff] }
 0x3e9   :  { %20104 = vst [vmem:[#allocation6_spill] sm:$0xff] %v14297_v36  ;;  %v14301_v44 = vpop.f32.mrf.mxu0  ;;  %v14305_v24 = vadd.f32 %v3383_v15, %v2944_v26  ;;  %v2340_v33 = vadd.f32 %v20113_v8, %v20112_v21  ;;  %v5286_v26 = vpack.c.bf16 %v5232_v63, %v5231_v54  ;;  %v20117_v15 = vld [vmem:[#allocation117_spill] sm:$0xff]  ;;  %v20125_v54 = vld [vmem:[#allocation116_spill] sm:$0xff] }
 0x3ea   :  { %20106 = vst [vmem:[#allocation81_spill] sm:$0xff] %v14301_v44  ;;  %v10119_v60 = vpop.f32.mrf.mxu1  ;;  %v20115_v44 = vld [vmem:[#allocation112_spill] sm:$0xff]  ;;  %v2351_v49 = vadd.f32 %v20118_v47, %v20117_v15  ;;  %v5236_v15 = vld [vmem:[#allocation2 + $0x141] sm:$0xff] }
 0x3eb   :  { %20109 = vst [vmem:[#allocation183_spill] sm:$0xff] %v14305_v24  ;;  %v14308_v59 = vpop.f32.mrf.mxu0  ;;  %v14312_v39 = vadd.f32 %v10119_v60, %v2947_v61  ;;  %v2945_v6 = vadd.f32 %v20115_v44, %v2327_v27  ;;  %v5287_v24 = vpack.c.bf16 %v5234_v58, %v5233_v28  ;;  %v20122_v61 = vld [vmem:[#allocation119_spill] sm:$0xff]  ;;  %v20123_v60 = vld [vmem:[#allocation221_spill] sm:$0xff]  ;;  %v2948_v63 = vadd.f32 %v20125_v54, %v2340_v33  ;;  %v20130_v58 = vld [vmem:[#allocation118_spill] sm:$0xff] }
 0x3ec   :  { %20111 = vst [vmem:[#allocation78_spill] sm:$0xff] %v14308_v59  ;;  %v3386_v22 = vpop.f32.mrf.mxu1  ;;  %v2950_v59 = vadd.f32 %v20120_v12, %v2348_v40  ;;  %v2343_v27 = vadd.f32 %v20123_v60, %v20122_v61  ;;  %v20128_v12 = vld [vmem:[#allocation223_spill] sm:$0xff]  ;;  %v2951_v8 = vadd.f32 %v20130_v58, %v2351_v49  ;;  %v20133_v60 = vld [vmem:[#allocation225_spill] sm:$0xff] }
 0x3ed   :  { %20114 = vst [vmem:[#allocation83_spill] sm:$0xff] %v14312_v39  ;;  %v14315_v42 = vpop.f32.mrf.mxu0  ;;  %v14319_v45 = vadd.f32 %v3386_v22, %v2945_v6  ;;  %v20127_v22 = vld [vmem:[#allocation121_spill] sm:$0xff]  ;;  %v20137_v49 = vld [vmem:[#allocation227_spill] sm:$0xff] }
 0x3ee   :  { %20116 = vst [vmem:[#allocation185_spill] sm:$0xff] %v14315_v42  ;;  %v10122_v36 = vpop.f32.mrf.mxu1  ;;  %10361 = vmatmul.mubr.msk.bf16.gmra.mxu1 %vm560_vm1, %v5286_v26  ;;  %v2364_v40 = vadd.f32 %v20128_v12, %v20127_v22  ;;  %v5235_v26 = vld [vmem:[#allocation2 + $0x139] sm:$0xff] }
 0x3ef   :  { %20119 = vst [vmem:[#allocation80_spill] sm:$0xff] %v14319_v45  ;;  %v14322_v56 = vpop.f32.mrf.mxu0  ;;  %v14327_v44 = vadd.f32 %v10122_v36, %v2950_v59  ;;  %10364 = vmatprep.mubr.msk.bf16.mxu1 %vm560_vm1, %v5287_v24  ;;  %v5237_v36 = vld [vmem:[#allocation2 + $0x151] sm:$0xff]  ;;  %v5238_v59 = vld [vmem:[#allocation2 + $0x159] sm:$0xff]  ;;  %v20132_v24 = vld [vmem:[#allocation123_spill] sm:$0xff] }
 0x3f0   :  { %20121 = vst [vmem:[#allocation85_spill] sm:$0xff] %v14322_v56  ;;  %v3399_v21 = vpop.f32.mrf.mxu1  ;;  %v2356_v33 = vadd.f32 %v20133_v60, %v20132_v24  ;;  %v20139_v45 = vld [vmem:[#allocation122_spill] sm:$0xff] }
 0x3f1   :  { %20124 = vst [vmem:[#allocation187_spill] sm:$0xff] %v14327_v44  ;;  %v14331_v6 = vpop.f32.mrf.mxu0  ;;  %v14335_v28 = vadd.f32 %v3399_v21, %v2948_v63  ;;  %v5288_v63 = vpack.c.bf16 %v5236_v15, %v5235_v26  ;;  %v20136_v21 = vld [vmem:[#allocation125_spill] sm:$0xff]  ;;  %v20144_v26 = vld [vmem:[#allocation124_spill] sm:$0xff] }
 0x3f2   :  { %20126 = vst [vmem:[#allocation82_spill] sm:$0xff] %v14331_v6  ;;  %v10123_v47 = vpop.f32.mrf.mxu1  ;;  %v20134_v6 = vld [vmem:[#allocation120_spill] sm:$0xff]  ;;  %v2367_v12 = vadd.f32 %v20137_v49, %v20136_v21  ;;  %v2952_v15 = vadd.f32 %v20144_v26, %v2356_v33 }
 0x3f3   :  { %20129 = vst [vmem:[#allocation87_spill] sm:$0xff] %v14335_v28  ;;  %v14338_v61 = vpop.f32.mrf.mxu0  ;;  %v14342_v54 = vadd.f32 %v10123_v47, %v2951_v8  ;;  %v2949_v56 = vadd.f32 %v20134_v6, %v2343_v27  ;;  %v5289_v28 = vpack.c.bf16 %v5238_v59, %v5237_v36  ;;  %v20141_v8 = vld [vmem:[#allocation127_spill] sm:$0xff]  ;;  %v20142_v47 = vld [vmem:[#allocation229_spill] sm:$0xff]  ;;  %v20149_v59 = vld [vmem:[#allocation126_spill] sm:$0xff] }
 0x3f4   :  { %20131 = vst [vmem:[#allocation189_spill] sm:$0xff] %v14338_v61  ;;  %v3402_v42 = vpop.f32.mrf.mxu1  ;;  %v2954_v61 = vadd.f32 %v20139_v45, %v2364_v40  ;;  %v2359_v27 = vadd.f32 %v20142_v47, %v20141_v8  ;;  %v20147_v45 = vld [vmem:[#allocation231_spill] sm:$0xff]  ;;  %v2955_v60 = vadd.f32 %v20149_v59, %v2367_v12  ;;  %v5240_v21 = vld [vmem:[#allocation2 + $0x171] sm:$0xff]  ;;  %v20156_v59 = vld [vmem:[#allocation130_spill] sm:$0xff] }
 0x3f5   :  { %v14345_v22 = vpop.f32.mrf.mxu0  ;;  %v14349_v58 = vadd.f32 %v3402_v42, %v2949_v56  ;;  %v20146_v42 = vld [vmem:[#allocation129_spill] sm:$0xff] }
 0x3f6   :  { %20135 = vst [vmem:[#allocation84_spill] sm:$0xff] %v14345_v22  ;;  %v10126_v44 = vpop.f32.mrf.mxu1  ;;  %10365 = vmatmul.mubr.msk.bf16.gmra.mxu1 %vm560_vm1, %v5288_v63  ;;  %v2380_v40 = vadd.f32 %v20147_v45, %v20146_v42  ;;  %v5239_v63 = vld [vmem:[#allocation2 + $0x169] sm:$0xff]  ;;  %v20152_v47 = vld [vmem:[#allocation233_spill] sm:$0xff] }
 0x3f7   :  { %20138 = vst [vmem:[#allocation89_spill] sm:$0xff] %v14349_v58  ;;  %v14352_v39 = vpop.f32.mrf.mxu0  ;;  %v14357_v6 = vadd.f32 %v10126_v44, %v2954_v61  ;;  %10368 = vmatprep.mubr.msk.bf16.mxu1 %vm560_vm1, %v5289_v28  ;;  %v5241_v44 = vld [vmem:[#allocation2 + $0x181] sm:$0xff]  ;;  %v5242_v61 = vld [vmem:[#allocation2 + $0x189] sm:$0xff] }
 0x3f8   :  { %20140 = vst [vmem:[#allocation191_spill] sm:$0xff] %v14352_v39  ;;  %v3415_v24 = vpop.f32.mrf.mxu1  ;;  %v20151_v28 = vld [vmem:[#allocation131_spill] sm:$0xff]  ;;  %v5291_v58 = vpack.c.bf16 %v5242_v61, %v5241_v44 }
 0x3f9   :  { %20143 = vst [vmem:[#allocation86_spill] sm:$0xff] %v14357_v6  ;;  %v14361_v56 = vpop.f32.mrf.mxu0  ;;  %v14365_v36 = vadd.f32 %v3415_v24, %v2952_v15  ;;  %v2372_v33 = vadd.f32 %v20152_v47, %v20151_v28  ;;  %v5290_v15 = vpack.c.bf16 %v5240_v21, %v5239_v63  ;;  %v20155_v24 = vld [vmem:[#allocation133_spill] sm:$0xff]  ;;  %v20159_v63 = vld [vmem:[#allocation132_spill] sm:$0xff]  ;;  %v20162_v28 = vld [vmem:[#allocation134_spill] sm:$0xff] }
 0x3fa   :  { %20145 = vst [vmem:[#allocation91_spill] sm:$0xff] %v14361_v56  ;;  %v10127_v49 = vpop.f32.mrf.mxu1  ;;  %v20153_v56 = vld [vmem:[#allocation128_spill] sm:$0xff]  ;;  %v2383_v12 = vadd.f32 %v13910_v1, %v20155_v24  ;;  %v5243_v1 = vld [vmem:[#allocation2 + $0x199] sm:$0xff]  ;;  %v20164_v24 = vld [vmem:[#allocation139_spill] sm:$0xff] }
 0x3fb   :  { %20148 = vst [vmem:[#allocation193_spill] sm:$0xff] %v14365_v36  ;;  %v14368_v8 = vpop.f32.mrf.mxu0  ;;  %v14372_v26 = vadd.f32 %v10127_v49, %v2955_v60  ;;  %v2953_v39 = vadd.f32 %v20153_v56, %v2359_v27  ;;  %v20158_v60 = vld [vmem:[#allocation135_spill] sm:$0xff]  ;;  %v2956_v21 = vadd.f32 %v20159_v63, %v2372_v33  ;;  %v20165_v33 = vld [vmem:[#allocation238_spill] sm:$0xff]  ;;  %v20166_v63 = vld [vmem:[#allocation136_spill] sm:$0xff] }
 0x3fc   :  { %20150 = vst [vmem:[#allocation88_spill] sm:$0xff] %v14368_v8  ;;  %v3418_v22 = vpop.f32.mrf.mxu1  ;;  %v2958_v8 = vadd.f32 %v20156_v59, %v2380_v40  ;;  %v2375_v27 = vadd.f32 %v13914_v3, %v20158_v60  ;;  %v20161_v40 = vld [vmem:[#allocation137_spill] sm:$0xff]  ;;  %v2959_v47 = vadd.f32 %v20162_v28, %v2383_v12  ;;  %v2388_v59 = vadd.f32 %v20165_v33, %v20164_v24  ;;  %v20172_v24 = vld [vmem:[#allocation140_spill] sm:$0xff] }
 0x3fd   :  { %v14375_v42 = vpop.f32.mrf.mxu0  ;;  %v14379_v45 = vadd.f32 %v3418_v22, %v2953_v39  ;;  %v5244_v39 = vld [vmem:[#allocation2 + $0x1a1] sm:$0xff]  ;;  %v2396_v44 = vadd.f32 %v13918_v9, %v20161_v40  ;;  %v20168_v9 = vld [vmem:[#allocation141_spill] sm:$0xff] }
 0x3fe   :  { %20154 = vst [vmem:[#allocation93_spill] sm:$0xff] %v14375_v42  ;;  %v10130_v36 = vpop.f32.mrf.mxu1  ;;  %10369 = vmatmul.mubr.msk.bf16.gmra.mxu1 %vm560_vm1, %v5290_v15  ;;  %v2960_v33 = vadd.f32 %v20172_v24, %v2388_v59 }
 0x3ff   :  { %v14382_v6 = vpop.f32.mrf.mxu0  ;;  %v14387_v56 = vadd.f32 %v10130_v36, %v2958_v8  ;;  %10372 = vmatprep.mubr.msk.bf16.mxu1 %vm560_vm1, %v5291_v58  ;;  %v5292_v36 = vpack.c.bf16 %v5244_v39, %v5243_v1  ;;  %v5245_v8 = vld [vmem:[#allocation2 + $0x1e1] sm:$0xff]  ;;  %v5246_v58 = vld [vmem:[#allocation2 + $0x1e9] sm:$0xff] }
 0x400   :  { %20157 = vst [vmem:[#allocation195_spill] sm:$0xff] %v14382_v6  ;;  %v3431_v22 = vpop.f32.mrf.mxu1  ;;  %v5293_v1 = vpack.c.bf16 %v5246_v58, %v5245_v8  ;;  %v5247_v58 = vld [vmem:[#allocation2 + $0x1f9] sm:$0xff] }
 0x401   :  { %v14391_v49 = vpop.f32.mrf.mxu0  ;;  %v14395_v61 = vadd.f32 %v3431_v22, %v2956_v21  ;;  %v2399_v21 = vadd.f32 %v13932_v2, %v20168_v9  ;;  %v20169_v22 = vld [vmem:[#allocation138_spill] sm:$0xff] }
 0x402   :  { %20160 = vst [vmem:[#allocation90_spill] sm:$0xff] %v14391_v49  ;;  %v10131_v15 = vpop.f32.mrf.mxu1  ;;  %v2957_v49 = vadd.f32 %v20166_v63, %v2375_v27  ;;  %v2962_v40 = vadd.f32 %v20169_v22, %v2396_v44  ;;  %v20174_v44 = vld [vmem:[#allocation142_spill] sm:$0xff]  ;;  %v5249_v22 = vld [vmem:[#allocation2 + $0x211] sm:$0xff] }
 0x403   :  { %v14398_v3 = vpop.f32.mrf.mxu0  ;;  %v14402_v60 = vadd.f32 %v10131_v15, %v2959_v47  ;;  %v20171_v47 = vld [vmem:[#allocation143_spill] sm:$0xff]  ;;  %v2963_v8 = vadd.f32 %v20174_v44, %v2399_v21 }
 0x404   :  { %20163 = vst [vmem:[#allocation95_spill] sm:$0xff] %v14398_v3  ;;  %v3434_v6 = vpop.f32.mrf.mxu1  ;;  %v2391_v15 = vadd.f32 %v13938_v4, %v20171_v47  ;;  %v5248_v63 = vld [vmem:[#allocation2 + $0x201] sm:$0xff]  ;;  %v5250_v4 = vld [vmem:[#allocation2 + $0x219] sm:$0xff] }
 0x405   :  { %v14405_v42 = vpop.f32.mrf.mxu0  ;;  %v14409_v12 = vadd.f32 %v3434_v6, %v2957_v49  ;;  %v5294_v59 = vpack.c.bf16 %v5248_v63, %v5247_v58  ;;  %v20180_v63 = vld [vmem:[#allocation147_spill] sm:$0xff] }
 0x406   :  { %20167 = vst [vmem:[#allocation197_spill] sm:$0xff] %v14405_v42  ;;  %v10134_v39 = vpop.f32.mrf.mxu1  ;;  %10373 = vmatmul.mubr.msk.bf16.gmra.mxu1 %vm560_vm1, %v5292_v36 }
 0x407   :  { %v14412_v28 = vpop.f32.mrf.mxu0  ;;  %v14417_v27 = vadd.f32 %v10134_v39, %v2962_v40  ;;  %10376 = vmatprep.mubr.msk.bf16.mxu1 %vm560_vm1, %v5293_v1  ;;  %v20176_v39 = vld [vmem:[#allocation144_spill] sm:$0xff] }
 0x408   :  { %20170 = vst [vmem:[#allocation92_spill] sm:$0xff] %v14412_v28  ;;  %v3447_v2 = vpop.f32.mrf.mxu1  ;;  %v2961_v1 = vadd.f32 %v20176_v39, %v2391_v15  ;;  %v4027_v39 = vadd.f32 %v20180_v63, %v13967_v46 }
 0x409   :  { %v14421_v6 = vpop.f32.mrf.mxu0  ;;  %v14423_v49 = vadd.f32 %v3447_v2, %v2960_v33  ;;  %v20177_v33 = vld [vmem:[#allocation145_spill] sm:$0xff] }
 0x40a   :  { %20173 = vst [vmem:[#allocation97_spill] sm:$0xff] %v14421_v6  ;;  %v10135_v9 = vpop.f32.mrf.mxu1  ;;  %v4026_v2 = vadd.f32 %v20177_v33, %v13951_v18  ;;  %v5295_v6 = vpack.c.bf16 %v5250_v4, %v5249_v22  ;;  %v5251_v18 = vld [vmem:[#allocation2 + $0x229] sm:$0xff]  ;;  %v5252_v22 = vld [vmem:[#allocation2 + $0x231] sm:$0xff] }
 0x40b   :  { %v14426_v36 = vpop.f32.mrf.mxu0  ;;  %v14428_v40 = vadd.f32 %v10135_v9, %v2963_v8  ;;  %v20179_v8 = vld [vmem:[#allocation146_spill] sm:$0xff] }
 0x40c   :  { %20175 = vst [vmem:[#allocation199_spill] sm:$0xff] %v14426_v36  ;;  %v3450_v47 = vpop.f32.mrf.mxu1  ;;  %v4024_v15 = vadd.f32 %v20179_v8, %v13960_v25  ;;  %v5296_v25 = vpack.c.bf16 %v5252_v22, %v5251_v18  ;;  %v10642_v18 = vld [vmem:[%s19289_s10 + $0x18] sm:$0xff]  }
 0x40d   :  { %v14431_v24 = vadd.f32 %v3450_v47, %v2961_v1  ;;  %v14435_v21 = vpop.f32.mrf.mxu0  ;;  %v5253_v47 = vld [vmem:[#allocation2 + $0x241] sm:$0xff]  ;;  %10544 = vmatprep.subr.bf16.mxu0 %v10642_v18 }
 0x40e   :  { %20178 = vst [vmem:[#allocation94_spill] sm:$0xff] %v14435_v21  ;;  %v10210_v44 = vpop.f32.mrf.mxu1  ;;  %10377 = vmatmul.mubr.msk.bf16.gmra.mxu1 %vm560_vm1, %v5294_v59  ;;  %v5254_v59 = vld [vmem:[#allocation2 + $0x249] sm:$0xff]  ;;  %10545 = vmatpush3.bf16.msra.mxu0 %v10642_v18  ;;  %v20189_v18 = vld [vmem:[#allocation154_spill] sm:$0xff] }
 0x40f   :  { %v14438_v36 = vadd.f32 %v10210_v44, %v4026_v2  ;;  %10380 = vmatprep.mubr.msk.bf16.mxu1 %vm560_vm1, %v5295_v6  ;;  %v14447_v4 = vpop.f32.mrf.mxu0  ;;  %v20181_v6 = vld [vmem:[#allocation148_spill] sm:$0xff]  ;;  %v5297_v46 = vpack.c.bf16 %v5254_v59, %v5253_v47  ;;  %v5255_v59 = vld [vmem:[#allocation2 + $0x259] sm:$0xff] }
 0x410   :  { %v4331_v9 = vpop.f32.mrf.mxu1  ;;  %v4025_v2 = vadd.f32 %v20181_v6, %v13974_v5  ;;  %v5256_v6 = vld [vmem:[#allocation2 + $0x261] sm:$0xff] }
 0x411   :  { %v14443_v58 = vadd.f32 %v4331_v9, %v4024_v15  ;;  %v20182_v15 = vld [vmem:[#allocation149_spill] sm:$0xff]  ;;  %v14457_v63 = vpop.f32.mrf.mxu0 }
 0x412   :  { %v10211_v1 = vpop.f32.mrf.mxu1  ;;  %v4030_v9 = vadd.f32 %v20182_v15, %v13983_v11  ;;  %v20184_v11 = vld [vmem:[#allocation151_spill] sm:$0xff]  ;;  %v20186_v15 = vld [vmem:[#allocation152_spill] sm:$0xff] }
 0x413   :  { %v14449_v33 = vadd.f32 %v10211_v1, %v4027_v39  ;;  %v20183_v39 = vld [vmem:[#allocation150_spill] sm:$0xff]  ;;  %v4031_v47 = vadd.f32 %v20184_v11, %v13999_v52  ;;  %v20187_v52 = vld [vmem:[#allocation153_spill] sm:$0xff] }
 0x414   :  { %v4334_v44 = vpop.f32.mrf.mxu1  ;;  %v4028_v5 = vadd.f32 %v20183_v39, %v13992_v41  ;;  %v5298_v39 = vpack.c.bf16 %v5256_v6, %v5255_v59 }
 0x415   :  { %v14453_v8 = vadd.f32 %v4334_v44, %v4025_v2  ;;  %v5257_v44 = vld [vmem:[#allocation2 + $0x271] sm:$0xff] }
 0x416   :  { %v10214_v21 = vpop.f32.mrf.mxu1  ;;  %10381 = vmatmul.mubr.msk.bf16.gmra.mxu1 %vm560_vm1, %v5296_v25  ;;  %v5258_v25 = vld [vmem:[#allocation2 + $0x279] sm:$0xff] }
 0x417   :  { %v14460_v28 = vadd.f32 %v10214_v21, %v4030_v9  ;;  %10384 = vmatprep.mubr.msk.bf16.mxu1 %vm560_vm1, %v5297_v46  ;;  %v14472_v21 = vpop.f32.mrf.mxu0  ;;  %v4029_v9 = vadd.f32 %v20186_v15, %v14006_v29  ;;  %v5299_v11 = vpack.c.bf16 %v5258_v25, %v5257_v44  ;;  %v4032_v29 = vadd.f32 %v20189_v18, %v14024_v7  ;;  %v5259_v44 = vld [vmem:[#allocation2 + $0x289] sm:$0xff]  ;;  %v5260_v25 = vld [vmem:[#allocation2 + $0x291] sm:$0xff] }
 0x418   :  { %v4347_v22 = vpop.f32.mrf.mxu1  ;;  %20185 = vst [vmem:[#allocation99_spill] sm:$0xff] %v14472_v21 }
 0x419   :  { %v14468_v1 = vadd.f32 %v4347_v22, %v4028_v5  ;;  %v4034_v22 = vadd.f32 %v20187_v52, %v14015_v31  ;;  %v14482_v42 = vpop.f32.mrf.mxu0  ;;  %v20190_v31 = vld [vmem:[#allocation155_spill] sm:$0xff] }
 0x41a   :  { %v10215_v2 = vpop.f32.mrf.mxu1  ;;  %20188 = vst [vmem:[#allocation201_spill] sm:$0xff] %v14482_v42 }
 0x41b   :  { %v14474_v41 = vadd.f32 %v10215_v2, %v4031_v47  ;;  %v10643_v47 = vld [vmem:[%s19289_s10 + $0x10] sm:$0xff]   ;;  %v4035_v2 = vadd.f32 %v20190_v31, %v14031_v43  ;;  %v5300_v43 = vpack.c.bf16 %v5260_v25, %v5259_v44  ;;  %v10645_v25 = vld [vmem:[%s19289_s10] sm:$0xff]  }
 0x41c   :  { %v4350_v46 = vpop.f32.mrf.mxu1  ;;  %10546 = vmatprep.subr.bf16.mxu0 %v10643_v47 }
 0x41d   :  { %v14478_v5 = vadd.f32 %v4350_v46, %v4029_v9  ;;  %v5261_v9 = vld [vmem:[#allocation2 + $0x2a1] sm:$0xff]  ;;  %v5262_v46 = vld [vmem:[#allocation2 + $0x2a9] sm:$0xff]  ;;  %10547 = vmatpush3.bf16.msra.mxu0 %v10643_v47 }
 0x41e   :  { %v10218_v3 = vpop.f32.mrf.mxu1  ;;  %10385 = vmatmul.mubr.msk.bf16.gmra.mxu1 %vm560_vm1, %v5298_v39  ;;  %v20192_v39 = vld [vmem:[#allocation156_spill] sm:$0xff]  ;;  %v5301_v31 = vpack.c.bf16 %v5262_v46, %v5261_v9  ;;  %v20196_v9 = vld [vmem:[#allocation159_spill] sm:$0xff] }
 0x41f   :  { %v14485_v21 = vadd.f32 %v10218_v3, %v4034_v22  ;;  %10388 = vmatprep.mubr.msk.bf16.mxu1 %vm560_vm1, %v5299_v11  ;;  %v14497_v3 = vpop.f32.mrf.mxu0  ;;  %v4033_v52 = vadd.f32 %v20192_v39, %v14038_v16  ;;  %v10644_v22 = vld [vmem:[%s19289_s10 + $0x8] sm:$0xff]   ;;  %v4039_v46 = vadd.f32 %v20196_v9, %v14063_v0  ;;  %v5263_v39 = vld [vmem:[#allocation2 + $0x2b9] sm:$0xff] }
 0x420   :  { %v4363_v59 = vpop.f32.mrf.mxu1  ;;  %20191 = vst [vmem:[#allocation96_spill] sm:$0xff] %v14497_v3  ;;  %10548 = vmatprep.subr.bf16.mxu0 %v10644_v22  ;;  %v20199_v0 = vld [vmem:[#allocation161_spill] sm:$0xff] }
 0x421   :  { %v14493_v6 = vadd.f32 %v4363_v59, %v4032_v29  ;;  %v20193_v29 = vld [vmem:[#allocation157_spill] sm:$0xff]  ;;  %v14510_v3 = vpop.f32.mrf.mxu0  ;;  %10549 = vmatpush3.bf16.msra.mxu0 %v10644_v22 }
 0x422   :  { %v10219_v15 = vpop.f32.mrf.mxu1  ;;  %v4038_v59 = vadd.f32 %v20193_v29, %v14047_v10  ;;  %20194 = vst [vmem:[#allocation101_spill] sm:$0xff] %v14510_v3  ;;  %10550 = vmatprep.subr.bf16.mxu0 %v10645_v25  ;;  %v5266_v29 = vld [vmem:[#allocation2 + $0x2d9] sm:$0xff]  ;;  %v20200_v3 = vld [vmem:[#allocation7_spill] sm:$0xff] }
 0x423   :  { %v14499_v7 = vadd.f32 %v10219_v15, %v4035_v2  ;;  %v20195_v2 = vld [vmem:[#allocation158_spill] sm:$0xff]  ;;  %v14525_v22 = vpop.f32.mrf.mxu0 }
 0x424   :  { %v4366_v11 = vpop.f32.mrf.mxu1  ;;  %v4036_v44 = vadd.f32 %v20195_v2, %v14056_v20  ;;  %20197 = vst [vmem:[#allocation203_spill] sm:$0xff] %v14525_v22 }
 0x425   :  { %v14506_v18 = vadd.f32 %v4366_v11, %v4033_v52  ;;  %v5264_v52 = vld [vmem:[#allocation2 + $0x2c1] sm:$0xff]  ;;  %10551 = vmatpush3.bf16.msra.mxu0 %v10645_v25  ;;  %v14537_v22 = vpop.f32.mrf.mxu0  ;;  %v20201_v25 = vld [vmem:[#allocation8_spill] sm:$0xff] }
 0x426   :  { %v10222_v47 = vpop.f32.mrf.mxu1  ;;  %10389 = vmatmul.mubr.msk.bf16.gmra.mxu1 %vm560_vm1, %v5300_v43  ;;  %v5265_v43 = vld [vmem:[#allocation2 + $0x2d1] sm:$0xff]  ;;  %v5302_v2 = vpack.c.bf16 %v5264_v52, %v5263_v39 }
 0x427   :  { %v14513_v16 = vadd.f32 %v10222_v47, %v4038_v59  ;;  %10392 = vmatprep.mubr.msk.bf16.mxu1 %vm560_vm1, %v5301_v31  ;;  %v20198_v59 = vld [vmem:[#allocation160_spill] sm:$0xff]  ;;  %v5303_v9 = vpack.c.bf16 %v5266_v29, %v5265_v43 }
 0x428   :  { %v4379_v10 = vpop.f32.mrf.mxu1  ;;  %v4037_v31 = vadd.f32 %v20198_v59, %v14070_v19  ;;  %10553 = vmatmul.mubr.msk.bf16.vlgmr.msra.gmra.mxu0 %vm174_vm0, %v20200_v3  ;;  %v20203_v3 = vld [vmem:[#allocation163_spill] sm:$0xff]  ;;  %v5268_v29 = vld [vmem:[#allocation2 + $0x2f1] sm:$0xff]  ;;  %v14551_v59 = vpop.f32.mrf.mxu0 }
 0x429   :  { %v14521_v15 = vadd.f32 %v4379_v10, %v4036_v44  ;;  %v4042_v10 = vadd.f32 %v20199_v0, %v14079_v48  ;;  %10556 = vmatprep.mubr.msk.bf16.mxu0 %vm174_vm0, %v20201_v25  ;;  %v5267_v43 = vld [vmem:[#allocation2 + $0x2e9] sm:$0xff]  ;;  %20204 = vst [vmem:[#allocation98_spill] sm:$0xff] %v14551_v59  ;;  %v5273_v59 = vld [vmem:[#allocation2 + $0x331] sm:$0xff] }
 0x42a   :  { %v10223_v11 = vpop.f32.mrf.mxu1 }
 0x42b   :  { %v14527_v20 = vadd.f32 %v10223_v11, %v4039_v46  ;;  %v20202_v46 = vld [vmem:[#allocation162_spill] sm:$0xff]  ;;  %v4043_v11 = vadd.f32 %v20203_v3, %v14095_v30  ;;  %v14561_v30 = vpop.f32.mrf.mxu0 }
 0x42c   :  { %v4382_v47 = vpop.f32.mrf.mxu1  ;;  %v4040_v39 = vadd.f32 %v20202_v46, %v14088_v37  ;;  %v20205_v37 = vld [vmem:[#allocation165_spill] sm:$0xff] }
 0x42d   :  { %v14531_v44 = vadd.f32 %v4382_v47, %v4037_v31  ;;  %v5269_v47 = vld [vmem:[#allocation2 + $0x301] sm:$0xff]  ;;  %v20206_v46 = vld [vmem:[#allocation9_spill] sm:$0xff] }
 0x42e   :  { %v10226_v42 = vpop.f32.mrf.mxu1  ;;  %10393 = vmatmul.mubr.msk.bf16.gmra.mxu1 %vm560_vm1, %v5302_v2  ;;  %v5270_v2 = vld [vmem:[#allocation2 + $0x309] sm:$0xff] }
 0x42f   :  { %v14542_v19 = vadd.f32 %v10226_v42, %v4042_v10  ;;  %10396 = vmatprep.mubr.msk.bf16.mxu1 %vm560_vm1, %v5303_v9  ;;  %v5304_v10 = vpack.c.bf16 %v5268_v29, %v5267_v43  ;;  %v4046_v9 = vadd.f32 %v20205_v37, %v14111_v34  ;;  %v5305_v25 = vpack.c.bf16 %v5270_v2, %v5269_v47  ;;  %v5271_v2 = vld [vmem:[#allocation2 + $0x319] sm:$0xff]  ;;  %v5272_v37 = vld [vmem:[#allocation2 + $0x321] sm:$0xff] }
 0x430   :  { %v4395_v48 = vpop.f32.mrf.mxu1  ;;  %10557 = vmatmul.mubr.msk.bf16.gmra.mxu0 %vm174_vm0, %v20206_v46  ;;  %v14575_v46 = vpop.f32.mrf.mxu0 }
 0x431   :  { %v14547_v52 = vadd.f32 %v4395_v48, %v4040_v39  ;;  %v20207_v48 = vld [vmem:[#allocation10_spill] sm:$0xff]  ;;  %20210 = vst [vmem:[#allocation103_spill] sm:$0xff] %v14575_v46  ;;  %v20215_v46 = vld [vmem:[#allocation12_spill] sm:$0xff] }
 0x432   :  { %v10227_v31 = vpop.f32.mrf.mxu1  ;;  %10560 = vmatprep.mubr.msk.bf16.mxu0 %vm174_vm0, %v20207_v48  ;;  %v5274_v48 = vld [vmem:[#allocation2 + $0x339] sm:$0xff] }
 0x433   :  { %v14553_v42 = vadd.f32 %v10227_v31, %v4043_v11  ;;  %v20208_v11 = vld [vmem:[#allocation166_spill] sm:$0xff]  ;;  %v20209_v31 = vld [vmem:[#allocation167_spill] sm:$0xff] }
 0x434   :  { %v14555_v0 = vpop.f32.mrf.mxu1  ;;  %v4044_v43 = vadd.f32 %v20208_v11, %v14120_v17  ;;  %v4047_v47 = vadd.f32 %v20209_v31, %v14127_v55  ;;  %v20212_v17 = vld [vmem:[#allocation169_spill] sm:$0xff]  ;;  %v14585_v55 = vpop.f32.mrf.mxu0 }
 0x435   :  { %v4050_v11 = vadd.f32 %v20212_v17, %v14143_v38  ;;  %20214 = vst [vmem:[#allocation100_spill] sm:$0xff] %v14585_v55  ;;  %v5275_v38 = vld [vmem:[#allocation2 + $0x349] sm:$0xff] }
 0x436   :  { %v10230_v39 = vpop.f32.mrf.mxu1  ;;  %10397 = vmatmul.mubr.msk.bf16.gmra.mxu1 %vm560_vm1, %v5304_v10  ;;  %v20217_v17 = vld [vmem:[#allocation172_spill] sm:$0xff]  ;;  %v14599_v55 = vpop.f32.mrf.mxu0 }
 0x437   :  { %v14566_v3 = vadd.f32 %v10230_v39, %v4046_v9  ;;  %10400 = vmatprep.mubr.msk.bf16.mxu1 %vm560_vm1, %v5305_v25  ;;  %v5306_v25 = vpack.c.bf16 %v5272_v37, %v5271_v2  ;;  %v20216_v2 = vld [vmem:[#allocation170_spill] sm:$0xff] }
 0x438   :  { %v4411_v34 = vpop.f32.mrf.mxu1  ;;  %v4048_v37 = vadd.f32 %v20216_v2, %v14152_v57  ;;  %v20220_v57 = vld [vmem:[#allocation13_spill] sm:$0xff]  ;;  %v14609_v2 = vpop.f32.mrf.mxu0 }
 0x439   :  { %v14571_v29 = vadd.f32 %v4411_v34, %v4044_v43  ;;  %v5307_v43 = vpack.c.bf16 %v5274_v48, %v5273_v59  ;;  %v20213_v34 = vld [vmem:[#allocation11_spill] sm:$0xff]  ;;  %v5276_v59 = vld [vmem:[#allocation2 + $0x351] sm:$0xff] }
 0x43a   :  { %v10231_v10 = vpop.f32.mrf.mxu1  ;;  %10561 = vmatmul.mubr.msk.bf16.gmra.mxu0 %vm174_vm0, %v20213_v34  ;;  %v4051_v34 = vadd.f32 %v20217_v17, %v14159_v53  ;;  %v20221_v53 = vld [vmem:[#allocation14_spill] sm:$0xff] }
 0x43b   :  { %v14577_v9 = vadd.f32 %v10231_v10, %v4047_v47  ;;  %10564 = vmatprep.mubr.msk.bf16.mxu0 %vm174_vm0, %v20215_v46 }
 0x43c   :  { %v14579_v39 = vpop.f32.mrf.mxu1 }
 0x43d   :  { %20211 = vst [vmem:[#allocation205_spill] sm:$0xff] %v14577_v9  ;;  %v5308_v9 = vpack.c.bf16 %v5276_v59, %v5275_v38  ;;  %v20222_v38 = vld [vmem:[#allocation178_spill] sm:$0xff] }
 0x43e   :  { %v10234_v31 = vpop.f32.mrf.mxu1  ;;  %10401 = vmatmul.mubr.msk.bf16.gmra.mxu1 %vm560_vm1, %v5306_v25  ;;  %v4052_v59 = vadd.f32 %v20222_v38, %v14185_v13 }
 0x43f   :  { %v14590_v47 = vadd.f32 %v10234_v31, %v4050_v11  ;;  %10404 = vmatprep.mubr.msk.bf16.mxu1 %vm560_vm1, %v5307_v43  ;;  %v20219_v43 = vld [vmem:[#allocation176_spill] sm:$0xff] }
 0x440   :  { %v4427_v10 = vpop.f32.mrf.mxu1  ;;  %v4054_v31 = vadd.f32 %v20219_v43, %v14175_v35  ;;  %v20224_v35 = vld [vmem:[#allocation180_spill] sm:$0xff]  ;;  %v14622_v43 = vpop.f32.mrf.mxu0 }
 0x441   :  { %v14595_v48 = vadd.f32 %v4427_v10, %v4048_v37 }
 0x442   :  { %v10235_v25 = vpop.f32.mrf.mxu1  ;;  %10565 = vmatmul.mubr.msk.bf16.gmra.mxu0 %vm174_vm0, %v20220_v57  ;;  %v14632_v13 = vpop.f32.mrf.mxu0 }
 0x443   :  { %v14601_v46 = vadd.f32 %v10235_v25, %v4051_v34  ;;  %10568 = vmatprep.mubr.msk.bf16.mxu0 %vm174_vm0, %v20221_v53  ;;  %v4055_v25 = vadd.f32 %v20224_v35, %v14192_v51  ;;  %v20227_v53 = vld [vmem:[#allocation184_spill] sm:$0xff] }
 0x444   :  { %v14603_v11 = vpop.f32.mrf.mxu1 }
 0x445   :  { %20218 = vst [vmem:[#allocation105_spill] sm:$0xff] %v14601_v46 }
 0x446   :  { %v10238_v37 = vpop.f32.mrf.mxu1  ;;  %10405 = vmatmul.mubr.msk.bf16.gmra.mxu1 %vm560_vm1, %v5308_v9 }
 0x447   :  { %v14614_v10 = vadd.f32 %v10238_v37, %v4054_v31  ;;  %v4058_v31 = vadd.f32 %v20227_v53, %v14207_v62  ;;  %v20228_v37 = vld [vmem:[#allocation15_spill] sm:$0xff]  ;;  %v20233_v53 = vld [vmem:[#allocation188_spill] sm:$0xff] }
 0x448   :  { %v4443_v17 = vpop.f32.mrf.mxu1 }
 0x449   :  { %v14618_v34 = vadd.f32 %v4443_v17, %v4052_v59  ;;  %v20229_v59 = vld [vmem:[#allocation16_spill] sm:$0xff]  ;;  %v20231_v17 = vld [vmem:[#allocation186_spill] sm:$0xff] }
 0x44a   :  { %v10239_v57 = vpop.f32.mrf.mxu1  ;;  %10569 = vmatmul.mubr.msk.bf16.gmra.mxu0 %vm174_vm0, %v20228_v37  ;;  %v4056_v35 = vadd.f32 %v20231_v17, %v14215_v23  ;;  %v4059_v37 = vadd.f32 %v20233_v53, %v14222_v14  ;;  %v20237_v23 = vld [vmem:[#allocation192_spill] sm:$0xff]  ;;  %v20238_v17 = vld [vmem:[#allocation17_spill] sm:$0xff] }
 0x44b   :  { %20223 = vst [vmem:[#allocation207_spill] sm:$0xff] %v14618_v34  ;;  %v14624_v46 = vadd.f32 %v10239_v57, %v4055_v25  ;;  %10572 = vmatprep.mubr.msk.bf16.mxu0 %vm174_vm0, %v20229_v59  ;;  %v10646_v25 = vld [vmem:[%s19286_s7 + $0x8] sm:$0xff]   ;;  %v4062_v59 = vadd.f32 %v20237_v23, %v14237_v32 }
 0x44c   :  { %v14626_v9 = vpop.f32.mrf.mxu1  ;;  %10476 = vmatprep.subr.bf16.mxu1 %v10646_v25 }
 0x44d   :  { %20225 = vst [vmem:[#allocation102_spill] sm:$0xff] %v14624_v46  ;;  %20226 = vst [vmem:[#allocation107_spill] sm:$0xff] %v14626_v9  ;;  %v14647_v46 = vpop.f32.mrf.mxu0  ;;  %10477 = vmatpush3.bf16.msra.mxu1 %v10646_v25  ;;  %v20241_v25 = vld [vmem:[#allocation194_spill] sm:$0xff] }
 0x44e   :  { %v10242_v38 = vpop.f32.mrf.mxu1  ;;  %20234 = vst [vmem:[#allocation109_spill] sm:$0xff] %v14647_v46  ;;  %v20248_v46 = vld [vmem:[#allocation177_spill] sm:$0xff] }
 0x44f   :  { %v14636_v51 = vadd.f32 %v10242_v38, %v4058_v31 }
 0x450   :  { %v4459_v57 = vpop.f32.mrf.mxu1 }
 0x451   :  { %20230 = vst [vmem:[#allocation209_spill] sm:$0xff] %v14636_v51  ;;  %v14643_v62 = vadd.f32 %v4459_v57, %v4056_v35  ;;  %v14657_v35 = vpop.f32.mrf.mxu0 }
 0x452   :  { %v10243_v9 = vpop.f32.mrf.mxu1  ;;  %10573 = vmatmul.mubr.msk.bf16.gmra.mxu0 %vm174_vm0, %v20238_v17 }
 0x453   :  { %20232 = vst [vmem:[#allocation104_spill] sm:$0xff] %v14643_v62  ;;  %v14649_v31 = vadd.f32 %v10243_v9, %v4059_v37  ;;  %v20239_v62 = vld [vmem:[#allocation18_spill] sm:$0xff]  ;;  %v4060_v9 = vadd.f32 %v20241_v25, %v14245_v50  ;;  %v14669_v23 = vpop.f32.mrf.mxu0 }
 0x454   :  { %v14651_v38 = vpop.f32.mrf.mxu1  ;;  %10576 = vmatprep.mubr.msk.bf16.mxu0 %vm174_vm0, %v20239_v62  ;;  %20245 = vst [vmem:[#allocation108_spill] sm:$0xff] %v14669_v23  ;;  %v20249_v62 = vld [vmem:[#allocation200_spill] sm:$0xff]  ;;  %v20262_v23 = vld [vmem:[#allocation6_spill] sm:$0xff] }
 0x455   :  { %20235 = vst [vmem:[#allocation211_spill] sm:$0xff] %v14649_v31  ;;  %20236 = vst [vmem:[#allocation106_spill] sm:$0xff] %v14651_v38  ;;  %v20243_v31 = vld [vmem:[#allocation73_spill] sm:$0xff]  ;;  %v20244_v38 = vld [vmem:[#allocation196_spill] sm:$0xff]  ;;  %v14679_v50 = vpop.f32.mrf.mxu0 }
 0x456   :  { %v10246_v57 = vpop.f32.mrf.mxu1  ;;  %v4063_v32 = vadd.f32 %v20244_v38, %v20243_v31  ;;  %20251 = vst [vmem:[#allocation110_spill] sm:$0xff] %v14679_v50  ;;  %v20254_v38 = vld [vmem:[#allocation77_spill] sm:$0xff] }
 0x457   :  { %v14661_v14 = vadd.f32 %v10246_v57, %v4062_v59  ;;  %v4066_v59 = vadd.f32 %v20249_v62, %v20248_v46  ;;  %v20250_v57 = vld [vmem:[#allocation19_spill] sm:$0xff]  ;;  %v14691_v62 = vpop.f32.mrf.mxu0 }
 0x458   :  { %v4475_v53 = vpop.f32.mrf.mxu1  ;;  %20259 = vst [vmem:[#allocation112_spill] sm:$0xff] %v14691_v62 }
 0x459   :  { %20240 = vst [vmem:[#allocation111_spill] sm:$0xff] %v14661_v14  ;;  %v14665_v37 = vadd.f32 %v4475_v53, %v4060_v9  ;;  %v20252_v9 = vld [vmem:[#allocation20_spill] sm:$0xff]  ;;  %v20255_v53 = vld [vmem:[#allocation202_spill] sm:$0xff] }
 0x45a   :  { %v10247_v17 = vpop.f32.mrf.mxu1  ;;  %10577 = vmatmul.mubr.msk.bf16.gmra.mxu0 %vm174_vm0, %v20250_v57 }
 0x45b   :  { %20242 = vst [vmem:[#allocation213_spill] sm:$0xff] %v14665_v37  ;;  %v14671_v51 = vadd.f32 %v10247_v17, %v4063_v32  ;;  %10580 = vmatprep.mubr.msk.bf16.mxu0 %vm174_vm0, %v20252_v9  ;;  %v4064_v32 = vadd.f32 %v20255_v53, %v20254_v38  ;;  %v20258_v37 = vld [vmem:[#allocation204_spill] sm:$0xff]  ;;  %v14701_v38 = vpop.f32.mrf.mxu0 }
 0x45c   :  { %v14673_v34 = vpop.f32.mrf.mxu1  ;;  %v20263_v9 = vld [vmem:[#allocation208_spill] sm:$0xff]  ;;  %20265 = vst [vmem:[#allocation114_spill] sm:$0xff] %v14701_v38  ;;  %v20276_v38 = vld [vmem:[#allocation187_spill] sm:$0xff] }
 0x45d   :  { %20246 = vst [vmem:[#allocation113_spill] sm:$0xff] %v14671_v51  ;;  %20247 = vst [vmem:[#allocation215_spill] sm:$0xff] %v14673_v34  ;;  %v20257_v34 = vld [vmem:[#allocation74_spill] sm:$0xff] }
 0x45e   :  { %v10250_v25 = vpop.f32.mrf.mxu1  ;;  %v4067_v46 = vadd.f32 %v20258_v37, %v20257_v34  ;;  %v20268_v37 = vld [vmem:[#allocation183_spill] sm:$0xff] }
 0x45f   :  { %v14683_v31 = vadd.f32 %v10250_v25, %v4066_v59  ;;  %v4070_v59 = vadd.f32 %v20263_v9, %v20262_v23  ;;  %v20264_v25 = vld [vmem:[#allocation21_spill] sm:$0xff]  ;;  %v14713_v9 = vpop.f32.mrf.mxu0 }
 0x460   :  { %v4491_v17 = vpop.f32.mrf.mxu1  ;;  %20273 = vst [vmem:[#allocation116_spill] sm:$0xff] %v14713_v9  ;;  %v20288_v9 = vld [vmem:[#allocation86_spill] sm:$0xff] }
 0x461   :  { %20253 = vst [vmem:[#allocation115_spill] sm:$0xff] %v14683_v31  ;;  %v14687_v51 = vadd.f32 %v4491_v17, %v4064_v32  ;;  %v20266_v32 = vld [vmem:[#allocation22_spill] sm:$0xff] }
 0x462   :  { %v10251_v57 = vpop.f32.mrf.mxu1  ;;  %10581 = vmatmul.mubr.msk.bf16.gmra.mxu0 %vm174_vm0, %v20264_v25  ;;  %v20269_v17 = vld [vmem:[#allocation210_spill] sm:$0xff] }
 0x463   :  { %20256 = vst [vmem:[#allocation217_spill] sm:$0xff] %v14687_v51  ;;  %v14693_v14 = vadd.f32 %v10251_v57, %v4067_v46  ;;  %10584 = vmatprep.mubr.msk.bf16.mxu0 %vm174_vm0, %v20266_v32  ;;  %v4068_v46 = vadd.f32 %v20269_v17, %v20268_v37  ;;  %v20271_v51 = vld [vmem:[#allocation83_spill] sm:$0xff]  ;;  %v20277_v32 = vld [vmem:[#allocation216_spill] sm:$0xff]  ;;  %v14723_v37 = vpop.f32.mrf.mxu0 }
 0x464   :  { %v14695_v50 = vpop.f32.mrf.mxu1 }
 0x465   :  { %20260 = vst [vmem:[#allocation117_spill] sm:$0xff] %v14693_v14  ;;  %20261 = vst [vmem:[#allocation219_spill] sm:$0xff] %v14695_v50  ;;  %v20272_v50 = vld [vmem:[#allocation212_spill] sm:$0xff] }
 0x466   :  { %v10254_v53 = vpop.f32.mrf.mxu1  ;;  %v4071_v23 = vadd.f32 %v20272_v50, %v20271_v51  ;;  %v20281_v50 = vld [vmem:[#allocation87_spill] sm:$0xff] }
 0x467   :  { %v14705_v34 = vadd.f32 %v10254_v53, %v4070_v59  ;;  %v4074_v59 = vadd.f32 %v20277_v32, %v20276_v38  ;;  %v20278_v53 = vld [vmem:[#allocation23_spill] sm:$0xff]  ;;  %v14735_v32 = vpop.f32.mrf.mxu0 }
 0x468   :  { %v4507_v57 = vpop.f32.mrf.mxu1  ;;  %20285 = vst [vmem:[#allocation225_spill] sm:$0xff] %v14735_v32  ;;  %v20345_v32 = vld [vmem:[#allocation222_spill] sm:$0xff] }
 0x469   :  { %20267 = vst [vmem:[#allocation119_spill] sm:$0xff] %v14705_v34  ;;  %v14709_v14 = vadd.f32 %v4507_v57, %v4068_v46  ;;  %v20279_v46 = vld [vmem:[#allocation24_spill] sm:$0xff]  ;;  %v20282_v57 = vld [vmem:[#allocation218_spill] sm:$0xff] }
 0x46a   :  { %v10255_v25 = vpop.f32.mrf.mxu1  ;;  %10585 = vmatmul.mubr.msk.bf16.gmra.mxu0 %vm174_vm0, %v20278_v53 }
 0x46b   :  { %20270 = vst [vmem:[#allocation221_spill] sm:$0xff] %v14709_v14  ;;  %v14715_v31 = vadd.f32 %v10255_v25, %v4071_v23  ;;  %10588 = vmatprep.mubr.msk.bf16.mxu0 %vm174_vm0, %v20279_v46  ;;  %v4072_v23 = vadd.f32 %v20282_v57, %v20281_v50  ;;  %v20289_v46 = vld [vmem:[#allocation224_spill] sm:$0xff]  ;;  %v14745_v50 = vpop.f32.mrf.mxu0 }
 0x46c   :  { %v14717_v62 = vpop.f32.mrf.mxu1 }
 0x46d   :  { %20274 = vst [vmem:[#allocation121_spill] sm:$0xff] %v14715_v31  ;;  %20275 = vst [vmem:[#allocation223_spill] sm:$0xff] %v14717_v62  ;;  %v20284_v62 = vld [vmem:[#allocation220_spill] sm:$0xff] }
 0x46e   :  { %v10258_v17 = vpop.f32.mrf.mxu1  ;;  %v4075_v38 = vadd.f32 %v20284_v62, %v14342_v54  ;;  %v20293_v62 = vld [vmem:[#allocation193_spill] sm:$0xff] }
 0x46f   :  { %v14727_v51 = vadd.f32 %v10258_v17, %v4074_v59  ;;  %v4078_v59 = vadd.f32 %v20289_v46, %v20288_v9  ;;  %v20290_v17 = vld [vmem:[#allocation25_spill] sm:$0xff]  ;;  %v14757_v46 = vpop.f32.mrf.mxu0 }
 0x470   :  { %v4523_v25 = vpop.f32.mrf.mxu1  ;;  %20297 = vst [vmem:[#allocation127_spill] sm:$0xff] %v14757_v46  ;;  %v20343_v46 = vld [vmem:[#allocation214_spill] sm:$0xff] }
 0x471   :  { %20280 = vst [vmem:[#allocation118_spill] sm:$0xff] %v14727_v51  ;;  %v14731_v31 = vadd.f32 %v4523_v25, %v4072_v23  ;;  %v20291_v23 = vld [vmem:[#allocation26_spill] sm:$0xff] }
 0x472   :  { %v10259_v53 = vpop.f32.mrf.mxu1  ;;  %10589 = vmatmul.mubr.msk.bf16.gmra.mxu0 %vm174_vm0, %v20290_v17  ;;  %v20294_v25 = vld [vmem:[#allocation226_spill] sm:$0xff] }
 0x473   :  { %20283 = vst [vmem:[#allocation123_spill] sm:$0xff] %v14731_v31  ;;  %v14737_v14 = vadd.f32 %v10259_v53, %v4075_v38  ;;  %10592 = vmatprep.mubr.msk.bf16.mxu0 %vm174_vm0, %v20291_v23  ;;  %v4076_v38 = vadd.f32 %v20294_v25, %v20293_v62  ;;  %v20296_v31 = vld [vmem:[#allocation228_spill] sm:$0xff]  ;;  %v14767_v62 = vpop.f32.mrf.mxu0 }
 0x474   :  { %v14739_v34 = vpop.f32.mrf.mxu1  ;;  %v4079_v9 = vadd.f32 %v20296_v31, %v14372_v26  ;;  %v20300_v23 = vld [vmem:[#allocation232_spill] sm:$0xff]  ;;  %20302 = vst [vmem:[#allocation129_spill] sm:$0xff] %v14767_v62  ;;  %v20305_v31 = vld [vmem:[#allocation234_spill] sm:$0xff] }
 0x475   :  { %20286 = vst [vmem:[#allocation120_spill] sm:$0xff] %v14737_v14  ;;  %20287 = vst [vmem:[#allocation125_spill] sm:$0xff] %v14739_v34  ;;  %v20341_v62 = vld [vmem:[#allocation206_spill] sm:$0xff] }
 0x476   :  { %v10262_v57 = vpop.f32.mrf.mxu1 }
 0x477   :  { %v14749_v54 = vadd.f32 %v10262_v57, %v4078_v59  ;;  %v4082_v59 = vadd.f32 %v20300_v23, %v14387_v56  ;;  %v20301_v57 = vld [vmem:[#allocation27_spill] sm:$0xff]  ;;  %v14779_v23 = vpop.f32.mrf.mxu0 }
 0x478   :  { %v4539_v53 = vpop.f32.mrf.mxu1  ;;  %20308 = vst [vmem:[#allocation131_spill] sm:$0xff] %v14779_v23  ;;  %v20337_v23 = vld [vmem:[#allocation70_spill] sm:$0xff] }
 0x479   :  { %20292 = vst [vmem:[#allocation227_spill] sm:$0xff] %v14749_v54  ;;  %v14753_v14 = vadd.f32 %v4539_v53, %v4076_v38  ;;  %v20303_v38 = vld [vmem:[#allocation28_spill] sm:$0xff]  ;;  %v4080_v53 = vadd.f32 %v20305_v31, %v14395_v61  ;;  %v14789_v61 = vpop.f32.mrf.mxu0 }
 0x47a   :  { %v10263_v17 = vpop.f32.mrf.mxu1  ;;  %10593 = vmatmul.mubr.msk.bf16.gmra.mxu0 %vm174_vm0, %v20301_v57  ;;  %20313 = vst [vmem:[#allocation133_spill] sm:$0xff] %v14789_v61  ;;  %v20338_v61 = vld [vmem:[#allocation198_spill] sm:$0xff] }
 0x47b   :  { %20295 = vst [vmem:[#allocation122_spill] sm:$0xff] %v14753_v14  ;;  %v14759_v34 = vadd.f32 %v10263_v17, %v4079_v9  ;;  %10596 = vmatprep.mubr.msk.bf16.mxu0 %vm174_vm0, %v20303_v38  ;;  %v20311_v38 = vld [vmem:[#allocation237_spill] sm:$0xff] }
 0x47c   :  { %v14761_v51 = vpop.f32.mrf.mxu1 }
 0x47d   :  { %20298 = vst [vmem:[#allocation229_spill] sm:$0xff] %v14759_v34  ;;  %20299 = vst [vmem:[#allocation124_spill] sm:$0xff] %v14761_v51  ;;  %v20307_v34 = vld [vmem:[#allocation235_spill] sm:$0xff] }
 0x47e   :  { %v10266_v25 = vpop.f32.mrf.mxu1  ;;  %v4083_v56 = vadd.f32 %v20307_v34, %v14402_v60  ;;  %v20316_v34 = vld [vmem:[#allocation239_spill] sm:$0xff] }
 0x47f   :  { %v14771_v26 = vadd.f32 %v10266_v25, %v4082_v59  ;;  %v4086_v59 = vadd.f32 %v20311_v38, %v14417_v27  ;;  %v20312_v25 = vld [vmem:[#allocation29_spill] sm:$0xff]  ;;  %v14801_v38 = vpop.f32.mrf.mxu0 }
 0x480   :  { %v4555_v9 = vpop.f32.mrf.mxu1  ;;  %20319 = vst [vmem:[#allocation132_spill] sm:$0xff] %v14801_v38 }
 0x481   :  { %20304 = vst [vmem:[#allocation231_spill] sm:$0xff] %v14771_v26  ;;  %v14775_v17 = vadd.f32 %v4555_v9, %v4080_v53  ;;  %v20314_v53 = vld [vmem:[#allocation30_spill] sm:$0xff]  ;;  %v4084_v9 = vadd.f32 %v20316_v34, %v14423_v49  ;;  %v20322_v26 = vld [vmem:[#allocation31_spill] sm:$0xff]  ;;  %v20324_v49 = vld [vmem:[#allocation32_spill] sm:$0xff] }
 0x482   :  { %v10267_v57 = vpop.f32.mrf.mxu1  ;;  %10597 = vmatmul.mubr.msk.bf16.gmra.mxu0 %vm174_vm0, %v20312_v25  ;;  %v20326_v34 = vld [vmem:[#allocation164_spill] sm:$0xff] }
 0x483   :  { %20306 = vst [vmem:[#allocation126_spill] sm:$0xff] %v14775_v17  ;;  %v14781_v51 = vadd.f32 %v10267_v57, %v4083_v56  ;;  %10600 = vmatprep.mubr.msk.bf16.mxu0 %vm174_vm0, %v20314_v53  ;;  %v20325_v53 = vld [vmem:[#allocation49_spill] sm:$0xff] }
 0x484   :  { %v14783_v14 = vpop.f32.mrf.mxu1 }
 0x485   :  { %20309 = vst [vmem:[#allocation233_spill] sm:$0xff] %v14781_v51  ;;  %20310 = vst [vmem:[#allocation128_spill] sm:$0xff] %v14783_v14  ;;  %v20318_v51 = vld [vmem:[#allocation240_spill] sm:$0xff] }
 0x486   :  { %v10270_v31 = vpop.f32.mrf.mxu1  ;;  %v4087_v27 = vadd.f32 %v20318_v51, %v14428_v40  ;;  %v20327_v40 = vld [vmem:[#allocation243_spill] sm:$0xff] }
 0x487   :  { %v14793_v60 = vadd.f32 %v10270_v31, %v4086_v59  ;;  %v14809_v59 = vpop.f32.mrf.mxu0  ;;  %v5149_v51 = vadd.f32 %v20327_v40, %v14443_v58  ;;  %v20335_v40 = vld [vmem:[#allocation63_spill] sm:$0xff] }
 0x488   :  { %v4571_v56 = vpop.f32.mrf.mxu1  ;;  %20323 = vst [vmem:[#allocation139_spill] sm:$0xff] %v14809_v59  ;;  %v20336_v59 = vld [vmem:[#allocation190_spill] sm:$0xff] }
 0x489   :  { %20315 = vst [vmem:[#allocation130_spill] sm:$0xff] %v14793_v60  ;;  %v14797_v57 = vadd.f32 %v4571_v56, %v4084_v9  ;;  %v4041_v9 = vadd.f32 %v20326_v34, %v20325_v53  ;;  %v10647_v56 = vld [vmem:[%s19286_s7] sm:$0xff]   ;;  %v20332_v60 = vld [vmem:[#allocation56_spill] sm:$0xff]  ;;  %v14836_v38 = vadd.f32 %v20336_v59, %v20335_v40 }
 0x48a   :  { %v10271_v25 = vpop.f32.mrf.mxu1  ;;  %10601 = vmatmul.mubr.msk.bf16.gmra.mxu0 %vm174_vm0, %v20322_v26  ;;  %v20330_v26 = vld [vmem:[#allocation57_spill] sm:$0xff]  ;;  %v20334_v53 = vld [vmem:[#allocation242_spill] sm:$0xff]  ;;  %10478 = vmatprep.subr.bf16.mxu1 %v10647_v56 }
 0x48b   :  { %20317 = vst [vmem:[#allocation135_spill] sm:$0xff] %v14797_v57  ;;  %v14803_v17 = vadd.f32 %v10271_v25, %v4087_v27  ;;  %10604 = vmatprep.mubr.msk.bf16.mxu0 %vm174_vm0, %v20324_v49  ;;  %v20328_v27 = vld [vmem:[#allocation51_spill] sm:$0xff]  ;;  %v20329_v25 = vld [vmem:[#allocation168_spill] sm:$0xff]  ;;  %v20333_v49 = vld [vmem:[#allocation182_spill] sm:$0xff]  ;;  %v5151_v34 = vadd.f32 %v20334_v53, %v14438_v36  ;;  %10479 = vmatpush3.bf16.msra.mxu1 %v10647_v56 }
 0x48c   :  { %v14805_v14 = vpop.f32.mrf.mxu1  ;;  %v14830_v54 = vadd.f32 %v20333_v49, %v20332_v60  ;;  %v14846_v60 = vpop.f32.mrf.mxu0  ;;  %v20342_v49 = vld [vmem:[#allocation80_spill] sm:$0xff]  ;;  %v20344_v53 = vld [vmem:[#allocation89_spill] sm:$0xff] }
 0x48d   :  { %20320 = vst [vmem:[#allocation137_spill] sm:$0xff] %v14803_v17  ;;  %20321 = vst [vmem:[#allocation134_spill] sm:$0xff] %v14805_v14  ;;  %v14822_v17 = vadd.f32 %v20329_v25, %v20328_v27  ;;  %v20331_v14 = vld [vmem:[#allocation174_spill] sm:$0xff]  ;;  %v14840_v27 = vadd.f32 %v20338_v61, %v20337_v23  ;;  %v20340_v25 = vld [vmem:[#allocation181_spill] sm:$0xff]  ;;  %v14850_v36 = vadd.f32 %v20343_v46, %v20342_v49 }
 0x48e   :  { %v10346_v31 = vpop.f32.mrf.mxu1  ;;  %v14826_v57 = vadd.f32 %v20331_v14, %v20330_v26  ;;  %v14844_v14 = vadd.f32 %v20341_v62, %v20340_v25  ;;  %v14854_v59 = vadd.f32 %v20345_v32, %v20344_v53  ;;  %v20346_v23 = vld [vmem:[#allocation244_spill] sm:$0xff]  ;;  %v20347_v62 = vld [vmem:[#allocation230_spill] sm:$0xff]  ;;  %v20350_v46 = vld [vmem:[#allocation241_spill] sm:$0xff] }
 0x48f   :  { %20339 = vst [vmem:[#allocation238_spill] sm:$0xff] %v14840_v27  ;;  %v5713_v40 = vadd.f32 %v10346_v31, %v5151_v34  ;;  %v5152_v61 = vadd.f32 %v20346_v23, %v14449_v33  ;;  %v14868_v49 = vadd.f32 %v20350_v46, %v14431_v24  ;;  %v20352_v32 = vld [vmem:[#allocation245_spill] sm:$0xff]  ;;  %v20354_v53 = vld [vmem:[#allocation246_spill] sm:$0xff]  ;;  %v20355_v23 = vld [vmem:[#allocation247_spill] sm:$0xff] }
 0x490   :  { %v5456_v58 = vpop.f32.mrf.mxu1  ;;  %v5150_v31 = vadd.f32 %v20352_v32, %v14453_v8  ;;  %v20357_v24 = vld [vmem:[#allocation249_spill] sm:$0xff]  ;;  %v20362_v32 = vld [vmem:[#allocation39_spill] sm:$0xff] }
 0x491   :  { %v5711_v26 = vadd.f32 %v5456_v58, %v5149_v51  ;;  %v14860_v51 = vadd.f32 %v20347_v62, %v14379_v45  ;;  %v20348_v58 = vld [vmem:[#allocation236_spill] sm:$0xff]  ;;  %20351 = vst [vmem:[#allocation141_spill] sm:$0xff] %v14868_v49  ;;  %v5155_v45 = vadd.f32 %v20354_v53, %v14460_v28  ;;  %v5153_v62 = vadd.f32 %v20355_v23, %v14468_v1  ;;  %v20358_v49 = vld [vmem:[#allocation250_spill] sm:$0xff]  ;;  %v14891_v28 = vpop.f32.mrf.mxu0 }
 0x492   :  { %v10347_v27 = vpop.f32.mrf.mxu1  ;;  %v14864_v25 = vadd.f32 %v20348_v58, %v14409_v12  ;;  %v20356_v12 = vld [vmem:[#allocation248_spill] sm:$0xff]  ;;  %v5154_v46 = vadd.f32 %v20357_v24, %v14478_v5  ;;  %v14885_v8 = vadd.f32 %v20358_v49, %v14485_v21  ;;  %v14894_v1 = vadd.f32 %v14447_v4, %v5713_v40  ;;  %v20363_v21 = vld [vmem:[#allocation65_spill] sm:$0xff]  ;;  %v20364_v53 = vld [vmem:[#allocation34_spill] sm:$0xff] }
 0x493   :  { %v14873_v34 = vadd.f32 %v14457_v63, %v5711_v26  ;;  %v5714_v33 = vadd.f32 %v10347_v27, %v5152_v61  ;;  %v5156_v58 = vadd.f32 %v20356_v12, %v14474_v41  ;;  %v20359_v63 = vld [vmem:[#allocation66_spill] sm:$0xff]  ;;  %v20360_v26 = vld [vmem:[#allocation33_spill] sm:$0xff]  ;;  %v14898_v5 = vadd.f32 %v20362_v32, %v14499_v7  ;;  %v20366_v4 = vld [vmem:[#allocation67_spill] sm:$0xff] }
 0x494   :  { %20349 = vst [vmem:[#allocation136_spill] sm:$0xff] %v14864_v25  ;;  %v5459_v56 = vpop.f32.mrf.mxu1  ;;  %v5157_v27 = vadd.f32 %v20359_v63, %v14493_v6  ;;  %10605 = vmatmul.mubr.msk.bf16.gmra.mxu0 %vm174_vm0, %v20360_v26  ;;  %20361 = vst [vmem:[#allocation143_spill] sm:$0xff] %v14894_v1  ;;  %v14902_v49 = vadd.f32 %v20363_v21, %v14506_v18  ;;  %v20365_v6 = vld [vmem:[#allocation43_spill] sm:$0xff]  ;;  %v14912_v40 = vadd.f32 %v20366_v4, %v14521_v15  ;;  %v20368_v7 = vld [vmem:[#allocation41_spill] sm:$0xff] }
 0x495   :  { %20353 = vst [vmem:[#allocation138_spill] sm:$0xff] %v14873_v34  ;;  %v5712_v61 = vadd.f32 %v5459_v56, %v5150_v31  ;;  %10608 = vmatprep.mubr.msk.bf16.mxu0 %vm174_vm0, %v20364_v53  ;;  %v14908_v23 = vadd.f32 %v20365_v6, %v14513_v16  ;;  %v20367_v31 = vld [vmem:[#allocation42_spill] sm:$0xff]  ;;  %v14920_v12 = vadd.f32 %v20368_v7, %v14531_v44  ;;  %v20369_v24 = vld [vmem:[#allocation99_spill] sm:$0xff]  ;;  %v20370_v16 = vld [vmem:[#allocation201_spill] sm:$0xff] }
 0x496   :  { %v10350_v41 = vpop.f32.mrf.mxu1  ;;  %v14916_v56 = vadd.f32 %v20367_v31, %v14527_v20  ;;  %v6471_v18 = vmul.f32 %v14873_v34, %v14873_v34  ;;  %v14925_v63 = vadd.f32 %v20369_v24, %v5714_v33  ;;  %v20372_v15 = vld [vmem:[#allocation47_spill] sm:$0xff]  ;;  %v4603_v20 = vadd.f32 %v14555_v0, %v4041_v9  ;;  %v20373_v44 = vld [vmem:[#allocation40_spill] sm:$0xff]  ;;  %v14939_v31 = vpop.f32.mrf.mxu0  ;;  %v20375_v7 = vld [vmem:[#allocation46_spill] sm:$0xff] }
 0x497   :  { %v14928_v26 = vadd.f32 %v20370_v16, %v5712_v61  ;;  %v14932_v21 = vadd.f32 %v20372_v15, %v14542_v19  ;;  %v5717_v53 = vadd.f32 %v10350_v41, %v5155_v45  ;;  %v14937_v4 = vadd.f32 %v20373_v44, %v14547_v52 }
 0x498   :  { %v5472_v32 = vpop.f32.mrf.mxu1  ;;  %v6473_v33 = vmul.f32 %v14894_v1, %v14894_v1  ;;  %v6337_v61 = vsel %vm560_vm1, %v14873_v34, 0.0  ;;  %v6340_v45 = vsel %vm560_vm1, %v14894_v1, 0.0  ;;  %v14956_v24 = vadd.f32 %v20375_v7, %v14553_v42  ;;  %v20376_v1 = vld [vmem:[#allocation96_spill] sm:$0xff]  ;;  %v14970_v42 = vpop.f32.mrf.mxu0 }
 0x499   :  { %20371 = vst [vmem:[#allocation140_spill] sm:$0xff] %v14928_v26  ;;  %v5715_v6 = vadd.f32 %v5472_v32, %v5153_v62  ;;  %v6338_v19 = vsel %vm560_vm1, %v14928_v26, 0.0  ;;  %v6472_v0 = vmul.f32 %v14928_v26, %v14928_v26  ;;  %v20374_v62 = vld [vmem:[#allocation101_spill] sm:$0xff]  ;;  %v6535_v16 = vsel %vm560_vm1, %v6471_v18, 0.0 }
 0x49a   :  { %v10351_v9 = vpop.f32.mrf.mxu1  ;;  %v6339_v52 = vadd.f32 %v6338_v19, %v6337_v61  ;;  %v6474_v32 = vmul.f32 %v14925_v63, %v14925_v63  ;;  %v14963_v61 = vadd.f32 %v20376_v1, %v5717_v53  ;;  %v6538_v18 = vsel %vm560_vm1, %v6473_v33, 0.0  ;;  %v20380_v1 = vld [vmem:[#allocation36_spill] sm:$0xff] }
 0x49b   :  { %v14952_v41 = vadd.f32 %v20374_v62, %v5715_v6  ;;  %v6536_v15 = vsel %vm560_vm1, %v6472_v0, 0.0  ;;  %v5718_v44 = vadd.f32 %v10351_v9, %v5156_v58  ;;  %v20378_v6 = vld [vmem:[#allocation45_spill] sm:$0xff]  ;;  %v20379_v62 = vld [vmem:[#allocation35_spill] sm:$0xff]  ;;  %v6342_v0 = vsel %vm560_vm1, %v14925_v63, 0.0 }
 0x49c   :  { %v5475_v26 = vpop.f32.mrf.mxu1  ;;  %v6341_v34 = vadd.f32 %v6340_v45, %v6339_v52  ;;  %v6537_v25 = vadd.f32 %v6536_v15, %v6535_v16  ;;  %20377 = vst [vmem:[#allocation142_spill] sm:$0xff] %v14963_v61  ;;  %v14966_v19 = vadd.f32 %v20378_v6, %v4603_v20  ;;  %10609 = vmatmul.mubr.msk.bf16.gmra.mxu0 %vm174_vm0, %v20379_v62  ;;  %v20381_v52 = vld [vmem:[#allocation44_spill] sm:$0xff]  ;;  %v6540_v15 = vsel %vm560_vm1, %v6474_v32, 0.0 }
 0x49d   :  { %v6475_v58 = vmul.f32 %v14952_v41, %v14952_v41  ;;  %v5716_v9 = vadd.f32 %v5475_v26, %v5154_v46  ;;  %10612 = vmatprep.mubr.msk.bf16.mxu0 %vm174_vm0, %v20380_v1  ;;  %v14981_v7 = vadd.f32 %v20381_v52, %v14566_v3  ;;  %v20382_v16 = vld [vmem:[#allocation48_spill] sm:$0xff]  ;;  %v6344_v6 = vsel %vm560_vm1, %v14952_v41, 0.0  ;;  %v20383_v46 = vld [vmem:[#allocation203_spill] sm:$0xff] }
 0x49e   :  { %v10354_v45 = vpop.f32.mrf.mxu1  ;;  %v6539_v20 = vadd.f32 %v6538_v18, %v6537_v25  ;;  %v6343_v53 = vadd.f32 %v6342_v0, %v6341_v34  ;;  %v14985_v33 = vadd.f32 %v20382_v16, %v14571_v29  ;;  %v14991_v26 = vadd.f32 %v20383_v46, %v5718_v44  ;;  %v14998_v29 = vpop.f32.mrf.mxu0 }
 0x49f   :  { %v14994_v62 = vadd.f32 %v14537_v22, %v5716_v9  ;;  %v6477_v3 = vmul.f32 %v14963_v61, %v14963_v61  ;;  %v6542_v32 = vsel %vm560_vm1, %v6475_v58, 0.0  ;;  %v5721_v22 = vadd.f32 %v10354_v45, %v14885_v8 }
 0x4a0   :  { %v5488_v25 = vpop.f32.mrf.mxu1  ;;  %v6345_v34 = vadd.f32 %v6344_v6, %v6343_v53  ;;  %v6541_v18 = vadd.f32 %v6540_v15, %v6539_v20  ;;  %v4607_v52 = vadd.f32 %v14579_v39, %v14822_v17  ;;  %v6348_v20 = vsel %vm560_vm1, %v14963_v61, 0.0  ;;  %v20384_v17 = vld [vmem:[#allocation205_spill] sm:$0xff] }
 0x4a1   :  { %v5719_v0 = vadd.f32 %v5488_v25, %v5157_v27  ;;  %v6346_v1 = vsel %vm560_vm1, %v14994_v62, 0.0  ;;  %v6476_v44 = vmul.f32 %v14994_v62, %v14994_v62  ;;  %v6478_v58 = vmul.f32 %v14991_v26, %v14991_v26  ;;  %v20385_v25 = vld [vmem:[#allocation38_spill] sm:$0xff] }
 0x4a2   :  { %v10355_v9 = vpop.f32.mrf.mxu1  ;;  %v6543_v27 = vadd.f32 %v6542_v32, %v6541_v18  ;;  %v6347_v53 = vadd.f32 %v6346_v1, %v6345_v34  ;;  %v15020_v61 = vadd.f32 %v20385_v25, %v20384_v17  ;;  %v20386_v34 = vld [vmem:[#allocation37_spill] sm:$0xff]  ;;  %v15024_v18 = vpop.f32.mrf.mxu0  ;;  %v6546_v32 = vsel %vm560_vm1, %v6477_v3, 0.0  ;;  %v20390_v17 = vld [vmem:[#allocation103_spill] sm:$0xff] }
 0x4a3   :  { %v6544_v16 = vsel %vm560_vm1, %v6476_v44, 0.0  ;;  %v15014_v15 = vadd.f32 %v14561_v30, %v5719_v0  ;;  %v5722_v6 = vadd.f32 %v10355_v9, %v14898_v5  ;;  %v6350_v30 = vsel %vm560_vm1, %v14991_v26, 0.0  ;;  %v20387_v5 = vld [vmem:[#allocation98_spill] sm:$0xff] }
 0x4a4   :  { %v5491_v8 = vpop.f32.mrf.mxu1  ;;  %v6349_v45 = vadd.f32 %v6348_v20, %v6347_v53  ;;  %v6545_v46 = vadd.f32 %v6544_v16, %v6543_v27  ;;  %10613 = vmatmul.mubr.msk.bf16.gmra.mxu0 %vm174_vm0, %v20386_v34  ;;  %v15030_v0 = vadd.f32 %v20387_v5, %v5721_v22  ;;  %v20388_v20 = vld [vmem:[#allocation100_spill] sm:$0xff]  ;;  %v20389_v53 = vld [vmem:[#allocation55_spill] sm:$0xff]  ;;  %v6548_v3 = vsel %vm560_vm1, %v6478_v58, 0.0  ;;  %v15054_v58 = vpop.f32.mrf.mxu0 }
 0x4a5   :  { %v5720_v39 = vadd.f32 %v5491_v8, %v14902_v49  ;;  %v6479_v49 = vmul.f32 %v15014_v15, %v15014_v15  ;;  %v15038_v16 = vadd.f32 %v20389_v53, %v4607_v52  ;;  %v6352_v8 = vsel %vm560_vm1, %v15014_v15, 0.0  ;;  %v20391_v34 = vld [vmem:[#allocation59_spill] sm:$0xff] }
 0x4a6   :  { %v10358_v1 = vpop.f32.mrf.mxu1  ;;  %v6547_v44 = vadd.f32 %v6546_v32, %v6545_v46  ;;  %v6351_v9 = vadd.f32 %v6350_v30, %v6349_v45  ;;  %v15044_v22 = vadd.f32 %v20390_v17, %v5722_v6  ;;  %v15048_v5 = vadd.f32 %v20391_v34, %v14590_v47 }
 0x4a7   :  { %v15035_v27 = vadd.f32 %v20388_v20, %v5720_v39  ;;  %v6481_v32 = vmul.f32 %v15030_v0, %v15030_v0  ;;  %v6550_v6 = vsel %vm560_vm1, %v6479_v49, 0.0  ;;  %v5725_v30 = vadd.f32 %v10358_v1, %v14908_v23 }
 0x4a8   :  { %v5504_v25 = vpop.f32.mrf.mxu1  ;;  %v6353_v45 = vadd.f32 %v6352_v8, %v6351_v9  ;;  %v6549_v46 = vadd.f32 %v6548_v3, %v6547_v44  ;;  %v4611_v44 = vadd.f32 %v14603_v11, %v14826_v57  ;;  %v6356_v8 = vsel %vm560_vm1, %v15030_v0, 0.0  ;;  %v20392_v57 = vld [vmem:[#allocation50_spill] sm:$0xff] }
 0x4a9   :  { %v6354_v39 = vsel %vm560_vm1, %v15035_v27, 0.0  ;;  %v6480_v52 = vmul.f32 %v15035_v27, %v15035_v27  ;;  %v5723_v47 = vadd.f32 %v5504_v25, %v14912_v40  ;;  %v6482_v17 = vmul.f32 %v15044_v22, %v15044_v22 }
 0x4aa   :  { %v10359_v20 = vpop.f32.mrf.mxu1  ;;  %v6551_v9 = vadd.f32 %v6550_v6, %v6549_v46  ;;  %v6355_v53 = vadd.f32 %v6354_v39, %v6353_v45  ;;  %v15075_v34 = vadd.f32 %v20392_v57, %v14595_v48  ;;  %v15077_v45 = vpop.f32.mrf.mxu0  ;;  %v6554_v46 = vsel %vm560_vm1, %v6481_v32, 0.0 }
 0x4ab   :  { %v6552_v3 = vsel %vm560_vm1, %v6480_v52, 0.0  ;;  %v15069_v49 = vadd.f32 %v14609_v2, %v5723_v47  ;;  %v5726_v23 = vadd.f32 %v10359_v20, %v14916_v56  ;;  %v6358_v39 = vsel %vm560_vm1, %v15044_v22, 0.0  ;;  %v20394_v47 = vld [vmem:[#allocation105_spill] sm:$0xff] }
 0x4ac   :  { %v5507_v40 = vpop.f32.mrf.mxu1  ;;  %v6357_v1 = vadd.f32 %v6356_v8, %v6355_v53  ;;  %v6553_v25 = vadd.f32 %v6552_v3, %v6551_v9  ;;  %v15083_v2 = vadd.f32 %v14599_v55, %v5725_v30  ;;  %v20395_v20 = vld [vmem:[#allocation53_spill] sm:$0xff]  ;;  %v20396_v9 = vld [vmem:[#allocation52_spill] sm:$0xff]  ;;  %v6556_v32 = vsel %vm560_vm1, %v6482_v17, 0.0 }
 0x4ad   :  { %v5724_v11 = vadd.f32 %v5507_v40, %v14920_v12  ;;  %v6483_v56 = vmul.f32 %v15069_v49, %v15069_v49  ;;  %v15089_v48 = vadd.f32 %v20395_v20, %v20394_v47  ;;  %v15092_v53 = vadd.f32 %v20396_v9, %v4611_v44  ;;  %v15105_v44 = vpop.f32.mrf.mxu0 }
 0x4ae   :  { %20393 = vst [vmem:[#allocation144_spill] sm:$0xff] %v15083_v2  ;;  %v10362_v52 = vpop.f32.mrf.mxu1  ;;  %v6555_v6 = vadd.f32 %v6554_v46, %v6553_v25  ;;  %v6359_v12 = vadd.f32 %v6358_v39, %v6357_v1  ;;  %v6360_v3 = vsel %vm560_vm1, %v15069_v49, 0.0  ;;  %v15098_v55 = vadd.f32 %v14622_v43, %v5726_v23 }
 0x4af   :  { %v15101_v30 = vadd.f32 %v14632_v13, %v5724_v11  ;;  %v5729_v25 = vadd.f32 %v10362_v52, %v14932_v21  ;;  %v6485_v17 = vmul.f32 %v15083_v2, %v15083_v2  ;;  %v6558_v46 = vsel %vm560_vm1, %v6483_v56, 0.0 }
 0x4b0   :  { %20397 = vst [vmem:[#allocation145_spill] sm:$0xff] %v15098_v55  ;;  %v5520_v8 = vpop.f32.mrf.mxu1  ;;  %v6361_v40 = vadd.f32 %v6360_v3, %v6359_v12  ;;  %v6557_v1 = vadd.f32 %v6556_v32, %v6555_v6  ;;  %v6364_v6 = vsel %vm560_vm1, %v15083_v2, 0.0  ;;  %v6486_v56 = vmul.f32 %v15098_v55, %v15098_v55  ;;  %v20400_v3 = vld [vmem:[#allocation109_spill] sm:$0xff] }
 0x4b1   :  { %v5727_v57 = vadd.f32 %v5520_v8, %v14937_v4  ;;  %v6362_v43 = vsel %vm560_vm1, %v15101_v30, 0.0  ;;  %v6484_v13 = vmul.f32 %v15101_v30, %v15101_v30  ;;  %v20399_v4 = vld [vmem:[#allocation64_spill] sm:$0xff]  ;;  %v20402_v8 = vld [vmem:[#allocation207_spill] sm:$0xff] }
 0x4b2   :  { %v10363_v23 = vpop.f32.mrf.mxu1  ;;  %v6559_v11 = vadd.f32 %v6558_v46, %v6557_v1  ;;  %v6363_v39 = vadd.f32 %v6362_v43, %v6361_v40  ;;  %v15119_v52 = vadd.f32 %v20399_v4, %v14614_v10  ;;  %v20403_v40 = vld [vmem:[#allocation58_spill] sm:$0xff]  ;;  %v15134_v1 = vpop.f32.mrf.mxu0  ;;  %v6366_v46 = vsel %vm560_vm1, %v15098_v55, 0.0 }
 0x4b3   :  { %v15115_v21 = vadd.f32 %v14657_v35, %v5727_v57  ;;  %v6560_v12 = vsel %vm560_vm1, %v6484_v13, 0.0  ;;  %v5730_v47 = vadd.f32 %v10363_v23, %v14956_v24  ;;  %v15128_v35 = vadd.f32 %v20400_v3, %v5729_v25  ;;  %v20404_v25 = vld [vmem:[#allocation107_spill] sm:$0xff]  ;;  %v20405_v4 = vld [vmem:[#allocation102_spill] sm:$0xff] }
 0x4b4   :  { %v5523_v20 = vpop.f32.mrf.mxu1  ;;  %v6365_v9 = vadd.f32 %v6364_v6, %v6363_v39  ;;  %v6561_v32 = vadd.f32 %v6560_v12, %v6559_v11  ;;  %v15132_v10 = vadd.f32 %v20403_v40, %v20402_v8  ;;  %v6562_v57 = vsel %vm560_vm1, %v6485_v17, 0.0  ;;  %v20406_v6 = vld [vmem:[#allocation54_spill] sm:$0xff]  ;;  %v20407_v8 = vld [vmem:[#allocation108_spill] sm:$0xff] }
 0x4b5   :  { %20398 = vst [vmem:[#allocation146_spill] sm:$0xff] %v15115_v21  ;;  %20401 = vst [vmem:[#allocation147_spill] sm:$0xff] %v15128_v35  ;;  %v6487_v24 = vmul.f32 %v15115_v21, %v15115_v21  ;;  %v5728_v43 = vadd.f32 %v5523_v20, %v14966_v19  ;;  %v4615_v23 = vadd.f32 %v20404_v25, %v14830_v54  ;;  %v6564_v17 = vsel %vm560_vm1, %v6486_v56, 0.0  ;;  %v20409_v55 = vld [vmem:[#allocation110_spill] sm:$0xff] }
 0x4b6   :  { %v10366_v13 = vpop.f32.mrf.mxu1  ;;  %v6563_v11 = vadd.f32 %v6562_v57, %v6561_v32  ;;  %v6367_v39 = vadd.f32 %v6366_v46, %v6365_v9  ;;  %v15146_v12 = vadd.f32 %v20406_v6, %v20405_v4  ;;  %v6368_v3 = vsel %vm560_vm1, %v15115_v21, 0.0  ;;  %v15160_v46 = vpop.f32.mrf.mxu0  ;;  %v20411_v6 = vld [vmem:[#allocation61_spill] sm:$0xff]  ;;  %v20441_v21 = vld [vmem:[#allocation131_spill] sm:$0xff] }
 0x4b7   :  { %v15152_v40 = vadd.f32 %v20407_v8, %v5730_v47  ;;  %v15155_v19 = vadd.f32 %v20409_v55, %v5728_v43  ;;  %v6489_v54 = vmul.f32 %v15128_v35, %v15128_v35  ;;  %v6566_v56 = vsel %vm560_vm1, %v6487_v24, 0.0 }
 0x4b8   :  { %v5536_v20 = vpop.f32.mrf.mxu1  ;;  %v6369_v9 = vadd.f32 %v6368_v3, %v6367_v39  ;;  %v6565_v32 = vadd.f32 %v6564_v17, %v6563_v11  ;;  %v5733_v55 = vadd.f32 %v10366_v13, %v14981_v7  ;;  %v6372_v4 = vsel %vm560_vm1, %v15128_v35, 0.0  ;;  %v20412_v3 = vld [vmem:[#allocation114_spill] sm:$0xff] }
 0x4b9   :  { %20408 = vst [vmem:[#allocation148_spill] sm:$0xff] %v15152_v40  ;;  %20410 = vst [vmem:[#allocation149_spill] sm:$0xff] %v15155_v19  ;;  %v5731_v57 = vadd.f32 %v5536_v20, %v14985_v33  ;;  %v6370_v25 = vsel %vm560_vm1, %v15155_v19, 0.0  ;;  %v6488_v47 = vmul.f32 %v15155_v19, %v15155_v19  ;;  %v15171_v33 = vadd.f32 %v20411_v6, %v4615_v23  ;;  %v15185_v23 = vpop.f32.mrf.mxu0 }
 0x4ba   :  { %v10367_v43 = vpop.f32.mrf.mxu1  ;;  %v6567_v39 = vadd.f32 %v6566_v56, %v6565_v32  ;;  %v6371_v11 = vadd.f32 %v6370_v25, %v6369_v9  ;;  %v6490_v24 = vmul.f32 %v15152_v40, %v15152_v40  ;;  %v20414_v32 = vld [vmem:[#allocation209_spill] sm:$0xff]  ;;  %v20415_v9 = vld [vmem:[#allocation60_spill] sm:$0xff]  ;;  %v6570_v25 = vsel %vm560_vm1, %v6489_v54, 0.0  ;;  %v20421_v54 = vld [vmem:[#allocation106_spill] sm:$0xff] }
 0x4bb   :  { %v6568_v17 = vsel %vm560_vm1, %v6488_v47, 0.0  ;;  %v15177_v8 = vadd.f32 %v20412_v3, %v5731_v57  ;;  %v5734_v20 = vadd.f32 %v10367_v43, %v15020_v61  ;;  %v15183_v56 = vadd.f32 %v20415_v9, %v20414_v32  ;;  %v20416_v57 = vld [vmem:[#allocation112_spill] sm:$0xff] }
 0x4bc   :  { %v5539_v7 = vpop.f32.mrf.mxu1  ;;  %v6373_v13 = vadd.f32 %v6372_v4, %v6371_v11  ;;  %v6569_v19 = vadd.f32 %v6568_v17, %v6567_v39  ;;  %v6374_v47 = vsel %vm560_vm1, %v15152_v40, 0.0  ;;  %v15191_v6 = vadd.f32 %v20416_v57, %v5733_v55  ;;  %v20419_v11 = vld [vmem:[#allocation104_spill] sm:$0xff]  ;;  %v20420_v17 = vld [vmem:[#allocation62_spill] sm:$0xff] }
 0x4bd   :  { %20413 = vst [vmem:[#allocation150_spill] sm:$0xff] %v15177_v8  ;;  %v5732_v35 = vadd.f32 %v5539_v7, %v15038_v16  ;;  %v6491_v61 = vmul.f32 %v15177_v8, %v15177_v8  ;;  %v15200_v3 = vadd.f32 %v20420_v17, %v20419_v11  ;;  %v4619_v7 = vadd.f32 %v20421_v54, %v14836_v38  ;;  %v20422_v9 = vld [vmem:[#allocation116_spill] sm:$0xff] }
 0x4be   :  { %20417 = vst [vmem:[#allocation151_spill] sm:$0xff] %v15191_v6  ;;  %v10370_v43 = vpop.f32.mrf.mxu1  ;;  %v6571_v4 = vadd.f32 %v6570_v25, %v6569_v19  ;;  %v6375_v16 = vadd.f32 %v6374_v47, %v6373_v13  ;;  %v6572_v32 = vsel %vm560_vm1, %v6490_v24, 0.0  ;;  %v6376_v55 = vsel %vm560_vm1, %v15177_v8, 0.0  ;;  %v15214_v47 = vpop.f32.mrf.mxu0 }
 0x4bf   :  { %v15196_v39 = vadd.f32 %v14723_v37, %v5732_v35  ;;  %v15208_v57 = vadd.f32 %v20422_v9, %v5734_v20  ;;  %v6493_v38 = vmul.f32 %v15191_v6, %v15191_v6  ;;  %v6574_v24 = vsel %vm560_vm1, %v6491_v61, 0.0 }
 0x4c0   :  { %v5552_v19 = vpop.f32.mrf.mxu1  ;;  %v6377_v13 = vadd.f32 %v6376_v55, %v6375_v16  ;;  %v6573_v25 = vadd.f32 %v6572_v32, %v6571_v4  ;;  %v5737_v11 = vadd.f32 %v10370_v43, %v15048_v5  ;;  %v20424_v32 = vld [vmem:[#allocation211_spill] sm:$0xff]  ;;  %v20425_v55 = vld [vmem:[#allocation69_spill] sm:$0xff] }
 0x4c1   :  { %20418 = vst [vmem:[#allocation152_spill] sm:$0xff] %v15196_v39  ;;  %20423 = vst [vmem:[#allocation153_spill] sm:$0xff] %v15208_v57  ;;  %v6378_v37 = vsel %vm560_vm1, %v15196_v39, 0.0  ;;  %v6492_v35 = vmul.f32 %v15196_v39, %v15196_v39  ;;  %v5735_v20 = vadd.f32 %v5552_v19, %v15075_v34  ;;  %v15224_v9 = vadd.f32 %v20425_v55, %v20424_v32  ;;  %v20428_v55 = vld [vmem:[#allocation225_spill] sm:$0xff] }
 0x4c2   :  { %v10371_v17 = vpop.f32.mrf.mxu1  ;;  %v6575_v16 = vadd.f32 %v6574_v24, %v6573_v25  ;;  %v6379_v4 = vadd.f32 %v6378_v37, %v6377_v13  ;;  %v6380_v39 = vsel %vm560_vm1, %v15191_v6, 0.0  ;;  %v6494_v8 = vmul.f32 %v15208_v57, %v15208_v57  ;;  %v20427_v25 = vld [vmem:[#allocation171_spill] sm:$0xff] }
 0x4c3   :  { %v6576_v54 = vsel %vm560_vm1, %v6492_v35, 0.0  ;;  %v15231_v61 = vadd.f32 %v14745_v50, %v5735_v20  ;;  %v5738_v5 = vadd.f32 %v10371_v17, %v15089_v48  ;;  %v15236_v37 = vadd.f32 %v20427_v25, %v4619_v7  ;;  %v15238_v35 = vpop.f32.mrf.mxu0  ;;  %v20434_v25 = vld [vmem:[#allocation127_spill] sm:$0xff] }
 0x4c4   :  { %v5555_v34 = vpop.f32.mrf.mxu1  ;;  %v6381_v43 = vadd.f32 %v6380_v39, %v6379_v4  ;;  %v6577_v19 = vadd.f32 %v6576_v54, %v6575_v16  ;;  %v6578_v24 = vsel %vm560_vm1, %v6493_v38, 0.0  ;;  %v6382_v32 = vsel %vm560_vm1, %v15208_v57, 0.0  ;;  %v20431_v16 = vld [vmem:[#allocation71_spill] sm:$0xff]  ;;  %v20432_v4 = vld [vmem:[#allocation213_spill] sm:$0xff] }
 0x4c5   :  { %20426 = vst [vmem:[#allocation154_spill] sm:$0xff] %v15231_v61  ;;  %v5736_v13 = vadd.f32 %v5555_v34, %v15092_v53  ;;  %v15244_v50 = vadd.f32 %v20428_v55, %v5737_v11  ;;  %v6495_v48 = vmul.f32 %v15231_v61, %v15231_v61  ;;  %v20430_v53 = vld [vmem:[#allocation111_spill] sm:$0xff]  ;;  %v20433_v54 = vld [vmem:[#allocation173_spill] sm:$0xff]  ;;  %v6580_v38 = vsel %vm560_vm1, %v6494_v8, 0.0 }
 0x4c6   :  { %v10374_v39 = vpop.f32.mrf.mxu1  ;;  %v6579_v20 = vadd.f32 %v6578_v24, %v6577_v19  ;;  %v6383_v17 = vadd.f32 %v6382_v32, %v6381_v43  ;;  %v15250_v7 = vadd.f32 %v20431_v16, %v20430_v53  ;;  %v15254_v34 = vadd.f32 %v20433_v54, %v20432_v4  ;;  %v20436_v57 = vld [vmem:[#allocation129_spill] sm:$0xff]  ;;  %v15267_v16 = vpop.f32.mrf.mxu0 }
 0x4c7   :  { %20429 = vst [vmem:[#allocation155_spill] sm:$0xff] %v15244_v50  ;;  %v6384_v11 = vsel %vm560_vm1, %v15231_v61, 0.0  ;;  %v15260_v55 = vadd.f32 %v20434_v25, %v5738_v5  ;;  %v15263_v6 = vadd.f32 %v20436_v57, %v5736_v13  ;;  %v5741_v32 = vadd.f32 %v10374_v39, %v15119_v52 }
 0x4c8   :  { %v5568_v43 = vpop.f32.mrf.mxu1  ;;  %v6385_v19 = vadd.f32 %v6384_v11, %v6383_v17  ;;  %v6581_v24 = vadd.f32 %v6580_v38, %v6579_v20  ;;  %v6497_v8 = vmul.f32 %v15244_v50, %v15244_v50  ;;  %v6582_v4 = vsel %vm560_vm1, %v6495_v48, 0.0  ;;  %v20438_v17 = vld [vmem:[#allocation238_spill] sm:$0xff]  ;;  %v20439_v20 = vld [vmem:[#allocation215_spill] sm:$0xff] }
 0x4c9   :  { %20435 = vst [vmem:[#allocation156_spill] sm:$0xff] %v15260_v55  ;;  %20437 = vst [vmem:[#allocation157_spill] sm:$0xff] %v15263_v6  ;;  %v5739_v53 = vadd.f32 %v5568_v43, %v15132_v10  ;;  %v6386_v5 = vsel %vm560_vm1, %v15263_v6, 0.0  ;;  %v6496_v57 = vmul.f32 %v15263_v6, %v15263_v6  ;;  %v4623_v54 = vadd.f32 %v20439_v20, %v20438_v17  ;;  %v20440_v10 = vld [vmem:[#allocation133_spill] sm:$0xff] }
 0x4ca   :  { %v10375_v13 = vpop.f32.mrf.mxu1  ;;  %v6583_v52 = vadd.f32 %v6582_v4, %v6581_v24  ;;  %v6387_v39 = vadd.f32 %v6386_v5, %v6385_v19  ;;  %v6388_v11 = vsel %vm560_vm1, %v15244_v50, 0.0  ;;  %v6498_v48 = vmul.f32 %v15260_v55, %v15260_v55  ;;  %v20443_v19 = vld [vmem:[#allocation113_spill] sm:$0xff]  ;;  %v20444_v24 = vld [vmem:[#allocation68_spill] sm:$0xff]  ;;  %v15294_v4 = vpop.f32.mrf.mxu0  ;;  %v20449_v50 = vld [vmem:[#allocation139_spill] sm:$0xff] }
 0x4cb   :  { %v15279_v38 = vadd.f32 %v20440_v10, %v5739_v53  ;;  %v6584_v25 = vsel %vm560_vm1, %v6496_v57, 0.0  ;;  %v5742_v43 = vadd.f32 %v10375_v13, %v15146_v12  ;;  %v15288_v17 = vadd.f32 %v20441_v21, %v5741_v32  ;;  %v20445_v32 = vld [vmem:[#allocation175_spill] sm:$0xff] }
 0x4cc   :  { %v5571_v6 = vpop.f32.mrf.mxu1  ;;  %v6389_v61 = vadd.f32 %v6388_v11, %v6387_v39  ;;  %v6585_v40 = vadd.f32 %v6584_v25, %v6583_v52  ;;  %v15292_v53 = vadd.f32 %v20444_v24, %v20443_v19  ;;  %v6586_v5 = vsel %vm560_vm1, %v6497_v8, 0.0  ;;  %v20446_v10 = vld [vmem:[#allocation115_spill] sm:$0xff]  ;;  %v20448_v24 = vld [vmem:[#allocation132_spill] sm:$0xff] }
 0x4cd   :  { %20442 = vst [vmem:[#allocation158_spill] sm:$0xff] %v15288_v17  ;;  %v6390_v20 = vsel %vm560_vm1, %v15260_v55, 0.0  ;;  %v6499_v12 = vmul.f32 %v15279_v38, %v15279_v38  ;;  %v5740_v57 = vadd.f32 %v5571_v6, %v15171_v33  ;;  %v15303_v39 = vadd.f32 %v20445_v32, %v4623_v54  ;;  %v20447_v11 = vld [vmem:[#allocation75_spill] sm:$0xff] }
 0x4ce   :  { %v10378_v13 = vpop.f32.mrf.mxu1  ;;  %v6587_v52 = vadd.f32 %v6586_v5, %v6585_v40  ;;  %v6391_v21 = vadd.f32 %v6390_v20, %v6389_v61  ;;  %v15307_v25 = vadd.f32 %v20447_v11, %v20446_v10  ;;  %v6588_v8 = vsel %vm560_vm1, %v6498_v48, 0.0  ;;  %v15321_v20 = vpop.f32.mrf.mxu0  ;;  %v20451_v10 = vld [vmem:[#allocation219_spill] sm:$0xff] }
 0x4cf   :  { %v6392_v19 = vsel %vm560_vm1, %v15279_v38, 0.0  ;;  %v15313_v55 = vadd.f32 %v20448_v24, %v5742_v43  ;;  %v15316_v33 = vadd.f32 %v20449_v50, %v5740_v57  ;;  %v6501_v6 = vmul.f32 %v15288_v17, %v15288_v17 }
 0x4d0   :  { %v5584_v40 = vpop.f32.mrf.mxu1  ;;  %v6393_v61 = vadd.f32 %v6392_v19, %v6391_v21  ;;  %v6589_v54 = vadd.f32 %v6588_v8, %v6587_v52  ;;  %v6590_v48 = vsel %vm560_vm1, %v6499_v12, 0.0  ;;  %v5745_v50 = vadd.f32 %v10378_v13, %v15183_v56 }
 0x4d1   :  { %20450 = vst [vmem:[#allocation159_spill] sm:$0xff] %v15316_v33  ;;  %v5743_v5 = vadd.f32 %v5584_v40, %v15200_v3  ;;  %v6394_v32 = vsel %vm560_vm1, %v15316_v33, 0.0  ;;  %v6500_v43 = vmul.f32 %v15316_v33, %v15316_v33  ;;  %v4627_v11 = vadd.f32 %v20451_v10, %v14844_v14  ;;  %v20452_v10 = vld [vmem:[#allocation217_spill] sm:$0xff]  ;;  %v20453_v33 = vld [vmem:[#allocation72_spill] sm:$0xff] }
 0x4d2   :  { %v10379_v57 = vpop.f32.mrf.mxu1  ;;  %v6396_v52 = vsel %vm560_vm1, %v15288_v17, 0.0  ;;  %v6591_v3 = vadd.f32 %v6590_v48, %v6589_v54  ;;  %v6395_v21 = vadd.f32 %v6394_v32, %v6393_v61  ;;  %v6502_v12 = vmul.f32 %v15313_v55, %v15313_v55  ;;  %v15343_v54 = vpop.f32.mrf.mxu0 }
 0x4d3   :  { %v6592_v8 = vsel %vm560_vm1, %v6500_v43, 0.0  ;;  %v15337_v19 = vadd.f32 %v14891_v28, %v5743_v5  ;;  %v5746_v24 = vadd.f32 %v10379_v57, %v15224_v9  ;;  %v5189_v17 = vadd.f32 %v20453_v33, %v20452_v10  ;;  %v20454_v33 = vld [vmem:[#allocation117_spill] sm:$0xff]  ;;  %v20455_v57 = vld [vmem:[#allocation179_spill] sm:$0xff] }
 0x4d4   :  { %v5587_v56 = vpop.f32.mrf.mxu1  ;;  %v6397_v13 = vadd.f32 %v6396_v52, %v6395_v21  ;;  %v6593_v40 = vadd.f32 %v6592_v8, %v6591_v3  ;;  %v6594_v61 = vsel %vm560_vm1, %v6501_v6, 0.0  ;;  %v6398_v48 = vsel %vm560_vm1, %v15313_v55, 0.0  ;;  %v20457_v21 = vld [vmem:[#allocation79_spill] sm:$0xff] }
 0x4d5   :  { %v5744_v14 = vadd.f32 %v5587_v56, %v15236_v37  ;;  %v15349_v28 = vadd.f32 %v14846_v60, %v5745_v50  ;;  %v6503_v9 = vmul.f32 %v15337_v19, %v15337_v19  ;;  %v5192_v52 = vadd.f32 %v20455_v57, %v20454_v33  ;;  %v20459_v33 = vld [vmem:[#allocation76_spill] sm:$0xff] }
 0x4d6   :  { %v10382_v5 = vpop.f32.mrf.mxu1  ;;  %v6595_v32 = vadd.f32 %v6594_v61, %v6593_v40  ;;  %v6399_v43 = vadd.f32 %v6398_v48, %v6397_v13  ;;  %v6596_v6 = vsel %vm560_vm1, %v6502_v12, 0.0  ;;  %v6400_v3 = vsel %vm560_vm1, %v15337_v19, 0.0 }
 0x4d7   :  { %v15354_v37 = vadd.f32 %v14970_v42, %v5744_v14  ;;  %v15362_v60 = vadd.f32 %v14939_v31, %v5746_v24  ;;  %v15365_v8 = vadd.f32 %v20457_v21, %v4627_v11  ;;  %v15371_v14 = vpop.f32.mrf.mxu0  ;;  %v6505_v12 = vmul.f32 %v15349_v28, %v15349_v28 }
 0x4d8   :  { %v5600_v50 = vpop.f32.mrf.mxu1  ;;  %v6401_v56 = vadd.f32 %v6400_v3, %v6399_v43  ;;  %v6597_v13 = vadd.f32 %v6596_v6, %v6595_v32  ;;  %v6598_v31 = vsel %vm560_vm1, %v6503_v9, 0.0  ;;  %v5749_v24 = vadd.f32 %v10382_v5, %v15250_v7  ;;  %v20458_v43 = vld [vmem:[#allocation119_spill] sm:$0xff] }
 0x4d9   :  { %20456 = vst [vmem:[#allocation160_spill] sm:$0xff] %v15362_v60  ;;  %v6402_v42 = vsel %vm560_vm1, %v15354_v37, 0.0  ;;  %v6504_v40 = vmul.f32 %v15354_v37, %v15354_v37  ;;  %v5747_v11 = vadd.f32 %v5600_v50, %v15254_v34  ;;  %v15381_v57 = vadd.f32 %v20459_v33, %v20458_v43  ;;  %v20464_v33 = vld [vmem:[#allocation78_spill] sm:$0xff] }
 0x4da   :  { %v10383_v10 = vpop.f32.mrf.mxu1  ;;  %v6599_v61 = vadd.f32 %v6598_v31, %v6597_v13  ;;  %v6403_v48 = vadd.f32 %v6402_v42, %v6401_v56  ;;  %v6404_v6 = vsel %vm560_vm1, %v15349_v28, 0.0  ;;  %v6506_v3 = vmul.f32 %v15362_v60, %v15362_v60  ;;  %v20460_v56 = vld [vmem:[#allocation221_spill] sm:$0xff] }
 0x4db   :  { %v6600_v32 = vsel %vm560_vm1, %v6504_v40, 0.0  ;;  %v15388_v9 = vadd.f32 %v15024_v18, %v5747_v11  ;;  %v5750_v7 = vadd.f32 %v10383_v10, %v15292_v53  ;;  %v20461_v13 = vld [vmem:[#allocation81_spill] sm:$0xff]  ;;  %v15394_v40 = vpop.f32.mrf.mxu0  ;;  %v6602_v31 = vsel %vm560_vm1, %v6505_v12, 0.0  ;;  %v20462_v10 = vld [vmem:[#allocation223_spill] sm:$0xff] }
 0x4dc   :  { %v5603_v34 = vpop.f32.mrf.mxu1  ;;  %v6405_v5 = vadd.f32 %v6404_v6, %v6403_v48  ;;  %v6601_v50 = vadd.f32 %v6600_v32, %v6599_v61  ;;  %v5193_v42 = vadd.f32 %v20461_v13, %v20460_v56  ;;  %v6406_v43 = vsel %vm560_vm1, %v15362_v60, 0.0  ;;  %v20463_v32 = vld [vmem:[#allocation121_spill] sm:$0xff] }
 0x4dd   :  { %v5748_v21 = vadd.f32 %v5603_v34, %v15303_v39  ;;  %v15400_v18 = vadd.f32 %v14998_v29, %v5749_v24  ;;  %v6507_v53 = vmul.f32 %v15388_v9, %v15388_v9  ;;  %v4631_v39 = vadd.f32 %v20462_v10, %v14850_v36 }
 0x4de   :  { %v10386_v11 = vpop.f32.mrf.mxu1  ;;  %v6603_v61 = vadd.f32 %v6602_v31, %v6601_v50  ;;  %v6407_v48 = vadd.f32 %v6406_v43, %v6405_v5  ;;  %v5196_v6 = vadd.f32 %v20464_v33, %v20463_v32  ;;  %v6604_v12 = vsel %vm560_vm1, %v6506_v3, 0.0  ;;  %v15418_v50 = vpop.f32.mrf.mxu0 }
 0x4df   :  { %v6408_v34 = vsel %vm560_vm1, %v15388_v9, 0.0  ;;  %v15412_v29 = vadd.f32 %v15054_v58, %v5750_v7  ;;  %v15415_v24 = vadd.f32 %v15077_v45, %v5748_v21  ;;  %v5753_v36 = vadd.f32 %v10386_v11, %v15307_v25 }
 0x4e0   :  { %v5616_v56 = vpop.f32.mrf.mxu1  ;;  %v6409_v13 = vadd.f32 %v6408_v34, %v6407_v48  ;;  %v6605_v60 = vadd.f32 %v6604_v12, %v6603_v61  ;;  %v6509_v3 = vmul.f32 %v15400_v18, %v15400_v18  ;;  %v6606_v31 = vsel %vm560_vm1, %v6507_v53, 0.0  ;;  %v20467_v34 = vld [vmem:[#allocation118_spill] sm:$0xff] }
 0x4e1   :  { %v5751_v5 = vadd.f32 %v5616_v56, %v5189_v17  ;;  %v6410_v58 = vsel %vm560_vm1, %v15415_v24, 0.0  ;;  %v6508_v45 = vmul.f32 %v15415_v24, %v15415_v24  ;;  %v20465_v17 = vld [vmem:[#allocation185_spill] sm:$0xff]  ;;  %v6412_v11 = vsel %vm560_vm1, %v15400_v18, 0.0 }
 0x4e2   :  { %v10387_v7 = vpop.f32.mrf.mxu1  ;;  %v6607_v21 = vadd.f32 %v6606_v31, %v6605_v60  ;;  %v6411_v43 = vadd.f32 %v6410_v58, %v6409_v13  ;;  %v5194_v25 = vadd.f32 %v20465_v17, %v4631_v39  ;;  %v6510_v53 = vmul.f32 %v15412_v29, %v15412_v29  ;;  %v15441_v13 = vpop.f32.mrf.mxu0 }
 0x4e3   :  { %v15428_v10 = vadd.f32 %v15134_v1, %v5751_v5  ;;  %v6608_v61 = vsel %vm560_vm1, %v6508_v45, 0.0  ;;  %v5754_v48 = vadd.f32 %v10387_v7, %v5192_v52  ;;  %v15437_v60 = vadd.f32 %v15105_v44, %v5753_v36  ;;  %v20468_v1 = vld [vmem:[#allocation85_spill] sm:$0xff] }
 0x4e4   :  { %v5619_v32 = vpop.f32.mrf.mxu1  ;;  %v6413_v33 = vadd.f32 %v6412_v11, %v6411_v43  ;;  %v6609_v12 = vadd.f32 %v6608_v61, %v6607_v21  ;;  %v5199_v56 = vadd.f32 %v20468_v1, %v20467_v34  ;;  %v6610_v39 = vsel %vm560_vm1, %v6509_v3, 0.0  ;;  %v20469_v45 = vld [vmem:[#allocation125_spill] sm:$0xff]  ;;  %v20470_v21 = vld [vmem:[#allocation123_spill] sm:$0xff]  ;;  %v20471_v43 = vld [vmem:[#allocation82_spill] sm:$0xff]  ;;  %v15464_v1 = vpop.f32.mrf.mxu0 }
 0x4e5   :  { %20466 = vst [vmem:[#allocation161_spill] sm:$0xff] %v15437_v60  ;;  %v6414_v5 = vsel %vm560_vm1, %v15412_v29, 0.0  ;;  %v6511_v31 = vmul.f32 %v15428_v10, %v15428_v10  ;;  %v5752_v52 = vadd.f32 %v5619_v32, %v15365_v8  ;;  %v4635_v44 = vadd.f32 %v20469_v45, %v14854_v59 }
 0x4e6   :  { %v10390_v58 = vpop.f32.mrf.mxu1  ;;  %v6611_v36 = vadd.f32 %v6610_v39, %v6609_v12  ;;  %v6415_v7 = vadd.f32 %v6414_v5, %v6413_v33  ;;  %v5197_v17 = vadd.f32 %v20471_v43, %v20470_v21  ;;  %v6612_v11 = vsel %vm560_vm1, %v6510_v53, 0.0 }
 0x4e7   :  { %v6416_v3 = vsel %vm560_vm1, %v15428_v10, 0.0  ;;  %v15457_v61 = vadd.f32 %v15160_v46, %v5754_v48  ;;  %v15460_v34 = vadd.f32 %v15185_v23, %v5752_v52  ;;  %v6513_v59 = vmul.f32 %v15437_v60, %v15437_v60 }
 0x4e8   :  { %v5632_v8 = vpop.f32.mrf.mxu1  ;;  %v6417_v32 = vadd.f32 %v6416_v3, %v6415_v7  ;;  %v6613_v33 = vadd.f32 %v6612_v11, %v6611_v36  ;;  %v6614_v53 = vsel %vm560_vm1, %v6511_v31, 0.0  ;;  %v5757_v23 = vadd.f32 %v10390_v58, %v15381_v57  ;;  %v20473_v36 = vld [vmem:[#allocation120_spill] sm:$0xff] }
 0x4e9   :  { %20472 = vst [vmem:[#allocation7_spill] sm:$0xff] %v15460_v34  ;;  %v5755_v12 = vadd.f32 %v5632_v8, %v5193_v42  ;;  %v6418_v39 = vsel %vm560_vm1, %v15460_v34, 0.0  ;;  %v6512_v46 = vmul.f32 %v15460_v34, %v15460_v34  ;;  %v6420_v5 = vsel %vm560_vm1, %v15437_v60, 0.0  ;;  %v20474_v42 = vld [vmem:[#allocation189_spill] sm:$0xff]  ;;  %v20475_v34 = vld [vmem:[#allocation84_spill] sm:$0xff] }
 0x4ea   :  { %v10391_v48 = vpop.f32.mrf.mxu1  ;;  %v6615_v52 = vadd.f32 %v6614_v53, %v6613_v33  ;;  %v6419_v45 = vadd.f32 %v6418_v39, %v6417_v32  ;;  %v5200_v7 = vadd.f32 %v20474_v42, %v20473_v36  ;;  %v6514_v31 = vmul.f32 %v15457_v61, %v15457_v61  ;;  %v15483_v33 = vpop.f32.mrf.mxu0 }
 0x4eb   :  { %v6616_v21 = vsel %vm560_vm1, %v6512_v46, 0.0  ;;  %v15480_v43 = vadd.f32 %v15238_v35, %v5755_v12  ;;  %v5758_v11 = vadd.f32 %v10391_v48, %v5196_v6  ;;  %v5198_v60 = vadd.f32 %v20475_v34, %v4635_v44  ;;  %v20477_v44 = vld [vmem:[#allocation227_spill] sm:$0xff] }
 0x4ec   :  { %v5635_v3 = vpop.f32.mrf.mxu1  ;;  %v6421_v57 = vadd.f32 %v6420_v5, %v6419_v45  ;;  %v6617_v58 = vadd.f32 %v6616_v21, %v6615_v52  ;;  %v6618_v32 = vsel %vm560_vm1, %v6513_v59, 0.0  ;;  %v6422_v53 = vsel %vm560_vm1, %v15457_v61, 0.0  ;;  %v20478_v34 = vld [vmem:[#allocation191_spill] sm:$0xff]  ;;  %v20480_v52 = vld [vmem:[#allocation122_spill] sm:$0xff] }
 0x4ed   :  { %v5756_v8 = vadd.f32 %v5635_v3, %v5194_v25  ;;  %v15489_v39 = vadd.f32 %v15214_v47, %v5757_v23  ;;  %v6515_v35 = vmul.f32 %v15480_v43, %v15480_v43  ;;  %v5203_v48 = vadd.f32 %v20478_v34, %v20477_v44  ;;  %v20481_v45 = vld [vmem:[#allocation91_spill] sm:$0xff] }
 0x4ee   :  { %v10394_v6 = vpop.f32.mrf.mxu1  ;;  %v6619_v12 = vadd.f32 %v6618_v32, %v6617_v58  ;;  %v6423_v46 = vadd.f32 %v6422_v53, %v6421_v57  ;;  %v6620_v59 = vsel %vm560_vm1, %v6514_v31, 0.0  ;;  %v6424_v5 = vsel %vm560_vm1, %v15480_v43, 0.0  ;;  %v15510_v57 = vpop.f32.mrf.mxu0  ;;  %v20482_v32 = vld [vmem:[#allocation124_spill] sm:$0xff] }
 0x4ef   :  { %20476 = vst [vmem:[#allocation8_spill] sm:$0xff] %v15489_v39  ;;  %v15494_v25 = vadd.f32 %v15294_v4, %v5756_v8  ;;  %v15502_v47 = vadd.f32 %v15267_v16, %v5758_v11  ;;  %v5201_v36 = vadd.f32 %v20481_v45, %v20480_v52  ;;  %v6517_v31 = vmul.f32 %v15489_v39, %v15489_v39  ;;  %v20483_v52 = vld [vmem:[#allocation229_spill] sm:$0xff] }
 0x4f0   :  { %v5648_v23 = vpop.f32.mrf.mxu1  ;;  %v6425_v42 = vadd.f32 %v6424_v5, %v6423_v46  ;;  %v6621_v21 = vadd.f32 %v6620_v59, %v6619_v12  ;;  %v6622_v16 = vsel %vm560_vm1, %v6515_v35, 0.0  ;;  %v5761_v11 = vadd.f32 %v10394_v6, %v5199_v56 }
 0x4f1   :  { %20479 = vst [vmem:[#allocation162_spill] sm:$0xff] %v15502_v47  ;;  %v6426_v4 = vsel %vm560_vm1, %v15494_v25, 0.0  ;;  %v6516_v3 = vmul.f32 %v15494_v25, %v15494_v25  ;;  %v5759_v58 = vadd.f32 %v5648_v23, %v5197_v17  ;;  %v4639_v53 = vadd.f32 %v20482_v32, %v14860_v51  ;;  %v20484_v51 = vld [vmem:[#allocation88_spill] sm:$0xff]  ;;  %v20487_v32 = vld [vmem:[#allocation231_spill] sm:$0xff] }
 0x4f2   :  { %v10395_v8 = vpop.f32.mrf.mxu1  ;;  %v6623_v12 = vadd.f32 %v6622_v16, %v6621_v21  ;;  %v6427_v46 = vadd.f32 %v6426_v4, %v6425_v42  ;;  %v6428_v34 = vsel %vm560_vm1, %v15489_v39, 0.0  ;;  %v6518_v59 = vmul.f32 %v15502_v47, %v15502_v47  ;;  %v15527_v42 = vpop.f32.mrf.mxu0 }
 0x4f3   :  { %v6624_v44 = vsel %vm560_vm1, %v6516_v3, 0.0  ;;  %v15523_v5 = vadd.f32 %v15343_v54, %v5759_v58  ;;  %v5762_v35 = vadd.f32 %v10395_v8, %v5200_v7  ;;  %v5204_v45 = vadd.f32 %v20484_v51, %v20483_v52 }
 0x4f4   :  { %v5651_v56 = vpop.f32.mrf.mxu1  ;;  %v6429_v17 = vadd.f32 %v6428_v34, %v6427_v46  ;;  %v6625_v6 = vadd.f32 %v6624_v44, %v6623_v12  ;;  %v6626_v21 = vsel %vm560_vm1, %v6517_v31, 0.0  ;;  %v6430_v4 = vsel %vm560_vm1, %v15502_v47, 0.0  ;;  %v20488_v12 = vld [vmem:[#allocation195_spill] sm:$0xff] }
 0x4f5   :  { %v5760_v23 = vadd.f32 %v5651_v56, %v5198_v60  ;;  %v15533_v3 = vadd.f32 %v15321_v20, %v5761_v11  ;;  %v6519_v54 = vmul.f32 %v15523_v5, %v15523_v5  ;;  %v20486_v60 = vld [vmem:[#allocation93_spill] sm:$0xff]  ;;  %v5207_v46 = vadd.f32 %v20488_v12, %v20487_v32  ;;  %v20498_v47 = vld [vmem:[#allocation135_spill] sm:$0xff] }
 0x4f6   :  { %v10398_v7 = vpop.f32.mrf.mxu1  ;;  %v6627_v16 = vadd.f32 %v6626_v21, %v6625_v6  ;;  %v6431_v58 = vadd.f32 %v6430_v4, %v6429_v17  ;;  %v5202_v8 = vadd.f32 %v20486_v60, %v4639_v53  ;;  %v6628_v44 = vsel %vm560_vm1, %v6518_v59, 0.0  ;;  %v15549_v53 = vpop.f32.mrf.mxu0 }
 0x4f7   :  { %20485 = vst [vmem:[#allocation163_spill] sm:$0xff] %v15533_v3  ;;  %v6432_v31 = vsel %vm560_vm1, %v15523_v5, 0.0  ;;  %v15544_v34 = vadd.f32 %v15371_v14, %v5762_v35  ;;  %v15547_v20 = vadd.f32 %v15394_v40, %v5760_v23  ;;  %v5765_v17 = vadd.f32 %v10398_v7, %v5203_v48  ;;  %v20489_v35 = vld [vmem:[#allocation136_spill] sm:$0xff] }
 0x4f8   :  { %v5664_v11 = vpop.f32.mrf.mxu1  ;;  %v6433_v56 = vadd.f32 %v6432_v31, %v6431_v58  ;;  %v6629_v6 = vadd.f32 %v6628_v44, %v6627_v16  ;;  %v6521_v51 = vmul.f32 %v15533_v3, %v15533_v3  ;;  %v6630_v59 = vsel %vm560_vm1, %v6519_v54, 0.0  ;;  %v20490_v23 = vld [vmem:[#allocation128_spill] sm:$0xff] }
 0x4f9   :  { %v5763_v52 = vadd.f32 %v5664_v11, %v5201_v36  ;;  %v6434_v21 = vsel %vm560_vm1, %v15547_v20, 0.0  ;;  %v6520_v14 = vmul.f32 %v15547_v20, %v15547_v20  ;;  %v4643_v4 = vadd.f32 %v20490_v23, %v20489_v35  ;;  %v20491_v11 = vld [vmem:[#allocation126_spill] sm:$0xff]  ;;  %v20493_v23 = vld [vmem:[#allocation233_spill] sm:$0xff] }
 0x4fa   :  { %v10399_v40 = vpop.f32.mrf.mxu1  ;;  %v6631_v16 = vadd.f32 %v6630_v59, %v6629_v6  ;;  %v6435_v48 = vadd.f32 %v6434_v21, %v6433_v56  ;;  %v6436_v7 = vsel %vm560_vm1, %v15533_v3, 0.0  ;;  %v6522_v54 = vmul.f32 %v15544_v34, %v15544_v34  ;;  %v20492_v56 = vld [vmem:[#allocation90_spill] sm:$0xff] }
 0x4fb   :  { %v15561_v36 = vadd.f32 %v15441_v13, %v5763_v52  ;;  %v6632_v58 = vsel %vm560_vm1, %v6520_v14, 0.0  ;;  %v5766_v60 = vadd.f32 %v10399_v40, %v5204_v45  ;;  %v15569_v31 = vadd.f32 %v15418_v50, %v5765_v17  ;;  %v6245_v13 = vpop.f32.mrf.mxu0  ;;  %v20495_v17 = vld [vmem:[#allocation197_spill] sm:$0xff] }
 0x4fc   :  { %v5667_v32 = vpop.f32.mrf.mxu1  ;;  %v6437_v12 = vadd.f32 %v6436_v7, %v6435_v48  ;;  %v6633_v44 = vadd.f32 %v6632_v58, %v6631_v16  ;;  %v5205_v6 = vadd.f32 %v20492_v56, %v20491_v11  ;;  %v6634_v52 = vsel %vm560_vm1, %v6521_v51, 0.0  ;;  %v20494_v16 = vld [vmem:[#allocation95_spill] sm:$0xff] }
 0x4fd   :  { %v6438_v59 = vsel %vm560_vm1, %v15544_v34, 0.0  ;;  %v6523_v21 = vmul.f32 %v15561_v36, %v15561_v36  ;;  %v5764_v14 = vadd.f32 %v5667_v32, %v5202_v8  ;;  %v5208_v50 = vadd.f32 %v20494_v16, %v20493_v23  ;;  %v10474_v32 = vpop.f32.mrf.mxu0  ;;  %v20496_v16 = vld [vmem:[#allocation130_spill] sm:$0xff] }
 0x4fe   :  { %v10402_v45 = vpop.f32.mrf.mxu1  ;;  %v6635_v40 = vadd.f32 %v6634_v52, %v6633_v44  ;;  %v6439_v35 = vadd.f32 %v6438_v59, %v6437_v12  ;;  %v5206_v48 = vadd.f32 %v20495_v17, %v4643_v4  ;;  %v6636_v7 = vsel %vm560_vm1, %v6522_v54, 0.0  ;;  %v20497_v17 = vld [vmem:[#allocation92_spill] sm:$0xff] }
 0x4ff   :  { %v6440_v51 = vsel %vm560_vm1, %v15561_v36, 0.0  ;;  %v15585_v58 = vadd.f32 %v15464_v1, %v5766_v60  ;;  %v15588_v11 = vadd.f32 %v15483_v33, %v5764_v14  ;;  %v6525_v12 = vmul.f32 %v15569_v31, %v15569_v31 }
 0x500   :  { %v5680_v8 = vpop.f32.mrf.mxu1  ;;  %v6441_v44 = vadd.f32 %v6440_v51, %v6439_v35  ;;  %v6637_v56 = vadd.f32 %v6636_v7, %v6635_v40  ;;  %v6638_v4 = vsel %vm560_vm1, %v6523_v21, 0.0  ;;  %v5769_v60 = vadd.f32 %v10402_v45, %v5207_v46  ;;  %v6258_v46 = vpop.f32.mrf.mxu0 }
 0x501   :  { %v5767_v52 = vadd.f32 %v5680_v8, %v5205_v6  ;;  %v6442_v54 = vsel %vm560_vm1, %v15588_v11, 0.0  ;;  %v6524_v1 = vmul.f32 %v15588_v11, %v15588_v11  ;;  %v6444_v33 = vsel %vm560_vm1, %v15569_v31, 0.0 }
 0x502   :  { %v10403_v59 = vpop.f32.mrf.mxu1  ;;  %v6639_v14 = vadd.f32 %v6638_v4, %v6637_v56  ;;  %v6443_v23 = vadd.f32 %v6442_v54, %v6441_v44  ;;  %v5211_v35 = vadd.f32 %v20497_v17, %v20496_v16  ;;  %v6526_v6 = vmul.f32 %v15585_v58, %v15585_v58  ;;  %v20499_v56 = vld [vmem:[#allocation97_spill] sm:$0xff] }
 0x503   :  { %v6640_v21 = vsel %vm560_vm1, %v6524_v1, 0.0  ;;  %v15605_v40 = vadd.f32 %v15527_v42, %v5767_v52  ;;  %v5770_v7 = vadd.f32 %v10403_v59, %v5208_v50  ;;  %v5209_v44 = vadd.f32 %v20499_v56, %v20498_v47  ;;  %v20501_v52 = vld [vmem:[#allocation141_spill] sm:$0xff]  ;;  %v20502_v1 = vld [vmem:[#allocation134_spill] sm:$0xff] }
 0x504   :  { %v5683_v51 = vpop.f32.mrf.mxu1  ;;  %v6445_v45 = vadd.f32 %v6444_v33, %v6443_v23  ;;  %v6641_v8 = vadd.f32 %v6640_v21, %v6639_v14  ;;  %v6642_v4 = vsel %vm560_vm1, %v6525_v12, 0.0  ;;  %v6446_v54 = vsel %vm560_vm1, %v15585_v58, 0.0 }
 0x505   :  { %v5768_v3 = vadd.f32 %v5683_v51, %v5206_v48  ;;  %v15613_v16 = vadd.f32 %v15510_v57, %v5769_v60  ;;  %v6527_v42 = vmul.f32 %v15605_v40, %v15605_v40  ;;  %v4647_v59 = vadd.f32 %v20502_v1, %v20501_v52  ;;  %v10475_v60 = vpop.f32.mrf.mxu0  ;;  %v20507_v52 = vld [vmem:[#allocation94_spill] sm:$0xff] }
 0x506   :  { %v10406_v50 = vpop.f32.mrf.mxu1  ;;  %v6643_v33 = vadd.f32 %v6642_v4, %v6641_v8  ;;  %v6447_v48 = vadd.f32 %v6446_v54, %v6445_v45  ;;  %v6644_v47 = vsel %vm560_vm1, %v6526_v6, 0.0  ;;  %v6448_v12 = vsel %vm560_vm1, %v15605_v40, 0.0  ;;  %v20505_v8 = vld [vmem:[#allocation137_spill] sm:$0xff] }
 0x507   :  { %20500 = vst [vmem:[#allocation165_spill] sm:$0xff] %v15613_v16  ;;  %v15619_v14 = vadd.f32 %v6245_v13, %v5768_v3  ;;  %v15625_v23 = vadd.f32 %v15549_v53, %v5770_v7  ;;  %v5773_v57 = vadd.f32 %v10406_v50, %v5211_v35  ;;  %v6529_v13 = vmul.f32 %v15613_v16, %v15613_v16  ;;  %v20506_v53 = vld [vmem:[#allocation199_spill] sm:$0xff] }
 0x508   :  { %v5696_v17 = vpop.f32.mrf.mxu1  ;;  %v6449_v21 = vadd.f32 %v6448_v12, %v6447_v48  ;;  %v6645_v51 = vadd.f32 %v6644_v47, %v6643_v33  ;;  %v6646_v6 = vsel %vm560_vm1, %v6527_v42, 0.0  ;;  %v5212_v7 = vadd.f32 %v20506_v53, %v20505_v8  ;;  %v6261_v42 = vpop.f32.mrf.mxu0 }
 0x509   :  { %20503 = vst [vmem:[#allocation9_spill] sm:$0xff] %v15619_v14  ;;  %20504 = vst [vmem:[#allocation10_spill] sm:$0xff] %v15625_v23  ;;  %v6450_v56 = vsel %vm560_vm1, %v15619_v14, 0.0  ;;  %v6528_v3 = vmul.f32 %v15619_v14, %v15619_v14  ;;  %v5771_v45 = vadd.f32 %v5696_v17, %v5209_v44  ;;  %v5210_v1 = vadd.f32 %v20507_v52, %v4647_v59 }
 0x50a   :  { %v10407_v35 = vpop.f32.mrf.mxu1  ;;  %v6647_v4 = vadd.f32 %v6646_v6, %v6645_v51  ;;  %v6451_v54 = vadd.f32 %v6450_v56, %v6449_v21  ;;  %v6452_v33 = vsel %vm560_vm1, %v15613_v16, 0.0  ;;  %v6530_v48 = vmul.f32 %v15625_v23, %v15625_v23 }
 0x50b   :  { %v6648_v50 = vsel %vm560_vm1, %v6528_v3, 0.0  ;;  %v15642_v47 = vadd.f32 %v6258_v46, %v5771_v45  ;;  %v5774_v44 = vadd.f32 %v10407_v35, %v5212_v7  ;;  %v15644_v53 = vadd.f32 %v10474_v32, %v5773_v57  ;;  %v15651_v3 = vpop.f32.mrf.mxu0 }
 0x50c   :  { %v5699_v12 = vpop.f32.mrf.mxu1  ;;  %v6453_v17 = vadd.f32 %v6452_v33, %v6451_v54  ;;  %v6649_v8 = vadd.f32 %v6648_v50, %v6647_v4  ;;  %v6650_v51 = vsel %vm560_vm1, %v6529_v13, 0.0  ;;  %v6454_v59 = vsel %vm560_vm1, %v15625_v23, 0.0  ;;  %20510 = vst [vmem:[#allocation169_spill] sm:$0xff] %v15651_v3 }
 0x50d   :  { %20508 = vst [vmem:[#allocation166_spill] sm:$0xff] %v15642_v47  ;;  %20509 = vst [vmem:[#allocation167_spill] sm:$0xff] %v15644_v53  ;;  %v5772_v21 = vadd.f32 %v5699_v12, %v5210_v1  ;;  %v6531_v56 = vmul.f32 %v15642_v47, %v15642_v47  ;;  %v6652_v45 = vsel %vm560_vm1, %v6530_v48, 0.0  ;;  %v6456_v7 = vsel %vm560_vm1, %v15642_v47, 0.0  ;;  %v15660_v13 = vpop.f32.mrf.mxu0 }
 0x50e   :  { %v6651_v46 = vadd.f32 %v6650_v51, %v6649_v8  ;;  %v6455_v6 = vadd.f32 %v6454_v59, %v6453_v17  ;;  %v15656_v32 = vadd.f32 %v10475_v60, %v5774_v44  ;;  %20512 = vst [vmem:[#allocation12_spill] sm:$0xff] %v15660_v13  ;;  %v6533_v35 = vmul.f32 %v15644_v53, %v15644_v53 }
 0x50f   :  { %v15658_v57 = vadd.f32 %v6261_v42, %v5772_v21  ;;  %v6654_v50 = vsel %vm560_vm1, %v6531_v56, 0.0  ;;  %v15669_v33 = vpop.f32.mrf.mxu0  ;;  %v6460_v42 = vsel %vm560_vm1, %v15644_v53, 0.0  ;;  %v8311_v17 = vmul.f32 %v15660_v13, %v15660_v13 }
 0x510   :  { %20511 = vst [vmem:[#allocation11_spill] sm:$0xff] %v15656_v32  ;;  %v6457_v4 = vadd.f32 %v6456_v7, %v6455_v6  ;;  %v6653_v54 = vadd.f32 %v6652_v45, %v6651_v46  ;;  %20513 = vst [vmem:[#allocation170_spill] sm:$0xff] %v15669_v33  ;;  %v6534_v44 = vmul.f32 %v15656_v32, %v15656_v32  ;;  %v6658_v8 = vsel %vm560_vm1, %v6533_v35, 0.0 }
 0x511   :  { %v6458_v52 = vsel %vm560_vm1, %v15658_v57, 0.0  ;;  %v6532_v1 = vmul.f32 %v15658_v57, %v15658_v57  ;;  %v15679_v59 = vpop.f32.mrf.mxu0  ;;  %v6462_v56 = vsel %vm560_vm1, %v15656_v32, 0.0  ;;  %v8313_v46 = vmul.f32 %v15651_v3, %v15651_v3 }
 0x512   :  { %v6655_v60 = vadd.f32 %v6654_v50, %v6653_v54  ;;  %v6459_v48 = vadd.f32 %v6458_v52, %v6457_v4  ;;  %20514 = vst [vmem:[#allocation172_spill] sm:$0xff] %v15679_v59  ;;  %v8241_v6 = vadd.f32 %v15679_v59, %v15660_v13  ;;  %v8312_v45 = vmul.f32 %v15679_v59, %v15679_v59 }
 0x513   :  { %v6656_v12 = vsel %vm560_vm1, %v6532_v1, 0.0  ;;  %v15689_v54 = vpop.f32.mrf.mxu0  ;;  %v6660_v35 = vsel %vm560_vm1, %v6534_v44, 0.0  ;;  %v8314_v50 = vmul.f32 %v15669_v33, %v15669_v33 }
 0x514   :  { %v6461_v21 = vadd.f32 %v6460_v42, %v6459_v48  ;;  %v6657_v51 = vadd.f32 %v6656_v12, %v6655_v60  ;;  %20515 = vst [vmem:[#allocation176_spill] sm:$0xff] %v15689_v54  ;;  %v8242_v52 = vadd.f32 %v15651_v3, %v8241_v6  ;;  %v8375_v1 = vadd.f32 %v8312_v45, %v8311_v17 }
 0x515   :  { %v15695_v42 = vpop.f32.mrf.mxu0  ;;  %v8317_v45 = vmul.f32 %v15689_v54, %v15689_v54 }
 0x516   :  { %v6463_v7 = vadd.f32 %v6462_v56, %v6461_v21  ;;  %v6659_v4 = vadd.f32 %v6658_v8, %v6657_v51  ;;  %20516 = vst [vmem:[#allocation13_spill] sm:$0xff] %v15695_v42  ;;  %v8376_v12 = vadd.f32 %v8375_v1, %v8313_v46  ;;  %v8243_v13 = vadd.f32 %v15669_v33, %v8242_v52 }
 0x517   :  { %v8315_v8 = vmul.f32 %v15695_v42, %v15695_v42  ;;  %v15700_v56 = vpop.f32.mrf.mxu0 }
 0x518   :  { %v6464_v60 = vrot.slane %v6463_v7, 4  ;;  %v6661_v48 = vadd.f32 %v6660_v35, %v6659_v4  ;;  %20517 = vst [vmem:[#allocation14_spill] sm:$0xff] %v15700_v56  ;;  %v8244_v44 = vadd.f32 %v8243_v13, %v15695_v42  ;;  %v8377_v59 = vadd.f32 %v8376_v12, %v8314_v50 }
 0x519   :  { %v15703_v17 = vpop.f32.mrf.mxu0 }
 0x51a   :  { %v6465_v21 = vadd.f32 %v6464_v60, %v6463_v7  ;;  %v6662_v51 = vrot.slane %v6661_v48, 4  ;;  %20518 = vst [vmem:[#allocation178_spill] sm:$0xff] %v15703_v17  ;;  %v8378_v46 = vadd.f32 %v8377_v59, %v8315_v8  ;;  %v8245_v4 = vadd.f32 %v8244_v44, %v15703_v17 }
 0x51b   :  { %v8316_v35 = vmul.f32 %v15703_v17, %v15703_v17  ;;  %v15710_v1 = vpop.f32.mrf.mxu0 }
 0x51c   :  { %v6466_v39 = vrot.slane %v6465_v21, 2  ;;  %v6663_v6 = vadd.f32 %v6662_v51, %v6661_v48  ;;  %20519 = vst [vmem:[#allocation180_spill] sm:$0xff] %v15710_v1  ;;  %v8246_v13 = vadd.f32 %v15689_v54, %v8245_v4  ;;  %v8318_v51 = vmul.f32 %v15700_v56, %v15700_v56  ;;  %v20552_v54 = vld [vmem:[#allocation160_spill] sm:$0xff] }
 0x51d   :  { %v8379_v50 = vadd.f32 %v8378_v46, %v8316_v35  ;;  %v15713_v12 = vpop.f32.mrf.mxu0 }
 0x51e   :  { %v6467_v7 = vadd.f32 %v6466_v39, %v6465_v21  ;;  %v6664_v52 = vrot.slane %v6663_v6, 2  ;;  %20520 = vst [vmem:[#allocation184_spill] sm:$0xff] %v15713_v12  ;;  %v8247_v42 = vadd.f32 %v15700_v56, %v8246_v13 }
 0x51f   :  { %v8380_v59 = vadd.f32 %v8379_v50, %v8317_v45  ;;  %v15718_v17 = vpop.f32.mrf.mxu0 }
 0x520   :  { %v6468_v60 = vrot.slane %v6467_v7, 1  ;;  %v6665_v48 = vadd.f32 %v6664_v52, %v6663_v6  ;;  %20521 = vst [vmem:[#allocation15_spill] sm:$0xff] %v15718_v17  ;;  %v8319_v6 = vmul.f32 %v15713_v12, %v15713_v12 }
 0x521   :  { %v15722_v33 = vpop.f32.mrf.mxu0  ;;  %v8381_v46 = vadd.f32 %v8380_v59, %v8318_v51  ;;  %v15743_v51 = vmul.f32 %v15718_v17, %v15718_v17 }
 0x522   :  { %v6469_v8 = vadd.f32 %v6468_v60, %v6467_v7  ;;  %v6666_v44 = vrot.slane %v6665_v48, 1  ;;  %20522 = vst [vmem:[#allocation16_spill] sm:$0xff] %v15722_v33  ;;  %v8248_v7 = vadd.f32 %v8247_v42, %v15713_v12  ;;  %v15737_v60 = vmul.f32 %v15710_v1, %v15710_v1 }
 0x523   :  { %v15731_v52 = vpop.f32.mrf.mxu0  ;;  %20525 = vst [vmem:[#allocation192_spill] sm:$0xff] %v15743_v51 }
 0x524   :  { %v15720_v39 = vmul.f32 0.001953125, %v6469_v8  ;;  %v6667_v21 = vadd.f32 %v6666_v44, %v6665_v48  ;;  %20523 = vst [vmem:[#allocation186_spill] sm:$0xff] %v15731_v52  ;;  %v15739_v48 = vadd.f32 %v8381_v46, %v8319_v6  ;;  %v20526_v8 = vld [vmem:[#allocation138_spill] sm:$0xff]  ;;  %v8249_v42 = vadd.f32 %v8248_v7, %v15722_v33  ;;  %v20529_v6 = vld [vmem:[#allocation143_spill] sm:$0xff] }
 0x525   :  { %v15733_v50 = vpop.f32.mrf.mxu0  ;;  %v20543_v7 = vld [vmem:[#allocation154_spill] sm:$0xff] }
 0x526   :  { %v6668_v4 = vmul.f32 0.001953125, %v6667_v21  ;;  %v6669_v35 = vmul.f32 %v15720_v39, %v15720_v39  ;;  %20524 = vst [vmem:[#allocation188_spill] sm:$0xff] %v15733_v50  ;;  %v8320_v21 = vmul.f32 %v15722_v33, %v15722_v33  ;;  %v20530_v33 = vld [vmem:[#allocation142_spill] sm:$0xff]  ;;  %v20546_v50 = vld [vmem:[#allocation156_spill] sm:$0xff]  ;;  %v8250_v12 = vadd.f32 %v15710_v1, %v8249_v42  ;;  %v20554_v42 = vld [vmem:[#allocation7_spill] sm:$0xff] }
 0x527   :  { %v6707_v16 = vsub.f32 %v20552_v54, %v15720_v39  ;;  %v6709_v52 = vsub.f32 %v15415_v24, %v15720_v39  ;;  %v6711_v51 = vsub.f32 %v15412_v29, %v15720_v39  ;;  %v6713_v54 = vsub.f32 %v20554_v42, %v15720_v39  ;;  %v20556_v29 = vld [vmem:[#allocation8_spill] sm:$0xff]  ;;  %v15895_v42 = vld [vmem:[%s19284_s5] ss:$0 sm:$0xff] }
 0x528   :  { %v6670_v13 = vsub.f32 %v6668_v4, %v6669_v35  ;;  %v15750_v4 = vpop.f32.mrf.mxu0  ;;  %v20528_v35 = vld [vmem:[#allocation140_spill] sm:$0xff]  ;;  %v8383_v56 = vadd.f32 %v15739_v48, %v8320_v21  ;;  %v6712_v48 = vsub.f32 %v15428_v10, %v15720_v39  ;;  %v20555_v21 = vld [vmem:[#allocation161_spill] sm:$0xff]  ;;  %v6715_v24 = vsub.f32 %v15457_v61, %v15720_v39  ;;  %v20558_v61 = vld [vmem:[#allocation162_spill] sm:$0xff] }
 0x529   :  { %20527 = vst [vmem:[#allocation17_spill] sm:$0xff] %v15750_v4  ;;  %v20545_v4 = vld [vmem:[#allocation155_spill] sm:$0xff]  ;;  %v6717_v1 = vsub.f32 %v15494_v25, %v15720_v39  ;;  %v20561_v23 = vsub.f32 %v20526_v8, %v15720_v39  ;;  %v20567_v8 = vsub.f32 %v14952_v41, %v15720_v39  ;;  %v20572_v41 = vsub.f32 %v14991_v26, %v15720_v39 }
 0x52a   :  { %v6671_v59 = vmax.f32 %v6670_v13, 0.0  ;;  %v15766_v45 = vpop.f32.mrf.mxu0  ;;  %v6708_v13 = vsub.f32 %v15388_v9, %v15720_v39  ;;  %v6714_v9 = vsub.f32 %v20555_v21, %v15720_v39  ;;  %v6719_v21 = vsub.f32 %v20558_v61, %v15720_v39 }
 0x52b   :  { %20531 = vst [vmem:[#allocation18_spill] sm:$0xff] %v15766_v45  ;;  %v20544_v45 = vld [vmem:[#allocation157_spill] sm:$0xff]  ;;  %v15902_v25 = vadd.f32 %v8383_v56, %v15737_v60  ;;  %v20562_v61 = vsub.f32 %v20528_v35, %v15720_v39  ;;  %v20577_v26 = vsub.f32 %v15030_v0, %v15720_v39 }
 0x52c   :  { %v6736_v44 = vadd.f32 1e-05, %v6671_v59  ;;  %v15782_v46 = vpop.f32.mrf.mxu0  ;;  %v20534_v59 = vld [vmem:[#allocation146_spill] sm:$0xff] }
 0x52d   :  { %20532 = vst [vmem:[#allocation194_spill] sm:$0xff] %v15782_v46 }
 0x52e   :  { %10650 = vrsqrt.f32 %v6736_v44  ;;  %v15800_v2 = vpop.f32.mrf.mxu0  ;;  %v20548_v44 = vld [vmem:[#allocation158_spill] sm:$0xff] }
 0x52f   :  { %20541 = vst [vmem:[#allocation73_spill] sm:$0xff] %v15800_v2  ;;  %v20547_v2 = vld [vmem:[#allocation159_spill] sm:$0xff] }
 0x530   :  { %v15818_v46 = vpop.f32.mrf.mxu0 }
 0x531   :  { %20549 = vst [vmem:[#allocation196_spill] sm:$0xff] %v15818_v46 }
 0x532   :  { %v15836_v46 = vpop.f32.mrf.mxu0 }
 0x533   :  { %20550 = vst [vmem:[#allocation177_spill] sm:$0xff] %v15836_v46 }
 0x534   :  { %v15854_v46 = vpop.f32.mrf.mxu0 }
 0x535   :  { %20551 = vst [vmem:[#allocation200_spill] sm:$0xff] %v15854_v46  ;;  %v6710_v46 = vsub.f32 %v15400_v18, %v15720_v39  ;;  %v6716_v18 = vsub.f32 %v15480_v43, %v15720_v39  ;;  %v20559_v43 = vld [vmem:[#allocation163_spill] sm:$0xff] }
 0x536   :  { %v15870_v3 = vpop.f32.mrf.mxu0  ;;  %v6722_v53 = vsub.f32 %v20559_v43, %v15720_v39 }
 0x537   :  { %20553 = vst [vmem:[#allocation19_spill] sm:$0xff] %v15870_v3  ;;  %v6718_v3 = vsub.f32 %v20556_v29, %v15720_v39  ;;  %v15905_v29 = vadd.f32 %v15718_v17, %v8250_v12  ;;  %v20564_v12 = vsub.f32 %v20529_v6, %v15720_v39  ;;  %v20568_v6 = vsub.f32 %v14994_v62, %v15720_v39 }
 0x538   :  { %v15888_v32 = vpop.f32.mrf.mxu0  ;;  %v20573_v62 = vsub.f32 %v15014_v15, %v15720_v39  ;;  %v20578_v15 = vsub.f32 %v15044_v22, %v15720_v39 }
 0x539   :  { %20557 = vst [vmem:[#allocation20_spill] sm:$0xff] %v15888_v32  ;;  %v20560_v32 = vsub.f32 %v15658_v57, %v15720_v39 }
 0x53a   :  { %v15929_v57 = vpop.f32.mrf.mxu0 }
 0x53b   :  { %v15890_v10 = vpop.eup %10650  ;;  %20565 = vst [vmem:[#allocation202_spill] sm:$0xff] %v15929_v57  ;;  %v20590_v57 = vld [vmem:[#allocation147_spill] sm:$0xff] }
 0x53c   :  { %v6799_v47 = vmul.f32 %v15890_v10, %v20560_v32  ;;  %v15915_v14 = vmul.f32 %v15890_v10, %v20561_v23  ;;  %v15921_v56 = vmul.f32 %v15890_v10, %v20562_v61  ;;  %v15927_v60 = vmul.f32 %v15890_v10, %v20564_v12 }
 0x53d   :  { %v20566_v32 = vsub.f32 %v14925_v63, %v15720_v39  ;;  %v15941_v35 = vmul.f32 %v15890_v10, %v20567_v8  ;;  %v15947_v43 = vmul.f32 %v15890_v10, %v20568_v6  ;;  %v20570_v61 = vsub.f32 %v20530_v33, %v15720_v39 }
 0x53e   :  { %20563 = vst [vmem:[#allocation77_spill] sm:$0xff] %v15921_v56  ;;  %v15956_v12 = vmul.f32 %v15895_v42, %v6799_v47  ;;  %v15968_v8 = vmul.f32 %v15890_v10, %v20573_v62  ;;  %v20574_v33 = vsub.f32 %v15035_v27, %v15720_v39  ;;  %v15976_v47 = vpop.f32.mrf.mxu0  ;;  %v20579_v27 = vsub.f32 %v15069_v49, %v15720_v39 }
 0x53f   :  { %v15935_v23 = vmul.f32 %v15890_v10, %v20566_v32  ;;  %20569 = vst [vmem:[#allocation74_spill] sm:$0xff] %v15947_v43  ;;  %v15953_v63 = vmul.f32 %v15890_v10, %v20570_v61  ;;  %v15962_v32 = vmul.f32 %v15890_v10, %v20572_v41  ;;  %20576 = vst [vmem:[#allocation208_spill] sm:$0xff] %v15976_v47  ;;  %v20597_v43 = vld [vmem:[#allocation152_spill] sm:$0xff] }
 0x540   :  { %20571 = vst [vmem:[#allocation204_spill] sm:$0xff] %v15956_v12  ;;  %v15974_v6 = vmul.f32 %v15890_v10, %v20574_v33  ;;  %v15982_v61 = vmul.f32 %v15890_v10, %v20577_v26  ;;  %v15988_v41 = vmul.f32 %v15890_v10, %v20578_v15  ;;  %v15994_v62 = vmul.f32 %v15890_v10, %v20579_v27  ;;  %v20582_v26 = vld [vmem:[#allocation144_spill] sm:$0xff]  ;;  %v20584_v15 = vld [vmem:[#allocation145_spill] sm:$0xff] }
 0x541   :  { %v20580_v33 = vsub.f32 %v15101_v30, %v15720_v39  ;;  %v20583_v17 = vsub.f32 %v20582_v26, %v15720_v39  ;;  %v20585_v47 = vsub.f32 %v20584_v15, %v15720_v39  ;;  %v20586_v27 = vsub.f32 %v20534_v59, %v15720_v39 }
 0x542   :  { %20575 = vst [vmem:[#allocation6_spill] sm:$0xff] %v15974_v6  ;;  %v20591_v15 = vsub.f32 %v20590_v57, %v15720_v39  ;;  %v20595_v6 = vld [vmem:[#allocation150_spill] sm:$0xff] }
 0x543   :  { %v16000_v0 = vmul.f32 %v15890_v10, %v20580_v33  ;;  %v16006_v22 = vmul.f32 %v15890_v10, %v20583_v17  ;;  %v16012_v49 = vmul.f32 %v15890_v10, %v20585_v47  ;;  %v16018_v30 = vmul.f32 %v15890_v10, %v20586_v27  ;;  %v20587_v33 = vld [vmem:[#allocation149_spill] sm:$0xff]  ;;  %v16026_v17 = vpop.f32.mrf.mxu0 }
 0x544   :  { %v20588_v12 = vsub.f32 %v20587_v33, %v15720_v39  ;;  %20589 = vst [vmem:[#allocation22_spill] sm:$0xff] %v16026_v17  ;;  %v16032_v47 = vmul.f32 %v15890_v10, %v20591_v15  ;;  %v20596_v33 = vsub.f32 %v20595_v6, %v15720_v39  ;;  %v20598_v17 = vsub.f32 %v20597_v43, %v15720_v39  ;;  %v20599_v15 = vld [vmem:[#allocation151_spill] sm:$0xff] }
 0x545   :  { %20581 = vst [vmem:[#allocation21_spill] sm:$0xff] %v16000_v0  ;;  %v20592_v0 = vld [vmem:[#allocation148_spill] sm:$0xff]  ;;  %v20600_v56 = vsub.f32 %v20599_v15, %v15720_v39 }
 0x546   :  { %v16024_v26 = vmul.f32 %v15890_v10, %v20588_v12  ;;  %v20593_v59 = vsub.f32 %v20592_v0, %v15720_v39  ;;  %v16044_v12 = vmul.f32 %v15890_v10, %v20596_v33  ;;  %v16050_v57 = vmul.f32 %v15890_v10, %v20598_v17 }
 0x547   :  { %v16056_v0 = vmul.f32 %v15890_v10, %v20600_v56  ;;  %v20603_v33 = vsub.f32 %v20543_v7, %v15720_v39  ;;  %v20605_v17 = vsub.f32 %v20544_v45, %v15720_v39  ;;  %v16076_v56 = vpop.f32.mrf.mxu0  ;;  %v20610_v7 = vsub.f32 %v20546_v50, %v15720_v39 }
 0x548   :  { %v16038_v27 = vmul.f32 %v15890_v10, %v20593_v59  ;;  %v20601_v59 = vld [vmem:[#allocation153_spill] sm:$0xff]  ;;  %20607 = vst [vmem:[#allocation212_spill] sm:$0xff] %v16076_v56  ;;  %v20612_v45 = vsub.f32 %v15279_v38, %v15720_v39  ;;  %v20614_v56 = vsub.f32 %v20547_v2, %v15720_v39 }
 0x549   :  { %v16068_v43 = vmul.f32 %v15890_v10, %v20603_v33  ;;  %v16074_v15 = vmul.f32 %v15890_v10, %v20605_v17  ;;  %v16088_v33 = vmul.f32 %v15890_v10, %v20610_v7  ;;  %v20618_v7 = vsub.f32 %v15313_v55, %v15720_v39 }
 0x54a   :  { %20594 = vst [vmem:[#allocation183_spill] sm:$0xff] %v16038_v27  ;;  %v20602_v27 = vsub.f32 %v20601_v59, %v15720_v39  ;;  %v20608_v59 = vsub.f32 %v20545_v4, %v15720_v39  ;;  %v16094_v17 = vmul.f32 %v15890_v10, %v20612_v45  ;;  %v16100_v4 = vmul.f32 %v15890_v10, %v20614_v56 }
 0x54b   :  { %20604 = vst [vmem:[#allocation210_spill] sm:$0xff] %v16068_v43  ;;  %20606 = vst [vmem:[#allocation83_spill] sm:$0xff] %v16074_v15  ;;  %v16112_v38 = vmul.f32 %v15890_v10, %v20618_v7  ;;  %v20620_v45 = vsub.f32 %v15337_v19, %v15720_v39  ;;  %v20622_v56 = vsub.f32 %v15354_v37, %v15720_v39 }
 0x54c   :  { %v16062_v6 = vmul.f32 %v15890_v10, %v20602_v27  ;;  %v16082_v27 = vmul.f32 %v15890_v10, %v20608_v59  ;;  %20611 = vst [vmem:[#allocation216_spill] sm:$0xff] %v16088_v33  ;;  %20613 = vst [vmem:[#allocation23_spill] sm:$0xff] %v16094_v17  ;;  %v20616_v59 = vsub.f32 %v20548_v44, %v15720_v39  ;;  %v20644_v17 = vld [vmem:[#allocation167_spill] sm:$0xff] }
 0x54d   :  { %20615 = vst [vmem:[#allocation24_spill] sm:$0xff] %v16100_v4  ;;  %20619 = vst [vmem:[#allocation218_spill] sm:$0xff] %v16112_v38  ;;  %v16118_v2 = vmul.f32 %v15890_v10, %v20620_v45  ;;  %v16124_v44 = vmul.f32 %v15890_v10, %v20622_v56  ;;  %v20625_v55 = vsub.f32 %v15349_v28, %v15720_v39  ;;  %v20642_v4 = vld [vmem:[#allocation166_spill] sm:$0xff]  ;;  %v20646_v33 = vld [vmem:[#allocation11_spill] sm:$0xff] }
 0x54e   :  { %20609 = vst [vmem:[#allocation187_spill] sm:$0xff] %v16082_v27  ;;  %v16106_v50 = vmul.f32 %v15890_v10, %v20616_v59  ;;  %v16126_v59 = vpop.f32.mrf.mxu0  ;;  %v6773_v38 = vmul.f32 %v15890_v10, %v6707_v16  ;;  %v6774_v19 = vmul.f32 %v15890_v10, %v6708_v13  ;;  %v6775_v45 = vmul.f32 %v15890_v10, %v6709_v52  ;;  %v20648_v27 = vld [vmem:[#allocation186_spill] sm:$0xff] }
 0x54f   :  { %20621 = vst [vmem:[#allocation220_spill] sm:$0xff] %v16118_v2  ;;  %20623 = vst [vmem:[#allocation86_spill] sm:$0xff] %v16124_v44  ;;  %v6772_v7 = vmul.f32 %v15890_v10, %v20625_v55  ;;  %v6776_v2 = vmul.f32 %v15890_v10, %v6710_v46  ;;  %v6777_v37 = vmul.f32 %v15890_v10, %v6711_v51 }
 0x550   :  { %20617 = vst [vmem:[#allocation87_spill] sm:$0xff] %v16106_v50  ;;  %20624 = vst [vmem:[#allocation224_spill] sm:$0xff] %v16126_v59  ;;  %v6778_v56 = vmul.f32 %v15890_v10, %v6712_v48  ;;  %v6779_v44 = vmul.f32 %v15890_v10, %v6713_v54  ;;  %v16139_v59 = vpop.f32.mrf.mxu0  ;;  %v6780_v28 = vmul.f32 %v15890_v10, %v6714_v9  ;;  %v20640_v50 = vld [vmem:[#allocation10_spill] sm:$0xff] }
 0x551   :  { %20626 = vst [vmem:[#allocation25_spill] sm:$0xff] %v16139_v59  ;;  %v6781_v55 = vmul.f32 %v15890_v10, %v6715_v24  ;;  %v6782_v16 = vmul.f32 %v15890_v10, %v6716_v18  ;;  %v6783_v13 = vmul.f32 %v15890_v10, %v6717_v1  ;;  %v6784_v52 = vmul.f32 %v15890_v10, %v6718_v3 }
 0x552   :  { %v6785_v46 = vmul.f32 %v15890_v10, %v6719_v21  ;;  %v20627_v51 = vsub.f32 %v15523_v5, %v15720_v39  ;;  %v20628_v54 = vsub.f32 %v15547_v20, %v15720_v39  ;;  %v6788_v24 = vmul.f32 %v15890_v10, %v6722_v53  ;;  %v16168_v20 = vpop.f32.mrf.mxu0 }
 0x553   :  { %v20629_v18 = vsub.f32 %v15544_v34, %v15720_v39  ;;  %v20630_v3 = vsub.f32 %v15561_v36, %v15720_v39  ;;  %v20631_v5 = vsub.f32 %v15588_v11, %v15720_v39  ;;  %20632 = vst [vmem:[#allocation26_spill] sm:$0xff] %v16168_v20  ;;  %v20633_v53 = vsub.f32 %v15569_v31, %v15720_v39  ;;  %v20636_v11 = vld [vmem:[#allocation9_spill] sm:$0xff] }
 0x554   :  { %v6786_v48 = vmul.f32 %v15890_v10, %v20627_v51  ;;  %v6787_v9 = vmul.f32 %v15890_v10, %v20628_v54  ;;  %v20634_v34 = vsub.f32 %v15585_v58, %v15720_v39  ;;  %v20635_v36 = vsub.f32 %v15605_v40, %v15720_v39  ;;  %v20638_v20 = vld [vmem:[#allocation165_spill] sm:$0xff]  ;;  %v16222_v43 = vpop.f32.mrf.mxu0 }
 0x555   :  { %v6789_v1 = vmul.f32 %v15890_v10, %v20629_v18  ;;  %v6790_v21 = vmul.f32 %v15890_v10, %v20630_v3  ;;  %v6791_v51 = vmul.f32 %v15890_v10, %v20631_v5  ;;  %v6792_v54 = vmul.f32 %v15890_v10, %v20633_v53  ;;  %20654 = vst [vmem:[#allocation228_spill] sm:$0xff] %v16222_v43 }
 0x556   :  { %v6793_v18 = vmul.f32 %v15890_v10, %v20634_v34  ;;  %v6794_v3 = vmul.f32 %v15890_v10, %v20635_v36  ;;  %v20637_v5 = vsub.f32 %v20636_v11, %v15720_v39  ;;  %v20639_v31 = vsub.f32 %v20638_v20, %v15720_v39 }
 0x557   :  { %v20641_v58 = vsub.f32 %v20640_v50, %v15720_v39  ;;  %v20643_v40 = vsub.f32 %v20642_v4, %v15720_v39  ;;  %v20645_v11 = vsub.f32 %v20644_v17, %v15720_v39  ;;  %v20647_v20 = vsub.f32 %v20646_v33, %v15720_v39  ;;  %v20651_v4 = vld [vmem:[#allocation17_spill] sm:$0xff]  ;;  %v20653_v17 = vld [vmem:[#allocation18_spill] sm:$0xff] }
 0x558   :  { %v6795_v59 = vmul.f32 %v15890_v10, %v20637_v5  ;;  %v6796_v53 = vmul.f32 %v15890_v10, %v20639_v31  ;;  %v16208_v50 = vmul.f32 %v20648_v27, %v20648_v27  ;;  %v16242_v27 = vmul.f32 %v15895_v42, %v15915_v14 }
 0x559   :  { %v6797_v34 = vmul.f32 %v15890_v10, %v20641_v58  ;;  %v6798_v36 = vmul.f32 %v15890_v10, %v20643_v40  ;;  %v6800_v5 = vmul.f32 %v15890_v10, %v20645_v11  ;;  %v6801_v31 = vmul.f32 %v15890_v10, %v20647_v20  ;;  %v20650_v58 = vld [vmem:[#allocation188_spill] sm:$0xff]  ;;  %v20656_v20 = vld [vmem:[#allocation73_spill] sm:$0xff] }
 0x55a   :  { %20649 = vst [vmem:[#allocation193_spill] sm:$0xff] %v16208_v50  ;;  %v16212_v15 = vmul.f32 %v20650_v58, %v20650_v58  ;;  %v16216_v40 = vmul.f32 %v20651_v4, %v20651_v4  ;;  %v16220_v11 = vmul.f32 %v20653_v17, %v20653_v17  ;;  %v16226_v39 = vadd.f32 %v15905_v29, %v20650_v58  ;;  %v20655_v10 = vld [vmem:[#allocation192_spill] sm:$0xff]  ;;  %v20658_v4 = vld [vmem:[#allocation177_spill] sm:$0xff] }
 0x55b   :  { %v16230_v33 = vadd.f32 %v15902_v25, %v20655_v10  ;;  %v16234_v50 = vmul.f32 %v20656_v20, %v20656_v20  ;;  %v6811_v29 = vmul.f32 %v15895_v42, %v15927_v60  ;;  %v16248_v58 = vmul.f32 %v15895_v42, %v15935_v23 }
 0x55c   :  { %20652 = vst [vmem:[#allocation226_spill] sm:$0xff] %v16216_v40  ;;  %v16238_v40 = vmul.f32 %v20658_v4, %v20658_v4  ;;  %v16252_v25 = vmul.f32 %v15895_v42, %v15941_v35  ;;  %v6815_v10 = vmul.f32 %v15895_v42, %v15953_v63  ;;  %v6816_v43 = vmul.f32 %v15895_v42, %v15962_v32 }
 0x55d   :  { %20657 = vst [vmem:[#allocation232_spill] sm:$0xff] %v16234_v50  ;;  %v16260_v14 = vmul.f32 %v15895_v42, %v15968_v8  ;;  %v6819_v60 = vmul.f32 %v15895_v42, %v15982_v61  ;;  %v16266_v23 = vmul.f32 %v15895_v42, %v15988_v41  ;;  %v16270_v35 = vmul.f32 %v15895_v42, %v15994_v62  ;;  %v16280_v8 = vpop.f32.mrf.mxu0 }
 0x55e   :  { %20659 = vst [vmem:[#allocation27_spill] sm:$0xff] %v16238_v40  ;;  %v16274_v63 = vmul.f32 %v15895_v42, %v16006_v22  ;;  %v16278_v32 = vmul.f32 %v15895_v42, %v16012_v49  ;;  %20660 = vst [vmem:[#allocation28_spill] sm:$0xff] %v16280_v8  ;;  %v16284_v61 = vmul.f32 %v15895_v42, %v16018_v30  ;;  %v20661_v22 = vld [vmem:[#allocation183_spill] sm:$0xff] }
 0x55f   :  { %v16288_v41 = vmul.f32 %v15895_v42, %v16024_v26  ;;  %v16292_v62 = vmul.f32 %v15895_v42, %v16032_v47  ;;  %v16296_v40 = vmul.f32 %v15895_v42, %v20661_v22  ;;  %v16300_v49 = vmul.f32 %v15895_v42, %v16044_v12  ;;  %v16327_v20 = vpop.f32.mrf.mxu0 }
 0x560   :  { %v16304_v30 = vmul.f32 %v15895_v42, %v16050_v57  ;;  %v16308_v26 = vmul.f32 %v15895_v42, %v16056_v0  ;;  %v6843_v8 = vmul.f32 %v15895_v42, %v6772_v7  ;;  %v6844_v47 = vmul.f32 %v15895_v42, %v6773_v38  ;;  %20663 = vst [vmem:[#allocation235_spill] sm:$0xff] %v16327_v20 }
 0x561   :  { %v16313_v4 = vmul.f32 %v15895_v42, %v6774_v19  ;;  %v16316_v22 = vmul.f32 %v15895_v42, %v6775_v45  ;;  %v6847_v12 = vmul.f32 %v15895_v42, %v6776_v2  ;;  %v6848_v50 = vmul.f32 %v15895_v42, %v6777_v37  ;;  %v16361_v20 = vpop.f32.mrf.mxu0 }
 0x562   :  { %v16321_v57 = vmul.f32 %v15895_v42, %v6778_v56  ;;  %v16324_v0 = vmul.f32 %v15895_v42, %v6779_v44  ;;  %v6851_v7 = vmul.f32 %v15895_v42, %v6780_v28  ;;  %v6852_v38 = vmul.f32 %v15895_v42, %v6781_v55  ;;  %20672 = vst [vmem:[#allocation164_spill] sm:$0xff] %v16361_v20  ;;  %v20675_v20 = vld [vmem:[#allocation83_spill] sm:$0xff] }
 0x563   :  { %v16331_v19 = vmul.f32 %v15895_v42, %v6782_v16  ;;  %v16334_v45 = vmul.f32 %v15895_v42, %v6783_v13  ;;  %v6855_v2 = vmul.f32 %v15895_v42, %v6784_v52  ;;  %v6856_v37 = vmul.f32 %v15895_v42, %v6785_v46 }
 0x564   :  { %20662 = vst [vmem:[#allocation234_spill] sm:$0xff] %v16324_v0  ;;  %v16339_v56 = vmul.f32 %v15895_v42, %v6786_v48  ;;  %v16342_v44 = vmul.f32 %v15895_v42, %v6787_v9  ;;  %v6859_v28 = vmul.f32 %v15895_v42, %v6788_v24  ;;  %v6860_v55 = vmul.f32 %v15895_v42, %v6789_v1  ;;  %v16366_v1 = vld [vmem:[%s19285_s6] ss:$0 sm:$0xff] }
 0x565   :  { %20664 = vst [vmem:[#allocation237_spill] sm:$0xff] %v16331_v19  ;;  %20665 = vst [vmem:[#allocation29_spill] sm:$0xff] %v16334_v45  ;;  %v16347_v16 = vmul.f32 %v15895_v42, %v6790_v21  ;;  %v16350_v13 = vmul.f32 %v15895_v42, %v6791_v51  ;;  %v6863_v52 = vmul.f32 %v15895_v42, %v6792_v54  ;;  %v20683_v45 = vld [vmem:[#allocation86_spill] sm:$0xff]  ;;  %v16409_v19 = vpop.f32.mrf.mxu0 }
 0x566   :  { %20666 = vst [vmem:[#allocation30_spill] sm:$0xff] %v16339_v56  ;;  %20667 = vst [vmem:[#allocation239_spill] sm:$0xff] %v16342_v44  ;;  %v6864_v46 = vmul.f32 %v15895_v42, %v6793_v18  ;;  %v16355_v48 = vmul.f32 %v15895_v42, %v6794_v3  ;;  %v16358_v9 = vmul.f32 %v15895_v42, %v6795_v59  ;;  %v20674_v3 = vld [vmem:[#allocation210_spill] sm:$0xff]  ;;  %v20682_v56 = vld [vmem:[#allocation220_spill] sm:$0xff] }
 0x567   :  { %20668 = vst [vmem:[#allocation240_spill] sm:$0xff] %v16347_v16  ;;  %20669 = vst [vmem:[#allocation31_spill] sm:$0xff] %v16350_v13  ;;  %v6867_v24 = vmul.f32 %v15895_v42, %v6796_v53  ;;  %v6868_v21 = vmul.f32 %v15895_v42, %v6797_v34  ;;  %v16370_v51 = vmul.f32 %v15895_v42, %v6798_v36  ;;  %v20677_v36 = vld [vmem:[#allocation216_spill] sm:$0xff]  ;;  %v20681_v44 = vld [vmem:[#allocation218_spill] sm:$0xff] }
 0x568   :  { %20670 = vst [vmem:[#allocation32_spill] sm:$0xff] %v16355_v48  ;;  %20671 = vst [vmem:[#allocation49_spill] sm:$0xff] %v16358_v9  ;;  %v6871_v54 = vmul.f32 %v15895_v42, %v6800_v5  ;;  %v6872_v18 = vmul.f32 %v15895_v42, %v6801_v31  ;;  %v6832_v59 = vmul.f32 %v15895_v42, %v16062_v6  ;;  %v20676_v48 = vld [vmem:[#allocation187_spill] sm:$0xff]  ;;  %v20679_v13 = vld [vmem:[#allocation24_spill] sm:$0xff] }
 0x569   :  { %20673 = vst [vmem:[#allocation243_spill] sm:$0xff] %v16370_v51  ;;  %v16378_v53 = vmul.f32 %v15895_v42, %v20674_v3  ;;  %v16382_v9 = vmul.f32 %v15895_v42, %v20675_v20  ;;  %v6835_v34 = vmul.f32 %v15895_v42, %v20676_v48  ;;  %v6836_v51 = vmul.f32 %v15895_v42, %v20677_v36  ;;  %v20678_v5 = vld [vmem:[#allocation23_spill] sm:$0xff] }
 0x56a   :  { %v16390_v31 = vmul.f32 %v15895_v42, %v20678_v5  ;;  %v16394_v6 = vmul.f32 %v15895_v42, %v20679_v13  ;;  %v20680_v3 = vld [vmem:[#allocation87_spill] sm:$0xff]  ;;  %v6840_v20 = vmul.f32 %v15895_v42, %v20681_v44  ;;  %v16402_v48 = vmul.f32 %v15895_v42, %v20682_v56  ;;  %20684 = vst [vmem:[#allocation51_spill] sm:$0xff] %v16409_v19 }
 0x56b   :  { %v6839_v16 = vmul.f32 %v15895_v42, %v20680_v3  ;;  %v16406_v36 = vmul.f32 %v15895_v42, %v20683_v45  ;;  %v6882_v5 = vadd.f32 %v16366_v1, %v6811_v29  ;;  %v6883_v13 = vadd.f32 %v16366_v1, %v16248_v58 }
 0x56c   :  { %v6886_v3 = vadd.f32 %v16366_v1, %v6815_v10  ;;  %v6887_v0 = vadd.f32 %v16366_v1, %v6816_v43  ;;  %v16416_v44 = vadd.f32 %v16366_v1, %v6819_v60  ;;  %v16419_v56 = vadd.f32 %v16366_v1, %v6843_v8 }
 0x56d   :  { %v16422_v45 = vadd.f32 %v16366_v1, %v6844_v47  ;;  %v16425_v29 = vadd.f32 %v16366_v1, %v6847_v12  ;;  %v16428_v19 = vadd.f32 %v16366_v1, %v6848_v50  ;;  %v16431_v58 = vadd.f32 %v16366_v1, %v6851_v7  ;;  %v16454_v7 = vpop.f32.mrf.mxu0 }
 0x56e   :  { %v16434_v43 = vadd.f32 %v16366_v1, %v6852_v38  ;;  %v16437_v10 = vadd.f32 %v16366_v1, %v6855_v2  ;;  %v16440_v60 = vadd.f32 %v16366_v1, %v6856_v37  ;;  %v16443_v8 = vadd.f32 %v16366_v1, %v6859_v28  ;;  %20687 = vst [vmem:[#allocation174_spill] sm:$0xff] %v16454_v7 }
 0x56f   :  { %v16446_v47 = vadd.f32 %v16366_v1, %v6860_v55  ;;  %v16449_v50 = vadd.f32 %v16366_v1, %v6863_v52  ;;  %v16452_v12 = vadd.f32 %v16366_v1, %v6864_v46  ;;  %v16457_v38 = vadd.f32 %v16366_v1, %v6867_v24  ;;  %v16497_v7 = vpop.f32.mrf.mxu0 }
 0x570   :  { %v16460_v2 = vadd.f32 %v16366_v1, %v6868_v21  ;;  %v16463_v37 = vadd.f32 %v16366_v1, %v6871_v54  ;;  %v16466_v28 = vadd.f32 %v16366_v1, %v6872_v18  ;;  %v6891_v55 = vadd.f32 %v16366_v1, %v16266_v23  ;;  %20692 = vst [vmem:[#allocation190_spill] sm:$0xff] %v16497_v7 }
 0x571   :  { %20685 = vst [vmem:[#allocation168_spill] sm:$0xff] %v16449_v50  ;;  %20686 = vst [vmem:[#allocation57_spill] sm:$0xff] %v16452_v12  ;;  %v6894_v52 = vadd.f32 %v16366_v1, %v16274_v63  ;;  %v6895_v46 = vadd.f32 %v16366_v1, %v16278_v32  ;;  %v6898_v24 = vadd.f32 %v16366_v1, %v16292_v62 }
 0x572   :  { %20688 = vst [vmem:[#allocation56_spill] sm:$0xff] %v16457_v38  ;;  %20689 = vst [vmem:[#allocation182_spill] sm:$0xff] %v16460_v2  ;;  %v6899_v21 = vadd.f32 %v16366_v1, %v16296_v40  ;;  %v16480_v54 = vadd.f32 %v16366_v1, %v16308_v26  ;;  %v16483_v18 = vadd.f32 %v16366_v1, %v6832_v59  ;;  %v6946_v40 = vmax.f32 %v6882_v5, 0.0 }
 0x573   :  { %20690 = vst [vmem:[#allocation242_spill] sm:$0xff] %v16463_v37  ;;  %20691 = vst [vmem:[#allocation63_spill] sm:$0xff] %v16466_v28  ;;  %v16486_v23 = vadd.f32 %v16366_v1, %v6835_v34  ;;  %v16489_v63 = vadd.f32 %v16366_v1, %v6836_v51  ;;  %v16492_v32 = vadd.f32 %v16366_v1, %v6839_v16  ;;  %v6947_v26 = vmax.f32 %v6883_v13, 0.0 }
 0x574   :  { %v16495_v62 = vadd.f32 %v16366_v1, %v6840_v20  ;;  %v6950_v28 = vmax.f32 %v6886_v3, 0.0  ;;  %v6951_v37 = vmax.f32 %v6887_v0, 0.0  ;;  %v6954_v59 = vmax.f32 %v16416_v44, 0.0  ;;  %v16507_v3 = vpop.f32.mrf.mxu0 }
 0x575   :  { %v6955_v2 = vmax.f32 %v6891_v55, 0.0  ;;  %v6958_v34 = vmax.f32 %v6894_v52, 0.0  ;;  %v6959_v38 = vmax.f32 %v6895_v46, 0.0  ;;  %v6962_v12 = vmax.f32 %v6898_v24, 0.0  ;;  %20693 = vst [vmem:[#allocation70_spill] sm:$0xff] %v16507_v3  ;;  %v20694_v24 = vld [vmem:[#allocation77_spill] sm:$0xff] }
 0x576   :  { %v6963_v51 = vmax.f32 %v6899_v21, 0.0  ;;  %v6966_v50 = vmax.f32 %v16480_v54, 0.0  ;;  %v6967_v16 = vmax.f32 %v16483_v18, 0.0  ;;  %v6970_v20 = vmax.f32 %v16486_v23, 0.0  ;;  %v20695_v23 = vld [vmem:[#allocation74_spill] sm:$0xff] }
 0x577   :  { %v6971_v5 = vmax.f32 %v16489_v63, 0.0  ;;  %v6974_v7 = vmax.f32 %v16492_v32, 0.0  ;;  %v6975_v13 = vmax.f32 %v16495_v62, 0.0  ;;  %v6810_v21 = vmul.f32 %v15895_v42, %v20694_v24  ;;  %v20696_v55 = vld [vmem:[#allocation6_spill] sm:$0xff] }
 0x578   :  { %v6880_v54 = vadd.f32 %v16366_v1, %v16242_v27  ;;  %v7009_v18 = vpack.c.bf16 %v6947_v26, %v6946_v40  ;;  %v6814_v63 = vmul.f32 %v15895_v42, %v20695_v23  ;;  %v6884_v32 = vadd.f32 %v16366_v1, %v16252_v25  ;;  %v16531_v26 = vpop.f32.mrf.mxu0 }
 0x579   :  { %v16521_v62 = vpack.c.bf16 %v6951_v37, %v6950_v28  ;;  %v6818_v52 = vmul.f32 %v15895_v42, %v20696_v55  ;;  %v6888_v46 = vadd.f32 %v16366_v1, %v16260_v14  ;;  %v6881_v24 = vadd.f32 %v16366_v1, %v6810_v21  ;;  %v20697_v28 = vld [vmem:[#allocation21_spill] sm:$0xff] }
 0x57a   :  { %v6944_v44 = vmax.f32 %v6880_v54, 0.0  ;;  %v6885_v27 = vadd.f32 %v16366_v1, %v6814_v63  ;;  %v16529_v40 = vpack.c.bf16 %v6955_v2, %v6954_v59  ;;  %v6948_v23 = vmax.f32 %v6884_v32, 0.0 }
 0x57b   :  { %v6889_v25 = vadd.f32 %v16366_v1, %v6818_v52  ;;  %v6952_v37 = vmax.f32 %v6888_v46, 0.0  ;;  %v6822_v0 = vmul.f32 %v15895_v42, %v20697_v28  ;;  %v6945_v55 = vmax.f32 %v6881_v24, 0.0  ;;  %v16547_v24 = vpop.f32.mrf.mxu0 }
 0x57c   :  { %v6949_v3 = vmax.f32 %v6885_v27, 0.0  ;;  %v6892_v14 = vadd.f32 %v16366_v1, %v16270_v35  ;;  %v16538_v21 = vpack.c.bf16 %v6959_v38, %v6958_v34  ;;  %v6896_v59 = vadd.f32 %v16366_v1, %v16284_v61 }
 0x57d   :  { %v6953_v54 = vmax.f32 %v6889_v25, 0.0  ;;  %v6893_v2 = vadd.f32 %v16366_v1, %v6822_v0  ;;  %v6897_v52 = vadd.f32 %v16366_v1, %v16288_v41  ;;  %v7008_v46 = vpack.c.bf16 %v6945_v55, %v6944_v44 }
 0x57e   :  { %v7010_v63 = vpack.c.bf16 %v6949_v3, %v6948_v23  ;;  %v6956_v32 = vmax.f32 %v6892_v14, 0.0  ;;  %v16545_v42 = vpack.c.bf16 %v6963_v51, %v6962_v12  ;;  %v6960_v38 = vmax.f32 %v6896_v59, 0.0 }
 0x57f   :  { %v7012_v27 = vpack.c.bf16 %v6953_v54, %v6952_v37  ;;  %v6957_v35 = vmax.f32 %v6893_v2, 0.0  ;;  %v6961_v34 = vmax.f32 %v6897_v52, 0.0  ;;  %10480 = vmatprep.mubr.msk.bf16.mxu1 %vm560_vm1, %v7008_v46  ;;  %v6900_v0 = vadd.f32 %v16366_v1, %v16300_v49 }
 0x580   :  { %v6901_v61 = vadd.f32 %v16366_v1, %v16304_v30  ;;  %v16554_v41 = vpack.c.bf16 %v6967_v16, %v6966_v50  ;;  %v6904_v12 = vadd.f32 %v16366_v1, %v16378_v53  ;;  %10481 = vmatmul.mubr.msk.bf16.vlgmr.msra.gmra.mxu1 %vm560_vm1, %v7009_v18  ;;  %v6905_v44 = vadd.f32 %v16366_v1, %v16382_v9  ;;  %v16570_v53 = vpop.f32.mrf.mxu0 }
 0x581   :  { %v16559_v51 = vpack.c.bf16 %v6957_v35, %v6956_v32  ;;  %v16561_v3 = vpack.c.bf16 %v6961_v34, %v6960_v38  ;;  %v16565_v23 = vpack.c.bf16 %v6971_v5, %v6970_v20  ;;  %10484 = vmatprep.mubr.msk.bf16.mxu1 %vm560_vm1, %v7010_v63  ;;  %v6964_v49 = vmax.f32 %v6900_v0, 0.0 }
 0x582   :  { %v6965_v30 = vmax.f32 %v6901_v61, 0.0  ;;  %v6968_v50 = vmax.f32 %v6904_v12, 0.0  ;;  %v6908_v16 = vadd.f32 %v16366_v1, %v16390_v31  ;;  %v6969_v18 = vmax.f32 %v6905_v44, 0.0  ;;  %v20705_v61 = vld [vmem:[#allocation226_spill] sm:$0xff] }
 0x583   :  { %v6909_v25 = vadd.f32 %v16366_v1, %v16394_v6  ;;  %v8386_v37 = vadd.f32 %v16230_v33, %v16212_v15  ;;  %v16576_v9 = vpack.c.bf16 %v6975_v13, %v6974_v7  ;;  %v8253_v28 = vadd.f32 %v16226_v39, %v20653_v17  ;;  %v20698_v15 = vld [vmem:[#allocation186_spill] sm:$0xff] }
 0x584   :  { %v16578_v20 = vpack.c.bf16 %v6965_v30, %v6964_v49  ;;  %v6972_v5 = vmax.f32 %v6908_v16, 0.0  ;;  %v6912_v31 = vadd.f32 %v16366_v1, %v16402_v48  ;;  %v16584_v55 = vpack.c.bf16 %v6969_v18, %v6968_v50  ;;  %v16598_v48 = vpop.f32.mrf.mxu0  ;;  %v20707_v49 = vld [vmem:[#allocation73_spill] sm:$0xff]  ;;  %v20708_v50 = vld [vmem:[#allocation234_spill] sm:$0xff] }
 0x585   :  { %v6973_v14 = vmax.f32 %v6909_v25, 0.0  ;;  %v8387_v54 = vadd.f32 %v8386_v37, %v16220_v11  ;;  %v6913_v6 = vadd.f32 %v16366_v1, %v16406_v36  ;;  %v8254_v33 = vadd.f32 %v20698_v15, %v8253_v28  ;;  %v20701_v11 = vld [vmem:[#allocation193_spill] sm:$0xff]  ;;  %v20709_v25 = vld [vmem:[#allocation232_spill] sm:$0xff] }
 0x586   :  { %v6976_v7 = vmax.f32 %v6912_v31, 0.0  ;;  %v20699_v13 = vmax.f32 %v16419_v56, 0.0  ;;  %v20700_v2 = vmax.f32 %v16422_v45, 0.0  ;;  %v6916_v39 = vadd.f32 %v16366_v1, %v16313_v4  ;;  %v20702_v56 = vld [vmem:[#allocation17_spill] sm:$0xff]  ;;  %v16627_v16 = vpop.f32.mrf.mxu0 }
 0x587   :  { %v16600_v52 = vpack.c.bf16 %v6973_v14, %v6972_v5  ;;  %v8388_v46 = vadd.f32 %v8387_v54, %v20701_v11  ;;  %v6977_v63 = vmax.f32 %v6913_v6, 0.0  ;;  %v6917_v36 = vadd.f32 %v16366_v1, %v16316_v22  ;;  %v20711_v28 = vld [vmem:[#allocation177_spill] sm:$0xff] }
 0x588   :  { %v16594_v59 = vpack.c.bf16 %v20700_v2, %v20699_v13  ;;  %v6987_v32 = vmax.f32 %v16434_v43, 0.0  ;;  %v8255_v35 = vadd.f32 %v20702_v56, %v8254_v33  ;;  %v6980_v45 = vmax.f32 %v6916_v39, 0.0  ;;  %10485 = vmatmul.mubr.msk.bf16.gmra.mxu1 %vm560_vm1, %v16521_v62  ;;  %v20713_v33 = vld [vmem:[#allocation27_spill] sm:$0xff]  ;;  %v20715_v2 = vld [vmem:[#allocation237_spill] sm:$0xff] }
 0x589   :  { %v20703_v38 = vmax.f32 %v16425_v29, 0.0  ;;  %v20704_v34 = vmax.f32 %v16428_v19, 0.0  ;;  %v16615_v0 = vpack.c.bf16 %v6977_v63, %v6976_v7  ;;  %v8389_v12 = vadd.f32 %v8388_v46, %v20705_v61  ;;  %10488 = vmatprep.mubr.msk.bf16.mxu1 %vm560_vm1, %v7012_v27  ;;  %v20706_v29 = vld [vmem:[#allocation194_spill] sm:$0xff]  ;;  %v20714_v13 = vld [vmem:[#allocation19_spill] sm:$0xff]  ;;  %v20716_v11 = vld [vmem:[#allocation29_spill] sm:$0xff] }
 0x58a   :  { %v6981_v44 = vmax.f32 %v6917_v36, 0.0  ;;  %v6920_v22 = vadd.f32 %v16366_v1, %v16321_v57  ;;  %v6990_v43 = vmax.f32 %v16437_v10, 0.0  ;;  %v8329_v19 = vmul.f32 %v20706_v29, %v20706_v29  ;;  %v20710_v10 = vld [vmem:[#allocation196_spill] sm:$0xff] }
 0x58b   :  { %v16611_v4 = vpack.c.bf16 %v20704_v34, %v20703_v38  ;;  %v8256_v30 = vadd.f32 %v8255_v35, %v20707_v49  ;;  %v6921_v62 = vadd.f32 %v16366_v1, %v20708_v50  ;;  %v6991_v18 = vmax.f32 %v16440_v60, 0.0  ;;  %v20768_v49 = vld [vmem:[#allocation25_spill] sm:$0xff] }
 0x58c   :  { %v8390_v37 = vadd.f32 %v8389_v12, %v20709_v25  ;;  %v16631_v5 = vpack.c.bf16 %v6981_v44, %v6980_v45  ;;  %v6984_v57 = vmax.f32 %v6920_v22, 0.0  ;;  %v8330_v27 = vmul.f32 %v20710_v10, %v20710_v10  ;;  %v20717_v44 = vld [vmem:[#allocation30_spill] sm:$0xff] }
 0x58d   :  { %v8257_v31 = vadd.f32 %v8256_v30, %v20711_v28  ;;  %v6985_v14 = vmax.f32 %v6921_v62, 0.0  ;;  %v20712_v54 = vmax.f32 %v16431_v58, 0.0  ;;  %v8331_v60 = vmul.f32 %v20714_v13, %v20714_v13  ;;  %v20718_v30 = vld [vmem:[#allocation239_spill] sm:$0xff]  ;;  %v20720_v25 = vld [vmem:[#allocation202_spill] sm:$0xff]  ;;  %v20769_v28 = vld [vmem:[#allocation228_spill] sm:$0xff] }
 0x58e   :  { %v8391_v7 = vadd.f32 %v8390_v37, %v20713_v33  ;;  %v6924_v39 = vadd.f32 %v16366_v1, %v20715_v2  ;;  %v6925_v46 = vadd.f32 %v16366_v1, %v20716_v11  ;;  %v6994_v63 = vmax.f32 %v16443_v8, 0.0  ;;  %v20722_v33 = vld [vmem:[#allocation200_spill] sm:$0xff] }
 0x58f   :  { %v16638_v6 = vpack.c.bf16 %v6987_v32, %v20712_v54  ;;  %v6995_v36 = vmax.f32 %v16446_v47, 0.0  ;;  %v8258_v35 = vadd.f32 %v20706_v29, %v8257_v31  ;;  %v16650_v58 = vpack.c.bf16 %v6985_v14, %v6984_v57  ;;  %v16652_v32 = vpop.f32.mrf.mxu0  ;;  %v20719_v47 = vld [vmem:[#allocation168_spill] sm:$0xff] }
 0x590   :  { %v8392_v45 = vadd.f32 %v8391_v7, %v8329_v19  ;;  %v6988_v38 = vmax.f32 %v6924_v39, 0.0  ;;  %v6989_v34 = vmax.f32 %v6925_v46, 0.0  ;;  %v16654_v61 = vpack.c.bf16 %v6991_v18, %v6990_v43  ;;  %10489 = vmatmul.mubr.msk.bf16.gmra.mxu1 %vm560_vm1, %v16529_v40  ;;  %v20721_v43 = vld [vmem:[#allocation57_spill] sm:$0xff]  ;;  %v20723_v2 = vld [vmem:[#allocation240_spill] sm:$0xff] }
 0x591   :  { %v8259_v12 = vadd.f32 %v20710_v10, %v8258_v35  ;;  %v6928_v22 = vadd.f32 %v16366_v1, %v20717_v44  ;;  %v6929_v8 = vadd.f32 %v16366_v1, %v20718_v30  ;;  %v6998_v50 = vmax.f32 %v20719_v47, 0.0  ;;  %10492 = vmatprep.mubr.msk.bf16.mxu1 %vm560_vm1, %v16559_v51  ;;  %v16672_v54 = vpop.f32.mrf.mxu0  ;;  %v20724_v11 = vld [vmem:[#allocation20_spill] sm:$0xff]  ;;  %v20727_v44 = vld [vmem:[#allocation182_spill] sm:$0xff] }
 0x592   :  { %v8393_v62 = vadd.f32 %v8392_v45, %v8330_v27  ;;  %v8332_v19 = vmul.f32 %v20720_v25, %v20720_v25  ;;  %v16666_v37 = vpack.c.bf16 %v6989_v34, %v6988_v38  ;;  %v6999_v18 = vmax.f32 %v20721_v43, 0.0  ;;  %v20725_v45 = vld [vmem:[#allocation31_spill] sm:$0xff]  ;;  %v20726_v34 = vld [vmem:[#allocation56_spill] sm:$0xff] }
 0x593   :  { %v8260_v57 = vadd.f32 %v8259_v12, %v20714_v13  ;;  %v6992_v31 = vmax.f32 %v6928_v22, 0.0  ;;  %v6993_v14 = vmax.f32 %v6929_v8, 0.0  ;;  %v8333_v40 = vmul.f32 %v20722_v33, %v20722_v33  ;;  %v16693_v43 = vpop.f32.mrf.mxu0 }
 0x594   :  { %v8394_v27 = vadd.f32 %v8393_v62, %v8331_v60  ;;  %v16676_v7 = vpack.c.bf16 %v6995_v36, %v6994_v63  ;;  %v6932_v39 = vadd.f32 %v16366_v1, %v20723_v2  ;;  %v8334_v46 = vmul.f32 %v20724_v11, %v20724_v11  ;;  %v20728_v36 = vld [vmem:[#allocation242_spill] sm:$0xff]  ;;  %v20730_v2 = vld [vmem:[#allocation32_spill] sm:$0xff] }
 0x595   :  { %v8261_v51 = vadd.f32 %v8260_v57, %v20720_v25  ;;  %v16683_v35 = vpack.c.bf16 %v6993_v14, %v6992_v31  ;;  %v6933_v38 = vadd.f32 %v16366_v1, %v20725_v45  ;;  %v7002_v12 = vmax.f32 %v20726_v34, 0.0  ;;  %v20729_v31 = vld [vmem:[#allocation22_spill] sm:$0xff]  ;;  %v20731_v34 = vld [vmem:[#allocation49_spill] sm:$0xff] }
 0x596   :  { %v7003_v22 = vmax.f32 %v20727_v44, 0.0  ;;  %v8395_v60 = vadd.f32 %v8394_v27, %v8332_v19  ;;  %v6996_v63 = vmax.f32 %v6932_v39, 0.0  ;;  %v7006_v30 = vmax.f32 %v20728_v36, 0.0  ;;  %v20732_v27 = vld [vmem:[#allocation63_spill] sm:$0xff] }
 0x597   :  { %v8262_v8 = vadd.f32 %v20722_v33, %v8261_v51  ;;  %v6997_v47 = vmax.f32 %v6933_v38, 0.0  ;;  %v16691_v62 = vpack.c.bf16 %v6999_v18, %v6998_v50  ;;  %v8335_v14 = vmul.f32 %v20729_v31, %v20729_v31  ;;  %v20733_v51 = vld [vmem:[#allocation224_spill] sm:$0xff] }
 0x598   :  { %v8396_v57 = vadd.f32 %v8395_v60, %v8333_v40  ;;  %v6936_v45 = vadd.f32 %v16366_v1, %v20730_v2  ;;  %v6937_v19 = vadd.f32 %v16366_v1, %v20731_v34  ;;  %v7007_v39 = vmax.f32 %v20732_v27, 0.0  ;;  %10493 = vmatmul.mubr.msk.bf16.gmra.mxu1 %vm560_vm1, %v16538_v21  ;;  %v20734_v34 = vld [vmem:[#allocation243_spill] sm:$0xff]  ;;  %v20735_v27 = vld [vmem:[#allocation204_spill] sm:$0xff] }
 0x599   :  { %v8263_v44 = vadd.f32 %v20724_v11, %v8262_v8  ;;  %v8336_v50 = vmul.f32 %v20733_v51, %v20733_v51  ;;  %v16705_v18 = vpack.c.bf16 %v6997_v47, %v6996_v63  ;;  %v16709_v36 = vpack.c.bf16 %v7003_v22, %v7002_v12  ;;  %10496 = vmatprep.mubr.msk.bf16.mxu1 %vm560_vm1, %v16561_v3  ;;  %v16718_v47 = vpop.f32.mrf.mxu0  ;;  %v20736_v11 = vld [vmem:[#allocation208_spill] sm:$0xff] }
 0x59a   :  { %v8397_v40 = vadd.f32 %v8396_v57, %v8334_v46  ;;  %v7000_v38 = vmax.f32 %v6936_v45, 0.0  ;;  %v7001_v60 = vmax.f32 %v6937_v19, 0.0  ;;  %v6940_v8 = vadd.f32 %v16366_v1, %v20734_v34  ;;  %v20737_v45 = vld [vmem:[#allocation212_spill] sm:$0xff] }
 0x59b   :  { %v8264_v2 = vadd.f32 %v8263_v44, %v20729_v31  ;;  %v6941_v63 = vadd.f32 %v16366_v1, %v20735_v27  ;;  %v8337_v21 = vmul.f32 %v20736_v11, %v20736_v11  ;;  %v8338_v19 = vmul.f32 %v20737_v45, %v20737_v45  ;;  %v16732_v31 = vpop.f32.mrf.mxu0 }
 0x59c   :  { %v8398_v46 = vadd.f32 %v8397_v40, %v8335_v14  ;;  %v16722_v57 = vpack.c.bf16 %v7001_v60, %v7000_v38  ;;  %v7004_v22 = vmax.f32 %v6940_v8, 0.0  ;;  %v16727_v34 = vpack.c.bf16 %v7007_v39, %v7006_v30  ;;  %v20738_v14 = vld [vmem:[#allocation26_spill] sm:$0xff]  ;;  %v20740_v8 = vld [vmem:[#allocation25_spill] sm:$0xff] }
 0x59d   :  { %v8265_v12 = vadd.f32 %v8264_v2, %v20733_v51  ;;  %v7005_v3 = vmax.f32 %v6941_v63, 0.0  ;;  %v8339_v40 = vmul.f32 %v20738_v14, %v20738_v14  ;;  %v20739_v2 = vld [vmem:[#allocation28_spill] sm:$0xff]  ;;  %v8341_v63 = vmul.f32 %v20740_v8, %v20740_v8 }
 0x59e   :  { %v8399_v44 = vadd.f32 %v8398_v46, %v8336_v50  ;;  %v8340_v30 = vmul.f32 %v20739_v2, %v20739_v2  ;;  %v16744_v50 = vpop.f32.mrf.mxu0 }
 0x59f   :  { %v8266_v1 = vadd.f32 %v20736_v11, %v8265_v12  ;;  %v16730_v27 = vpack.c.bf16 %v7005_v3, %v7004_v22  ;;  %v20741_v12 = vld [vmem:[#allocation228_spill] sm:$0xff] }
 0x5a0   :  { %v8400_v33 = vadd.f32 %v8399_v44, %v8337_v21  ;;  %10497 = vmatmul.mubr.msk.bf16.gmra.mxu1 %vm560_vm1, %v16545_v42  ;;  %v8342_v42 = vmul.f32 %v20741_v12, %v20741_v12  ;;  %v16752_v3 = vpop.f32.mrf.mxu0 }
 0x5a1   :  { %v8267_v38 = vadd.f32 %v20737_v45, %v8266_v1  ;;  %10500 = vmatprep.mubr.msk.bf16.mxu1 %vm560_vm1, %v16578_v20  ;;  %20742 = vst [vmem:[#allocation198_spill] sm:$0xff] %v16752_v3  ;;  %v20743_v20 = vld [vmem:[#allocation164_spill] sm:$0xff] }
 0x5a2   :  { %v8401_v60 = vadd.f32 %v8400_v33, %v8338_v19  ;;  %v8343_v44 = vmul.f32 %v20743_v20, %v20743_v20 }
 0x5a3   :  { %v8268_v39 = vadd.f32 %v8267_v38, %v20738_v14  ;;  %v20744_v38 = vld [vmem:[#allocation174_spill] sm:$0xff] }
 0x5a4   :  { %v8402_v21 = vadd.f32 %v8401_v60, %v8339_v40  ;;  %v8344_v60 = vmul.f32 %v20744_v38, %v20744_v38 }
 0x5a5   :  { %v8269_v46 = vadd.f32 %v8268_v39, %v20739_v2  ;;  %v16764_v39 = vpop.f32.mrf.mxu0 }
 0x5a6   :  { %v8403_v33 = vadd.f32 %v8402_v21, %v8340_v30 }
 0x5a7   :  { %v8270_v22 = vadd.f32 %v20740_v8, %v8269_v46 }
 0x5a8   :  { %v8404_v19 = vadd.f32 %v8403_v33, %v8341_v63  ;;  %10501 = vmatmul.mubr.msk.bf16.gmra.mxu1 %vm560_vm1, %v16554_v41  ;;  %v20745_v63 = vld [vmem:[#allocation235_spill] sm:$0xff] }
 0x5a9   :  { %v8271_v1 = vadd.f32 %v20741_v12, %v8270_v22  ;;  %10504 = vmatprep.mubr.msk.bf16.mxu1 %vm560_vm1, %v16584_v55  ;;  %v8345_v21 = vmul.f32 %v20745_v63, %v20745_v63  ;;  %v20746_v22 = vld [vmem:[#allocation51_spill] sm:$0xff]  ;;  %v16772_v12 = vpop.f32.mrf.mxu0  ;;  %v20747_v55 = vld [vmem:[#allocation70_spill] sm:$0xff] }
 0x5aa   :  { %v8405_v40 = vadd.f32 %v8404_v19, %v8342_v42  ;;  %v8346_v41 = vmul.f32 %v20746_v22, %v20746_v22 }
 0x5ab   :  { %v8272_v30 = vadd.f32 %v8271_v1, %v20743_v20  ;;  %v8347_v1 = vmul.f32 %v20747_v55, %v20747_v55 }
 0x5ac   :  { %v8406_v46 = vadd.f32 %v8405_v40, %v8343_v44  ;;  %v8348_v40 = vmul.f32 %v16547_v24, %v16547_v24 }
 0x5ad   :  { %v8273_v33 = vadd.f32 %v8272_v30, %v20744_v38  ;;  %v16784_v30 = vpop.f32.mrf.mxu0 }
 0x5ae   :  { %v8407_v42 = vadd.f32 %v8406_v46, %v8344_v60 }
 0x5af   :  { %v8274_v19 = vadd.f32 %v20745_v63, %v8273_v33 }
 0x5b0   :  { %v8408_v8 = vadd.f32 %v8407_v42, %v8345_v21  ;;  %10505 = vmatmul.mubr.msk.bf16.gmra.mxu1 %vm560_vm1, %v16565_v23  ;;  %v20748_v21 = vld [vmem:[#allocation190_spill] sm:$0xff]  ;;  %v8350_v23 = vmul.f32 %v16531_v26, %v16531_v26 }
 0x5b1   :  { %v8275_v20 = vadd.f32 %v20746_v22, %v8274_v19  ;;  %10508 = vmatprep.mubr.msk.bf16.mxu1 %vm560_vm1, %v16600_v52  ;;  %v8349_v46 = vmul.f32 %v20748_v21, %v20748_v21  ;;  %v16792_v19 = vpop.f32.mrf.mxu0  ;;  %v8351_v52 = vmul.f32 %v16598_v48, %v16598_v48 }
 0x5b2   :  { %v8409_v44 = vadd.f32 %v8408_v8, %v8346_v41 }
 0x5b3   :  { %v8276_v60 = vadd.f32 %v8275_v20, %v20747_v55 }
 0x5b4   :  { %v8410_v33 = vadd.f32 %v8409_v44, %v8347_v1  ;;  %v8352_v44 = vmul.f32 %v16652_v32, %v16652_v32 }
 0x5b5   :  { %v8277_v42 = vadd.f32 %v8276_v60, %v16547_v24  ;;  %v16804_v60 = vpop.f32.mrf.mxu0 }
 0x5b6   :  { %v8411_v8 = vadd.f32 %v8410_v33, %v8348_v40  ;;  %20749 = vst [vmem:[#allocation181_spill] sm:$0xff] %v16804_v60 }
 0x5b7   :  { %v8278_v41 = vadd.f32 %v20748_v21, %v8277_v42 }
 0x5b8   :  { %v8412_v22 = vadd.f32 %v8411_v8, %v8349_v46  ;;  %10509 = vmatmul.mubr.msk.bf16.gmra.mxu1 %vm560_vm1, %v16576_v9  ;;  %v8353_v46 = vmul.f32 %v16570_v53, %v16570_v53  ;;  %v8354_v9 = vmul.f32 %v16627_v16, %v16627_v16  ;;  %v16812_v8 = vpop.f32.mrf.mxu0 }
 0x5b9   :  { %v8279_v20 = vadd.f32 %v16531_v26, %v8278_v41  ;;  %10512 = vmatprep.mubr.msk.bf16.mxu1 %vm560_vm1, %v16615_v0  ;;  %v8355_v0 = vmul.f32 %v16693_v43, %v16693_v43 }
 0x5ba   :  { %v8413_v1 = vadd.f32 %v8412_v22, %v8350_v23 }
 0x5bb   :  { %v8280_v40 = vadd.f32 %v8279_v20, %v16598_v48 }
 0x5bc   :  { %v8414_v33 = vadd.f32 %v8413_v1, %v8351_v52  ;;  %v8356_v1 = vmul.f32 %v16732_v31, %v16732_v31 }
 0x5bd   :  { %v8281_v42 = vadd.f32 %v8280_v40, %v16652_v32  ;;  %v16824_v40 = vpop.f32.mrf.mxu0 }
 0x5be   :  { %v8415_v22 = vadd.f32 %v8414_v33, %v8352_v44 }
 0x5bf   :  { %v8282_v23 = vadd.f32 %v16570_v53, %v8281_v42 }
 0x5c0   :  { %v8416_v41 = vadd.f32 %v8415_v22, %v8353_v46  ;;  %10513 = vmatmul.mubr.msk.bf16.gmra.mxu1 %vm560_vm1, %v16594_v59  ;;  %v8357_v46 = vmul.f32 %v16672_v54, %v16672_v54  ;;  %v8358_v59 = vmul.f32 %v16718_v47, %v16718_v47 }
 0x5c1   :  { %v8283_v20 = vadd.f32 %v16627_v16, %v8282_v23  ;;  %10516 = vmatprep.mubr.msk.bf16.mxu1 %vm560_vm1, %v16631_v5  ;;  %v16832_v23 = vpop.f32.mrf.mxu0  ;;  %v8359_v5 = vmul.f32 %v16752_v3, %v16752_v3 }
 0x5c2   :  { %v8417_v52 = vadd.f32 %v8416_v41, %v8354_v9 }
 0x5c3   :  { %v8284_v44 = vadd.f32 %v8283_v20, %v16693_v43 }
 0x5c4   :  { %v8418_v33 = vadd.f32 %v8417_v52, %v8355_v0  ;;  %v8360_v52 = vmul.f32 %v16772_v12, %v16772_v12 }
 0x5c5   :  { %v8285_v42 = vadd.f32 %v8284_v44, %v16732_v31  ;;  %v16844_v44 = vpop.f32.mrf.mxu0 }
 0x5c6   :  { %v8419_v9 = vadd.f32 %v8418_v33, %v8356_v1 }
 0x5c7   :  { %v8286_v22 = vadd.f32 %v16672_v54, %v8285_v42 }
 0x5c8   :  { %v8420_v41 = vadd.f32 %v8419_v9, %v8357_v46  ;;  %10517 = vmatmul.mubr.msk.bf16.gmra.mxu1 %vm560_vm1, %v16611_v4  ;;  %v8361_v46 = vmul.f32 %v16744_v50, %v16744_v50  ;;  %v8362_v4 = vmul.f32 %v16764_v39, %v16764_v39 }
 0x5c9   :  { %v8287_v20 = vadd.f32 %v16718_v47, %v8286_v22  ;;  %10520 = vmatprep.mubr.msk.bf16.mxu1 %vm560_vm1, %v16650_v58  ;;  %v16852_v22 = vpop.f32.mrf.mxu0  ;;  %v8363_v58 = vmul.f32 %v16792_v19, %v16792_v19 }
 0x5ca   :  { %v8421_v0 = vadd.f32 %v8420_v41, %v8358_v59 }
 0x5cb   :  { %v8288_v1 = vadd.f32 %v8287_v20, %v16752_v3 }
 0x5cc   :  { %v8422_v33 = vadd.f32 %v8421_v0, %v8359_v5  ;;  %v8364_v0 = vmul.f32 %v16812_v8, %v16812_v8 }
 0x5cd   :  { %v8289_v42 = vadd.f32 %v8288_v1, %v16772_v12  ;;  %v16864_v1 = vpop.f32.mrf.mxu0 }
 0x5ce   :  { %v8423_v59 = vadd.f32 %v8422_v33, %v8360_v52 }
 0x5cf   :  { %v8290_v9 = vadd.f32 %v16744_v50, %v8289_v42 }
 0x5d0   :  { %v8424_v41 = vadd.f32 %v8423_v59, %v8361_v46  ;;  %10521 = vmatmul.mubr.msk.bf16.gmra.mxu1 %vm560_vm1, %v16638_v6  ;;  %v8365_v46 = vmul.f32 %v16784_v30, %v16784_v30  ;;  %v8366_v6 = vmul.f32 %v16804_v60, %v16804_v60 }
 0x5d1   :  { %v8291_v20 = vadd.f32 %v16764_v39, %v8290_v9  ;;  %10524 = vmatprep.mubr.msk.bf16.mxu1 %vm560_vm1, %v16666_v37  ;;  %v16872_v9 = vpop.f32.mrf.mxu0  ;;  %v8367_v37 = vmul.f32 %v16832_v23, %v16832_v23 }
 0x5d2   :  { %v8425_v5 = vadd.f32 %v8424_v41, %v8362_v4  ;;  %20750 = vst [vmem:[#allocation206_spill] sm:$0xff] %v16872_v9 }
 0x5d3   :  { %v8292_v52 = vadd.f32 %v8291_v20, %v16792_v19 }
 0x5d4   :  { %v8426_v33 = vadd.f32 %v8425_v5, %v8363_v58  ;;  %v8368_v5 = vmul.f32 %v16852_v22, %v16852_v22 }
 0x5d5   :  { %v8293_v42 = vadd.f32 %v8292_v52, %v16812_v8  ;;  %v16884_v52 = vpop.f32.mrf.mxu0 }
 0x5d6   :  { %v8427_v4 = vadd.f32 %v8426_v33, %v8364_v0 }
 0x5d7   :  { %v8294_v59 = vadd.f32 %v16784_v30, %v8293_v42 }
 0x5d8   :  { %v8428_v41 = vadd.f32 %v8427_v4, %v8365_v46  ;;  %10525 = vmatmul.mubr.msk.bf16.gmra.mxu1 %vm560_vm1, %v16654_v61  ;;  %v8369_v46 = vmul.f32 %v16824_v40, %v16824_v40  ;;  %v8370_v61 = vmul.f32 %v16844_v44, %v16844_v44 }
 0x5d9   :  { %v8295_v20 = vadd.f32 %v16804_v60, %v8294_v59  ;;  %10528 = vmatprep.mubr.msk.bf16.mxu1 %vm560_vm1, %v16683_v35  ;;  %v16892_v59 = vpop.f32.mrf.mxu0  ;;  %v8371_v35 = vmul.f32 %v16872_v9, %v16872_v9  ;;  %v20772_v14 = vld [vmem:[#allocation206_spill] sm:$0xff] }
 0x5da   :  { %v8429_v58 = vadd.f32 %v8428_v41, %v8366_v6  ;;  %20751 = vst [vmem:[#allocation80_spill] sm:$0xff] %v16892_v59 }
 0x5db   :  { %v8296_v0 = vadd.f32 %v8295_v20, %v16832_v23 }
 0x5dc   :  { %v8430_v33 = vadd.f32 %v8429_v58, %v8367_v37  ;;  %v8372_v58 = vmul.f32 %v16892_v59, %v16892_v59 }
 0x5dd   :  { %v8297_v42 = vadd.f32 %v8296_v0, %v16852_v22  ;;  %v8373_v0 = vmul.f32 %v16864_v1, %v16864_v1 }
 0x5de   :  { %v8431_v6 = vadd.f32 %v8430_v33, %v8368_v5 }
 0x5df   :  { %v8298_v4 = vadd.f32 %v16824_v40, %v8297_v42  ;;  %v8374_v42 = vmul.f32 %v16884_v52, %v16884_v52 }
 0x5e0   :  { %v8432_v41 = vadd.f32 %v8431_v6, %v8369_v46  ;;  %10529 = vmatmul.mubr.msk.bf16.gmra.mxu1 %vm560_vm1, %v16676_v7 }
 0x5e1   :  { %v8299_v20 = vadd.f32 %v16844_v44, %v8298_v4  ;;  %10532 = vmatprep.mubr.msk.bf16.mxu1 %vm560_vm1, %v16705_v18 }
 0x5e2   :  { %v8433_v37 = vadd.f32 %v8432_v41, %v8370_v61 }
 0x5e3   :  { %v8300_v5 = vadd.f32 %v8299_v20, %v16872_v9 }
 0x5e4   :  { %v8434_v46 = vadd.f32 %v8433_v37, %v8371_v35 }
 0x5e5   :  { %v8301_v33 = vadd.f32 %v8300_v5, %v16892_v59 }
 0x5e6   :  { %v8435_v6 = vadd.f32 %v8434_v46, %v8372_v58 }
 0x5e7   :  { %v8302_v7 = vadd.f32 %v16864_v1, %v8301_v33 }
 0x5e8   :  { %v8436_v61 = vadd.f32 %v8435_v6, %v8373_v0  ;;  %10533 = vmatmul.mubr.msk.bf16.gmra.mxu1 %vm560_vm1, %v16691_v62 }
 0x5e9   :  { %v8303_v4 = vadd.f32 %v16884_v52, %v8302_v7  ;;  %10536 = vmatprep.mubr.msk.bf16.mxu1 %vm560_vm1, %v16722_v57 }
 0x5ea   :  { %v8437_v18 = vadd.f32 %v8436_v61, %v8374_v42 }
 0x5eb   :  { %v8304_v41 = vrot.slane %v8303_v4, 4 }
 0x5ec   :  { %v8438_v35 = vrot.slane %v8437_v18, 4 }
 0x5ed   :  { %v8305_v20 = vadd.f32 %v8304_v41, %v8303_v4 }
 0x5ee   :  { %v8439_v37 = vadd.f32 %v8438_v35, %v8437_v18  ;;  %v20755_v35 = vld [vmem:[#allocation170_spill] sm:$0xff] }
 0x5ef   :  { %v8306_v5 = vrot.slane %v8305_v20, 2 }
 0x5f0   :  { %v8440_v59 = vrot.slane %v8439_v37, 2  ;;  %10537 = vmatmul.mubr.msk.bf16.gmra.mxu1 %vm560_vm1, %v16709_v36 }
 0x5f1   :  { %v8307_v9 = vadd.f32 %v8306_v5, %v8305_v20  ;;  %10540 = vmatprep.mubr.msk.bf16.mxu1 %vm560_vm1, %v16730_v27  ;;  %v20753_v27 = vld [vmem:[#allocation172_spill] sm:$0xff] }
 0x5f2   :  { %v8441_v58 = vadd.f32 %v8440_v59, %v8439_v37  ;;  %v20752_v59 = vld [vmem:[#allocation12_spill] sm:$0xff]  ;;  %v20756_v37 = vld [vmem:[#allocation13_spill] sm:$0xff] }
 0x5f3   :  { %v8308_v0 = vrot.slane %v8307_v9, 1  ;;  %v20762_v20 = vld [vmem:[#allocation180_spill] sm:$0xff] }
 0x5f4   :  { %v8442_v62 = vrot.slane %v8441_v58, 1  ;;  %v20770_v5 = vld [vmem:[#allocation164_spill] sm:$0xff] }
 0x5f5   :  { %v8309_v46 = vadd.f32 %v8308_v0, %v8307_v9  ;;  %v20754_v9 = vld [vmem:[#allocation169_spill] sm:$0xff]  ;;  %v20758_v0 = vld [vmem:[#allocation176_spill] sm:$0xff] }
 0x5f6   :  { %v8443_v33 = vadd.f32 %v8442_v62, %v8441_v58 }
 0x5f7   :  { %v16919_v42 = vmul.f32 0.001953125, %v8309_v46  ;;  %v20759_v46 = vld [vmem:[#allocation14_spill] sm:$0xff] }
 0x5f8   :  { %v8444_v57 = vmul.f32 0.001953125, %v8443_v33  ;;  %10541 = vmatmul.mubr.msk.bf16.gmra.mxu1 %vm560_vm1, %v16727_v34  ;;  %v20757_v34 = vld [vmem:[#allocation178_spill] sm:$0xff]  ;;  %v20771_v33 = vld [vmem:[#allocation51_spill] sm:$0xff] }
 0x5f9   :  { %v8445_v6 = vmul.f32 %v16919_v42, %v16919_v42  ;;  %v8453_v58 = vsub.f32 %v20757_v34, %v16919_v42  ;;  %v8454_v62 = vsub.f32 %v20758_v0, %v16919_v42  ;;  %v20764_v34 = vld [vmem:[#allocation188_spill] sm:$0xff]  ;;  %v20773_v0 = vsub.f32 %v20752_v59, %v16919_v42 }
 0x5fa   :  { %v20774_v4 = vsub.f32 %v20753_v27, %v16919_v42  ;;  %v20775_v41 = vsub.f32 %v20754_v9, %v16919_v42  ;;  %v20776_v18 = vsub.f32 %v20755_v35, %v16919_v42  ;;  %v20778_v35 = vsub.f32 %v20759_v46, %v16919_v42 }
 0x5fb   :  { %v8446_v7 = vsub.f32 %v8444_v57, %v8445_v6  ;;  %v20760_v57 = vld [vmem:[#allocation184_spill] sm:$0xff] }
 0x5fc   :  { %v20765_v6 = vld [vmem:[#allocation200_spill] sm:$0xff] }
 0x5fd   :  { %v8447_v61 = vmax.f32 %v8446_v7, 0.0  ;;  %v20761_v7 = vld [vmem:[#allocation16_spill] sm:$0xff] }
 0x5ff   :  { %v8512_v36 = vadd.f32 1e-05, %v8447_v61 }
 0x601   :  { %10652 = vrsqrt.f32 %v8512_v36  ;;  %v20763_v36 = vld [vmem:[#allocation15_spill] sm:$0xff] }
 0x60e   :  { %v17037_v3 = vpop.eup %10652 }
 0x60f   :  { %v17053_v60 = vmul.f32 %v17037_v3, %v20773_v0  ;;  %v17059_v61 = vmul.f32 %v17037_v3, %v20774_v4  ;;  %v17065_v51 = vmul.f32 %v17037_v3, %v20775_v41  ;;  %v17071_v59 = vmul.f32 %v17037_v3, %v20776_v18 }
 0x610   :  { %v20777_v0 = vsub.f32 %v20756_v37, %v16919_v42  ;;  %v17080_v4 = vmul.f32 %v17037_v3, %v8453_v58  ;;  %v17083_v9 = vmul.f32 %v17037_v3, %v8454_v62  ;;  %v8510_v41 = vsub.f32 %v16864_v1, %v16919_v42 }
 0x611   :  { %v17091_v18 = vmul.f32 %v17037_v3, %v20778_v35  ;;  %v20779_v37 = vsub.f32 %v20760_v57, %v16919_v42  ;;  %v20780_v58 = vsub.f32 %v20761_v7, %v16919_v42  ;;  %v20781_v1 = vsub.f32 %v20762_v20, %v16919_v42 }
 0x612   :  { %v17077_v27 = vmul.f32 %v17037_v3, %v20777_v0  ;;  %v20782_v35 = vsub.f32 %v20763_v36, %v16919_v42  ;;  %v20787_v36 = vsub.f32 %v20698_v15, %v16919_v42 }
 0x613   :  { %v17097_v0 = vmul.f32 %v17037_v3, %v20779_v37  ;;  %v17103_v62 = vmul.f32 %v17037_v3, %v20780_v58  ;;  %v17109_v46 = vmul.f32 %v17037_v3, %v20781_v1  ;;  %v20783_v37 = vsub.f32 %v20764_v34, %v16919_v42 }
 0x614   :  { %v17115_v57 = vmul.f32 %v17037_v3, %v20782_v35  ;;  %v20785_v58 = vsub.f32 %v20653_v17, %v16919_v42  ;;  %v8511_v1 = vsub.f32 %v16884_v52, %v16919_v42  ;;  %v17135_v35 = vmul.f32 %v17037_v3, %v20787_v36 }
 0x615   :  { %v17121_v7 = vmul.f32 %v17037_v3, %v20783_v37  ;;  %v20788_v34 = vsub.f32 %v20702_v56, %v16919_v42  ;;  %v20793_v36 = vsub.f32 %v20706_v29, %v16919_v42 }
 0x616   :  { %v17127_v20 = vmul.f32 %v17037_v3, %v20785_v58 }
 0x617   :  { %20784 = vst [vmem:[#allocation214_spill] sm:$0xff] %v17121_v7  ;;  %v17141_v37 = vmul.f32 %v17037_v3, %v20788_v34  ;;  %v20789_v7 = vld [vmem:[#allocation73_spill] sm:$0xff]  ;;  %v17159_v56 = vmul.f32 %v17037_v3, %v20793_v36  ;;  %v20794_v34 = vsub.f32 %v20710_v10, %v16919_v42  ;;  %v20800_v36 = vsub.f32 %v20765_v6, %v16919_v42 }
 0x618   :  { %20786 = vst [vmem:[#allocation89_spill] sm:$0xff] %v17127_v20  ;;  %v20790_v17 = vsub.f32 %v20789_v7, %v16919_v42  ;;  %v20791_v20 = vld [vmem:[#allocation177_spill] sm:$0xff] }
 0x619   :  { %v20792_v52 = vsub.f32 %v20791_v20, %v16919_v42  ;;  %v17165_v7 = vmul.f32 %v17037_v3, %v20794_v34  ;;  %v17183_v10 = vmul.f32 %v17037_v3, %v20800_v36  ;;  %v20801_v34 = vld [vmem:[#allocation20_spill] sm:$0xff]  ;;  %v20809_v36 = vsub.f32 %v20736_v11, %v16919_v42 }
 0x61a   :  { %v17147_v58 = vmul.f32 %v17037_v3, %v20790_v17  ;;  %v20796_v17 = vsub.f32 %v20714_v13, %v16919_v42 }
 0x61b   :  { %v17153_v15 = vmul.f32 %v17037_v3, %v20792_v52  ;;  %20795 = vst [vmem:[#allocation222_spill] sm:$0xff] %v17165_v7  ;;  %v20798_v52 = vsub.f32 %v20720_v25, %v16919_v42  ;;  %v20802_v7 = vsub.f32 %v20801_v34, %v16919_v42  ;;  %v17207_v34 = vmul.f32 %v17037_v3, %v20809_v36 }
 0x61c   :  { %v17171_v20 = vmul.f32 %v17037_v3, %v20796_v17  ;;  %v20803_v17 = vld [vmem:[#allocation22_spill] sm:$0xff]  ;;  %v20818_v36 = vsub.f32 %v20768_v49, %v16919_v42  ;;  %v20823_v49 = vsub.f32 %v20745_v63, %v16919_v42  ;;  %v20827_v63 = vsub.f32 %v20748_v21, %v16919_v42 }
 0x61d   :  { %v17177_v29 = vmul.f32 %v17037_v3, %v20798_v52  ;;  %v17189_v13 = vmul.f32 %v17037_v3, %v20802_v7  ;;  %v20806_v52 = vld [vmem:[#allocation224_spill] sm:$0xff]  ;;  %20810 = vst [vmem:[#allocation245_spill] sm:$0xff] %v17207_v34  ;;  %v20811_v7 = vsub.f32 %v20737_v45, %v16919_v42  ;;  %v20831_v21 = vsub.f32 %v16570_v53, %v16919_v42 }
 0x61e   :  { %20797 = vst [vmem:[#allocation244_spill] sm:$0xff] %v17171_v20  ;;  %v20804_v20 = vsub.f32 %v20803_v17, %v16919_v42  ;;  %v17231_v45 = vmul.f32 %v17037_v3, %v20818_v36  ;;  %v8548_v36 = vmul.f32 %v17037_v3, %v20823_v49  ;;  %v8552_v49 = vmul.f32 %v17037_v3, %v20827_v63 }
 0x61f   :  { %20799 = vst [vmem:[#allocation230_spill] sm:$0xff] %v17177_v29  ;;  %v20807_v29 = vsub.f32 %v20806_v52, %v16919_v42  ;;  %v17213_v17 = vmul.f32 %v17037_v3, %v20811_v7  ;;  %v20820_v7 = vsub.f32 %v20769_v28, %v16919_v42  ;;  %v20824_v28 = vsub.f32 %v20771_v33, %v16919_v42 }
 0x620   :  { %v17195_v25 = vmul.f32 %v17037_v3, %v20804_v20  ;;  %v20813_v20 = vld [vmem:[#allocation26_spill] sm:$0xff]  ;;  %20819 = vst [vmem:[#allocation249_spill] sm:$0xff] %v17231_v45  ;;  %v20828_v33 = vsub.f32 %v16531_v26, %v16919_v42  ;;  %v8556_v63 = vmul.f32 %v17037_v3, %v20831_v21  ;;  %v20832_v26 = vsub.f32 %v16627_v16, %v16919_v42 }
 0x621   :  { %v17201_v6 = vmul.f32 %v17037_v3, %v20807_v29  ;;  %20812 = vst [vmem:[#allocation246_spill] sm:$0xff] %v17213_v17  ;;  %v20816_v29 = vsub.f32 %v20739_v2, %v16919_v42  ;;  %v20822_v2 = vsub.f32 %v20744_v38, %v16919_v42  ;;  %v20826_v38 = vsub.f32 %v16547_v24, %v16919_v42  ;;  %v20837_v45 = vld [vmem:[#allocation198_spill] sm:$0xff] }
 0x622   :  { %20805 = vst [vmem:[#allocation236_spill] sm:$0xff] %v17195_v25  ;;  %v20814_v25 = vsub.f32 %v20813_v20, %v16919_v42  ;;  %v8545_v20 = vmul.f32 %v17037_v3, %v20820_v7  ;;  %v8549_v7 = vmul.f32 %v17037_v3, %v20824_v28  ;;  %v8553_v28 = vmul.f32 %v17037_v3, %v20828_v33 }
 0x623   :  { %20808 = vst [vmem:[#allocation241_spill] sm:$0xff] %v17201_v6  ;;  %v17225_v11 = vmul.f32 %v17037_v3, %v20816_v29  ;;  %v8547_v29 = vmul.f32 %v17037_v3, %v20822_v2  ;;  %v8551_v2 = vmul.f32 %v17037_v3, %v20826_v38  ;;  %v20830_v24 = vsub.f32 %v16652_v32, %v16919_v42 }
 0x624   :  { %v17219_v52 = vmul.f32 %v17037_v3, %v20814_v25  ;;  %v20821_v25 = vsub.f32 %v20770_v5, %v16919_v42  ;;  %v20825_v5 = vsub.f32 %v20747_v55, %v16919_v42  ;;  %v20829_v55 = vsub.f32 %v16598_v48, %v16919_v42 }
 0x625   :  { %20817 = vst [vmem:[#allocation248_spill] sm:$0xff] %v17225_v11  ;;  %v8555_v38 = vmul.f32 %v17037_v3, %v20830_v24  ;;  %v8557_v33 = vmul.f32 %v17037_v3, %v20832_v26  ;;  %v20833_v48 = vsub.f32 %v16693_v43, %v16919_v42  ;;  %v20834_v32 = vsub.f32 %v16732_v31, %v16919_v42  ;;  %v20845_v11 = vld [vmem:[#allocation181_spill] sm:$0xff] }
 0x626   :  { %20815 = vst [vmem:[#allocation247_spill] sm:$0xff] %v17219_v52  ;;  %v8546_v52 = vmul.f32 %v17037_v3, %v20821_v25  ;;  %v8550_v25 = vmul.f32 %v17037_v3, %v20825_v5  ;;  %v8554_v5 = vmul.f32 %v17037_v3, %v20829_v55  ;;  %v20835_v53 = vsub.f32 %v16672_v54, %v16919_v42 }
 0x627   :  { %v8558_v55 = vmul.f32 %v17037_v3, %v20833_v48  ;;  %v8559_v24 = vmul.f32 %v17037_v3, %v20834_v32  ;;  %v20836_v16 = vsub.f32 %v16718_v47, %v16919_v42  ;;  %v20838_v43 = vsub.f32 %v20837_v45, %v16919_v42 }
 0x628   :  { %v8560_v21 = vmul.f32 %v17037_v3, %v20835_v53  ;;  %v20839_v31 = vsub.f32 %v16772_v12, %v16919_v42  ;;  %v20840_v54 = vsub.f32 %v16744_v50, %v16919_v42  ;;  %v20841_v47 = vsub.f32 %v16764_v39, %v16919_v42 }
 0x629   :  { %v8561_v26 = vmul.f32 %v17037_v3, %v20836_v16  ;;  %v8562_v48 = vmul.f32 %v17037_v3, %v20838_v43  ;;  %v20842_v45 = vsub.f32 %v16792_v19, %v16919_v42  ;;  %v20843_v12 = vsub.f32 %v16812_v8, %v16919_v42 }
 0x62a   :  { %v8563_v32 = vmul.f32 %v17037_v3, %v20839_v31  ;;  %v8564_v53 = vmul.f32 %v17037_v3, %v20840_v54  ;;  %v8565_v16 = vmul.f32 %v17037_v3, %v20841_v47  ;;  %v20844_v50 = vsub.f32 %v16784_v30, %v16919_v42 }
 0x62b   :  { %v8566_v43 = vmul.f32 %v17037_v3, %v20842_v45  ;;  %v8567_v31 = vmul.f32 %v17037_v3, %v20843_v12  ;;  %v20846_v39 = vsub.f32 %v20845_v11, %v16919_v42  ;;  %v20847_v19 = vsub.f32 %v16832_v23, %v16919_v42 }
 0x62c   :  { %v8568_v54 = vmul.f32 %v17037_v3, %v20844_v50  ;;  %v20848_v8 = vsub.f32 %v16852_v22, %v16919_v42  ;;  %v20849_v30 = vsub.f32 %v16824_v40, %v16919_v42  ;;  %v20850_v11 = vsub.f32 %v16844_v44, %v16919_v42  ;;  %v17358_v40 = vld [vmem:[%s19290_s11] ss:$0 sm:$0xff] }
 0x62d   :  { %v8569_v47 = vmul.f32 %v17037_v3, %v20846_v39  ;;  %v8570_v45 = vmul.f32 %v17037_v3, %v20847_v19  ;;  %v20851_v23 = vsub.f32 %v20772_v14, %v16919_v42  ;;  %v8576_v17 = vmul.f32 %v17037_v3, %v8510_v41 }
 0x62e   :  { %v8571_v12 = vmul.f32 %v17037_v3, %v20848_v8  ;;  %v8572_v50 = vmul.f32 %v17037_v3, %v20849_v30  ;;  %v8573_v39 = vmul.f32 %v17037_v3, %v20850_v11  ;;  %v8577_v22 = vmul.f32 %v17037_v3, %v8511_v1 }
 0x62f   :  { %v8574_v19 = vmul.f32 %v17037_v3, %v20851_v23  ;;  %v8616_v8 = vmul.f32 %v17358_v40, %v8545_v20  ;;  %v8617_v44 = vmul.f32 %v17358_v40, %v8546_v52  ;;  %v8618_v30 = vmul.f32 %v17358_v40, %v8547_v29 }
 0x630   :  { %v8619_v11 = vmul.f32 %v17358_v40, %v8548_v36  ;;  %v8620_v14 = vmul.f32 %v17358_v40, %v8549_v7  ;;  %v8621_v23 = vmul.f32 %v17358_v40, %v8550_v25  ;;  %v8622_v41 = vmul.f32 %v17358_v40, %v8551_v2 }
 0x631   :  { %v8623_v1 = vmul.f32 %v17358_v40, %v8552_v49  ;;  %v8624_v34 = vmul.f32 %v17358_v40, %v8553_v28  ;;  %v8625_v6 = vmul.f32 %v17358_v40, %v8554_v5  ;;  %v8626_v20 = vmul.f32 %v17358_v40, %v8555_v38 }
 0x632   :  { %v8627_v52 = vmul.f32 %v17358_v40, %v8556_v63  ;;  %v8628_v29 = vmul.f32 %v17358_v40, %v8557_v33  ;;  %v8629_v36 = vmul.f32 %v17358_v40, %v8558_v55  ;;  %v8630_v7 = vmul.f32 %v17358_v40, %v8559_v24 }
 0x633   :  { %v8631_v25 = vmul.f32 %v17358_v40, %v8560_v21  ;;  %v8632_v2 = vmul.f32 %v17358_v40, %v8561_v26  ;;  %v8633_v49 = vmul.f32 %v17358_v40, %v8562_v48  ;;  %v8634_v28 = vmul.f32 %v17358_v40, %v8563_v32 }
 0x634   :  { %v8635_v5 = vmul.f32 %v17358_v40, %v8564_v53  ;;  %v8636_v38 = vmul.f32 %v17358_v40, %v8565_v16  ;;  %v8637_v63 = vmul.f32 %v17358_v40, %v8566_v43  ;;  %v8638_v33 = vmul.f32 %v17358_v40, %v8567_v31  ;;  %v17395_v31 = vld [vmem:[%s19291_s12] ss:$0 sm:$0xff] }
 0x635   :  { %v8639_v55 = vmul.f32 %v17358_v40, %v8568_v54  ;;  %v8640_v24 = vmul.f32 %v17358_v40, %v8569_v47  ;;  %v8641_v21 = vmul.f32 %v17358_v40, %v8570_v45  ;;  %v8642_v26 = vmul.f32 %v17358_v40, %v8571_v12 }
 0x636   :  { %v8643_v48 = vmul.f32 %v17358_v40, %v8572_v50  ;;  %v8644_v32 = vmul.f32 %v17358_v40, %v8573_v39  ;;  %v8645_v53 = vmul.f32 %v17358_v40, %v8574_v19  ;;  %v8647_v16 = vmul.f32 %v17358_v40, %v8576_v17 }
 0x637   :  { %v8648_v43 = vmul.f32 %v17358_v40, %v8577_v22  ;;  %v17398_v54 = vadd.f32 %v17395_v31, %v8616_v8  ;;  %v17401_v47 = vadd.f32 %v17395_v31, %v8617_v44  ;;  %v17404_v45 = vadd.f32 %v17395_v31, %v8618_v30 }
 0x638   :  { %v17407_v12 = vadd.f32 %v17395_v31, %v8619_v11  ;;  %v17410_v17 = vadd.f32 %v17395_v31, %v8620_v14  ;;  %v17413_v50 = vadd.f32 %v17395_v31, %v8621_v23  ;;  %v17416_v39 = vadd.f32 %v17395_v31, %v8622_v41 }
 0x639   :  { %20852 = vst [vmem:[#allocation250_spill] sm:$0xff] %v17398_v54  ;;  %20853 = vst [vmem:[#allocation66_spill] sm:$0xff] %v17401_v47  ;;  %v17419_v19 = vadd.f32 %v17395_v31, %v8623_v1  ;;  %v17422_v22 = vadd.f32 %v17395_v31, %v8624_v34  ;;  %v17425_v8 = vadd.f32 %v17395_v31, %v8625_v6 }
 0x63a   :  { %20854 = vst [vmem:[#allocation33_spill] sm:$0xff] %v17404_v45  ;;  %20855 = vst [vmem:[#allocation39_spill] sm:$0xff] %v17407_v12  ;;  %v17428_v44 = vadd.f32 %v17395_v31, %v8626_v20  ;;  %v17431_v30 = vadd.f32 %v17395_v31, %v8627_v52  ;;  %v17434_v11 = vadd.f32 %v17395_v31, %v8628_v29 }
 0x63b   :  { %20856 = vst [vmem:[#allocation65_spill] sm:$0xff] %v17410_v17  ;;  %20857 = vst [vmem:[#allocation34_spill] sm:$0xff] %v17413_v50  ;;  %v17437_v14 = vadd.f32 %v17395_v31, %v8629_v36  ;;  %v17440_v23 = vadd.f32 %v17395_v31, %v8630_v7  ;;  %v17443_v34 = vadd.f32 %v17395_v31, %v8631_v25 }
 0x63c   :  { %20858 = vst [vmem:[#allocation43_spill] sm:$0xff] %v17416_v39  ;;  %20859 = vst [vmem:[#allocation67_spill] sm:$0xff] %v17419_v19  ;;  %v17446_v6 = vadd.f32 %v17395_v31, %v8632_v2  ;;  %v17449_v41 = vadd.f32 %v17395_v31, %v8633_v49  ;;  %v17452_v1 = vadd.f32 %v17395_v31, %v8634_v28 }
 0x63d   :  { %20860 = vst [vmem:[#allocation42_spill] sm:$0xff] %v17422_v22  ;;  %20861 = vst [vmem:[#allocation41_spill] sm:$0xff] %v17425_v8  ;;  %v17455_v20 = vadd.f32 %v17395_v31, %v8635_v5  ;;  %v17458_v52 = vadd.f32 %v17395_v31, %v8636_v38  ;;  %v17461_v29 = vadd.f32 %v17395_v31, %v8637_v63 }
 0x63e   :  { %20862 = vst [vmem:[#allocation99_spill] sm:$0xff] %v17428_v44  ;;  %20863 = vst [vmem:[#allocation201_spill] sm:$0xff] %v17431_v30  ;;  %v17464_v36 = vadd.f32 %v17395_v31, %v8638_v33  ;;  %v17467_v7 = vadd.f32 %v17395_v31, %v8639_v55  ;;  %v17470_v25 = vadd.f32 %v17395_v31, %v8640_v24 }
 0x63f   :  { %20864 = vst [vmem:[#allocation47_spill] sm:$0xff] %v17434_v11  ;;  %20865 = vst [vmem:[#allocation40_spill] sm:$0xff] %v17437_v14  ;;  %v17473_v2 = vadd.f32 %v17395_v31, %v8641_v21  ;;  %v17476_v49 = vadd.f32 %v17395_v31, %v8642_v26  ;;  %v17479_v28 = vadd.f32 %v17395_v31, %v8643_v48 }
 0x640   :  { %20866 = vst [vmem:[#allocation101_spill] sm:$0xff] %v17440_v23  ;;  %20867 = vst [vmem:[#allocation46_spill] sm:$0xff] %v17443_v34  ;;  %v17482_v5 = vadd.f32 %v17395_v31, %v8644_v32  ;;  %v17485_v38 = vadd.f32 %v17395_v31, %v8645_v53  ;;  %v17488_v63 = vadd.f32 %v17395_v31, %v8647_v16  ;;  %v17493_v55 = vpop.f32.mrf.mxu1 }
 0x641   :  { %20868 = vst [vmem:[#allocation96_spill] sm:$0xff] %v17446_v6  ;;  %20869 = vst [vmem:[#allocation45_spill] sm:$0xff] %v17449_v41  ;;  %v17491_v33 = vadd.f32 %v17395_v31, %v8648_v43  ;;  %v7513_v43 = vmul.f32 %v17493_v55, %v17493_v55 }
 0x642   :  { %20870 = vst [vmem:[#allocation35_spill] sm:$0xff] %v17452_v1  ;;  %20871 = vst [vmem:[#allocation36_spill] sm:$0xff] %v17455_v20  ;;  %v17495_v24 = vpop.f32.mrf.mxu1 }
 0x643   :  { %20872 = vst [vmem:[#allocation44_spill] sm:$0xff] %v17458_v52  ;;  %20873 = vst [vmem:[#allocation48_spill] sm:$0xff] %v17461_v29  ;;  %v7511_v48 = vmul.f32 %v17495_v24, %v17495_v24 }
 0x644   :  { %20874 = vst [vmem:[#allocation203_spill] sm:$0xff] %v17464_v36  ;;  %20875 = vst [vmem:[#allocation205_spill] sm:$0xff] %v17467_v7  ;;  %v17497_v21 = vpop.f32.mrf.mxu1 }
 0x645   :  { %20876 = vst [vmem:[#allocation38_spill] sm:$0xff] %v17470_v25  ;;  %20877 = vst [vmem:[#allocation37_spill] sm:$0xff] %v17473_v2 }
 0x646   :  { %20878 = vst [vmem:[#allocation98_spill] sm:$0xff] %v17476_v49  ;;  %20879 = vst [vmem:[#allocation100_spill] sm:$0xff] %v17479_v28  ;;  %v17499_v26 = vpop.f32.mrf.mxu1 }
 0x647   :  { %20880 = vst [vmem:[#allocation55_spill] sm:$0xff] %v17482_v5  ;;  %20881 = vst [vmem:[#allocation103_spill] sm:$0xff] %v17485_v38  ;;  %v7441_v32 = vadd.f32 %v17499_v26, %v17495_v24  ;;  %v7512_v53 = vmul.f32 %v17499_v26, %v17499_v26  ;;  %v7514_v5 = vmul.f32 %v17497_v21, %v17497_v21 }
 0x648   :  { %20882 = vst [vmem:[#allocation59_spill] sm:$0xff] %v17488_v63  ;;  %20883 = vst [vmem:[#allocation50_spill] sm:$0xff] %v17491_v33  ;;  %v17507_v16 = vpop.f32.mrf.mxu1 }
 0x649   :  { %v7442_v33 = vadd.f32 %v17493_v55, %v7441_v32  ;;  %v7575_v63 = vadd.f32 %v7512_v53, %v7511_v48 }
 0x64a   :  { %v17512_v38 = vpop.f32.mrf.mxu1 }
 0x64b   :  { %v7576_v28 = vadd.f32 %v7575_v63, %v7513_v43  ;;  %v7443_v49 = vadd.f32 %v17497_v21, %v7442_v33  ;;  %v7515_v7 = vmul.f32 %v17512_v38, %v17512_v38  ;;  %v7517_v63 = vmul.f32 %v17507_v16, %v17507_v16 }
 0x64c   :  { %v17517_v2 = vpop.f32.mrf.mxu1 }
 0x64d   :  { %v7444_v25 = vadd.f32 %v7443_v49, %v17512_v38  ;;  %v7577_v36 = vadd.f32 %v7576_v28, %v7514_v5  ;;  %v7518_v28 = vmul.f32 %v17517_v2, %v17517_v2 }
 0x64e   :  { %v17522_v29 = vpop.f32.mrf.mxu1 }
 0x64f   :  { %v7578_v32 = vadd.f32 %v7577_v36, %v7515_v7  ;;  %v7445_v48 = vadd.f32 %v7444_v25, %v17522_v29  ;;  %v7516_v53 = vmul.f32 %v17522_v29, %v17522_v29 }
 0x650   :  { %v17527_v52 = vpop.f32.mrf.mxu1 }
 0x651   :  { %v7446_v33 = vadd.f32 %v17507_v16, %v7445_v48  ;;  %v7579_v49 = vadd.f32 %v7578_v32, %v7516_v53 }
 0x652   :  { %v17532_v43 = vpop.f32.mrf.mxu1 }
 0x653   :  { %v7580_v5 = vadd.f32 %v7579_v49, %v7517_v63  ;;  %v7447_v36 = vadd.f32 %v17517_v2, %v7446_v33  ;;  %v7519_v20 = vmul.f32 %v17532_v43, %v17532_v43  ;;  %v7521_v63 = vmul.f32 %v17527_v52, %v17527_v52 }
 0x654   :  { %v17537_v7 = vpop.f32.mrf.mxu1 }
 0x655   :  { %v7448_v25 = vadd.f32 %v7447_v36, %v17532_v43  ;;  %v7581_v1 = vadd.f32 %v7580_v5, %v7518_v28  ;;  %v7522_v28 = vmul.f32 %v17537_v7, %v17537_v7 }
 0x656   :  { %v17542_v41 = vpop.f32.mrf.mxu1 }
 0x657   :  { %v7582_v48 = vadd.f32 %v7581_v1, %v7519_v20  ;;  %v7449_v32 = vadd.f32 %v7448_v25, %v17542_v41  ;;  %v7520_v53 = vmul.f32 %v17542_v41, %v17542_v41 }
 0x658   :  { %v17547_v6 = vpop.f32.mrf.mxu1 }
 0x659   :  { %v7450_v33 = vadd.f32 %v17527_v52, %v7449_v32  ;;  %v7583_v49 = vadd.f32 %v7582_v48, %v7520_v53 }
 0x65a   :  { %v17552_v36 = vpop.f32.mrf.mxu1 }
 0x65b   :  { %v7584_v5 = vadd.f32 %v7583_v49, %v7521_v63  ;;  %v7451_v1 = vadd.f32 %v17537_v7, %v7450_v33  ;;  %v7523_v34 = vmul.f32 %v17552_v36, %v17552_v36  ;;  %v7525_v63 = vmul.f32 %v17547_v6, %v17547_v6 }
 0x65c   :  { %v17557_v20 = vpop.f32.mrf.mxu1 }
 0x65d   :  { %v7452_v25 = vadd.f32 %v7451_v1, %v17552_v36  ;;  %v7585_v23 = vadd.f32 %v7584_v5, %v7522_v28  ;;  %v7526_v28 = vmul.f32 %v17557_v20, %v17557_v20 }
 0x65e   :  { %v17562_v14 = vpop.f32.mrf.mxu1 }
 0x65f   :  { %v7586_v32 = vadd.f32 %v7585_v23, %v7523_v34  ;;  %v7453_v48 = vadd.f32 %v7452_v25, %v17562_v14  ;;  %v7524_v53 = vmul.f32 %v17562_v14, %v17562_v14 }
 0x660   :  { %v17567_v11 = vpop.f32.mrf.mxu1 }
 0x661   :  { %20884 = vst [vmem:[#allocation105_spill] sm:$0xff] %v17567_v11  ;;  %v7454_v33 = vadd.f32 %v17547_v6, %v7453_v48  ;;  %v7587_v49 = vadd.f32 %v7586_v32, %v7524_v53 }
 0x662   :  { %v17572_v1 = vpop.f32.mrf.mxu1 }
 0x663   :  { %v7588_v5 = vadd.f32 %v7587_v49, %v7525_v63  ;;  %v7455_v23 = vadd.f32 %v17557_v20, %v7454_v33  ;;  %v7527_v30 = vmul.f32 %v17572_v1, %v17572_v1  ;;  %v7529_v63 = vmul.f32 %v17567_v11, %v17567_v11 }
 0x664   :  { %v17577_v34 = vpop.f32.mrf.mxu1 }
 0x665   :  { %20885 = vst [vmem:[#allocation53_spill] sm:$0xff] %v17577_v34  ;;  %v7456_v25 = vadd.f32 %v7455_v23, %v17572_v1  ;;  %v7589_v44 = vadd.f32 %v7588_v5, %v7526_v28  ;;  %v7530_v28 = vmul.f32 %v17577_v34, %v17577_v34 }
 0x666   :  { %v17582_v8 = vpop.f32.mrf.mxu1 }
 0x667   :  { %v7590_v48 = vadd.f32 %v7589_v44, %v7527_v30  ;;  %v7457_v32 = vadd.f32 %v7456_v25, %v17582_v8  ;;  %v7528_v53 = vmul.f32 %v17582_v8, %v17582_v8 }
 0x668   :  { %v17587_v22 = vpop.f32.mrf.mxu1 }
 0x669   :  { %20886 = vst [vmem:[#allocation52_spill] sm:$0xff] %v17587_v22  ;;  %v7458_v33 = vadd.f32 %v17567_v11, %v7457_v32  ;;  %v7591_v49 = vadd.f32 %v7590_v48, %v7528_v53 }
 0x66a   :  { %v17592_v23 = vpop.f32.mrf.mxu1 }
 0x66b   :  { %20887 = vst [vmem:[#allocation64_spill] sm:$0xff] %v17592_v23  ;;  %v7592_v5 = vadd.f32 %v7591_v49, %v7529_v63  ;;  %v7459_v44 = vadd.f32 %v17577_v34, %v7458_v33  ;;  %v7531_v19 = vmul.f32 %v17592_v23, %v17592_v23  ;;  %v7533_v63 = vmul.f32 %v17587_v22, %v17587_v22  ;;  %v20942_v34 = vld [vmem:[#allocation249_spill] sm:$0xff] }
 0x66c   :  { %v17597_v30 = vpop.f32.mrf.mxu1 }
 0x66d   :  { %20888 = vst [vmem:[#allocation109_spill] sm:$0xff] %v17597_v30  ;;  %v7460_v25 = vadd.f32 %v7459_v44, %v17592_v23  ;;  %v7593_v39 = vadd.f32 %v7592_v5, %v7530_v28  ;;  %v7534_v28 = vmul.f32 %v17597_v30, %v17597_v30  ;;  %v20941_v23 = vld [vmem:[#allocation248_spill] sm:$0xff] }
 0x66e   :  { %v17602_v50 = vpop.f32.mrf.mxu1 }
 0x66f   :  { %20889 = vst [vmem:[#allocation207_spill] sm:$0xff] %v17602_v50  ;;  %v7594_v32 = vadd.f32 %v7593_v39, %v7531_v19  ;;  %v7461_v48 = vadd.f32 %v7460_v25, %v17602_v50  ;;  %v7532_v53 = vmul.f32 %v17602_v50, %v17602_v50  ;;  %v20940_v50 = vld [vmem:[#allocation247_spill] sm:$0xff] }
 0x670   :  { %v17607_v17 = vpop.f32.mrf.mxu1 }
 0x671   :  { %20890 = vst [vmem:[#allocation58_spill] sm:$0xff] %v17607_v17  ;;  %v7462_v33 = vadd.f32 %v17587_v22, %v7461_v48  ;;  %v7595_v49 = vadd.f32 %v7594_v32, %v7532_v53  ;;  %v20939_v22 = vld [vmem:[#allocation246_spill] sm:$0xff] }
 0x672   :  { %v17612_v44 = vpop.f32.mrf.mxu1 }
 0x673   :  { %20891 = vst [vmem:[#allocation107_spill] sm:$0xff] %v17612_v44  ;;  %v7596_v5 = vadd.f32 %v7595_v49, %v7533_v63  ;;  %v7463_v39 = vadd.f32 %v17597_v30, %v7462_v33  ;;  %v7535_v12 = vmul.f32 %v17612_v44, %v17612_v44  ;;  %v7537_v63 = vmul.f32 %v17607_v17, %v17607_v17 }
 0x674   :  { %v17617_v19 = vpop.f32.mrf.mxu1 }
 0x675   :  { %20892 = vst [vmem:[#allocation102_spill] sm:$0xff] %v17617_v19  ;;  %v7464_v25 = vadd.f32 %v7463_v39, %v17612_v44  ;;  %v7597_v45 = vadd.f32 %v7596_v5, %v7534_v28  ;;  %v7538_v28 = vmul.f32 %v17617_v19, %v17617_v19 }
 0x676   :  { %v17622_v47 = vpop.f32.mrf.mxu1 }
 0x677   :  { %20893 = vst [vmem:[#allocation54_spill] sm:$0xff] %v17622_v47  ;;  %v7598_v48 = vadd.f32 %v7597_v45, %v7535_v12  ;;  %v7465_v32 = vadd.f32 %v7464_v25, %v17622_v47  ;;  %v7536_v53 = vmul.f32 %v17622_v47, %v17622_v47 }
 0x678   :  { %v17627_v54 = vpop.f32.mrf.mxu1 }
 0x679   :  { %20894 = vst [vmem:[#allocation108_spill] sm:$0xff] %v17627_v54  ;;  %v7466_v33 = vadd.f32 %v17607_v17, %v7465_v32  ;;  %v7599_v49 = vadd.f32 %v7598_v48, %v7536_v53 }
 0x67a   :  { %v17632_v39 = vpop.f32.mrf.mxu1 }
 0x67b   :  { %20895 = vst [vmem:[#allocation110_spill] sm:$0xff] %v17632_v39  ;;  %v7600_v5 = vadd.f32 %v7599_v49, %v7537_v63  ;;  %v7467_v45 = vadd.f32 %v17617_v19, %v7466_v33  ;;  %v7539_v47 = vmul.f32 %v17632_v39, %v17632_v39  ;;  %v7541_v63 = vmul.f32 %v17627_v54, %v17627_v54 }
 0x67c   :  { %v17637_v12 = vpop.f32.mrf.mxu1 }
 0x67d   :  { %20896 = vst [vmem:[#allocation61_spill] sm:$0xff] %v17637_v12  ;;  %v7468_v25 = vadd.f32 %v7467_v45, %v17632_v39  ;;  %v7601_v44 = vadd.f32 %v7600_v5, %v7538_v28  ;;  %v7542_v28 = vmul.f32 %v17637_v12, %v17637_v12 }
 0x67e   :  { %v17642_v30 = vpop.f32.mrf.mxu1 }
 0x67f   :  { %20897 = vst [vmem:[#allocation114_spill] sm:$0xff] %v17642_v30  ;;  %v7602_v32 = vadd.f32 %v7601_v44, %v7539_v47  ;;  %v7469_v48 = vadd.f32 %v7468_v25, %v17642_v30  ;;  %v7540_v53 = vmul.f32 %v17642_v30, %v17642_v30 }
 0x680   :  { %v17647_v17 = vpop.f32.mrf.mxu1 }
 0x681   :  { %20898 = vst [vmem:[#allocation209_spill] sm:$0xff] %v17647_v17  ;;  %v7470_v33 = vadd.f32 %v17627_v54, %v7469_v48  ;;  %v7603_v49 = vadd.f32 %v7602_v32, %v7540_v53 }
 0x682   :  { %v17652_v45 = vpop.f32.mrf.mxu1 }
 0x683   :  { %20899 = vst [vmem:[#allocation60_spill] sm:$0xff] %v17652_v45  ;;  %v7604_v5 = vadd.f32 %v7603_v49, %v7541_v63  ;;  %v7471_v47 = vadd.f32 %v17637_v12, %v7470_v33  ;;  %v7543_v30 = vmul.f32 %v17652_v45, %v17652_v45  ;;  %v7545_v63 = vmul.f32 %v17647_v17, %v17647_v17 }
 0x684   :  { %v17657_v44 = vpop.f32.mrf.mxu1 }
 0x685   :  { %20900 = vst [vmem:[#allocation112_spill] sm:$0xff] %v17657_v44  ;;  %v7472_v25 = vadd.f32 %v7471_v47, %v17652_v45  ;;  %v7605_v39 = vadd.f32 %v7604_v5, %v7542_v28  ;;  %v7546_v28 = vmul.f32 %v17657_v44, %v17657_v44 }
 0x686   :  { %v17662_v19 = vpop.f32.mrf.mxu1 }
 0x687   :  { %20901 = vst [vmem:[#allocation104_spill] sm:$0xff] %v17662_v19  ;;  %v7606_v48 = vadd.f32 %v7605_v39, %v7543_v30  ;;  %v7473_v32 = vadd.f32 %v7472_v25, %v17662_v19  ;;  %v7544_v53 = vmul.f32 %v17662_v19, %v17662_v19 }
 0x688   :  { %v17667_v54 = vpop.f32.mrf.mxu1 }
 0x689   :  { %20902 = vst [vmem:[#allocation62_spill] sm:$0xff] %v17667_v54  ;;  %v7474_v33 = vadd.f32 %v17647_v17, %v7473_v32  ;;  %v7607_v49 = vadd.f32 %v7606_v48, %v7544_v53 }
 0x68a   :  { %v17672_v47 = vpop.f32.mrf.mxu1 }
 0x68b   :  { %20903 = vst [vmem:[#allocation106_spill] sm:$0xff] %v17672_v47  ;;  %v7608_v5 = vadd.f32 %v7607_v49, %v7545_v63  ;;  %v7475_v30 = vadd.f32 %v17657_v44, %v7474_v33  ;;  %v7547_v19 = vmul.f32 %v17672_v47, %v17672_v47  ;;  %v7549_v63 = vmul.f32 %v17667_v54, %v17667_v54 }
 0x68c   :  { %v17677_v39 = vpop.f32.mrf.mxu1 }
 0x68d   :  { %20904 = vst [vmem:[#allocation116_spill] sm:$0xff] %v17677_v39  ;;  %v7476_v25 = vadd.f32 %v7475_v30, %v17672_v47  ;;  %v7609_v45 = vadd.f32 %v7608_v5, %v7546_v28  ;;  %v7550_v28 = vmul.f32 %v17677_v39, %v17677_v39 }
 0x68e   :  { %v17682_v12 = vpop.f32.mrf.mxu1 }
 0x68f   :  { %20905 = vst [vmem:[#allocation211_spill] sm:$0xff] %v17682_v12  ;;  %v7610_v32 = vadd.f32 %v7609_v45, %v7547_v19  ;;  %v7477_v48 = vadd.f32 %v7476_v25, %v17682_v12  ;;  %v7548_v53 = vmul.f32 %v17682_v12, %v17682_v12 }
 0x690   :  { %v17687_v17 = vpop.f32.mrf.mxu1 }
 0x691   :  { %20906 = vst [vmem:[#allocation69_spill] sm:$0xff] %v17687_v17  ;;  %v7478_v33 = vadd.f32 %v17667_v54, %v7477_v48  ;;  %v7611_v49 = vadd.f32 %v7610_v32, %v7548_v53 }
 0x692   :  { %v17692_v30 = vpop.f32.mrf.mxu1 }
 0x693   :  { %20907 = vst [vmem:[#allocation171_spill] sm:$0xff] %v17692_v30  ;;  %v7612_v5 = vadd.f32 %v7611_v49, %v7549_v63  ;;  %v7479_v19 = vadd.f32 %v17677_v39, %v7478_v33  ;;  %v7551_v12 = vmul.f32 %v17692_v30, %v17692_v30  ;;  %v7553_v63 = vmul.f32 %v17687_v17, %v17687_v17 }
 0x694   :  { %v17697_v45 = vpop.f32.mrf.mxu1 }
 0x695   :  { %20908 = vst [vmem:[#allocation225_spill] sm:$0xff] %v17697_v45  ;;  %v7480_v25 = vadd.f32 %v7479_v19, %v17692_v30  ;;  %v7613_v47 = vadd.f32 %v7612_v5, %v7550_v28  ;;  %v7554_v28 = vmul.f32 %v17697_v45, %v17697_v45 }
 0x696   :  { %v17702_v44 = vpop.f32.mrf.mxu1 }
 0x697   :  { %20909 = vst [vmem:[#allocation111_spill] sm:$0xff] %v17702_v44  ;;  %v7614_v48 = vadd.f32 %v7613_v47, %v7551_v12  ;;  %v7481_v32 = vadd.f32 %v7480_v25, %v17702_v44  ;;  %v7552_v53 = vmul.f32 %v17702_v44, %v17702_v44 }
 0x698   :  { %v17707_v54 = vpop.f32.mrf.mxu1 }
 0x699   :  { %20910 = vst [vmem:[#allocation71_spill] sm:$0xff] %v17707_v54  ;;  %v7482_v33 = vadd.f32 %v17687_v17, %v7481_v32  ;;  %v7615_v49 = vadd.f32 %v7614_v48, %v7552_v53 }
 0x69a   :  { %v17712_v19 = vpop.f32.mrf.mxu1 }
 0x69b   :  { %20911 = vst [vmem:[#allocation213_spill] sm:$0xff] %v17712_v19  ;;  %v7616_v5 = vadd.f32 %v7615_v49, %v7553_v63  ;;  %v7483_v12 = vadd.f32 %v17697_v45, %v7482_v33  ;;  %v7555_v44 = vmul.f32 %v17712_v19, %v17712_v19  ;;  %v7557_v63 = vmul.f32 %v17707_v54, %v17707_v54 }
 0x69c   :  { %v17717_v47 = vpop.f32.mrf.mxu1 }
 0x69d   :  { %20912 = vst [vmem:[#allocation173_spill] sm:$0xff] %v17717_v47  ;;  %v7484_v25 = vadd.f32 %v7483_v12, %v17712_v19  ;;  %v7617_v30 = vadd.f32 %v7616_v5, %v7554_v28  ;;  %v7558_v28 = vmul.f32 %v17717_v47, %v17717_v47 }
 0x69e   :  { %v17722_v39 = vpop.f32.mrf.mxu1 }
 0x69f   :  { %20913 = vst [vmem:[#allocation127_spill] sm:$0xff] %v17722_v39  ;;  %v7618_v32 = vadd.f32 %v7617_v30, %v7555_v44  ;;  %v7485_v48 = vadd.f32 %v7484_v25, %v17722_v39  ;;  %v7556_v53 = vmul.f32 %v17722_v39, %v17722_v39 }
 0x6a0   :  { %v17727_v17 = vpop.f32.mrf.mxu1 }
 0x6a1   :  { %20914 = vst [vmem:[#allocation129_spill] sm:$0xff] %v17727_v17  ;;  %v7486_v33 = vadd.f32 %v17707_v54, %v7485_v48  ;;  %v7619_v49 = vadd.f32 %v7618_v32, %v7556_v53 }
 0x6a2   :  { %v17732_v12 = vpop.f32.mrf.mxu1 }
 0x6a3   :  { %20915 = vst [vmem:[#allocation238_spill] sm:$0xff] %v17732_v12  ;;  %v7620_v5 = vadd.f32 %v7619_v49, %v7557_v63  ;;  %v7487_v44 = vadd.f32 %v17717_v47, %v7486_v33  ;;  %v7559_v39 = vmul.f32 %v17732_v12, %v17732_v12  ;;  %v7561_v63 = vmul.f32 %v17727_v17, %v17727_v17 }
 0x6a4   :  { %v17737_v30 = vpop.f32.mrf.mxu1 }
 0x6a5   :  { %20916 = vst [vmem:[#allocation215_spill] sm:$0xff] %v17737_v30  ;;  %v7488_v25 = vadd.f32 %v7487_v44, %v17732_v12  ;;  %v7621_v19 = vadd.f32 %v7620_v5, %v7558_v28  ;;  %v7562_v28 = vmul.f32 %v17737_v30, %v17737_v30 }
 0x6a6   :  { %v17742_v45 = vpop.f32.mrf.mxu1 }
 0x6a7   :  { %20917 = vst [vmem:[#allocation133_spill] sm:$0xff] %v17742_v45  ;;  %v7622_v48 = vadd.f32 %v7621_v19, %v7559_v39  ;;  %v7489_v32 = vadd.f32 %v7488_v25, %v17742_v45  ;;  %v7560_v53 = vmul.f32 %v17742_v45, %v17742_v45 }
 0x6a8   :  { %v17747_v54 = vpop.f32.mrf.mxu1 }
 0x6a9   :  { %20918 = vst [vmem:[#allocation131_spill] sm:$0xff] %v17747_v54  ;;  %v7490_v33 = vadd.f32 %v17727_v17, %v7489_v32  ;;  %v7623_v49 = vadd.f32 %v7622_v48, %v7560_v53 }
 0x6aa   :  { %v17752_v44 = vpop.f32.mrf.mxu1 }
 0x6ab   :  { %20919 = vst [vmem:[#allocation113_spill] sm:$0xff] %v17752_v44  ;;  %v7624_v5 = vadd.f32 %v7623_v49, %v7561_v63  ;;  %v7491_v39 = vadd.f32 %v17737_v30, %v7490_v33  ;;  %v7563_v47 = vmul.f32 %v17752_v44, %v17752_v44  ;;  %v7565_v63 = vmul.f32 %v17747_v54, %v17747_v54 }
 0x6ac   :  { %v17757_v19 = vpop.f32.mrf.mxu1 }
 0x6ad   :  { %20920 = vst [vmem:[#allocation68_spill] sm:$0xff] %v17757_v19  ;;  %v7492_v25 = vadd.f32 %v7491_v39, %v17752_v44  ;;  %v7625_v45 = vadd.f32 %v7624_v5, %v7562_v28  ;;  %v7566_v28 = vmul.f32 %v17757_v19, %v17757_v19 }
 0x6ae   :  { %v17762_v12 = vpop.f32.mrf.mxu1 }
 0x6af   :  { %20921 = vst [vmem:[#allocation175_spill] sm:$0xff] %v17762_v12  ;;  %v7626_v32 = vadd.f32 %v7625_v45, %v7563_v47  ;;  %v7493_v48 = vadd.f32 %v7492_v25, %v17762_v12  ;;  %v7564_v53 = vmul.f32 %v17762_v12, %v17762_v12 }
 0x6b0   :  { %v17767_v17 = vpop.f32.mrf.mxu1 }
 0x6b1   :  { %20922 = vst [vmem:[#allocation115_spill] sm:$0xff] %v17767_v17  ;;  %v7494_v33 = vadd.f32 %v17747_v54, %v7493_v48  ;;  %v7627_v49 = vadd.f32 %v7626_v32, %v7564_v53 }
 0x6b2   :  { %v17772_v39 = vpop.f32.mrf.mxu1 }
 0x6b3   :  { %20923 = vst [vmem:[#allocation75_spill] sm:$0xff] %v17772_v39  ;;  %v7628_v5 = vadd.f32 %v7627_v49, %v7565_v63  ;;  %v7495_v45 = vadd.f32 %v17757_v19, %v7494_v33  ;;  %v7567_v12 = vmul.f32 %v17772_v39, %v17772_v39  ;;  %v20926_v63 = vld [vmem:[#allocation80_spill] sm:$0xff] }
 0x6b4   :  { %v17777_v47 = vpop.f32.mrf.mxu1  ;;  %v8509_v49 = vsub.f32 %v20926_v63, %v16919_v42 }
 0x6b5   :  { %20924 = vst [vmem:[#allocation132_spill] sm:$0xff] %v17777_v47  ;;  %v7496_v25 = vadd.f32 %v7495_v45, %v17772_v39  ;;  %v7629_v44 = vadd.f32 %v7628_v5, %v7566_v28  ;;  %v7569_v45 = vmul.f32 %v17767_v17, %v17767_v17 }
 0x6b6   :  { %v17782_v30 = vpop.f32.mrf.mxu1 }
 0x6b7   :  { %20925 = vst [vmem:[#allocation139_spill] sm:$0xff] %v17782_v30  ;;  %v7630_v48 = vadd.f32 %v7629_v44, %v7567_v12  ;;  %v7497_v32 = vadd.f32 %v7496_v25, %v17782_v30  ;;  %v7568_v53 = vmul.f32 %v17782_v30, %v17782_v30  ;;  %v7570_v12 = vmul.f32 %v17777_v47, %v17777_v47 }
 0x6b8   :  { %v17789_v33 = vpop.f32.mrf.mxu1  ;;  %v8575_v25 = vmul.f32 %v17037_v3, %v8509_v49 }
 0x6b9   :  { %20927 = vst [vmem:[#allocation219_spill] sm:$0xff] %v17789_v33  ;;  %v7498_v19 = vadd.f32 %v17767_v17, %v7497_v32  ;;  %v7631_v39 = vadd.f32 %v7630_v48, %v7568_v53  ;;  %v7573_v3 = vmul.f32 %v17789_v33, %v17789_v33  ;;  %v20938_v17 = vld [vmem:[#allocation245_spill] sm:$0xff] }
 0x6ba   :  { %v17794_v28 = vpop.f32.mrf.mxu1 }
 0x6bb   :  { %20928 = vst [vmem:[#allocation217_spill] sm:$0xff] %v17794_v28  ;;  %v7632_v44 = vadd.f32 %v7631_v39, %v7569_v45  ;;  %v7499_v5 = vadd.f32 %v17777_v47, %v7498_v19  ;;  %v7571_v63 = vmul.f32 %v17794_v28, %v17794_v28  ;;  %v8646_v19 = vmul.f32 %v17358_v40, %v8575_v25  ;;  %v20937_v47 = vld [vmem:[#allocation241_spill] sm:$0xff] }
 0x6bc   :  { %v17800_v30 = vpop.f32.mrf.mxu1  ;;  %v8586_v25 = vmul.f32 %v17358_v40, %v17059_v61  ;;  %v8592_v61 = vmul.f32 %v17358_v40, %v17091_v18 }
 0x6bd   :  { %20929 = vst [vmem:[#allocation72_spill] sm:$0xff] %v17800_v30  ;;  %v7500_v42 = vadd.f32 %v7499_v5, %v17794_v28  ;;  %v7633_v54 = vadd.f32 %v7632_v44, %v7570_v12  ;;  %v7574_v5 = vmul.f32 %v17800_v30, %v17800_v30 }
 0x6be   :  { %v17805_v32 = vpop.f32.mrf.mxu1 }
 0x6bf   :  { %v7634_v48 = vadd.f32 %v7633_v54, %v7571_v63  ;;  %v7501_v53 = vadd.f32 %v7500_v42, %v17805_v32  ;;  %v7572_v39 = vmul.f32 %v17805_v32, %v17805_v32  ;;  %v17818_v54 = vadd.f32 %v17395_v31, %v8646_v19 }
 0x6c0   :  { %v8585_v42 = vmul.f32 %v17358_v40, %v17053_v60  ;;  %v8587_v63 = vmul.f32 %v17358_v40, %v17065_v51  ;;  %v8590_v19 = vmul.f32 %v17358_v40, %v17080_v4  ;;  %v8591_v60 = vmul.f32 %v17358_v40, %v17083_v9 }
 0x6c1   :  { %v7502_v49 = vadd.f32 %v17789_v33, %v7501_v53  ;;  %v7635_v45 = vadd.f32 %v7634_v48, %v7572_v39  ;;  %20930 = vst [vmem:[#allocation117_spill] sm:$0xff] %v17818_v54  ;;  %v8588_v48 = vmul.f32 %v17358_v40, %v17071_v59  ;;  %v8593_v51 = vmul.f32 %v17358_v40, %v17097_v0  ;;  %v20933_v54 = vld [vmem:[#allocation222_spill] sm:$0xff] }
 0x6c2   :  { %v8594_v59 = vmul.f32 %v17358_v40, %v17103_v62  ;;  %v8596_v4 = vmul.f32 %v17358_v40, %v17115_v57  ;;  %v8599_v0 = vmul.f32 %v17358_v40, %v17135_v35  ;;  %v8600_v62 = vmul.f32 %v17358_v40, %v17141_v37  ;;  %v20935_v33 = vld [vmem:[#allocation230_spill] sm:$0xff] }
 0x6c3   :  { %v7503_v12 = vadd.f32 %v17800_v30, %v7502_v49  ;;  %v7636_v44 = vadd.f32 %v7635_v45, %v7573_v3  ;;  %v8589_v3 = vmul.f32 %v17358_v40, %v17077_v27  ;;  %v8595_v27 = vmul.f32 %v17358_v40, %v17109_v46  ;;  %v20934_v30 = vld [vmem:[#allocation244_spill] sm:$0xff] }
 0x6c4   :  { %v8601_v46 = vmul.f32 %v17358_v40, %v17147_v58  ;;  %v8602_v57 = vmul.f32 %v17358_v40, %v17153_v15  ;;  %v8605_v35 = vmul.f32 %v17358_v40, %v20934_v30  ;;  %v8606_v37 = vmul.f32 %v17358_v40, %v20935_v33 }
 0x6c5   :  { %v7504_v53 = vrot.slane %v7503_v12, 4  ;;  %v7637_v39 = vadd.f32 %v7636_v44, %v7574_v5  ;;  %v20931_v5 = vld [vmem:[#allocation214_spill] sm:$0xff]  ;;  %v20932_v44 = vld [vmem:[#allocation89_spill] sm:$0xff]  ;;  %v8607_v58 = vmul.f32 %v17358_v40, %v17183_v10  ;;  %v8608_v15 = vmul.f32 %v17358_v40, %v17189_v13 }
 0x6c6   :  { %v8597_v9 = vmul.f32 %v17358_v40, %v20931_v5  ;;  %v8598_v18 = vmul.f32 %v17358_v40, %v20932_v44  ;;  %v8603_v5 = vmul.f32 %v17358_v40, %v17159_v56  ;;  %v8604_v44 = vmul.f32 %v17358_v40, %v20933_v54 }
 0x6c7   :  { %v7505_v49 = vadd.f32 %v7504_v53, %v7503_v12  ;;  %v7638_v45 = vrot.slane %v7637_v39, 4  ;;  %v8610_v54 = vmul.f32 %v17358_v40, %v20937_v47  ;;  %v8611_v30 = vmul.f32 %v17358_v40, %v20938_v17 }
 0x6c8   :  { %v8612_v33 = vmul.f32 %v17358_v40, %v20939_v22  ;;  %v8613_v10 = vmul.f32 %v17358_v40, %v20940_v50  ;;  %v8614_v13 = vmul.f32 %v17358_v40, %v20941_v23  ;;  %v17883_v11 = vadd.f32 %v17395_v31, %v8585_v42 }
 0x6c9   :  { %v7506_v12 = vrot.slane %v7505_v49, 2  ;;  %v7639_v53 = vadd.f32 %v7638_v45, %v7637_v39  ;;  %v20936_v45 = vld [vmem:[#allocation236_spill] sm:$0xff]  ;;  %v17886_v47 = vadd.f32 %v17395_v31, %v8586_v25  ;;  %v17889_v17 = vadd.f32 %v17395_v31, %v8587_v63 }
 0x6ca   :  { %v8609_v56 = vmul.f32 %v17358_v40, %v20936_v45  ;;  %v8615_v45 = vmul.f32 %v17358_v40, %v20942_v34  ;;  %20943 = vst [vmem:[#allocation179_spill] sm:$0xff] %v17883_v11  ;;  %v17895_v50 = vadd.f32 %v17395_v31, %v8589_v3  ;;  %v17898_v23 = vadd.f32 %v17395_v31, %v8590_v19 }
 0x6cb   :  { %v7507_v28 = vadd.f32 %v7506_v12, %v7505_v49  ;;  %v7640_v39 = vrot.slane %v7639_v53, 2  ;;  %20944 = vst [vmem:[#allocation79_spill] sm:$0xff] %v17886_v47  ;;  %20945 = vst [vmem:[#allocation119_spill] sm:$0xff] %v17889_v17  ;;  %v17901_v40 = vadd.f32 %v17395_v31, %v8591_v60  ;;  %v17904_v34 = vadd.f32 %v17395_v31, %v8592_v61 }
 0x6cc   :  { %20947 = vst [vmem:[#allocation221_spill] sm:$0xff] %v17895_v50  ;;  %20948 = vst [vmem:[#allocation81_spill] sm:$0xff] %v17898_v23  ;;  %v17907_v42 = vadd.f32 %v17395_v31, %v8593_v51  ;;  %v17912_v63 = vadd.f32 %v17395_v31, %v8594_v59  ;;  %v17918_v3 = vadd.f32 %v17395_v31, %v8596_v4 }
 0x6cd   :  { %v7508_v49 = vrot.slane %v7507_v28, 1  ;;  %v7641_v12 = vadd.f32 %v7640_v39, %v7639_v53  ;;  %v17892_v39 = vadd.f32 %v17395_v31, %v8588_v48  ;;  %20949 = vst [vmem:[#allocation223_spill] sm:$0xff] %v17901_v40  ;;  %20950 = vst [vmem:[#allocation121_spill] sm:$0xff] %v17904_v34  ;;  %v17915_v48 = vadd.f32 %v17395_v31, %v8595_v27 }
 0x6ce   :  { %20951 = vst [vmem:[#allocation78_spill] sm:$0xff] %v17907_v42  ;;  %20952 = vst [vmem:[#allocation185_spill] sm:$0xff] %v17912_v63  ;;  %v17921_v19 = vadd.f32 %v17395_v31, %v8597_v9  ;;  %v17924_v60 = vadd.f32 %v17395_v31, %v8598_v18  ;;  %v17927_v61 = vadd.f32 %v17395_v31, %v8599_v0  ;;  %v21008_v63 = vld [vmem:[#allocation211_spill] sm:$0xff]  ;;  %v21009_v42 = vld [vmem:[#allocation62_spill] sm:$0xff] }
 0x6cf   :  { %v7509_v22 = vadd.f32 %v7508_v49, %v7507_v28  ;;  %v7642_v53 = vrot.slane %v7641_v12, 1  ;;  %20946 = vst [vmem:[#allocation76_spill] sm:$0xff] %v17892_v39  ;;  %20953 = vst [vmem:[#allocation118_spill] sm:$0xff] %v17915_v48  ;;  %v17932_v49 = vadd.f32 %v17395_v31, %v8600_v62  ;;  %v17935_v27 = vadd.f32 %v17395_v31, %v8601_v46 }
 0x6d0   :  { %20954 = vst [vmem:[#allocation85_spill] sm:$0xff] %v17918_v3  ;;  %20955 = vst [vmem:[#allocation125_spill] sm:$0xff] %v17921_v19  ;;  %v17938_v4 = vadd.f32 %v17395_v31, %v8602_v57  ;;  %v17941_v9 = vadd.f32 %v17395_v31, %v8603_v5  ;;  %v17944_v18 = vadd.f32 %v17395_v31, %v8604_v44  ;;  %v21005_v19 = vld [vmem:[#allocation209_spill] sm:$0xff] }
 0x6d1   :  { %v17909_v28 = vmul.f32 0.001953125, %v7509_v22  ;;  %v7643_v25 = vadd.f32 %v7642_v53, %v7641_v12  ;;  %20956 = vst [vmem:[#allocation123_spill] sm:$0xff] %v17924_v60  ;;  %20957 = vst [vmem:[#allocation82_spill] sm:$0xff] %v17927_v61  ;;  %v17947_v0 = vadd.f32 %v17395_v31, %v8605_v35  ;;  %v17950_v12 = vadd.f32 %v17395_v31, %v8606_v37  ;;  %v21003_v61 = vld [vmem:[#allocation60_spill] sm:$0xff] }
 0x6d2   :  { %20958 = vst [vmem:[#allocation120_spill] sm:$0xff] %v17932_v49  ;;  %20959 = vst [vmem:[#allocation189_spill] sm:$0xff] %v17935_v27  ;;  %v17953_v22 = vadd.f32 %v17395_v31, %v8607_v58  ;;  %v17956_v46 = vadd.f32 %v17395_v31, %v8608_v15  ;;  %v17959_v57 = vadd.f32 %v17395_v31, %v8609_v56  ;;  %v20986_v56 = vld [vmem:[#allocation238_spill] sm:$0xff]  ;;  %v21004_v60 = vld [vmem:[#allocation104_spill] sm:$0xff] }
 0x6d3   :  { %v7644_v51 = vmul.f32 0.001953125, %v7643_v25  ;;  %v7645_v59 = vmul.f32 %v17909_v28, %v17909_v28  ;;  %20960 = vst [vmem:[#allocation84_spill] sm:$0xff] %v17938_v4  ;;  %20961 = vst [vmem:[#allocation227_spill] sm:$0xff] %v17941_v9  ;;  %v17962_v5 = vadd.f32 %v17395_v31, %v8610_v54  ;;  %v17965_v44 = vadd.f32 %v17395_v31, %v8611_v30  ;;  %v20976_v25 = vld [vmem:[#allocation64_spill] sm:$0xff]  ;;  %v20985_v54 = vld [vmem:[#allocation114_spill] sm:$0xff] }
 0x6d4   :  { %20962 = vst [vmem:[#allocation191_spill] sm:$0xff] %v17944_v18  ;;  %20963 = vst [vmem:[#allocation122_spill] sm:$0xff] %v17947_v0  ;;  %v17968_v35 = vadd.f32 %v17395_v31, %v8612_v33  ;;  %v17971_v37 = vadd.f32 %v17395_v31, %v8613_v10  ;;  %v17974_v53 = vadd.f32 %v17395_v31, %v8614_v13  ;;  %v20982_v13 = vld [vmem:[#allocation58_spill] sm:$0xff]  ;;  %v20999_v9 = vld [vmem:[#allocation108_spill] sm:$0xff] }
 0x6d5   :  { %20964 = vst [vmem:[#allocation91_spill] sm:$0xff] %v17950_v12  ;;  %v7646_v62 = vsub.f32 %v7644_v51, %v7645_v59  ;;  %20965 = vst [vmem:[#allocation124_spill] sm:$0xff] %v17953_v22  ;;  %v17977_v15 = vadd.f32 %v17395_v31, %v8615_v45  ;;  %v20974_v31 = vld [vmem:[#allocation105_spill] sm:$0xff]  ;;  %v20978_v59 = vld [vmem:[#allocation52_spill] sm:$0xff]  ;;  %v7678_v3 = vsub.f32 %v20999_v9, %v17909_v28 }
 0x6d6   :  { %20966 = vst [vmem:[#allocation229_spill] sm:$0xff] %v17956_v46  ;;  %20967 = vst [vmem:[#allocation88_spill] sm:$0xff] %v17959_v57  ;;  %v20975_v45 = vld [vmem:[#allocation53_spill] sm:$0xff]  ;;  %v20981_v51 = vld [vmem:[#allocation54_spill] sm:$0xff]  ;;  %v7680_v34 = vsub.f32 %v21003_v61, %v17909_v28  ;;  %v7681_v40 = vsub.f32 %v21004_v60, %v17909_v28  ;;  %v7682_v23 = vsub.f32 %v21005_v19, %v17909_v28 }
 0x6d7   :  { %20968 = vst [vmem:[#allocation93_spill] sm:$0xff] %v17962_v5  ;;  %20969 = vst [vmem:[#allocation231_spill] sm:$0xff] %v17965_v44  ;;  %v7647_v58 = vmax.f32 %v7646_v62, 0.0  ;;  %v20979_v62 = vld [vmem:[#allocation109_spill] sm:$0xff]  ;;  %v20983_v10 = vld [vmem:[#allocation102_spill] sm:$0xff]  ;;  %v7685_v17 = vsub.f32 %v21008_v63, %v17909_v28  ;;  %v7686_v47 = vsub.f32 %v21009_v42, %v17909_v28  ;;  %v21020_v44 = vsub.f32 %v17495_v24, %v17909_v28 }
 0x6d8   :  { %20970 = vst [vmem:[#allocation195_spill] sm:$0xff] %v17968_v35  ;;  %20971 = vst [vmem:[#allocation136_spill] sm:$0xff] %v17971_v37  ;;  %v20984_v33 = vld [vmem:[#allocation110_spill] sm:$0xff]  ;;  %v20989_v37 = vld [vmem:[#allocation215_spill] sm:$0xff]  ;;  %v21024_v24 = vsub.f32 %v17497_v21, %v17909_v28 }
 0x6d9   :  { %20972 = vst [vmem:[#allocation128_spill] sm:$0xff] %v17974_v53  ;;  %20973 = vst [vmem:[#allocation126_spill] sm:$0xff] %v17977_v15  ;;  %v7712_v30 = vadd.f32 1e-05, %v7647_v58  ;;  %v20980_v58 = vld [vmem:[#allocation107_spill] sm:$0xff]  ;;  %v20987_v15 = vld [vmem:[#allocation133_spill] sm:$0xff] }
 0x6da   :  { %v20988_v53 = vld [vmem:[#allocation129_spill] sm:$0xff]  ;;  %v21006_v9 = vld [vmem:[#allocation112_spill] sm:$0xff]  ;;  %v21011_v60 = vld [vmem:[#allocation171_spill] sm:$0xff] }
 0x6db   :  { %10654 = vrsqrt.f32 %v7712_v30  ;;  %v20977_v30 = vld [vmem:[#allocation207_spill] sm:$0xff]  ;;  %v21000_v4 = vld [vmem:[#allocation61_spill] sm:$0xff]  ;;  %v7683_v50 = vsub.f32 %v21006_v9, %v17909_v28  ;;  %v21010_v61 = vld [vmem:[#allocation116_spill] sm:$0xff]  ;;  %v7688_v49 = vsub.f32 %v21011_v60, %v17909_v28 }
 0x6dc   :  { %v7679_v48 = vsub.f32 %v21000_v4, %v17909_v28  ;;  %v21007_v4 = vld [vmem:[#allocation106_spill] sm:$0xff]  ;;  %v7687_v11 = vsub.f32 %v21010_v61, %v17909_v28  ;;  %v21012_v19 = vld [vmem:[#allocation111_spill] sm:$0xff]  ;;  %v21013_v9 = vld [vmem:[#allocation69_spill] sm:$0xff] }
 0x6dd   :  { %v7684_v39 = vsub.f32 %v21007_v4, %v17909_v28  ;;  %v7689_v27 = vsub.f32 %v21012_v19, %v17909_v28  ;;  %v7690_v18 = vsub.f32 %v21013_v9, %v17909_v28  ;;  %v21014_v4 = vld [vmem:[#allocation225_spill] sm:$0xff]  ;;  %v18104_v42 = vld [vmem:[%s19287_s8] ss:$0 sm:$0xff]  ;;  %v21016_v60 = vld [vmem:[#allocation127_spill] sm:$0xff] }
 0x6de   :  { %v7691_v0 = vsub.f32 %v21014_v4, %v17909_v28  ;;  %v21015_v63 = vld [vmem:[#allocation213_spill] sm:$0xff]  ;;  %v7693_v22 = vsub.f32 %v21016_v60, %v17909_v28  ;;  %v21017_v19 = vld [vmem:[#allocation71_spill] sm:$0xff]  ;;  %v21019_v4 = vsub.f32 %v17805_v32, %v17909_v28  ;;  %v18139_v32 = vld [vmem:[%s19288_s9] ss:$0 sm:$0xff]  ;;  %s10679_s9 = smov [#allocation3]  }
 0x6df   :  { %v7692_v61 = vsub.f32 %v21015_v63, %v17909_v28  ;;  %v7694_v46 = vsub.f32 %v21017_v19, %v17909_v28  ;;  %v21018_v9 = vld [vmem:[#allocation173_spill] sm:$0xff]  ;;  %v21021_v63 = vsub.f32 %v17499_v26, %v17909_v28  ;;  %v21022_v19 = vsub.f32 %v17493_v55, %v17909_v28  ;;  %21023 = vst [vmem:[#allocation90_spill] sm:$0xff] %v18139_v32  ;;  %s8917_s3 = sshll.u32 %s10679_s9, 4  ;;  %s19265_s3 = int_to_ptr.vmem [resolvable:$true] %s8917_s3 }
 0x6e0   :  { %v7695_v57 = vsub.f32 %v21018_v9, %v17909_v28  ;;  %v21025_v26 = vsub.f32 %v17512_v38, %v17909_v28  ;;  %v21026_v55 = vsub.f32 %v17522_v29, %v17909_v28  ;;  %v21028_v38 = vsub.f32 %v17517_v2, %v17909_v28  ;;  %s10656_s29 = scalar_lea.vmem %s19265_s3, 8192  ;;  %p10661_p1 = scmp.lt.s32.totalorder %s19265_s3, %s19265_s3 }
 0x6e1   :  { %v21029_v29 = vsub.f32 %v17532_v43, %v17909_v28  ;;  %p10657_p0 = scmp.ne.s32.totalorder %s19265_s3, %s10656_s29  ;;  %p10662_p2 = scmp.lt.s32.totalorder %s10656_s29, %s10656_s29 }
 0x6e3   :  { %p10663_p3 = por %p10662_p2, %p10661_p1 }
 0x6e5   :  { %p10664_p4 = pnand %p10663_p3, %p10657_p0 }
 0x6e8   :  { %v18099_v12 = vpop.eup %10654 }
 0x6e9   :  { %v7775_v5 = vmul.f32 %v18099_v12, %v21019_v4  ;;  %v18122_v35 = vmul.f32 %v18099_v12, %v21020_v44  ;;  %v18128_v60 = vmul.f32 %v18099_v12, %v21021_v63  ;;  %v18134_v9 = vmul.f32 %v18099_v12, %v21022_v19 }
 0x6ea   :  { %v18145_v44 = vmul.f32 %v18099_v12, %v21024_v24  ;;  %v18151_v4 = vmul.f32 %v18099_v12, %v21025_v26  ;;  %v18157_v63 = vmul.f32 %v18099_v12, %v21026_v55  ;;  %v21027_v19 = vsub.f32 %v17507_v16, %v17909_v28 }
 0x6eb   :  { %v7846_v24 = vmul.f32 %v18104_v42, %v7775_v5  ;;  %v18170_v26 = vmul.f32 %v18099_v12, %v21028_v38  ;;  %v18176_v55 = vmul.f32 %v18099_v12, %v21029_v29  ;;  %v21030_v16 = vsub.f32 %v17542_v41, %v17909_v28 }
 0x6ec   :  { %v18163_v21 = vmul.f32 %v18099_v12, %v21027_v19  ;;  %v21031_v5 = vsub.f32 %v17527_v52, %v17909_v28  ;;  %v21032_v38 = vsub.f32 %v17537_v7, %v17909_v28  ;;  %v21033_v29 = vsub.f32 %v17552_v36, %v17909_v28 }
 0x6ed   :  { %v18182_v19 = vmul.f32 %v18099_v12, %v21030_v16  ;;  %v21034_v16 = vsub.f32 %v17562_v14, %v17909_v28  ;;  %v21035_v7 = vsub.f32 %v17547_v6, %v17909_v28  ;;  %v21036_v36 = vsub.f32 %v17557_v20, %v17909_v28 }
 0x6ee   :  { %v18188_v2 = vmul.f32 %v18099_v12, %v21031_v5  ;;  %v18194_v43 = vmul.f32 %v18099_v12, %v21032_v38  ;;  %v18200_v41 = vmul.f32 %v18099_v12, %v21033_v29  ;;  %v7917_v5 = vadd.f32 %v18139_v32, %v7846_v24 }
 0x6ef   :  { %v18206_v52 = vmul.f32 %v18099_v12, %v21034_v16  ;;  %v18213_v38 = vmul.f32 %v18099_v12, %v21035_v7  ;;  %v18219_v29 = vmul.f32 %v18099_v12, %v21036_v36  ;;  %v21037_v14 = vsub.f32 %v17572_v1, %v17909_v28 }
 0x6f0   :  { %v21038_v24 = vsub.f32 %v17582_v8, %v17909_v28  ;;  %v21039_v7 = vsub.f32 %v20974_v31, %v17909_v28  ;;  %v21040_v36 = vsub.f32 %v20975_v45, %v17909_v28  ;;  %v21043_v31 = vsub.f32 %v20977_v30, %v17909_v28 }
 0x6f1   :  { %v18225_v16 = vmul.f32 %v18099_v12, %v21037_v14  ;;  %v21041_v14 = vsub.f32 %v20976_v25, %v17909_v28  ;;  %v21044_v45 = vsub.f32 %v20978_v59, %v17909_v28  ;;  %v21045_v25 = vsub.f32 %v20979_v62, %v17909_v28 }
 0x6f2   :  { %v18231_v6 = vmul.f32 %v18099_v12, %v21038_v24  ;;  %v18237_v20 = vmul.f32 %v18099_v12, %v21039_v7  ;;  %v18243_v1 = vmul.f32 %v18099_v12, %v21040_v36  ;;  %v21042_v24 = vld [vmem:[#allocation117_spill] sm:$0xff]  ;;  %v18256_v7 = vmul.f32 %v18099_v12, %v21043_v31 }
 0x6f3   :  { %v18249_v8 = vmul.f32 %v18099_v12, %v21041_v14  ;;  %v8781_v32 = vadd.f32 %v21042_v24, %v7917_v5  ;;  %v18262_v36 = vmul.f32 %v18099_v12, %v21044_v45  ;;  %v18268_v14 = vmul.f32 %v18099_v12, %v21045_v25 }
 0x6f4   :  { %v21046_v5 = vsub.f32 %v20980_v58, %v17909_v28  ;;  %v21047_v24 = vsub.f32 %v20981_v51, %v17909_v28  ;;  %v21048_v31 = vsub.f32 %v20982_v13, %v17909_v28  ;;  %v21049_v45 = vsub.f32 %v20983_v10, %v17909_v28 }
 0x6f5   :  { %v8845_v25 = vmax.f32 %v8781_v32, 0.0  ;;  %v18310_v10 = vmul.f32 %v18099_v12, %v7679_v48  ;;  %v18313_v32 = vmul.f32 %v18099_v12, %v7680_v34  ;;  %v18331_v48 = vmul.f32 %v18099_v12, %v7686_v47 }
 0x6f6   :  { %v18274_v30 = vmul.f32 %v18099_v12, %v21046_v5  ;;  %v18280_v59 = vmul.f32 %v18099_v12, %v21047_v24  ;;  %v18286_v62 = vmul.f32 %v18099_v12, %v21048_v31  ;;  %v18292_v58 = vmul.f32 %v18099_v12, %v21049_v45 }
 0x6f7   :  { %v21050_v5 = vsub.f32 %v20984_v33, %v17909_v28  ;;  %v21051_v24 = vsub.f32 %v20985_v54, %v17909_v28  ;;  %v18307_v31 = vmul.f32 %v18099_v12, %v7678_v3  ;;  %v18316_v33 = vmul.f32 %v18099_v12, %v7681_v40  ;;  %8909 = vst [vmem:[#allocation3 + $0x1e8] sm:$0xff] %v8845_v25  ;;  %v21058_v25 = vld [vmem:[#allocation113_spill] sm:$0xff] }
 0x6f8   :  { %v18319_v45 = vmul.f32 %v18099_v12, %v7682_v23  ;;  %v18322_v54 = vmul.f32 %v18099_v12, %v7683_v50  ;;  %v18328_v3 = vmul.f32 %v18099_v12, %v7685_v17  ;;  %v18334_v34 = vmul.f32 %v18099_v12, %v7687_v11 }
 0x6f9   :  { %v18298_v51 = vmul.f32 %v18099_v12, %v21050_v5  ;;  %v18304_v13 = vmul.f32 %v18099_v12, %v21051_v24  ;;  %v18325_v5 = vmul.f32 %v18099_v12, %v7684_v39  ;;  %v18337_v40 = vmul.f32 %v18099_v12, %v7688_v49 }
 0x6fa   :  { %v18340_v23 = vmul.f32 %v18099_v12, %v7689_v27  ;;  %v18343_v50 = vmul.f32 %v18099_v12, %v7690_v18  ;;  %v18346_v39 = vmul.f32 %v18099_v12, %v7691_v0  ;;  %v18349_v17 = vmul.f32 %v18099_v12, %v7692_v61 }
 0x6fb   :  { %v18352_v47 = vmul.f32 %v18099_v12, %v7693_v22  ;;  %v18355_v11 = vmul.f32 %v18099_v12, %v7694_v46  ;;  %v18358_v49 = vmul.f32 %v18099_v12, %v7695_v57  ;;  %v21052_v27 = vsub.f32 %v20986_v56, %v17909_v28 }
 0x6fc   :  { %v21053_v0 = vsub.f32 %v20987_v15, %v17909_v28  ;;  %v21054_v22 = vsub.f32 %v20988_v53, %v17909_v28  ;;  %v21056_v57 = vsub.f32 %v20989_v37, %v17909_v28  ;;  %v21059_v24 = vsub.f32 %v21058_v25, %v17909_v28 }
 0x6fd   :  { %v18364_v18 = vmul.f32 %v18099_v12, %v21052_v27  ;;  %v21061_v27 = vld [vmem:[#allocation175_spill] sm:$0xff] }
 0x6fe   :  { %v18370_v61 = vmul.f32 %v18099_v12, %v21053_v0  ;;  %v18376_v46 = vmul.f32 %v18099_v12, %v21054_v22  ;;  %v18382_v56 = vmul.f32 %v18099_v12, %v21056_v57  ;;  %v18388_v15 = vmul.f32 %v18099_v12, %v21059_v24  ;;  %v21064_v22 = vld [vmem:[#allocation131_spill] sm:$0xff]  ;;  %v21067_v57 = vld [vmem:[#allocation68_spill] sm:$0xff] }
 0x6ff   :  { %v21062_v0 = vsub.f32 %v21061_v27, %v17909_v28  ;;  %v21070_v24 = vld [vmem:[#allocation75_spill] sm:$0xff] }
 0x700   :  { %21055 = vst [vmem:[#allocation233_spill] sm:$0xff] %v18376_v46  ;;  %21057 = vst [vmem:[#allocation95_spill] sm:$0xff] %v18382_v56  ;;  %v21065_v46 = vsub.f32 %v21064_v22, %v17909_v28  ;;  %v21068_v56 = vsub.f32 %v21067_v57, %v17909_v28 }
 0x701   :  { %21060 = vst [vmem:[#allocation197_spill] sm:$0xff] %v18388_v15  ;;  %v18394_v53 = vmul.f32 %v18099_v12, %v21062_v0  ;;  %v21071_v15 = vsub.f32 %v21070_v24, %v17909_v28  ;;  %v21073_v0 = vld [vmem:[#allocation139_spill] sm:$0xff] }
 0x702   :  { %v18400_v37 = vmul.f32 %v18099_v12, %v21065_v46  ;;  %v18406_v25 = vmul.f32 %v18099_v12, %v21068_v56  ;;  %v21076_v46 = vld [vmem:[#allocation115_spill] sm:$0xff]  ;;  %v21079_v56 = vld [vmem:[#allocation132_spill] sm:$0xff] }
 0x703   :  { %21063 = vst [vmem:[#allocation130_spill] sm:$0xff] %v18394_v53  ;;  %v18412_v27 = vmul.f32 %v18099_v12, %v21071_v15  ;;  %v21074_v53 = vsub.f32 %v21073_v0, %v17909_v28  ;;  %v21081_v15 = vld [vmem:[#allocation217_spill] sm:$0xff] }
 0x704   :  { %21066 = vst [vmem:[#allocation92_spill] sm:$0xff] %v18400_v37  ;;  %21069 = vst [vmem:[#allocation135_spill] sm:$0xff] %v18406_v25  ;;  %v21077_v37 = vsub.f32 %v21076_v46, %v17909_v28  ;;  %v21080_v25 = vsub.f32 %v21079_v56, %v17909_v28 }
 0x705   :  { %21072 = vst [vmem:[#allocation97_spill] sm:$0xff] %v18412_v27  ;;  %v18418_v22 = vmul.f32 %v18099_v12, %v21074_v53  ;;  %v21082_v27 = vsub.f32 %v21081_v15, %v17909_v28  ;;  %v21083_v53 = vld [vmem:[#allocation219_spill] sm:$0xff]  ;;  %v18460_v15 = vmul.f32 %v18104_v42, %v18134_v9  ;;  %v18484_v9 = vmul.f32 %v18104_v42, %v18176_v55 }
 0x706   :  { %v18424_v57 = vmul.f32 %v18099_v12, %v21077_v37  ;;  %v18430_v24 = vmul.f32 %v18099_v12, %v21080_v25  ;;  %v21085_v37 = vld [vmem:[#allocation72_spill] sm:$0xff]  ;;  %v18452_v25 = vmul.f32 %v18104_v42, %v18122_v35  ;;  %v18476_v35 = vmul.f32 %v18104_v42, %v18163_v21 }
 0x707   :  { %21075 = vst [vmem:[#allocation141_spill] sm:$0xff] %v18418_v22  ;;  %v18436_v0 = vmul.f32 %v18099_v12, %v21082_v27  ;;  %v21084_v22 = vsub.f32 %v21083_v53, %v17909_v28  ;;  %v18456_v27 = vmul.f32 %v18104_v42, %v18128_v60  ;;  %v18480_v60 = vmul.f32 %v18104_v42, %v18170_v26 }
 0x708   :  { %21078 = vst [vmem:[#allocation134_spill] sm:$0xff] %v18424_v57  ;;  %v21086_v57 = vsub.f32 %v21085_v37, %v17909_v28  ;;  %v18468_v28 = vmul.f32 %v18104_v42, %v18151_v4  ;;  %v18492_v4 = vmul.f32 %v18104_v42, %v18188_v2  ;;  %v18500_v21 = vmul.f32 %v18104_v42, %v18200_v41  ;;  %v21093_v53 = vld [vmem:[#allocation197_spill] sm:$0xff] }
 0x709   :  { %v18442_v46 = vmul.f32 %v18099_v12, %v21084_v22  ;;  %v18464_v22 = vmul.f32 %v18104_v42, %v18145_v44  ;;  %v18488_v44 = vmul.f32 %v18104_v42, %v18182_v19  ;;  %v18504_v26 = vmul.f32 %v18104_v42, %v18206_v52 }
 0x70a   :  { %v18448_v56 = vmul.f32 %v18099_v12, %v21086_v57  ;;  %v18472_v12 = vmul.f32 %v18104_v42, %v18157_v63  ;;  %v18496_v63 = vmul.f32 %v18104_v42, %v18194_v43  ;;  %v18508_v55 = vmul.f32 %v18104_v42, %v18213_v38  ;;  %v21091_v57 = vld [vmem:[#allocation95_spill] sm:$0xff]  ;;  %v21095_v37 = vld [vmem:[#allocation130_spill] sm:$0xff] }
 0x70b   :  { %v18512_v19 = vmul.f32 %v18104_v42, %v18219_v29  ;;  %v18516_v2 = vmul.f32 %v18104_v42, %v18225_v16  ;;  %v18520_v43 = vmul.f32 %v18104_v42, %v18231_v6  ;;  %v18524_v41 = vmul.f32 %v18104_v42, %v18237_v20 }
 0x70c   :  { %v18528_v52 = vmul.f32 %v18104_v42, %v18243_v1  ;;  %v18532_v38 = vmul.f32 %v18104_v42, %v18249_v8  ;;  %v18536_v29 = vmul.f32 %v18104_v42, %v18256_v7  ;;  %v18540_v16 = vmul.f32 %v18104_v42, %v18262_v36 }
 0x70d   :  { %v18544_v6 = vmul.f32 %v18104_v42, %v18268_v14  ;;  %v18548_v20 = vmul.f32 %v18104_v42, %v18274_v30  ;;  %v18552_v1 = vmul.f32 %v18104_v42, %v18280_v59  ;;  %v18556_v8 = vmul.f32 %v18104_v42, %v18286_v62 }
 0x70e   :  { %v18560_v7 = vmul.f32 %v18104_v42, %v18292_v58  ;;  %v18564_v36 = vmul.f32 %v18104_v42, %v18298_v51  ;;  %v18568_v14 = vmul.f32 %v18104_v42, %v18304_v13  ;;  %v18572_v30 = vmul.f32 %v18104_v42, %v18307_v31 }
 0x70f   :  { %v18576_v59 = vmul.f32 %v18104_v42, %v18310_v10  ;;  %v18580_v62 = vmul.f32 %v18104_v42, %v18313_v32  ;;  %v18584_v58 = vmul.f32 %v18104_v42, %v18316_v33  ;;  %v18588_v51 = vmul.f32 %v18104_v42, %v18319_v45 }
 0x710   :  { %v18592_v13 = vmul.f32 %v18104_v42, %v18322_v54  ;;  %v18596_v31 = vmul.f32 %v18104_v42, %v18325_v5  ;;  %v18600_v10 = vmul.f32 %v18104_v42, %v18328_v3  ;;  %v18604_v32 = vmul.f32 %v18104_v42, %v18331_v48 }
 0x711   :  { %v18608_v33 = vmul.f32 %v18104_v42, %v18334_v34  ;;  %v18612_v45 = vmul.f32 %v18104_v42, %v18337_v40  ;;  %v18616_v54 = vmul.f32 %v18104_v42, %v18340_v23  ;;  %v18620_v5 = vmul.f32 %v18104_v42, %v18343_v50 }
 0x712   :  { %v18624_v3 = vmul.f32 %v18104_v42, %v18346_v39  ;;  %v18628_v48 = vmul.f32 %v18104_v42, %v18349_v17  ;;  %v18632_v34 = vmul.f32 %v18104_v42, %v18352_v47  ;;  %v18636_v40 = vmul.f32 %v18104_v42, %v18355_v11  ;;  %v21089_v17 = vld [vmem:[#allocation233_spill] sm:$0xff] }
 0x713   :  { %v18640_v23 = vmul.f32 %v18104_v42, %v18358_v49  ;;  %v18644_v50 = vmul.f32 %v18104_v42, %v18364_v18  ;;  %v18648_v39 = vmul.f32 %v18104_v42, %v18370_v61  ;;  %v18652_v47 = vmul.f32 %v18104_v42, %v21089_v17 }
 0x714   :  { %v18656_v11 = vmul.f32 %v18104_v42, %v21091_v57  ;;  %v18660_v49 = vmul.f32 %v18104_v42, %v21093_v53  ;;  %v18664_v18 = vmul.f32 %v18104_v42, %v21095_v37 }
 0x715   :  { %21087 = vst [vmem:[#allocation137_spill] sm:$0xff] %v18644_v50  ;;  %21088 = vst [vmem:[#allocation199_spill] sm:$0xff] %v18648_v39  ;;  %v21096_v50 = vld [vmem:[#allocation92_spill] sm:$0xff]  ;;  %v21097_v39 = vld [vmem:[#allocation135_spill] sm:$0xff] }
 0x716   :  { %21090 = vst [vmem:[#allocation94_spill] sm:$0xff] %v18652_v47  ;;  %21092 = vst [vmem:[#allocation138_spill] sm:$0xff] %v18656_v11  ;;  %v18668_v61 = vmul.f32 %v18104_v42, %v21096_v50  ;;  %v18672_v17 = vmul.f32 %v18104_v42, %v21097_v39  ;;  %v21098_v47 = vld [vmem:[#allocation97_spill] sm:$0xff]  ;;  %v18688_v50 = vmul.f32 %v18104_v42, %v18430_v24 }
 0x717   :  { %21094 = vst [vmem:[#allocation140_spill] sm:$0xff] %v18660_v49  ;;  %v18676_v57 = vmul.f32 %v18104_v42, %v21098_v47  ;;  %v21099_v11 = vld [vmem:[#allocation141_spill] sm:$0xff]  ;;  %v21101_v49 = vld [vmem:[#allocation134_spill] sm:$0xff]  ;;  %v18692_v39 = vmul.f32 %v18104_v42, %v18436_v0  ;;  %v18696_v47 = vmul.f32 %v18104_v42, %v18442_v46 }
 0x718   :  { %v18680_v53 = vmul.f32 %v18104_v42, %v21099_v11  ;;  %v18684_v37 = vmul.f32 %v18104_v42, %v21101_v49  ;;  %v18700_v11 = vmul.f32 %v18104_v42, %v18448_v56 }
 0x71a   :  { %21100 = vst [vmem:[#allocation143_spill] sm:$0xff] %v18680_v53  ;;  %v21102_v53 = vld [vmem:[#allocation90_spill] sm:$0xff] }
 0x71b   :  { %v18704_v49 = vadd.f32 %v21102_v53, %v18452_v25  ;;  %v18708_v24 = vadd.f32 %v21102_v53, %v18456_v27  ;;  %v18712_v0 = vadd.f32 %v21102_v53, %v18460_v15  ;;  %v18716_v46 = vadd.f32 %v21102_v53, %v18464_v22 }
 0x71c   :  { %v18720_v42 = vadd.f32 %v21102_v53, %v18468_v28  ;;  %v18724_v56 = vadd.f32 %v21102_v53, %v18472_v12  ;;  %v18728_v25 = vadd.f32 %v21102_v53, %v18476_v35  ;;  %v18732_v27 = vadd.f32 %v21102_v53, %v18480_v60 }
 0x71d   :  { %v18736_v15 = vadd.f32 %v21102_v53, %v18484_v9  ;;  %v18740_v22 = vadd.f32 %v21102_v53, %v18488_v44  ;;  %v18744_v28 = vadd.f32 %v21102_v53, %v18492_v4  ;;  %v18748_v12 = vadd.f32 %v21102_v53, %v18496_v63 }
 0x71e   :  { %v18752_v35 = vadd.f32 %v21102_v53, %v18500_v21  ;;  %v18756_v60 = vadd.f32 %v21102_v53, %v18504_v26  ;;  %v18760_v9 = vadd.f32 %v21102_v53, %v18508_v55  ;;  %v18764_v44 = vadd.f32 %v21102_v53, %v18512_v19 }
 0x71f   :  { %v18768_v4 = vadd.f32 %v21102_v53, %v18516_v2  ;;  %v18772_v63 = vadd.f32 %v21102_v53, %v18520_v43  ;;  %v18776_v21 = vadd.f32 %v21102_v53, %v18524_v41  ;;  %v18780_v26 = vadd.f32 %v21102_v53, %v18528_v52 }
 0x720   :  { %v18784_v55 = vadd.f32 %v21102_v53, %v18532_v38  ;;  %v18788_v19 = vadd.f32 %v21102_v53, %v18536_v29  ;;  %v18792_v2 = vadd.f32 %v21102_v53, %v18540_v16  ;;  %v18796_v43 = vadd.f32 %v21102_v53, %v18544_v6 }
 0x721   :  { %v18800_v41 = vadd.f32 %v21102_v53, %v18548_v20  ;;  %v18804_v52 = vadd.f32 %v21102_v53, %v18552_v1  ;;  %v18808_v38 = vadd.f32 %v21102_v53, %v18556_v8  ;;  %v18812_v29 = vadd.f32 %v21102_v53, %v18560_v7 }
 0x722   :  { %v18816_v16 = vadd.f32 %v21102_v53, %v18564_v36  ;;  %v18820_v6 = vadd.f32 %v21102_v53, %v18568_v14  ;;  %v18824_v20 = vadd.f32 %v21102_v53, %v18572_v30  ;;  %v18828_v1 = vadd.f32 %v21102_v53, %v18576_v59 }
 0x723   :  { %v18832_v8 = vadd.f32 %v21102_v53, %v18580_v62  ;;  %v18836_v7 = vadd.f32 %v21102_v53, %v18584_v58  ;;  %v18840_v36 = vadd.f32 %v21102_v53, %v18588_v51  ;;  %v18844_v14 = vadd.f32 %v21102_v53, %v18592_v13 }
 0x724   :  { %v18848_v30 = vadd.f32 %v21102_v53, %v18596_v31  ;;  %v18852_v59 = vadd.f32 %v21102_v53, %v18600_v10  ;;  %v18856_v62 = vadd.f32 %v21102_v53, %v18604_v32  ;;  %v18860_v58 = vadd.f32 %v21102_v53, %v18608_v33 }
 0x725   :  { %v18864_v51 = vadd.f32 %v21102_v53, %v18612_v45  ;;  %v18868_v13 = vadd.f32 %v21102_v53, %v18616_v54  ;;  %v18872_v31 = vadd.f32 %v21102_v53, %v18620_v5  ;;  %v18876_v10 = vadd.f32 %v21102_v53, %v18624_v3  ;;  %v21107_v5 = vld [vmem:[#allocation137_spill] sm:$0xff] }
 0x726   :  { %v18880_v32 = vadd.f32 %v21102_v53, %v18628_v48  ;;  %v18884_v33 = vadd.f32 %v21102_v53, %v18632_v34  ;;  %v18888_v45 = vadd.f32 %v21102_v53, %v18636_v40  ;;  %v18892_v54 = vadd.f32 %v21102_v53, %v18640_v23 }
 0x727   :  { %21103 = vst [vmem:[#allocation142_spill] sm:$0xff] %v18876_v10  ;;  %v18896_v3 = vadd.f32 %v21102_v53, %v21107_v5  ;;  %v21108_v10 = vld [vmem:[#allocation199_spill] sm:$0xff]  ;;  %v18916_v5 = vadd.f32 %v21102_v53, %v18664_v18  ;;  %v18936_v18 = vadd.f32 %v21102_v53, %v18684_v37 }
 0x728   :  { %21104 = vst [vmem:[#allocation146_spill] sm:$0xff] %v18880_v32  ;;  %21105 = vst [vmem:[#allocation154_spill] sm:$0xff] %v18884_v33  ;;  %v18900_v48 = vadd.f32 %v21102_v53, %v21108_v10  ;;  %v21109_v32 = vld [vmem:[#allocation94_spill] sm:$0xff]  ;;  %v18920_v10 = vadd.f32 %v21102_v53, %v18668_v61  ;;  %v18940_v61 = vadd.f32 %v21102_v53, %v18688_v50 }
 0x729   :  { %21106 = vst [vmem:[#allocation157_spill] sm:$0xff] %v18888_v45  ;;  %v18904_v34 = vadd.f32 %v21102_v53, %v21109_v32  ;;  %v21110_v33 = vld [vmem:[#allocation138_spill] sm:$0xff]  ;;  %v21112_v45 = vld [vmem:[#allocation140_spill] sm:$0xff]  ;;  %v18924_v32 = vadd.f32 %v21102_v53, %v18672_v17  ;;  %21115 = vst [vmem:[#allocation159_spill] sm:$0xff] %v18936_v18  ;;  %v18944_v17 = vadd.f32 %v21102_v53, %v18692_v39 }
 0x72a   :  { %v18908_v40 = vadd.f32 %v21102_v53, %v21110_v33  ;;  %v18912_v23 = vadd.f32 %v21102_v53, %v21112_v45  ;;  %v18928_v33 = vadd.f32 %v21102_v53, %v18676_v57  ;;  %21116 = vst [vmem:[#allocation158_spill] sm:$0xff] %v18940_v61  ;;  %v18948_v57 = vadd.f32 %v21102_v53, %v18696_v47  ;;  %v21120_v18 = vld [vmem:[#allocation79_spill] sm:$0xff] }
 0x72b   :  { %21117 = vst [vmem:[#allocation160_spill] sm:$0xff] %v18944_v17  ;;  %v18960_v50 = vadd.f32 %v21120_v18, %v18708_v24  ;;  %v21121_v61 = vld [vmem:[#allocation119_spill] sm:$0xff]  ;;  %v21122_v17 = vld [vmem:[#allocation76_spill] sm:$0xff]  ;;  %v21126_v18 = vld [vmem:[#allocation121_spill] sm:$0xff] }
 0x72c   :  { %21111 = vst [vmem:[#allocation155_spill] sm:$0xff] %v18908_v40  ;;  %v21113_v40 = vld [vmem:[#allocation143_spill] sm:$0xff]  ;;  %21118 = vst [vmem:[#allocation7_spill] sm:$0xff] %v18948_v57  ;;  %v18964_v39 = vadd.f32 %v21121_v61, %v18712_v0  ;;  %v18968_v47 = vadd.f32 %v21122_v17, %v18716_v46  ;;  %v21123_v57 = vld [vmem:[#allocation221_spill] sm:$0xff]  ;;  %v18984_v0 = vadd.f32 %v21126_v18, %v18732_v27 }
 0x72d   :  { %v18932_v45 = vadd.f32 %v21102_v53, %v21113_v40  ;;  %v18952_v40 = vadd.f32 %v21102_v53, %v18700_v11  ;;  %v18972_v53 = vadd.f32 %v21123_v57, %v18720_v42  ;;  %v21124_v11 = vld [vmem:[#allocation81_spill] sm:$0xff]  ;;  %v21127_v61 = vld [vmem:[#allocation78_spill] sm:$0xff]  ;;  %v21132_v18 = vld [vmem:[#allocation123_spill] sm:$0xff] }
 0x72e   :  { %v18988_v46 = vadd.f32 %v21127_v61, %v18736_v15  ;;  %v21128_v17 = vld [vmem:[#allocation185_spill] sm:$0xff]  ;;  %v21129_v57 = vld [vmem:[#allocation118_spill] sm:$0xff]  ;;  %v19008_v15 = vadd.f32 %v21132_v18, %v18756_v60  ;;  %v21138_v18 = vld [vmem:[#allocation191_spill] sm:$0xff] }
 0x72f   :  { %21114 = vst [vmem:[#allocation156_spill] sm:$0xff] %v18932_v45  ;;  %v21119_v45 = vld [vmem:[#allocation179_spill] sm:$0xff]  ;;  %v18992_v42 = vadd.f32 %v21128_v17, %v18740_v22  ;;  %v21133_v61 = vld [vmem:[#allocation82_spill] sm:$0xff]  ;;  %v21134_v17 = vld [vmem:[#allocation120_spill] sm:$0xff] }
 0x730   :  { %v18956_v37 = vadd.f32 %v21119_v45, %v18704_v49  ;;  %v18976_v49 = vadd.f32 %v21124_v11, %v18724_v56  ;;  %v21125_v45 = vld [vmem:[#allocation223_spill] sm:$0xff]  ;;  %v18996_v56 = vadd.f32 %v21129_v57, %v18744_v28  ;;  %v21130_v11 = vld [vmem:[#allocation85_spill] sm:$0xff]  ;;  %v19012_v22 = vadd.f32 %v21133_v61, %v18760_v9  ;;  %v21139_v61 = vld [vmem:[#allocation122_spill] sm:$0xff] }
 0x731   :  { %v18980_v24 = vadd.f32 %v21125_v45, %v18728_v25  ;;  %v19000_v25 = vadd.f32 %v21130_v11, %v18748_v12  ;;  %v21131_v45 = vld [vmem:[#allocation125_spill] sm:$0xff]  ;;  %v19016_v28 = vadd.f32 %v21134_v17, %v18764_v44  ;;  %v21136_v11 = vld [vmem:[#allocation84_spill] sm:$0xff]  ;;  %v19032_v9 = vadd.f32 %v21138_v18, %v18780_v26  ;;  %v21140_v17 = vld [vmem:[#allocation91_spill] sm:$0xff] }
 0x732   :  { %v19004_v27 = vadd.f32 %v21131_v45, %v18752_v35  ;;  %v21135_v57 = vld [vmem:[#allocation189_spill] sm:$0xff]  ;;  %v19024_v35 = vadd.f32 %v21136_v11, %v18772_v63  ;;  %v21137_v45 = vld [vmem:[#allocation227_spill] sm:$0xff]  ;;  %v19036_v44 = vadd.f32 %v21139_v61, %v18784_v55 }
 0x733   :  { %v19020_v12 = vadd.f32 %v21135_v57, %v18768_v4  ;;  %v19028_v60 = vadd.f32 %v21137_v45, %v18776_v21  ;;  %v19040_v4 = vadd.f32 %v21140_v17, %v18788_v19  ;;  %v21141_v57 = vld [vmem:[#allocation124_spill] sm:$0xff]  ;;  %v21142_v11 = vld [vmem:[#allocation229_spill] sm:$0xff]  ;;  %v21145_v61 = vld [vmem:[#allocation231_spill] sm:$0xff] }
 0x734   :  { %v19044_v63 = vadd.f32 %v21141_v57, %v18792_v2  ;;  %v19048_v21 = vadd.f32 %v21142_v11, %v18796_v43  ;;  %v21143_v45 = vld [vmem:[#allocation88_spill] sm:$0xff]  ;;  %v21144_v18 = vld [vmem:[#allocation93_spill] sm:$0xff]  ;;  %v19060_v19 = vadd.f32 %v21145_v61, %v18808_v38  ;;  %v21146_v17 = vld [vmem:[#allocation195_spill] sm:$0xff] }
 0x735   :  { %v19052_v26 = vadd.f32 %v21143_v45, %v18800_v41  ;;  %v19056_v55 = vadd.f32 %v21144_v18, %v18804_v52  ;;  %v19064_v2 = vadd.f32 %v21146_v17, %v18812_v29  ;;  %v21147_v57 = vld [vmem:[#allocation136_spill] sm:$0xff]  ;;  %v21149_v45 = vld [vmem:[#allocation126_spill] sm:$0xff]  ;;  %v21152_v17 = vld [vmem:[#allocation33_spill] sm:$0xff] }
 0x736   :  { %v19068_v43 = vadd.f32 %v21147_v57, %v18816_v16  ;;  %v21148_v11 = vld [vmem:[#allocation128_spill] sm:$0xff]  ;;  %v19076_v52 = vadd.f32 %v21149_v45, %v18824_v20  ;;  %v21150_v18 = vld [vmem:[#allocation250_spill] sm:$0xff]  ;;  %v19088_v16 = vadd.f32 %v21152_v17, %v18836_v7  ;;  %v21153_v57 = vld [vmem:[#allocation39_spill] sm:$0xff] }
 0x737   :  { %v19072_v41 = vadd.f32 %v21148_v11, %v18820_v6  ;;  %v19080_v38 = vadd.f32 %v21150_v18, %v18828_v1  ;;  %v21151_v61 = vld [vmem:[#allocation66_spill] sm:$0xff]  ;;  %v19092_v6 = vadd.f32 %v21153_v57, %v18840_v36  ;;  %v21154_v11 = vld [vmem:[#allocation65_spill] sm:$0xff]  ;;  %v21156_v18 = vld [vmem:[#allocation43_spill] sm:$0xff] }
 0x738   :  { %v19084_v29 = vadd.f32 %v21151_v61, %v18832_v8  ;;  %v19096_v20 = vadd.f32 %v21154_v11, %v18844_v14  ;;  %v21155_v45 = vld [vmem:[#allocation34_spill] sm:$0xff]  ;;  %v19104_v8 = vadd.f32 %v21156_v18, %v18852_v59  ;;  %v21158_v61 = vld [vmem:[#allocation67_spill] sm:$0xff]  ;;  %v21162_v57 = vld [vmem:[#allocation41_spill] sm:$0xff] }
 0x739   :  { %v19100_v1 = vadd.f32 %v21155_v45, %v18848_v30  ;;  %v19108_v7 = vadd.f32 %v21158_v61, %v18856_v62  ;;  %v21160_v17 = vld [vmem:[#allocation42_spill] sm:$0xff]  ;;  %v19116_v14 = vadd.f32 %v21162_v57, %v18864_v51  ;;  %v21164_v11 = vld [vmem:[#allocation99_spill] sm:$0xff]  ;;  %v21165_v45 = vld [vmem:[#allocation201_spill] sm:$0xff] }
 0x73a   :  { %21157 = vst [vmem:[#allocation161_spill] sm:$0xff] %v19104_v8  ;;  %v19112_v36 = vadd.f32 %v21160_v17, %v18860_v58  ;;  %v19120_v30 = vadd.f32 %v21164_v11, %v18868_v13  ;;  %v19124_v59 = vadd.f32 %v21165_v45, %v18872_v31  ;;  %v21166_v18 = vld [vmem:[#allocation142_spill] sm:$0xff]  ;;  %v21167_v8 = vld [vmem:[#allocation47_spill] sm:$0xff]  ;;  %v21173_v57 = vld [vmem:[#allocation157_spill] sm:$0xff] }
 0x73b   :  { %21159 = vst [vmem:[#allocation8_spill] sm:$0xff] %v19108_v7  ;;  %21163 = vst [vmem:[#allocation163_spill] sm:$0xff] %v19116_v14  ;;  %v19128_v62 = vadd.f32 %v21167_v8, %v21166_v18  ;;  %v21168_v61 = vld [vmem:[#allocation146_spill] sm:$0xff]  ;;  %v21169_v7 = vld [vmem:[#allocation40_spill] sm:$0xff] }
 0x73c   :  { %21161 = vst [vmem:[#allocation162_spill] sm:$0xff] %v19112_v36  ;;  %v19132_v58 = vadd.f32 %v21169_v7, %v21168_v61  ;;  %v21170_v17 = vld [vmem:[#allocation154_spill] sm:$0xff]  ;;  %v21171_v36 = vld [vmem:[#allocation101_spill] sm:$0xff]  ;;  %v21175_v11 = vld [vmem:[#allocation96_spill] sm:$0xff] }
 0x73d   :  { %v19136_v51 = vadd.f32 %v21171_v36, %v21170_v17  ;;  %v21174_v14 = vld [vmem:[#allocation46_spill] sm:$0xff]  ;;  %v19144_v31 = vadd.f32 %v21175_v11, %v18892_v54  ;;  %v21176_v45 = vld [vmem:[#allocation45_spill] sm:$0xff]  ;;  %v21177_v18 = vld [vmem:[#allocation35_spill] sm:$0xff] }
 0x73e   :  { %v19140_v13 = vadd.f32 %v21174_v14, %v21173_v57  ;;  %v19148_v8 = vadd.f32 %v21176_v45, %v18896_v3  ;;  %v19152_v7 = vadd.f32 %v21177_v18, %v18900_v48  ;;  %v21178_v61 = vld [vmem:[#allocation36_spill] sm:$0xff]  ;;  %v21179_v17 = vld [vmem:[#allocation155_spill] sm:$0xff]  ;;  %v21186_v45 = vld [vmem:[#allocation205_spill] sm:$0xff] }
 0x73f   :  { %21172 = vst [vmem:[#allocation144_spill] sm:$0xff] %v19136_v51  ;;  %v19156_v36 = vadd.f32 %v21178_v61, %v18904_v34  ;;  %v21180_v51 = vld [vmem:[#allocation44_spill] sm:$0xff]  ;;  %v21184_v11 = vld [vmem:[#allocation203_spill] sm:$0xff]  ;;  %v19172_v48 = vadd.f32 %v21186_v45, %v18920_v10  ;;  %v21188_v18 = vld [vmem:[#allocation38_spill] sm:$0xff] }
 0x740   :  { %v19160_v14 = vadd.f32 %v21180_v51, %v21179_v17  ;;  %v21182_v57 = vld [vmem:[#allocation48_spill] sm:$0xff]  ;;  %v19168_v3 = vadd.f32 %v21184_v11, %v18916_v5  ;;  %v19176_v34 = vadd.f32 %v21188_v18, %v18924_v32  ;;  %v21190_v61 = vld [vmem:[#allocation37_spill] sm:$0xff]  ;;  %v21195_v11 = vld [vmem:[#allocation158_spill] sm:$0xff] }
 0x741   :  { %v19164_v54 = vadd.f32 %v21182_v57, %v18912_v23  ;;  %21187 = vst [vmem:[#allocation148_spill] sm:$0xff] %v19172_v48  ;;  %v19180_v51 = vadd.f32 %v21190_v61, %v18928_v33  ;;  %v21191_v17 = vld [vmem:[#allocation156_spill] sm:$0xff]  ;;  %v21193_v57 = vld [vmem:[#allocation159_spill] sm:$0xff]  ;;  %v21201_v61 = vld [vmem:[#allocation50_spill] sm:$0xff] }
 0x742   :  { %21181 = vst [vmem:[#allocation145_spill] sm:$0xff] %v19160_v14  ;;  %21185 = vst [vmem:[#allocation147_spill] sm:$0xff] %v19168_v3  ;;  %v21192_v14 = vld [vmem:[#allocation98_spill] sm:$0xff]  ;;  %v21196_v3 = vld [vmem:[#allocation55_spill] sm:$0xff] }
 0x743   :  { %21183 = vst [vmem:[#allocation149_spill] sm:$0xff] %v19164_v54  ;;  %21189 = vst [vmem:[#allocation150_spill] sm:$0xff] %v19176_v34  ;;  %v19184_v23 = vadd.f32 %v21192_v14, %v21191_v17  ;;  %v21194_v54 = vld [vmem:[#allocation100_spill] sm:$0xff]  ;;  %v19192_v10 = vadd.f32 %v21196_v3, %v21195_v11  ;;  %v21198_v48 = vld [vmem:[#allocation103_spill] sm:$0xff]  ;;  %v19204_v14 = vadd.f32 %v21201_v61, %v18952_v40  ;;  %v8784_v17 = vmax.f32 %v18956_v37, 0.0 }
 0x744   :  { %v19188_v5 = vadd.f32 %v21194_v54, %v21193_v57  ;;  %v21197_v45 = vld [vmem:[#allocation160_spill] sm:$0xff]  ;;  %v21199_v18 = vld [vmem:[#allocation7_spill] sm:$0xff]  ;;  %v8785_v54 = vmax.f32 %v18960_v50, 0.0  ;;  %v8786_v57 = vmax.f32 %v18964_v39, 0.0  ;;  %v8787_v3 = vmax.f32 %v18968_v47, 0.0 }
 0x745   :  { %v19196_v32 = vadd.f32 %v21198_v48, %v21197_v45  ;;  %v21200_v34 = vld [vmem:[#allocation59_spill] sm:$0xff]  ;;  %v8788_v11 = vmax.f32 %v18972_v53, 0.0  ;;  %v8789_v48 = vmax.f32 %v18976_v49, 0.0  ;;  %v8790_v45 = vmax.f32 %v18980_v24, 0.0  ;;  %8848 = vst [vmem:[#allocation3] sm:$0xff] %v8784_v17 }
 0x746   :  { %v19200_v33 = vadd.f32 %v21200_v34, %v21199_v18  ;;  %v8791_v34 = vmax.f32 %v18984_v0, 0.0  ;;  %v8792_v18 = vmax.f32 %v18988_v46, 0.0  ;;  %v8793_v40 = vmax.f32 %v18992_v42, 0.0  ;;  %8849 = vst [vmem:[#allocation3 + $0x8] sm:$0xff] %v8785_v54  ;;  %8850 = vst [vmem:[#allocation3 + $0x10] sm:$0xff] %v8786_v57  ;;  %v21206_v54 = vld [vmem:[#allocation144_spill] sm:$0xff] }
 0x747   :  { %v8794_v37 = vmax.f32 %v18996_v56, 0.0  ;;  %v8795_v50 = vmax.f32 %v19000_v25, 0.0  ;;  %v8796_v39 = vmax.f32 %v19004_v27, 0.0  ;;  %v8797_v47 = vmax.f32 %v19008_v15, 0.0  ;;  %8851 = vst [vmem:[#allocation3 + $0x18] sm:$0xff] %v8787_v3  ;;  %8852 = vst [vmem:[#allocation3 + $0x20] sm:$0xff] %v8788_v11 }
 0x748   :  { %v8798_v53 = vmax.f32 %v19012_v22, 0.0  ;;  %8853 = vst [vmem:[#allocation3 + $0x28] sm:$0xff] %v8789_v48  ;;  %8854 = vst [vmem:[#allocation3 + $0x30] sm:$0xff] %v8790_v45  ;;  %v8799_v49 = vmax.f32 %v19016_v28, 0.0  ;;  %v8800_v24 = vmax.f32 %v19020_v12, 0.0  ;;  %v8801_v0 = vmax.f32 %v19024_v35, 0.0 }
 0x749   :  { %v8802_v46 = vmax.f32 %v19028_v60, 0.0  ;;  %8855 = vst [vmem:[#allocation3 + $0x38] sm:$0xff] %v8791_v34  ;;  %8856 = vst [vmem:[#allocation3 + $0x40] sm:$0xff] %v8792_v18  ;;  %v8803_v42 = vmax.f32 %v19032_v9, 0.0  ;;  %v8804_v56 = vmax.f32 %v19036_v44, 0.0  ;;  %v8805_v25 = vmax.f32 %v19040_v4, 0.0 }
 0x74a   :  { %8857 = vst [vmem:[#allocation3 + $0x48] sm:$0xff] %v8793_v40  ;;  %8858 = vst [vmem:[#allocation3 + $0x50] sm:$0xff] %v8794_v37  ;;  %v8806_v27 = vmax.f32 %v19044_v63, 0.0  ;;  %v8807_v15 = vmax.f32 %v19048_v21, 0.0  ;;  %v8808_v22 = vmax.f32 %v19052_v26, 0.0  ;;  %v8809_v28 = vmax.f32 %v19056_v55, 0.0 }
 0x74b   :  { %8859 = vst [vmem:[#allocation3 + $0x58] sm:$0xff] %v8795_v50  ;;  %8860 = vst [vmem:[#allocation3 + $0x60] sm:$0xff] %v8796_v39  ;;  %v8810_v12 = vmax.f32 %v19060_v19, 0.0  ;;  %v8811_v35 = vmax.f32 %v19064_v2, 0.0  ;;  %v8812_v60 = vmax.f32 %v19068_v43, 0.0  ;;  %v8813_v9 = vmax.f32 %v19072_v41, 0.0 }
 0x74c   :  { %8861 = vst [vmem:[#allocation3 + $0x68] sm:$0xff] %v8797_v47  ;;  %8862 = vst [vmem:[#allocation3 + $0x70] sm:$0xff] %v8798_v53  ;;  %v8814_v44 = vmax.f32 %v19076_v52, 0.0  ;;  %v8815_v4 = vmax.f32 %v19080_v38, 0.0  ;;  %v8816_v63 = vmax.f32 %v19084_v29, 0.0  ;;  %v8817_v21 = vmax.f32 %v19088_v16, 0.0 }
 0x74d   :  { %8863 = vst [vmem:[#allocation3 + $0x78] sm:$0xff] %v8799_v49  ;;  %8864 = vst [vmem:[#allocation3 + $0x80] sm:$0xff] %v8800_v24  ;;  %v8818_v26 = vmax.f32 %v19092_v6, 0.0  ;;  %v8819_v55 = vmax.f32 %v19096_v20, 0.0  ;;  %v8820_v19 = vmax.f32 %v19100_v1, 0.0  ;;  %v21202_v2 = vld [vmem:[#allocation161_spill] sm:$0xff] }
 0x74e   :  { %8865 = vst [vmem:[#allocation3 + $0x88] sm:$0xff] %v8801_v0  ;;  %8866 = vst [vmem:[#allocation3 + $0x90] sm:$0xff] %v8802_v46  ;;  %v8821_v43 = vmax.f32 %v21202_v2, 0.0  ;;  %v21203_v41 = vld [vmem:[#allocation8_spill] sm:$0xff]  ;;  %v21204_v38 = vld [vmem:[#allocation162_spill] sm:$0xff]  ;;  %v8825_v61 = vmax.f32 %v19120_v30, 0.0 }
 0x74f   :  { %8867 = vst [vmem:[#allocation3 + $0x98] sm:$0xff] %v8803_v42  ;;  %8868 = vst [vmem:[#allocation3 + $0xa0] sm:$0xff] %v8804_v56  ;;  %v8822_v52 = vmax.f32 %v21203_v41, 0.0  ;;  %v8823_v29 = vmax.f32 %v21204_v38, 0.0  ;;  %v21205_v16 = vld [vmem:[#allocation163_spill] sm:$0xff]  ;;  %v8826_v17 = vmax.f32 %v19124_v59, 0.0 }
 0x750   :  { %8869 = vst [vmem:[#allocation3 + $0xa8] sm:$0xff] %v8805_v25  ;;  %8870 = vst [vmem:[#allocation3 + $0xb0] sm:$0xff] %v8806_v27  ;;  %v8824_v6 = vmax.f32 %v21205_v16, 0.0  ;;  %v8827_v20 = vmax.f32 %v19128_v62, 0.0  ;;  %v8828_v1 = vmax.f32 %v19132_v58, 0.0  ;;  %v8829_v57 = vmax.f32 %v21206_v54, 0.0 }
 0x751   :  { %8871 = vst [vmem:[#allocation3 + $0xb8] sm:$0xff] %v8807_v15  ;;  %8872 = vst [vmem:[#allocation3 + $0xc0] sm:$0xff] %v8808_v22  ;;  %v8830_v3 = vmax.f32 %v19140_v13, 0.0  ;;  %v8831_v30 = vmax.f32 %v19144_v31, 0.0  ;;  %v8832_v59 = vmax.f32 %v19148_v8, 0.0  ;;  %v8833_v11 = vmax.f32 %v19152_v7, 0.0 }
 0x752   :  { %8873 = vst [vmem:[#allocation3 + $0xc8] sm:$0xff] %v8809_v28  ;;  %8874 = vst [vmem:[#allocation3 + $0xd0] sm:$0xff] %v8810_v12  ;;  %v8834_v62 = vmax.f32 %v19156_v36, 0.0  ;;  %v21207_v58 = vld [vmem:[#allocation145_spill] sm:$0xff]  ;;  %v21209_v34 = vld [vmem:[#allocation147_spill] sm:$0xff]  ;;  %v8840_v7 = vmax.f32 %v19180_v51, 0.0 }
 0x753   :  { %8875 = vst [vmem:[#allocation3 + $0xd8] sm:$0xff] %v8811_v35  ;;  %8876 = vst [vmem:[#allocation3 + $0xe0] sm:$0xff] %v8812_v60  ;;  %v8835_v13 = vmax.f32 %v21207_v58, 0.0  ;;  %v21208_v48 = vld [vmem:[#allocation149_spill] sm:$0xff]  ;;  %v8837_v18 = vmax.f32 %v21209_v34, 0.0  ;;  %v21210_v40 = vld [vmem:[#allocation148_spill] sm:$0xff] }
 0x754   :  { %8877 = vst [vmem:[#allocation3 + $0xe8] sm:$0xff] %v8813_v9  ;;  %8878 = vst [vmem:[#allocation3 + $0xf0] sm:$0xff] %v8814_v44  ;;  %v8836_v45 = vmax.f32 %v21208_v48, 0.0  ;;  %v8838_v37 = vmax.f32 %v21210_v40, 0.0  ;;  %v21211_v31 = vld [vmem:[#allocation150_spill] sm:$0xff]  ;;  %v8841_v36 = vmax.f32 %v19184_v23, 0.0 }
 0x755   :  { %8879 = vst [vmem:[#allocation3 + $0xf8] sm:$0xff] %v8815_v4  ;;  %8880 = vst [vmem:[#allocation3 + $0x100] sm:$0xff] %v8816_v63  ;;  %v8839_v8 = vmax.f32 %v21211_v31, 0.0  ;;  %v8842_v50 = vmax.f32 %v19188_v5, 0.0  ;;  %v8843_v39 = vmax.f32 %v19192_v10, 0.0  ;;  %v8844_v47 = vmax.f32 %v19196_v32, 0.0 }
 0x756   :  { %8881 = vst [vmem:[#allocation3 + $0x108] sm:$0xff] %v8817_v21  ;;  %8882 = vst [vmem:[#allocation3 + $0x110] sm:$0xff] %v8818_v26  ;;  %v8846_v53 = vmax.f32 %v19200_v33, 0.0  ;;  %v8847_v51 = vmax.f32 %v19204_v14, 0.0 }
 0x757   :  { %8883 = vst [vmem:[#allocation3 + $0x118] sm:$0xff] %v8819_v55  ;;  %8884 = vst [vmem:[#allocation3 + $0x120] sm:$0xff] %v8820_v19 }
 0x758   :  { %8885 = vst [vmem:[#allocation3 + $0x128] sm:$0xff] %v8821_v43  ;;  %8886 = vst [vmem:[#allocation3 + $0x130] sm:$0xff] %v8822_v52 }
 0x759   :  { %8887 = vst [vmem:[#allocation3 + $0x138] sm:$0xff] %v8823_v29  ;;  %8888 = vst [vmem:[#allocation3 + $0x140] sm:$0xff] %v8824_v6 }
 0x75a   :  { %8889 = vst [vmem:[#allocation3 + $0x148] sm:$0xff] %v8825_v61  ;;  %8890 = vst [vmem:[#allocation3 + $0x150] sm:$0xff] %v8826_v17 }
 0x75b   :  { %8891 = vst [vmem:[#allocation3 + $0x158] sm:$0xff] %v8827_v20  ;;  %8892 = vst [vmem:[#allocation3 + $0x160] sm:$0xff] %v8828_v1 }
 0x75c   :  { %8893 = vst [vmem:[#allocation3 + $0x168] sm:$0xff] %v8829_v57  ;;  %8894 = vst [vmem:[#allocation3 + $0x170] sm:$0xff] %v8830_v3 }
 0x75d   :  { %8895 = vst [vmem:[#allocation3 + $0x178] sm:$0xff] %v8831_v30  ;;  %8896 = vst [vmem:[#allocation3 + $0x180] sm:$0xff] %v8832_v59 }
 0x75e   :  { %8897 = vst [vmem:[#allocation3 + $0x188] sm:$0xff] %v8833_v11  ;;  %8898 = vst [vmem:[#allocation3 + $0x190] sm:$0xff] %v8834_v62 }
 0x75f   :  { %8899 = vst [vmem:[#allocation3 + $0x198] sm:$0xff] %v8835_v13  ;;  %8900 = vst [vmem:[#allocation3 + $0x1a0] sm:$0xff] %v8836_v45 }
 0x760   :  { %8901 = vst [vmem:[#allocation3 + $0x1a8] sm:$0xff] %v8837_v18  ;;  %8902 = vst [vmem:[#allocation3 + $0x1b0] sm:$0xff] %v8838_v37 }
 0x761   :  { %8903 = vst [vmem:[#allocation3 + $0x1b8] sm:$0xff] %v8839_v8  ;;  %8904 = vst [vmem:[#allocation3 + $0x1c0] sm:$0xff] %v8840_v7 }
 0x762   :  { %8905 = vst [vmem:[#allocation3 + $0x1c8] sm:$0xff] %v8841_v36  ;;  %8906 = vst [vmem:[#allocation3 + $0x1d0] sm:$0xff] %v8842_v50 }
 0x763   :  { %8907 = vst [vmem:[#allocation3 + $0x1d8] sm:$0xff] %v8843_v39  ;;  %8908 = vst [vmem:[#allocation3 + $0x1e0] sm:$0xff] %v8844_v47 }
 0x764   :  { %8910 = vst [vmem:[#allocation3 + $0x1f0] sm:$0xff] %v8846_v53  ;;  %8911 = vst [vmem:[#allocation3 + $0x1f8] sm:$0xff] %v8847_v51 }
 0x765   :  { %10667 = shalt.err (!%p10664_p4)
}
 0x766   :  { %s10680_s30 = smov 128   ;;  %s10681_s14 = smov 8  }
 0x767   :  { %8923 = dma.vmem_to_hbm [thread:$0]  %s19265_s3, 8192, %s19292_s13, [#allocation4], %s10680_s30, %s10680_s30, %s10681_s14  }
 0x768   :  { %10676 = dma.done.wait [#allocation4], 8192  }
 0x769   :  { %10677 = vsyncadd [#allocation4], 4294959104 }
 0x76a   :  { %8927 = vsyncpa [#allocation4], 1 }

</bundles_post_ra>
